<compile_context>
chip_gen: v5e
topology: v5e:2x2
jax: 0.10.0
libtpu: 0.0.40
codegen_flags: <defaults>
</compile_context>

<pallas_src>
import jax
import jax.numpy as jnp
from jax.experimental import pallas as pl
from jax.experimental.pallas import tpu as pltpu

_BN_EPS = 1e-5
_CP = 128            # padded channel (lane) width -> lane-dense outputs


def _pick_tile(M, target=2048, min_tiles=4):
    """Largest M-tile <= target that divides M; small GEMMs get a single cell."""
    if M <= 512:
        return M
    tm = min(target, max(128, M // min_tiles))
    tm -= tm % 128
    while tm >= 128:
        if M % tm == 0:
            return tm
        tm -= 128
    return M


# ----------------------------- Pallas kernels -----------------------------

def _matmul_bnstats_kernel(a_ref, b_ref, y_ref, sum_ref, sq_ref):
    """Y = A @ B with fused per-channel sum / sum-of-squares (BN batch stats)."""
    y = jnp.dot(a_ref[...], b_ref[...], preferred_element_type=jnp.float32)
    y_ref[...] = y

    @pl.when(pl.program_id(0) == 0)
    def _():
        sum_ref[...] = jnp.zeros_like(sum_ref)
        sq_ref[...] = jnp.zeros_like(sq_ref)

    sum_ref[...] += jnp.sum(y, axis=0, keepdims=True)
    sq_ref[...] += jnp.sum(y * y, axis=0, keepdims=True)


def matmul_bn_stats(a, b, tm):
    M, K = a.shape
    _, N = b.shape
    assert M % tm == 0
    return pl.pallas_call(
        _matmul_bnstats_kernel,
        out_shape=(jax.ShapeDtypeStruct((M, N), jnp.float32),
                   jax.ShapeDtypeStruct((1, N), jnp.float32),
                   jax.ShapeDtypeStruct((1, N), jnp.float32)),
        grid_spec=pltpu.PrefetchScalarGridSpec(
            num_scalar_prefetch=0,
            grid=(M // tm,),
            in_specs=[pl.BlockSpec((tm, K), lambda i: (i, 0)),
                      pl.BlockSpec((K, N), lambda i: (0, 0))],
            out_specs=(pl.BlockSpec((tm, N), lambda i: (i, 0)),
                       pl.BlockSpec((1, N), lambda i: (0, 0)),
                       pl.BlockSpec((1, N), lambda i: (0, 0)))),
        # stats outputs accumulate across the M axis -> must be "arbitrary"
        compiler_params=pltpu.CompilerParams(
            dimension_semantics=("arbitrary",)),
    )(a, b)


def _matmul_tanh_kernel(a_ref, b_ref, o_ref):
    o_ref[...] = jnp.tanh(
        jnp.dot(a_ref[...], b_ref[...], preferred_element_type=jnp.float32))


def matmul_tanh(a, b, tm):
    M, K = a.shape
    _, N = b.shape
    assert M % tm == 0
    return pl.pallas_call(
        _matmul_tanh_kernel,
        out_shape=jax.ShapeDtypeStruct((M, N), jnp.float32),
        grid_spec=pltpu.PrefetchScalarGridSpec(
            num_scalar_prefetch=0,
            grid=(M // tm,),
            in_specs=[pl.BlockSpec((tm, K), lambda i: (i, 0)),
                      pl.BlockSpec((K, N), lambda i: (0, 0))],
            out_specs=pl.BlockSpec((tm, N), lambda i: (i, 0))),
        compiler_params=pltpu.CompilerParams(
            dimension_semantics=("parallel",)),
    )(a, b)


def _bn_relu_kernel(x_ref, scale_ref, shift_ref, o_ref):
    y = jnp.maximum(x_ref[...] * scale_ref[...] + shift_ref[...], 0.0)
    o_ref[...] = y.astype(o_ref.dtype)


def bn_relu(x, scale, shift, out_dtype=jnp.bfloat16):
    M, C = x.shape
    tm = M if M <= 4096 else _pick_tile(M, target=4096, min_tiles=1)
    return pl.pallas_call(
        _bn_relu_kernel,
        out_shape=jax.ShapeDtypeStruct((M, C), out_dtype),
        grid_spec=pltpu.PrefetchScalarGridSpec(
            num_scalar_prefetch=0,
            grid=(M // tm,),
            in_specs=[pl.BlockSpec((tm, C), lambda i: (i, 0)),
                      pl.BlockSpec((1, C), lambda i: (0, 0)),
                      pl.BlockSpec((1, C), lambda i: (0, 0))],
            out_specs=pl.BlockSpec((tm, C), lambda i: (i, 0))),
        compiler_params=pltpu.CompilerParams(
            dimension_semantics=("parallel",)),
    )(x, scale, shift)


# ------------------------------ JAX glue ----------------------------------

def _im2col_conv_transpose(x_nhwc, k, s, p, k_pad):
    """Lower ConvTranspose2d(k, s, p) to the im2col of an equivalent direct conv.

    Returns A of shape (N*Ho*Wo, k_pad) (K columns zero-padded) and (N, Ho, Wo).
    """
    # TODO(synk): replace the zero-dilated im2col with the s^2 sub-pixel
    # decomposition so structurally-zero K columns are never materialized.
    N, H, W, Cin = x_nhwc.shape
    Ho = (H - 1) * s - 2 * p + k
    Wo = (W - 1) * s - 2 * p + k
    pz = k - 1 - p
    Hz = (H - 1) * s + 1 + 2 * pz
    Wz = (W - 1) * s + 1 + 2 * pz
    z = jnp.zeros((N, Hz, Wz, Cin), x_nhwc.dtype)
    z = z.at[:, pz:pz + (H - 1) * s + 1:s, pz:pz + (W - 1) * s + 1:s, :].set(x_nhwc)
    patches = jnp.stack(
        [z[:, kh:kh + Ho, kw:kw + Wo, :] for kh in range(k) for kw in range(k)],
        axis=3)                                        # (N, Ho, Wo, k*k, Cin)
    A = patches.reshape(N * Ho * Wo, k * k * Cin)
    if k_pad > k * k * Cin:
        A = jnp.pad(A, ((0, 0), (0, k_pad - k * k * Cin)))
    return A, (N, Ho, Wo)


def make_generator(nz, ngf):
    chans = [nz, ngf * 8, ngf * 4, ngf * 2, ngf, 3]
    ksp = [(4, 1, 0), (4, 2, 1), (4, 2, 1), (4, 2, 1), (5, 3, 1)]
    n_layers = len(ksp)

    meta = []
    for i, (k, s, p) in enumerate(ksp):
        cin, cout = chans[i], chans[i + 1]
        K = k * k * cin
        K_pad = -(-K // 128) * 128
        meta.append((cin, cout, k, s, p, K, K_pad))

    def init_params(key):
        """PyTorch init: ConvT weight ~ N(0,.02); BN gamma ~ N(1,.02), beta = 0.
        Weights are pre-lowered (flip + transpose + pad) to GEMM B matrices."""
        params = {}
        for i, (cin, cout, k, s, p, K, K_pad) in enumerate(meta):
            key, kw, kg = jax.random.split(key, 3)
            # PyTorch ConvTranspose2d weight layout: (Cin, Cout, kH, kW)
            w = 0.02 * jax.random.normal(kw, (cin, cout, k, k), jnp.float32)
            # equivalent direct-conv weight: spatial flip -> (kH, kW, Cin, Cout)
            wc = jnp.transpose(jnp.flip(w, axis=(2, 3)), (2, 3, 0, 1)).reshape(K, cout)
            Bm = jnp.zeros((K_pad, _CP), jnp.float32).at[:K, :cout].set(wc)
            params[f"B{i}"] = Bm.astype(jnp.bfloat16)
            if i < n_layers - 1:
                g = 1.0 + 0.02 * jax.random.normal(kg, (cout,), jnp.float32)
                params[f"gamma{i}"] = jnp.ones((1, _CP), jnp.float32).at[0, :cout].set(g)
                params[f"beta{i}"] = jnp.zeros((1, _CP), jnp.float32)
        return params

    def forward(x_nchw, params):
        x = jnp.transpose(x_nchw, (0, 2, 3, 1)).astype(jnp.bfloat16)   # -> NHWC
        for i, (cin, cout, k, s, p, K, K_pad) in enumerate(meta):
            A, (N, Ho, Wo) = _im2col_conv_transpose(x, k, s, p, K_pad)
            M = N * Ho * Wo
            tm = _pick_tile(M)
            Bm = params[f"B{i}"]
            if i < n_layers - 1:
                # GEMM + fused BatchNorm batch-stat reduction (one HBM pass).
                Y, ssum, ssq = matmul_bn_stats(A, Bm, tm)
                mean = ssum / M
                var = jnp.maximum(ssq / M - mean * mean, 0.0)  # f32 cancellation clamp
                scale = params[f"gamma{i}"] * jax.lax.rsqrt(var + _BN_EPS)
                shift = params[f"beta{i}"] - mean * scale
                # padded channels: Y == 0 and beta == 0  ->  output 0 after ReLU
                Yact = bn_relu(Y, scale, shift)                # bf16, feeds next GEMM
                x = Yact[:, :cout].reshape(N, Ho, Wo, cout)
            else:
                Y = matmul_tanh(A, Bm, tm)                     # tanh fused in epilogue
                x = Y[:, :cout].reshape(N, Ho, Wo, cout)
        return jnp.transpose(x, (0, 3, 1, 2))                  # -> NCHW (f32)

    return init_params, forward


if __name__ == "__main__":
    nz, ngf, batch = 16, 8, 2     # config.noise_dim = 16, config.gen_feature_map = 8
    init_params, forward = make_generator(nz, ngf)

    key = jax.random.PRNGKey(0)
    kp, kx = jax.random.split(key)
    params = init_params(kp)
    x = jax.random.normal(kx, (batch, nz, 1, 1), jnp.float32)

    out = jax.jit(forward)(x, params)
    out = jax.block_until_ready(out)

    assert out.shape == (batch, 3, 96, 96), out.shape
    assert bool(jnp.all(jnp.isfinite(out)))
    assert bool(jnp.all(jnp.abs(out) <= 1.0))
    print("KERNEL_OK")
</pallas_src>

<mosaic_0001>
module attributes {stable_mosaic.version = 11 : i64} {
  func.func @_bn_relu_kernel(%arg0: i32, %arg1: memref<32x128xf32, #tpu.memory_space<vmem>>, %arg2: memref<1x128xf32, #tpu.memory_space<vmem>>, %arg3: memref<1x128xf32, #tpu.memory_space<vmem>>, %arg4: memref<32x128xbf16, #tpu.memory_space<vmem>>) attributes {dimension_semantics = [#tpu.dimension_semantics<parallel>], iteration_bounds = array<i64: 1>, scalar_prefetch = 0 : i64, scratch_operands = 0 : i64, tpu.core_type = #tpu.core_type<tc>, window_params = [{transform_indices = @transform_0, window_bounds = array<i64: 32, 128>}, {pipeline_mode = #tpu.pipeline_mode<synchronous>, transform_indices = @transform_1, window_bounds = array<i64: 1, 128>}, {pipeline_mode = #tpu.pipeline_mode<synchronous>, transform_indices = @transform_2, window_bounds = array<i64: 1, 128>}, {transform_indices = @transform_3, window_bounds = array<i64: 32, 128>}]} {
    %c0 = arith.constant 0 : index
    %c0_0 = arith.constant 0 : index
    %0 = vector.load %arg1[%c0, %c0_0] : memref<32x128xf32, #tpu.memory_space<vmem>>, vector<32x128xf32>
    %c0_1 = arith.constant 0 : index
    %c0_2 = arith.constant 0 : index
    %1 = vector.load %arg2[%c0_1, %c0_2] : memref<1x128xf32, #tpu.memory_space<vmem>>, vector<1x128xf32>
    %2 = vector.broadcast %1 : vector<1x128xf32> to vector<32x128xf32>
    %3 = arith.mulf %0, %2 : vector<32x128xf32>
    %c0_3 = arith.constant 0 : index
    %c0_4 = arith.constant 0 : index
    %4 = vector.load %arg3[%c0_3, %c0_4] : memref<1x128xf32, #tpu.memory_space<vmem>>, vector<1x128xf32>
    %5 = vector.broadcast %4 : vector<1x128xf32> to vector<32x128xf32>
    %6 = arith.addf %3, %5 : vector<32x128xf32>
    %cst = arith.constant 0.000000e+00 : f32
    %7 = vector.broadcast %cst : f32 to vector<32x128xf32>
    %8 = arith.maximumf %6, %7 : vector<32x128xf32>
    %9 = arith.truncf %8 : vector<32x128xf32> to vector<32x128xbf16>
    %c0_5 = arith.constant 0 : index
    %c0_6 = arith.constant 0 : index
    %10 = vector.load %arg4[%c0_5, %c0_6] : memref<32x128xbf16, #tpu.memory_space<vmem>>, vector<32x128xbf16>
    tpu.vector_store %arg4[%c0_5, %c0_6], %9 {strides = array<i32>} : memref<32x128xbf16, #tpu.memory_space<vmem>>, vector<32x128xbf16>,
    return
  }
  func.func @transform_0(%arg0: i32) -> (i32, i32) {
    %c0_i32 = arith.constant 0 : i32
    %c0_i32_0 = arith.constant 0 : i32
    return %arg0, %c0_i32 : i32, i32
  }
  func.func @transform_1(%arg0: i32) -> (i32, i32) {
    %c0_i32 = arith.constant 0 : i32
    %c0_i32_0 = arith.constant 0 : i32
    %c0_i32_1 = arith.constant 0 : i32
    return %c0_i32, %c0_i32_0 : i32, i32
  }
  func.func @transform_2(%arg0: i32) -> (i32, i32) {
    %c0_i32 = arith.constant 0 : i32
    %c0_i32_0 = arith.constant 0 : i32
    %c0_i32_1 = arith.constant 0 : i32
    return %c0_i32, %c0_i32_0 : i32, i32
  }
  func.func @transform_3(%arg0: i32) -> (i32, i32) {
    %c0_i32 = arith.constant 0 : i32
    %c0_i32_0 = arith.constant 0 : i32
    return %arg0, %c0_i32 : i32, i32
  }
}

module attributes {stable_mosaic.version = 11 : i64} {
  func.func @_matmul_bnstats_kernel(%arg0: i32, %arg1: memref<32x256xbf16, #tpu.memory_space<vmem>>, %arg2: memref<256x128xbf16, #tpu.memory_space<vmem>>, %arg3: memref<32x128xf32, #tpu.memory_space<vmem>>, %arg4: memref<1x128xf32, #tpu.memory_space<vmem>>, %arg5: memref<1x128xf32, #tpu.memory_space<vmem>>) attributes {dimension_semantics = [#tpu.dimension_semantics<arbitrary>], iteration_bounds = array<i64: 1>, scalar_prefetch = 0 : i64, scratch_operands = 0 : i64, tpu.core_type = #tpu.core_type<tc>, window_params = [{transform_indices = @transform_0, window_bounds = array<i64: 32, 256>}, {pipeline_mode = #tpu.pipeline_mode<synchronous>, transform_indices = @transform_1, window_bounds = array<i64: 256, 128>}, {transform_indices = @transform_2, window_bounds = array<i64: 32, 128>}, {pipeline_mode = #tpu.pipeline_mode<synchronous>, transform_indices = @transform_3, window_bounds = array<i64: 1, 128>}, {pipeline_mode = #tpu.pipeline_mode<synchronous>, transform_indices = @transform_4, window_bounds = array<i64: 1, 128>}]} {
    %c0 = arith.constant 0 : index
    %c0_0 = arith.constant 0 : index
    %0 = vector.load %arg1[%c0, %c0_0] : memref<32x256xbf16, #tpu.memory_space<vmem>>, vector<32x256xbf16>
    %c0_1 = arith.constant 0 : index
    %c0_2 = arith.constant 0 : index
    %1 = vector.load %arg2[%c0_1, %c0_2] : memref<256x128xbf16, #tpu.memory_space<vmem>>, vector<256x128xbf16>
    %cst = arith.constant dense<0.000000e+00> : vector<32x128xf32>
    %2 = tpu.matmul %0, %1, %cst {dimension_numbers = #tpu.dot_dimension_numbers<[1], [0], [0], [1], [0, 0, 1, 1], [], []>} : vector<32x256xbf16>, vector<256x128xbf16>, vector<32x128xf32> -> vector<32x128xf32>
    %c0_3 = arith.constant 0 : index
    %c0_4 = arith.constant 0 : index
    %3 = vector.load %arg3[%c0_3, %c0_4] : memref<32x128xf32, #tpu.memory_space<vmem>>, vector<32x128xf32>
    tpu.vector_store %arg3[%c0_3, %c0_4], %2 {strides = array<i32>} : memref<32x128xf32, #tpu.memory_space<vmem>>, vector<32x128xf32>,
    %c0_i32 = arith.constant 0 : i32
    %4 = arith.cmpi eq, %arg0, %c0_i32 : i32
    %5 = arith.extui %4 : i1 to i32
    %c0_i32_5 = arith.constant 0 : i32
    %6 = arith.cmpi ne, %5, %c0_i32_5 : i32
    scf.if %6 {
      %cst_16 = arith.constant 0.000000e+00 : f32
      %18 = vector.broadcast %cst_16 : f32 to vector<1x128xf32>
      %c0_17 = arith.constant 0 : index
      %c0_18 = arith.constant 0 : index
      %19 = vector.load %arg4[%c0_17, %c0_18] : memref<1x128xf32, #tpu.memory_space<vmem>>, vector<1x128xf32>
      tpu.vector_store %arg4[%c0_17, %c0_18], %18 {strides = array<i32>} : memref<1x128xf32, #tpu.memory_space<vmem>>, vector<1x128xf32>,
      %cst_19 = arith.constant 0.000000e+00 : f32
      %20 = vector.broadcast %cst_19 : f32 to vector<1x128xf32>
      %c0_20 = arith.constant 0 : index
      %c0_21 = arith.constant 0 : index
      %21 = vector.load %arg5[%c0_20, %c0_21] : memref<1x128xf32, #tpu.memory_space<vmem>>, vector<1x128xf32>
      tpu.vector_store %arg5[%c0_20, %c0_21], %20 {strides = array<i32>} : memref<1x128xf32, #tpu.memory_space<vmem>>, vector<1x128xf32>,
    } else {
    }
    %c0_6 = arith.constant 0 : index
    %c0_7 = arith.constant 0 : index
    %7 = vector.load %arg4[%c0_6, %c0_7] : memref<1x128xf32, #tpu.memory_space<vmem>>, vector<1x128xf32>
    %cst_8 = arith.constant dense<0.000000e+00> : vector<128xf32>
    %8 = vector.multi_reduction <add>, %2, %cst_8 [0] : vector<32x128xf32> to vector<128xf32>
    %9 = vector.shape_cast %8 : vector<128xf32> to vector<1x128xf32>
    %10 = arith.addf %7, %9 : vector<1x128xf32>
    %c0_9 = arith.constant 0 : index
    %c0_10 = arith.constant 0 : index
    %11 = vector.load %arg4[%c0_9, %c0_10] : memref<1x128xf32, #tpu.memory_space<vmem>>, vector<1x128xf32>
    tpu.vector_store %arg4[%c0_9, %c0_10], %10 {strides = array<i32>} : memref<1x128xf32, #tpu.memory_space<vmem>>, vector<1x128xf32>,
    %c0_11 = arith.constant 0 : index
    %c0_12 = arith.constant 0 : index
    %12 = vector.load %arg5[%c0_11, %c0_12] : memref<1x128xf32, #tpu.memory_space<vmem>>, vector<1x128xf32>
    %13 = arith.mulf %2, %2 : vector<32x128xf32>
    %cst_13 = arith.constant dense<0.000000e+00> : vector<128xf32>
    %14 = vector.multi_reduction <add>, %13, %cst_13 [0] : vector<32x128xf32> to vector<128xf32>
    %15 = vector.shape_cast %14 : vector<128xf32> to vector<1x128xf32>
    %16 = arith.addf %12, %15 : vector<1x128xf32>
    %c0_14 = arith.constant 0 : index
    %c0_15 = arith.constant 0 : index
    %17 = vector.load %arg5[%c0_14, %c0_15] : memref<1x128xf32, #tpu.memory_space<vmem>>, vector<1x128xf32>
    tpu.vector_store %arg5[%c0_14, %c0_15], %16 {strides = array<i32>} : memref<1x128xf32, #tpu.memory_space<vmem>>, vector<1x128xf32>,
    return
  }
  func.func @transform_0(%arg0: i32) -> (i32, i32) {
    %c0_i32 = arith.constant 0 : i32
    %c0_i32_0 = arith.constant 0 : i32
    return %arg0, %c0_i32 : i32, i32
  }
  func.func @transform_1(%arg0: i32) -> (i32, i32) {
    %c0_i32 = arith.constant 0 : i32
    %c0_i32_0 = arith.constant 0 : i32
    %c0_i32_1 = arith.constant 0 : i32
    return %c0_i32, %c0_i32_0 : i32, i32
  }
  func.func @transform_2(%arg0: i32) -> (i32, i32) {
    %c0_i32 = arith.constant 0 : i32
    %c0_i32_0 = arith.constant 0 : i32
    return %arg0, %c0_i32 : i32, i32
  }
  func.func @transform_3(%arg0: i32) -> (i32, i32) {
    %c0_i32 = arith.constant 0 : i32
    %c0_i32_0 = arith.constant 0 : i32
    %c0_i32_1 = arith.constant 0 : i32
    return %c0_i32, %c0_i32_0 : i32, i32
  }
  func.func @transform_4(%arg0: i32) -> (i32, i32) {
    %c0_i32 = arith.constant 0 : i32
    %c0_i32_0 = arith.constant 0 : i32
    %c0_i32_1 = arith.constant 0 : i32
    return %c0_i32, %c0_i32_0 : i32, i32
  }
}

module attributes {stable_mosaic.version = 11 : i64} {
  func.func @_matmul_bnstats_kernel(%arg0: i32, %arg1: memref<128x1024xbf16, #tpu.memory_space<vmem>>, %arg2: memref<1024x128xbf16, #tpu.memory_space<vmem>>, %arg3: memref<128x128xf32, #tpu.memory_space<vmem>>, %arg4: memref<1x128xf32, #tpu.memory_space<vmem>>, %arg5: memref<1x128xf32, #tpu.memory_space<vmem>>) attributes {dimension_semantics = [#tpu.dimension_semantics<arbitrary>], iteration_bounds = array<i64: 1>, scalar_prefetch = 0 : i64, scratch_operands = 0 : i64, tpu.core_type = #tpu.core_type<tc>, window_params = [{transform_indices = @transform_0, window_bounds = array<i64: 128, 1024>}, {pipeline_mode = #tpu.pipeline_mode<synchronous>, transform_indices = @transform_1, window_bounds = array<i64: 1024, 128>}, {transform_indices = @transform_2, window_bounds = array<i64: 128, 128>}, {pipeline_mode = #tpu.pipeline_mode<synchronous>, transform_indices = @transform_3, window_bounds = array<i64: 1, 128>}, {pipeline_mode = #tpu.pipeline_mode<synchronous>, transform_indices = @transform_4, window_bounds = array<i64: 1, 128>}]} {
    %c0 = arith.constant 0 : index
    %c0_0 = arith.constant 0 : index
    %0 = vector.load %arg1[%c0, %c0_0] : memref<128x1024xbf16, #tpu.memory_space<vmem>>, vector<128x1024xbf16>
    %c0_1 = arith.constant 0 : index
    %c0_2 = arith.constant 0 : index
    %1 = vector.load %arg2[%c0_1, %c0_2] : memref<1024x128xbf16, #tpu.memory_space<vmem>>, vector<1024x128xbf16>
    %cst = arith.constant dense<0.000000e+00> : vector<128x128xf32>
    %2 = tpu.matmul %0, %1, %cst {dimension_numbers = #tpu.dot_dimension_numbers<[1], [0], [0], [1], [0, 0, 1, 1], [], []>} : vector<128x1024xbf16>, vector<1024x128xbf16>, vector<128x128xf32> -> vector<128x128xf32>
    %c0_3 = arith.constant 0 : index
    %c0_4 = arith.constant 0 : index
    %3 = vector.load %arg3[%c0_3, %c0_4] : memref<128x128xf32, #tpu.memory_space<vmem>>, vector<128x128xf32>
    tpu.vector_store %arg3[%c0_3, %c0_4], %2 {strides = array<i32>} : memref<128x128xf32, #tpu.memory_space<vmem>>, vector<128x128xf32>,
    %c0_i32 = arith.constant 0 : i32
    %4 = arith.cmpi eq, %arg0, %c0_i32 : i32
    %5 = arith.extui %4 : i1 to i32
    %c0_i32_5 = arith.constant 0 : i32
    %6 = arith.cmpi ne, %5, %c0_i32_5 : i32
    scf.if %6 {
      %cst_16 = arith.constant 0.000000e+00 : f32
      %18 = vector.broadcast %cst_16 : f32 to vector<1x128xf32>
      %c0_17 = arith.constant 0 : index
      %c0_18 = arith.constant 0 : index
      %19 = vector.load %arg4[%c0_17, %c0_18] : memref<1x128xf32, #tpu.memory_space<vmem>>, vector<1x128xf32>
      tpu.vector_store %arg4[%c0_17, %c0_18], %18 {strides = array<i32>} : memref<1x128xf32, #tpu.memory_space<vmem>>, vector<1x128xf32>,
      %cst_19 = arith.constant 0.000000e+00 : f32
      %20 = vector.broadcast %cst_19 : f32 to vector<1x128xf32>
      %c0_20 = arith.constant 0 : index
      %c0_21 = arith.constant 0 : index
      %21 = vector.load %arg5[%c0_20, %c0_21] : memref<1x128xf32, #tpu.memory_space<vmem>>, vector<1x128xf32>
      tpu.vector_store %arg5[%c0_20, %c0_21], %20 {strides = array<i32>} : memref<1x128xf32, #tpu.memory_space<vmem>>, vector<1x128xf32>,
    } else {
    }
    %c0_6 = arith.constant 0 : index
    %c0_7 = arith.constant 0 : index
    %7 = vector.load %arg4[%c0_6, %c0_7] : memref<1x128xf32, #tpu.memory_space<vmem>>, vector<1x128xf32>
    %cst_8 = arith.constant dense<0.000000e+00> : vector<128xf32>
    %8 = vector.multi_reduction <add>, %2, %cst_8 [0] : vector<128x128xf32> to vector<128xf32>
    %9 = vector.shape_cast %8 : vector<128xf32> to vector<1x128xf32>
    %10 = arith.addf %7, %9 : vector<1x128xf32>
    %c0_9 = arith.constant 0 : index
    %c0_10 = arith.constant 0 : index
    %11 = vector.load %arg4[%c0_9, %c0_10] : memref<1x128xf32, #tpu.memory_space<vmem>>, vector<1x128xf32>
    tpu.vector_store %arg4[%c0_9, %c0_10], %10 {strides = array<i32>} : memref<1x128xf32, #tpu.memory_space<vmem>>, vector<1x128xf32>,
    %c0_11 = arith.constant 0 : index
    %c0_12 = arith.constant 0 : index
    %12 = vector.load %arg5[%c0_11, %c0_12] : memref<1x128xf32, #tpu.memory_space<vmem>>, vector<1x128xf32>
    %13 = arith.mulf %2, %2 : vector<128x128xf32>
    %cst_13 = arith.constant dense<0.000000e+00> : vector<128xf32>
    %14 = vector.multi_reduction <add>, %13, %cst_13 [0] : vector<128x128xf32> to vector<128xf32>
    %15 = vector.shape_cast %14 : vector<128xf32> to vector<1x128xf32>
    %16 = arith.addf %12, %15 : vector<1x128xf32>
    %c0_14 = arith.constant 0 : index
    %c0_15 = arith.constant 0 : index
    %17 = vector.load %arg5[%c0_14, %c0_15] : memref<1x128xf32, #tpu.memory_space<vmem>>, vector<1x128xf32>
    tpu.vector_store %arg5[%c0_14, %c0_15], %16 {strides = array<i32>} : memref<1x128xf32, #tpu.memory_space<vmem>>, vector<1x128xf32>,
    return
  }
  func.func @transform_0(%arg0: i32) -> (i32, i32) {
    %c0_i32 = arith.constant 0 : i32
    %c0_i32_0 = arith.constant 0 : i32
    return %arg0, %c0_i32 : i32, i32
  }
  func.func @transform_1(%arg0: i32) -> (i32, i32) {
    %c0_i32 = arith.constant 0 : i32
    %c0_i32_0 = arith.constant 0 : i32
    %c0_i32_1 = arith.constant 0 : i32
    return %c0_i32, %c0_i32_0 : i32, i32
  }
  func.func @transform_2(%arg0: i32) -> (i32, i32) {
    %c0_i32 = arith.constant 0 : i32
    %c0_i32_0 = arith.constant 0 : i32
    return %arg0, %c0_i32 : i32, i32
  }
  func.func @transform_3(%arg0: i32) -> (i32, i32) {
    %c0_i32 = arith.constant 0 : i32
    %c0_i32_0 = arith.constant 0 : i32
    %c0_i32_1 = arith.constant 0 : i32
    return %c0_i32, %c0_i32_0 : i32, i32
  }
  func.func @transform_4(%arg0: i32) -> (i32, i32) {
    %c0_i32 = arith.constant 0 : i32
    %c0_i32_0 = arith.constant 0 : i32
    %c0_i32_1 = arith.constant 0 : i32
    return %c0_i32, %c0_i32_0 : i32, i32
  }
}

module attributes {stable_mosaic.version = 11 : i64} {
  func.func @_bn_relu_kernel(%arg0: i32, %arg1: memref<128x128xf32, #tpu.memory_space<vmem>>, %arg2: memref<1x128xf32, #tpu.memory_space<vmem>>, %arg3: memref<1x128xf32, #tpu.memory_space<vmem>>, %arg4: memref<128x128xbf16, #tpu.memory_space<vmem>>) attributes {dimension_semantics = [#tpu.dimension_semantics<parallel>], iteration_bounds = array<i64: 1>, scalar_prefetch = 0 : i64, scratch_operands = 0 : i64, tpu.core_type = #tpu.core_type<tc>, window_params = [{transform_indices = @transform_0, window_bounds = array<i64: 128, 128>}, {pipeline_mode = #tpu.pipeline_mode<synchronous>, transform_indices = @transform_1, window_bounds = array<i64: 1, 128>}, {pipeline_mode = #tpu.pipeline_mode<synchronous>, transform_indices = @transform_2, window_bounds = array<i64: 1, 128>}, {transform_indices = @transform_3, window_bounds = array<i64: 128, 128>}]} {
    %c0 = arith.constant 0 : index
    %c0_0 = arith.constant 0 : index
    %0 = vector.load %arg1[%c0, %c0_0] : memref<128x128xf32, #tpu.memory_space<vmem>>, vector<128x128xf32>
    %c0_1 = arith.constant 0 : index
    %c0_2 = arith.constant 0 : index
    %1 = vector.load %arg2[%c0_1, %c0_2] : memref<1x128xf32, #tpu.memory_space<vmem>>, vector<1x128xf32>
    %2 = vector.broadcast %1 : vector<1x128xf32> to vector<128x128xf32>
    %3 = arith.mulf %0, %2 : vector<128x128xf32>
    %c0_3 = arith.constant 0 : index
    %c0_4 = arith.constant 0 : index
    %4 = vector.load %arg3[%c0_3, %c0_4] : memref<1x128xf32, #tpu.memory_space<vmem>>, vector<1x128xf32>
    %5 = vector.broadcast %4 : vector<1x128xf32> to vector<128x128xf32>
    %6 = arith.addf %3, %5 : vector<128x128xf32>
    %cst = arith.constant 0.000000e+00 : f32
    %7 = vector.broadcast %cst : f32 to vector<128x128xf32>
    %8 = arith.maximumf %6, %7 : vector<128x128xf32>
    %9 = arith.truncf %8 : vector<128x128xf32> to vector<128x128xbf16>
    %c0_5 = arith.constant 0 : index
    %c0_6 = arith.constant 0 : index
    %10 = vector.load %arg4[%c0_5, %c0_6] : memref<128x128xbf16, #tpu.memory_space<vmem>>, vector<128x128xbf16>
    tpu.vector_store %arg4[%c0_5, %c0_6], %9 {strides = array<i32>} : memref<128x128xbf16, #tpu.memory_space<vmem>>, vector<128x128xbf16>,
    return
  }
  func.func @transform_0(%arg0: i32) -> (i32, i32) {
    %c0_i32 = arith.constant 0 : i32
    %c0_i32_0 = arith.constant 0 : i32
    return %arg0, %c0_i32 : i32, i32
  }
  func.func @transform_1(%arg0: i32) -> (i32, i32) {
    %c0_i32 = arith.constant 0 : i32
    %c0_i32_0 = arith.constant 0 : i32
    %c0_i32_1 = arith.constant 0 : i32
    return %c0_i32, %c0_i32_0 : i32, i32
  }
  func.func @transform_2(%arg0: i32) -> (i32, i32) {
    %c0_i32 = arith.constant 0 : i32
    %c0_i32_0 = arith.constant 0 : i32
    %c0_i32_1 = arith.constant 0 : i32
    return %c0_i32, %c0_i32_0 : i32, i32
  }
  func.func @transform_3(%arg0: i32) -> (i32, i32) {
    %c0_i32 = arith.constant 0 : i32
    %c0_i32_0 = arith.constant 0 : i32
    return %arg0, %c0_i32 : i32, i32
  }
}

module attributes {stable_mosaic.version = 11 : i64} {
  func.func @_matmul_bnstats_kernel(%arg0: i32, %arg1: memref<512x512xbf16, #tpu.memory_space<vmem>>, %arg2: memref<512x128xbf16, #tpu.memory_space<vmem>>, %arg3: memref<512x128xf32, #tpu.memory_space<vmem>>, %arg4: memref<1x128xf32, #tpu.memory_space<vmem>>, %arg5: memref<1x128xf32, #tpu.memory_space<vmem>>) attributes {dimension_semantics = [#tpu.dimension_semantics<arbitrary>], iteration_bounds = array<i64: 1>, scalar_prefetch = 0 : i64, scratch_operands = 0 : i64, tpu.core_type = #tpu.core_type<tc>, window_params = [{transform_indices = @transform_0, window_bounds = array<i64: 512, 512>}, {pipeline_mode = #tpu.pipeline_mode<synchronous>, transform_indices = @transform_1, window_bounds = array<i64: 512, 128>}, {transform_indices = @transform_2, window_bounds = array<i64: 512, 128>}, {pipeline_mode = #tpu.pipeline_mode<synchronous>, transform_indices = @transform_3, window_bounds = array<i64: 1, 128>}, {pipeline_mode = #tpu.pipeline_mode<synchronous>, transform_indices = @transform_4, window_bounds = array<i64: 1, 128>}]} {
    %c0 = arith.constant 0 : index
    %c0_0 = arith.constant 0 : index
    %0 = vector.load %arg1[%c0, %c0_0] : memref<512x512xbf16, #tpu.memory_space<vmem>>, vector<512x512xbf16>
    %c0_1 = arith.constant 0 : index
    %c0_2 = arith.constant 0 : index
    %1 = vector.load %arg2[%c0_1, %c0_2] : memref<512x128xbf16, #tpu.memory_space<vmem>>, vector<512x128xbf16>
    %cst = arith.constant dense<0.000000e+00> : vector<512x128xf32>
    %2 = tpu.matmul %0, %1, %cst {dimension_numbers = #tpu.dot_dimension_numbers<[1], [0], [0], [1], [0, 0, 1, 1], [], []>} : vector<512x512xbf16>, vector<512x128xbf16>, vector<512x128xf32> -> vector<512x128xf32>
    %c0_3 = arith.constant 0 : index
    %c0_4 = arith.constant 0 : index
    %3 = vector.load %arg3[%c0_3, %c0_4] : memref<512x128xf32, #tpu.memory_space<vmem>>, vector<512x128xf32>
    tpu.vector_store %arg3[%c0_3, %c0_4], %2 {strides = array<i32>} : memref<512x128xf32, #tpu.memory_space<vmem>>, vector<512x128xf32>,
    %c0_i32 = arith.constant 0 : i32
    %4 = arith.cmpi eq, %arg0, %c0_i32 : i32
    %5 = arith.extui %4 : i1 to i32
    %c0_i32_5 = arith.constant 0 : i32
    %6 = arith.cmpi ne, %5, %c0_i32_5 : i32
    scf.if %6 {
      %cst_16 = arith.constant 0.000000e+00 : f32
      %18 = vector.broadcast %cst_16 : f32 to vector<1x128xf32>
      %c0_17 = arith.constant 0 : index
      %c0_18 = arith.constant 0 : index
      %19 = vector.load %arg4[%c0_17, %c0_18] : memref<1x128xf32, #tpu.memory_space<vmem>>, vector<1x128xf32>
      tpu.vector_store %arg4[%c0_17, %c0_18], %18 {strides = array<i32>} : memref<1x128xf32, #tpu.memory_space<vmem>>, vector<1x128xf32>,
      %cst_19 = arith.constant 0.000000e+00 : f32
      %20 = vector.broadcast %cst_19 : f32 to vector<1x128xf32>
      %c0_20 = arith.constant 0 : index
      %c0_21 = arith.constant 0 : index
      %21 = vector.load %arg5[%c0_20, %c0_21] : memref<1x128xf32, #tpu.memory_space<vmem>>, vector<1x128xf32>
      tpu.vector_store %arg5[%c0_20, %c0_21], %20 {strides = array<i32>} : memref<1x128xf32, #tpu.memory_space<vmem>>, vector<1x128xf32>,
    } else {
    }
    %c0_6 = arith.constant 0 : index
    %c0_7 = arith.constant 0 : index
    %7 = vector.load %arg4[%c0_6, %c0_7] : memref<1x128xf32, #tpu.memory_space<vmem>>, vector<1x128xf32>
    %cst_8 = arith.constant dense<0.000000e+00> : vector<128xf32>
    %8 = vector.multi_reduction <add>, %2, %cst_8 [0] : vector<512x128xf32> to vector<128xf32>
    %9 = vector.shape_cast %8 : vector<128xf32> to vector<1x128xf32>
    %10 = arith.addf %7, %9 : vector<1x128xf32>
    %c0_9 = arith.constant 0 : index
    %c0_10 = arith.constant 0 : index
    %11 = vector.load %arg4[%c0_9, %c0_10] : memref<1x128xf32, #tpu.memory_space<vmem>>, vector<1x128xf32>
    tpu.vector_store %arg4[%c0_9, %c0_10], %10 {strides = array<i32>} : memref<1x128xf32, #tpu.memory_space<vmem>>, vector<1x128xf32>,
    %c0_11 = arith.constant 0 : index
    %c0_12 = arith.constant 0 : index
    %12 = vector.load %arg5[%c0_11, %c0_12] : memref<1x128xf32, #tpu.memory_space<vmem>>, vector<1x128xf32>
    %13 = arith.mulf %2, %2 : vector<512x128xf32>
    %cst_13 = arith.constant dense<0.000000e+00> : vector<128xf32>
    %14 = vector.multi_reduction <add>, %13, %cst_13 [0] : vector<512x128xf32> to vector<128xf32>
    %15 = vector.shape_cast %14 : vector<128xf32> to vector<1x128xf32>
    %16 = arith.addf %12, %15 : vector<1x128xf32>
    %c0_14 = arith.constant 0 : index
    %c0_15 = arith.constant 0 : index
    %17 = vector.load %arg5[%c0_14, %c0_15] : memref<1x128xf32, #tpu.memory_space<vmem>>, vector<1x128xf32>
    tpu.vector_store %arg5[%c0_14, %c0_15], %16 {strides = array<i32>} : memref<1x128xf32, #tpu.memory_space<vmem>>, vector<1x128xf32>,
    return
  }
  func.func @transform_0(%arg0: i32) -> (i32, i32) {
    %c0_i32 = arith.constant 0 : i32
    %c0_i32_0 = arith.constant 0 : i32
    return %arg0, %c0_i32 : i32, i32
  }
  func.func @transform_1(%arg0: i32) -> (i32, i32) {
    %c0_i32 = arith.constant 0 : i32
    %c0_i32_0 = arith.constant 0 : i32
    %c0_i32_1 = arith.constant 0 : i32
    return %c0_i32, %c0_i32_0 : i32, i32
  }
  func.func @transform_2(%arg0: i32) -> (i32, i32) {
    %c0_i32 = arith.constant 0 : i32
    %c0_i32_0 = arith.constant 0 : i32
    return %arg0, %c0_i32 : i32, i32
  }
  func.func @transform_3(%arg0: i32) -> (i32, i32) {
    %c0_i32 = arith.constant 0 : i32
    %c0_i32_0 = arith.constant 0 : i32
    %c0_i32_1 = arith.constant 0 : i32
    return %c0_i32, %c0_i32_0 : i32, i32
  }
  func.func @transform_4(%arg0: i32) -> (i32, i32) {
    %c0_i32 = arith.constant 0 : i32
    %c0_i32_0 = arith.constant 0 : i32
    %c0_i32_1 = arith.constant 0 : i32
    return %c0_i32, %c0_i32_0 : i32, i32
  }
}

module attributes {stable_mosaic.version = 11 : i64} {
  func.func @_bn_relu_kernel(%arg0: i32, %arg1: memref<512x128xf32, #tpu.memory_space<vmem>>, %arg2: memref<1x128xf32, #tpu.memory_space<vmem>>, %arg3: memref<1x128xf32, #tpu.memory_space<vmem>>, %arg4: memref<512x128xbf16, #tpu.memory_space<vmem>>) attributes {dimension_semantics = [#tpu.dimension_semantics<parallel>], iteration_bounds = array<i64: 1>, scalar_prefetch = 0 : i64, scratch_operands = 0 : i64, tpu.core_type = #tpu.core_type<tc>, window_params = [{transform_indices = @transform_0, window_bounds = array<i64: 512, 128>}, {pipeline_mode = #tpu.pipeline_mode<synchronous>, transform_indices = @transform_1, window_bounds = array<i64: 1, 128>}, {pipeline_mode = #tpu.pipeline_mode<synchronous>, transform_indices = @transform_2, window_bounds = array<i64: 1, 128>}, {transform_indices = @transform_3, window_bounds = array<i64: 512, 128>}]} {
    %c0 = arith.constant 0 : index
    %c0_0 = arith.constant 0 : index
    %0 = vector.load %arg1[%c0, %c0_0] : memref<512x128xf32, #tpu.memory_space<vmem>>, vector<512x128xf32>
    %c0_1 = arith.constant 0 : index
    %c0_2 = arith.constant 0 : index
    %1 = vector.load %arg2[%c0_1, %c0_2] : memref<1x128xf32, #tpu.memory_space<vmem>>, vector<1x128xf32>
    %2 = vector.broadcast %1 : vector<1x128xf32> to vector<512x128xf32>
    %3 = arith.mulf %0, %2 : vector<512x128xf32>
    %c0_3 = arith.constant 0 : index
    %c0_4 = arith.constant 0 : index
    %4 = vector.load %arg3[%c0_3, %c0_4] : memref<1x128xf32, #tpu.memory_space<vmem>>, vector<1x128xf32>
    %5 = vector.broadcast %4 : vector<1x128xf32> to vector<512x128xf32>
    %6 = arith.addf %3, %5 : vector<512x128xf32>
    %cst = arith.constant 0.000000e+00 : f32
    %7 = vector.broadcast %cst : f32 to vector<512x128xf32>
    %8 = arith.maximumf %6, %7 : vector<512x128xf32>
    %9 = arith.truncf %8 : vector<512x128xf32> to vector<512x128xbf16>
    %c0_5 = arith.constant 0 : index
    %c0_6 = arith.constant 0 : index
    %10 = vector.load %arg4[%c0_5, %c0_6] : memref<512x128xbf16, #tpu.memory_space<vmem>>, vector<512x128xbf16>
    tpu.vector_store %arg4[%c0_5, %c0_6], %9 {strides = array<i32>} : memref<512x128xbf16, #tpu.memory_space<vmem>>, vector<512x128xbf16>,
    return
  }
  func.func @transform_0(%arg0: i32) -> (i32, i32) {
    %c0_i32 = arith.constant 0 : i32
    %c0_i32_0 = arith.constant 0 : i32
    return %arg0, %c0_i32 : i32, i32
  }
  func.func @transform_1(%arg0: i32) -> (i32, i32) {
    %c0_i32 = arith.constant 0 : i32
    %c0_i32_0 = arith.constant 0 : i32
    %c0_i32_1 = arith.constant 0 : i32
    return %c0_i32, %c0_i32_0 : i32, i32
  }
  func.func @transform_2(%arg0: i32) -> (i32, i32) {
    %c0_i32 = arith.constant 0 : i32
    %c0_i32_0 = arith.constant 0 : i32
    %c0_i32_1 = arith.constant 0 : i32
    return %c0_i32, %c0_i32_0 : i32, i32
  }
  func.func @transform_3(%arg0: i32) -> (i32, i32) {
    %c0_i32 = arith.constant 0 : i32
    %c0_i32_0 = arith.constant 0 : i32
    return %arg0, %c0_i32 : i32, i32
  }
}

module attributes {stable_mosaic.version = 11 : i64} {
  func.func @_matmul_bnstats_kernel(%arg0: i32, %arg1: memref<512x256xbf16, #tpu.memory_space<vmem>>, %arg2: memref<256x128xbf16, #tpu.memory_space<vmem>>, %arg3: memref<512x128xf32, #tpu.memory_space<vmem>>, %arg4: memref<1x128xf32, #tpu.memory_space<vmem>>, %arg5: memref<1x128xf32, #tpu.memory_space<vmem>>) attributes {dimension_semantics = [#tpu.dimension_semantics<arbitrary>], iteration_bounds = array<i64: 4>, scalar_prefetch = 0 : i64, scratch_operands = 0 : i64, tpu.core_type = #tpu.core_type<tc>, window_params = [{transform_indices = @transform_0, window_bounds = array<i64: 512, 256>}, {pipeline_mode = #tpu.pipeline_mode<synchronous>, transform_indices = @transform_1, window_bounds = array<i64: 256, 128>}, {transform_indices = @transform_2, window_bounds = array<i64: 512, 128>}, {pipeline_mode = #tpu.pipeline_mode<synchronous>, transform_indices = @transform_3, window_bounds = array<i64: 1, 128>}, {pipeline_mode = #tpu.pipeline_mode<synchronous>, transform_indices = @transform_4, window_bounds = array<i64: 1, 128>}]} {
    %c0 = arith.constant 0 : index
    %c0_0 = arith.constant 0 : index
    %0 = vector.load %arg1[%c0, %c0_0] : memref<512x256xbf16, #tpu.memory_space<vmem>>, vector<512x256xbf16>
    %c0_1 = arith.constant 0 : index
    %c0_2 = arith.constant 0 : index
    %1 = vector.load %arg2[%c0_1, %c0_2] : memref<256x128xbf16, #tpu.memory_space<vmem>>, vector<256x128xbf16>
    %cst = arith.constant dense<0.000000e+00> : vector<512x128xf32>
    %2 = tpu.matmul %0, %1, %cst {dimension_numbers = #tpu.dot_dimension_numbers<[1], [0], [0], [1], [0, 0, 1, 1], [], []>} : vector<512x256xbf16>, vector<256x128xbf16>, vector<512x128xf32> -> vector<512x128xf32>
    %c0_3 = arith.constant 0 : index
    %c0_4 = arith.constant 0 : index
    %3 = vector.load %arg3[%c0_3, %c0_4] : memref<512x128xf32, #tpu.memory_space<vmem>>, vector<512x128xf32>
    tpu.vector_store %arg3[%c0_3, %c0_4], %2 {strides = array<i32>} : memref<512x128xf32, #tpu.memory_space<vmem>>, vector<512x128xf32>,
    %c0_i32 = arith.constant 0 : i32
    %4 = arith.cmpi eq, %arg0, %c0_i32 : i32
    %5 = arith.extui %4 : i1 to i32
    %c0_i32_5 = arith.constant 0 : i32
    %6 = arith.cmpi ne, %5, %c0_i32_5 : i32
    scf.if %6 {
      %cst_16 = arith.constant 0.000000e+00 : f32
      %18 = vector.broadcast %cst_16 : f32 to vector<1x128xf32>
      %c0_17 = arith.constant 0 : index
      %c0_18 = arith.constant 0 : index
      %19 = vector.load %arg4[%c0_17, %c0_18] : memref<1x128xf32, #tpu.memory_space<vmem>>, vector<1x128xf32>
      tpu.vector_store %arg4[%c0_17, %c0_18], %18 {strides = array<i32>} : memref<1x128xf32, #tpu.memory_space<vmem>>, vector<1x128xf32>,
      %cst_19 = arith.constant 0.000000e+00 : f32
      %20 = vector.broadcast %cst_19 : f32 to vector<1x128xf32>
      %c0_20 = arith.constant 0 : index
      %c0_21 = arith.constant 0 : index
      %21 = vector.load %arg5[%c0_20, %c0_21] : memref<1x128xf32, #tpu.memory_space<vmem>>, vector<1x128xf32>
      tpu.vector_store %arg5[%c0_20, %c0_21], %20 {strides = array<i32>} : memref<1x128xf32, #tpu.memory_space<vmem>>, vector<1x128xf32>,
    } else {
    }
    %c0_6 = arith.constant 0 : index
    %c0_7 = arith.constant 0 : index
    %7 = vector.load %arg4[%c0_6, %c0_7] : memref<1x128xf32, #tpu.memory_space<vmem>>, vector<1x128xf32>
    %cst_8 = arith.constant dense<0.000000e+00> : vector<128xf32>
    %8 = vector.multi_reduction <add>, %2, %cst_8 [0] : vector<512x128xf32> to vector<128xf32>
    %9 = vector.shape_cast %8 : vector<128xf32> to vector<1x128xf32>
    %10 = arith.addf %7, %9 : vector<1x128xf32>
    %c0_9 = arith.constant 0 : index
    %c0_10 = arith.constant 0 : index
    %11 = vector.load %arg4[%c0_9, %c0_10] : memref<1x128xf32, #tpu.memory_space<vmem>>, vector<1x128xf32>
    tpu.vector_store %arg4[%c0_9, %c0_10], %10 {strides = array<i32>} : memref<1x128xf32, #tpu.memory_space<vmem>>, vector<1x128xf32>,
    %c0_11 = arith.constant 0 : index
    %c0_12 = arith.constant 0 : index
    %12 = vector.load %arg5[%c0_11, %c0_12] : memref<1x128xf32, #tpu.memory_space<vmem>>, vector<1x128xf32>
    %13 = arith.mulf %2, %2 : vector<512x128xf32>
    %cst_13 = arith.constant dense<0.000000e+00> : vector<128xf32>
    %14 = vector.multi_reduction <add>, %13, %cst_13 [0] : vector<512x128xf32> to vector<128xf32>
    %15 = vector.shape_cast %14 : vector<128xf32> to vector<1x128xf32>
    %16 = arith.addf %12, %15 : vector<1x128xf32>
    %c0_14 = arith.constant 0 : index
    %c0_15 = arith.constant 0 : index
    %17 = vector.load %arg5[%c0_14, %c0_15] : memref<1x128xf32, #tpu.memory_space<vmem>>, vector<1x128xf32>
    tpu.vector_store %arg5[%c0_14, %c0_15], %16 {strides = array<i32>} : memref<1x128xf32, #tpu.memory_space<vmem>>, vector<1x128xf32>,
    return
  }
  func.func @transform_0(%arg0: i32) -> (i32, i32) {
    %c0_i32 = arith.constant 0 : i32
    %c0_i32_0 = arith.constant 0 : i32
    return %arg0, %c0_i32 : i32, i32
  }
  func.func @transform_1(%arg0: i32) -> (i32, i32) {
    %c0_i32 = arith.constant 0 : i32
    %c0_i32_0 = arith.constant 0 : i32
    %c0_i32_1 = arith.constant 0 : i32
    return %c0_i32, %c0_i32_0 : i32, i32
  }
  func.func @transform_2(%arg0: i32) -> (i32, i32) {
    %c0_i32 = arith.constant 0 : i32
    %c0_i32_0 = arith.constant 0 : i32
    return %arg0, %c0_i32 : i32, i32
  }
  func.func @transform_3(%arg0: i32) -> (i32, i32) {
    %c0_i32 = arith.constant 0 : i32
    %c0_i32_0 = arith.constant 0 : i32
    %c0_i32_1 = arith.constant 0 : i32
    return %c0_i32, %c0_i32_0 : i32, i32
  }
  func.func @transform_4(%arg0: i32) -> (i32, i32) {
    %c0_i32 = arith.constant 0 : i32
    %c0_i32_0 = arith.constant 0 : i32
    %c0_i32_1 = arith.constant 0 : i32
    return %c0_i32, %c0_i32_0 : i32, i32
  }
}

module attributes {stable_mosaic.version = 11 : i64} {
  func.func @_bn_relu_kernel(%arg0: i32, %arg1: memref<2048x128xf32, #tpu.memory_space<vmem>>, %arg2: memref<1x128xf32, #tpu.memory_space<vmem>>, %arg3: memref<1x128xf32, #tpu.memory_space<vmem>>, %arg4: memref<2048x128xbf16, #tpu.memory_space<vmem>>) attributes {dimension_semantics = [#tpu.dimension_semantics<parallel>], iteration_bounds = array<i64: 1>, scalar_prefetch = 0 : i64, scratch_operands = 0 : i64, tpu.core_type = #tpu.core_type<tc>, window_params = [{transform_indices = @transform_0, window_bounds = array<i64: 2048, 128>}, {pipeline_mode = #tpu.pipeline_mode<synchronous>, transform_indices = @transform_1, window_bounds = array<i64: 1, 128>}, {pipeline_mode = #tpu.pipeline_mode<synchronous>, transform_indices = @transform_2, window_bounds = array<i64: 1, 128>}, {transform_indices = @transform_3, window_bounds = array<i64: 2048, 128>}]} {
    %c0 = arith.constant 0 : index
    %c0_0 = arith.constant 0 : index
    %0 = vector.load %arg1[%c0, %c0_0] : memref<2048x128xf32, #tpu.memory_space<vmem>>, vector<2048x128xf32>
    %c0_1 = arith.constant 0 : index
    %c0_2 = arith.constant 0 : index
    %1 = vector.load %arg2[%c0_1, %c0_2] : memref<1x128xf32, #tpu.memory_space<vmem>>, vector<1x128xf32>
    %2 = vector.broadcast %1 : vector<1x128xf32> to vector<2048x128xf32>
    %3 = arith.mulf %0, %2 : vector<2048x128xf32>
    %c0_3 = arith.constant 0 : index
    %c0_4 = arith.constant 0 : index
    %4 = vector.load %arg3[%c0_3, %c0_4] : memref<1x128xf32, #tpu.memory_space<vmem>>, vector<1x128xf32>
    %5 = vector.broadcast %4 : vector<1x128xf32> to vector<2048x128xf32>
    %6 = arith.addf %3, %5 : vector<2048x128xf32>
    %cst = arith.constant 0.000000e+00 : f32
    %7 = vector.broadcast %cst : f32 to vector<2048x128xf32>
    %8 = arith.maximumf %6, %7 : vector<2048x128xf32>
    %9 = arith.truncf %8 : vector<2048x128xf32> to vector<2048x128xbf16>
    %c0_5 = arith.constant 0 : index
    %c0_6 = arith.constant 0 : index
    %10 = vector.load %arg4[%c0_5, %c0_6] : memref<2048x128xbf16, #tpu.memory_space<vmem>>, vector<2048x128xbf16>
    tpu.vector_store %arg4[%c0_5, %c0_6], %9 {strides = array<i32>} : memref<2048x128xbf16, #tpu.memory_space<vmem>>, vector<2048x128xbf16>,
    return
  }
  func.func @transform_0(%arg0: i32) -> (i32, i32) {
    %c0_i32 = arith.constant 0 : i32
    %c0_i32_0 = arith.constant 0 : i32
    return %arg0, %c0_i32 : i32, i32
  }
  func.func @transform_1(%arg0: i32) -> (i32, i32) {
    %c0_i32 = arith.constant 0 : i32
    %c0_i32_0 = arith.constant 0 : i32
    %c0_i32_1 = arith.constant 0 : i32
    return %c0_i32, %c0_i32_0 : i32, i32
  }
  func.func @transform_2(%arg0: i32) -> (i32, i32) {
    %c0_i32 = arith.constant 0 : i32
    %c0_i32_0 = arith.constant 0 : i32
    %c0_i32_1 = arith.constant 0 : i32
    return %c0_i32, %c0_i32_0 : i32, i32
  }
  func.func @transform_3(%arg0: i32) -> (i32, i32) {
    %c0_i32 = arith.constant 0 : i32
    %c0_i32_0 = arith.constant 0 : i32
    return %arg0, %c0_i32 : i32, i32
  }
}

module attributes {stable_mosaic.version = 11 : i64} {
  func.func @_matmul_tanh_kernel(%arg0: i32, %arg1: memref<2048x256xbf16, #tpu.memory_space<vmem>>, %arg2: memref<256x128xbf16, #tpu.memory_space<vmem>>, %arg3: memref<2048x128xf32, #tpu.memory_space<vmem>>) attributes {dimension_semantics = [#tpu.dimension_semantics<parallel>], iteration_bounds = array<i64: 9>, scalar_prefetch = 0 : i64, scratch_operands = 0 : i64, tpu.core_type = #tpu.core_type<tc>, window_params = [{transform_indices = @transform_0, window_bounds = array<i64: 2048, 256>}, {pipeline_mode = #tpu.pipeline_mode<synchronous>, transform_indices = @transform_1, window_bounds = array<i64: 256, 128>}, {transform_indices = @transform_2, window_bounds = array<i64: 2048, 128>}]} {
    %c0 = arith.constant 0 : index
    %c0_0 = arith.constant 0 : index
    %0 = vector.load %arg1[%c0, %c0_0] : memref<2048x256xbf16, #tpu.memory_space<vmem>>, vector<2048x256xbf16>
    %c0_1 = arith.constant 0 : index
    %c0_2 = arith.constant 0 : index
    %1 = vector.load %arg2[%c0_1, %c0_2] : memref<256x128xbf16, #tpu.memory_space<vmem>>, vector<256x128xbf16>
    %cst = arith.constant dense<0.000000e+00> : vector<2048x128xf32>
    %2 = tpu.matmul %0, %1, %cst {dimension_numbers = #tpu.dot_dimension_numbers<[1], [0], [0], [1], [0, 0, 1, 1], [], []>} : vector<2048x256xbf16>, vector<256x128xbf16>, vector<2048x128xf32> -> vector<2048x128xf32>
    %3 = math.tanh %2 : vector<2048x128xf32>
    %c0_3 = arith.constant 0 : index
    %c0_4 = arith.constant 0 : index
    %4 = vector.load %arg3[%c0_3, %c0_4] : memref<2048x128xf32, #tpu.memory_space<vmem>>, vector<2048x128xf32>
    tpu.vector_store %arg3[%c0_3, %c0_4], %3 {strides = array<i32>} : memref<2048x128xf32, #tpu.memory_space<vmem>>, vector<2048x128xf32>,
    return
  }
  func.func @transform_0(%arg0: i32) -> (i32, i32) {
    %c0_i32 = arith.constant 0 : i32
    %c0_i32_0 = arith.constant 0 : i32
    return %arg0, %c0_i32 : i32, i32
  }
  func.func @transform_1(%arg0: i32) -> (i32, i32) {
    %c0_i32 = arith.constant 0 : i32
    %c0_i32_0 = arith.constant 0 : i32
    %c0_i32_1 = arith.constant 0 : i32
    return %c0_i32, %c0_i32_0 : i32, i32
  }
  func.func @transform_2(%arg0: i32) -> (i32, i32) {
    %c0_i32 = arith.constant 0 : i32
    %c0_i32_0 = arith.constant 0 : i32
    return %arg0, %c0_i32 : i32, i32
  }
}

</mosaic_0001>

<bundles_post_ra>
// kernel: forward.10
= control target key start
LH: loop header
LB: loop body
LE: loop exit
PB: predicated region body
PF: predicated region fallthrough
CT: control target
= control target key end

     0   :  { %s107_s0 = inlined_call_operand.vmem [shape: f32[32,128], index: 0, kind: input, shape index: {}]   ;;  %s108_s1 = inlined_call_operand.vmem [shape: f32[1,128], index: 1, kind: input, shape index: {}]   ;;  %s109_s2 = inlined_call_operand.vmem [shape: f32[1,128], index: 2, kind: input, shape index: {}]   ;;  %s110_s3 = inlined_call_operand.vmem [shape: bf16[32,128], index: 3, kind: output, shape index: {}]  }
   0x1   :  { %v14_v0 = vld [vmem:[%s107_s0] sm:$0xff]  ;;  %v15_v1 = vld [vmem:[%s107_s0 + $0x8] sm:$0xff]  ;;  %v16_v4 = vld [vmem:[%s107_s0 + $0x10] sm:$0xff] }
   0x2   :  { %v61_v2 = vld [vmem:[%s108_s1] ss:$0 sm:$0xff]  ;;  %v17_v5 = vld [vmem:[%s107_s0 + $0x18] sm:$0xff] }
   0x3   :  { %v62_v3 = vld [vmem:[%s109_s2] ss:$0 sm:$0xff]  ;;  %v22_v6 = vmul.f32 %v61_v2, %v14_v0  ;;  %v23_v7 = vmul.f32 %v61_v2, %v15_v1  ;;  %v24_v8 = vmul.f32 %v61_v2, %v16_v4  ;;  %v25_v9 = vmul.f32 %v61_v2, %v17_v5 }
   0x5   :  { %v30_v10 = vadd.f32 %v62_v3, %v22_v6  ;;  %v31_v11 = vadd.f32 %v62_v3, %v23_v7  ;;  %v32_v12 = vadd.f32 %v62_v3, %v24_v8  ;;  %v33_v13 = vadd.f32 %v62_v3, %v25_v9 }
   0x7   :  { %v34_v14 = vmax.f32 %v30_v10, 0.0  ;;  %v35_v15 = vmax.f32 %v31_v11, 0.0  ;;  %v36_v16 = vmax.f32 %v32_v12, 0.0  ;;  %v37_v17 = vmax.f32 %v33_v13, 0.0 }
   0x9   :  { %v53_v18 = vpack.c.bf16 %v35_v15, %v34_v14  ;;  %v58_v19 = vpack.c.bf16 %v37_v17, %v36_v16 }
   0xb   :  { %54 = vst [vmem:[%s110_s3] sm:$0xff] %v53_v18  }
   0xc   :  { %60 = vst [vmem:[%s110_s3 + $0x8] sm:$0xff] %v58_v19  }

// kernel: forward.9
= control target key start
LH: loop header
LB: loop body
LE: loop exit
PB: predicated region body
PF: predicated region fallthrough
CT: control target
= control target key end

     0   :  { %10 = vsyncpa [#allocation3], 0  ;;  %s417_s18 = smov [#allocation2]   ;;  %s418_s20 = smov 64   ;;  %s503_s0 = inlined_call_operand.vmem [shape: bf16[32,256], index: 0, kind: input, shape index: {}]   ;;  %s504_s1 = inlined_call_operand.hbm [shape: bf16[256,128], index: 1, kind: input, shape index: {}]   ;;  %s505_s2 = inlined_call_operand.vmem [shape: f32[32,128], index: 2, kind: output, shape index: {0}]   ;;  %s506_s3 = inlined_call_operand.vmem [shape: f32[1,128], index: 3, kind: output, shape index: {1}]   ;;  %s507_s4 = inlined_call_operand.vmem [shape: f32[1,128], index: 4, kind: output, shape index: {2}]  }
   0x1   :  { %s17_s17 = sshll.u32 %s504_s1, 4  ;;  %s19_s19 = sshll.u32 %s417_s18, 4  ;;  %s18_s17 = int_to_ptr.hbm [resolvable:$true] %s17_s17  ;;  %s20_s19 = int_to_ptr.vmem [resolvable:$true] %s19_s19 }
   0x2   :  { %s419_s21 = smov 4  }
   0x3   :  { %25 = dma.hbm_to_vmem [thread:$0]  %s18_s17, 2048, %s20_s19, [#allocation3], %s418_s20, %s418_s20, %s419_s21  }
   0x4   :  { %415 = dma.done.wait [#allocation3], 2048  }
   0x5   :  { %416 = vsyncadd [#allocation3], 4294965248  ;;  %v362_v0 = vld [vmem:[#allocation2 + $0x38] sm:$0xff]  ;;  %v361_v2 = vld [vmem:[#allocation2 + $0x30] sm:$0xff]  ;;  %v420_v28 = vmov 0.0  }
   0x6   :  { %v370_v1 = vld [vmem:[#allocation2 + $0x78] sm:$0xff]  ;;  %182 = vmatpush.bf16.msra.mxu0 %v362_v0  ;;  %371 = vmatpush.bf16.msra.mxu2 %v362_v0  ;;  %v369_v3 = vld [vmem:[#allocation2 + $0x70] sm:$0xff]  ;;  %v360_v4 = vld [vmem:[#allocation2 + $0x28] sm:$0xff]  ;;  %228 = vst [vmem:[%s506_s3] sm:$0x1] %v420_v28 }
   0x7   :  { %201 = vmatpush.bf16.msra.mxu1 %v370_v1  ;;  %379 = vmatpush.bf16.msra.mxu3 %v370_v1  ;;  %v368_v5 = vld [vmem:[#allocation2 + $0x68] sm:$0xff]  ;;  %v359_v6 = vld [vmem:[#allocation2 + $0x20] sm:$0xff]  ;;  %v358_v8 = vld [vmem:[#allocation2 + $0x18] sm:$0xff]  ;;  %229 = vst [vmem:[%s507_s4] sm:$0x1] %v420_v28 }
   0x8   :  { %v367_v7 = vld [vmem:[#allocation2 + $0x60] sm:$0xff]  ;;  %v366_v9 = vld [vmem:[#allocation2 + $0x58] sm:$0xff]  ;;  %v357_v10 = vld [vmem:[#allocation2 + $0x10] sm:$0xff] }
   0x9   :  { %v365_v11 = vld [vmem:[#allocation2 + $0x50] sm:$0xff]  ;;  %v356_v12 = vld [vmem:[#allocation2 + $0x8] sm:$0xff]  ;;  %v355_v14 = vld [vmem:[#allocation2] sm:$0xff] }
   0xa   :  { %183 = vmatpush.bf16.msra.mxu0 %v361_v2  ;;  %372 = vmatpush.bf16.msra.mxu2 %v361_v2  ;;  %v364_v13 = vld [vmem:[#allocation2 + $0x48] sm:$0xff]  ;;  %v363_v15 = vld [vmem:[#allocation2 + $0x40] sm:$0xff]  ;;  %v281_v18 = vld [vmem:[%s503_s0 + $0x10] sm:$0xf] }
   0xb   :  { %202 = vmatpush.bf16.msra.mxu1 %v369_v3  ;;  %380 = vmatpush.bf16.msra.mxu3 %v369_v3  ;;  %v273_v16 = vld [vmem:[%s503_s0] sm:$0xf]  ;;  %v352_v17 = vld [vmem:[%s503_s0 + $0x4] sm:$0xf0]  ;;  %v354_v19 = vld [vmem:[%s503_s0 + $0x14] sm:$0xf0] }
   0xc   :  { %v351_v20 = vld [vmem:[%s503_s0 + $0x4] sm:$0xf]  ;;  %v275_v21 = vld [vmem:[%s503_s0 + $0x8] sm:$0xf0]  ;;  %v353_v22 = vld [vmem:[%s503_s0 + $0x14] sm:$0xf]  ;;  %v274_v24 = vor.u32 %v352_v17, %v273_v16  ;;  %v282_v25 = vor.u32 %v354_v19, %v281_v18 }
   0xd   :  { %v283_v23 = vld [vmem:[%s503_s0 + $0x18] sm:$0xf0]  ;;  %v278_v26 = vor.u32 %v351_v20, %v275_v21  ;;  %v230_v60 = vld [vmem:[%s506_s3] sm:$0x1] }
   0xe   :  { %184 = vmatpush.bf16.msra.mxu0 %v360_v4  ;;  %373 = vmatpush.bf16.msra.mxu2 %v360_v4  ;;  %v286_v27 = vor.u32 %v353_v22, %v283_v23  ;;  %v242_v63 = vld [vmem:[%s507_s4] sm:$0x1] }
   0xf   :  { %203 = vmatpush.bf16.msra.mxu1 %v368_v5  ;;  %381 = vmatpush.bf16.msra.mxu3 %v368_v5 }
  0x12   :  { %185 = vmatpush.bf16.msra.mxu0 %v359_v6  ;;  %374 = vmatpush.bf16.msra.mxu2 %v359_v6 }
  0x13   :  { %204 = vmatpush.bf16.msra.mxu1 %v367_v7  ;;  %382 = vmatpush.bf16.msra.mxu3 %v367_v7 }
  0x16   :  { %186 = vmatpush.bf16.msra.mxu0 %v358_v8  ;;  %375 = vmatpush.bf16.msra.mxu2 %v358_v8 }
  0x17   :  { %205 = vmatpush.bf16.msra.mxu1 %v366_v9  ;;  %383 = vmatpush.bf16.msra.mxu3 %v366_v9 }
  0x1a   :  { %187 = vmatpush.bf16.msra.mxu0 %v357_v10  ;;  %376 = vmatpush.bf16.msra.mxu2 %v357_v10 }
  0x1b   :  { %206 = vmatpush.bf16.msra.mxu1 %v365_v11  ;;  %384 = vmatpush.bf16.msra.mxu3 %v365_v11 }
  0x1e   :  { %188 = vmatpush.bf16.msra.mxu0 %v356_v12  ;;  %377 = vmatpush.bf16.msra.mxu2 %v356_v12 }
  0x1f   :  { %207 = vmatpush.bf16.msra.mxu1 %v364_v13  ;;  %385 = vmatpush.bf16.msra.mxu3 %v364_v13 }
  0x22   :  { %189 = vmatpush.bf16.msra.mxu0 %v355_v14  ;;  %378 = vmatpush.bf16.msra.mxu2 %v355_v14 }
  0x23   :  { %208 = vmatpush.bf16.msra.mxu1 %v363_v15  ;;  %386 = vmatpush.bf16.msra.mxu3 %v363_v15 }
  0x25   :  { %190 = vmatmul.bf16.vlgmr.msra.gmra.mxu0 %v274_v24  ;;  %195 = vmatmul.bf16.vlgmr.msra.gmra.mxu2 %v282_v25 }
  0x26   :  { %209 = vmatmul.bf16.vlgmr.msra.gmra.mxu1 %v278_v26  ;;  %214 = vmatmul.bf16.vlgmr.msra.gmra.mxu3 %v286_v27 }
  0xa2   :  { %v191_v29 = vpop.f32.mrf.mxu0 }
  0xa3   :  { %v210_v30 = vpop.f32.mrf.mxu1 }
  0xa4   :  { %v211_v31 = vadd.f32 %v210_v30, %v191_v29 }
  0xa6   :  { %220 = vst [vmem:[%s505_s2] sm:$0xff] %v211_v31  ;;  %v243_v38 = vmul.f32 %v211_v31, %v211_v31 }
  0xa8   :  { %v196_v32 = vpop.f32.mrf.mxu2 }
  0xa9   :  { %v215_v33 = vpop.f32.mrf.mxu3 }
  0xaa   :  { %v216_v34 = vadd.f32 %v215_v33, %v196_v32  ;;  %v193_v35 = vpop.f32.mrf.mxu0 }
  0xab   :  { %v212_v36 = vpop.f32.mrf.mxu1 }
  0xac   :  { %222 = vst [vmem:[%s505_s2 + $0x10] sm:$0xff] %v216_v34  ;;  %v213_v37 = vadd.f32 %v212_v36, %v193_v35  ;;  %v245_v44 = vmul.f32 %v216_v34, %v216_v34 }
  0xae   :  { %221 = vst [vmem:[%s505_s2 + $0x8] sm:$0xff] %v213_v37  ;;  %v231_v39 = vadd.f32 %v213_v37, %v211_v31  ;;  %v244_v40 = vmul.f32 %v213_v37, %v213_v37 }
  0xb0   :  { %v247_v41 = vadd.f32 %v244_v40, %v243_v38  ;;  %v198_v42 = vpop.f32.mrf.mxu2  ;;  %v232_v46 = vadd.f32 %v231_v39, %v216_v34 }
  0xb1   :  { %v217_v43 = vpop.f32.mrf.mxu3 }
  0xb2   :  { %v218_v45 = vadd.f32 %v217_v43, %v198_v42  ;;  %v248_v49 = vadd.f32 %v247_v41, %v245_v44 }
  0xb4   :  { %223 = vst [vmem:[%s505_s2 + $0x18] sm:$0xff] %v218_v45  ;;  %v233_v47 = vadd.f32 %v232_v46, %v218_v45  ;;  %v246_v48 = vmul.f32 %v218_v45, %v218_v45 }
  0xb6   :  { %v234_v50 = vrot.slane %v233_v47, 4  ;;  %v249_v51 = vadd.f32 %v248_v49, %v246_v48 }
  0xb8   :  { %v235_v52 = vadd.f32 %v234_v50, %v233_v47  ;;  %v250_v53 = vrot.slane %v249_v51, 4 }
  0xba   :  { %v236_v54 = vrot.slane %v235_v52, 2  ;;  %v251_v55 = vadd.f32 %v250_v53, %v249_v51 }
  0xbc   :  { %v237_v56 = vadd.f32 %v236_v54, %v235_v52  ;;  %v252_v57 = vrot.slane %v251_v55, 2 }
  0xbe   :  { %v238_v58 = vrot.slane %v237_v56, 1  ;;  %v253_v59 = vadd.f32 %v252_v57, %v251_v55 }
  0xc0   :  { %v239_v61 = vadd.f32 %v238_v58, %v237_v56  ;;  %v254_v62 = vrot.slane %v253_v59, 1 }
  0xc2   :  { %v240_v0 = vadd.f32 %v239_v61, %v230_v60  ;;  %v255_v1 = vadd.f32 %v254_v62, %v253_v59 }
  0xc4   :  { %241 = vst [vmem:[%s506_s3] sm:$0x1] %v240_v0  ;;  %v256_v2 = vadd.f32 %v255_v1, %v242_v63 }
  0xc6   :  { %257 = vst [vmem:[%s507_s4] sm:$0x1] %v256_v2 }
  0xc7   :  { %270 = vsyncpa [#allocation3], 1 }

// kernel: forward.12
= control target key start
LH: loop header
LB: loop body
LE: loop exit
PB: predicated region body
PF: predicated region fallthrough
CT: control target
= control target key end

     0   :  { %s287_s0 = inlined_call_operand.vmem [shape: f32[128,128], index: 0, kind: input, shape index: {}]   ;;  %s288_s1 = inlined_call_operand.vmem [shape: f32[1,128], index: 1, kind: input, shape index: {}]   ;;  %s289_s2 = inlined_call_operand.vmem [shape: f32[1,128], index: 2, kind: input, shape index: {}]   ;;  %s290_s3 = inlined_call_operand.vmem [shape: bf16[128,128], index: 3, kind: output, shape index: {}]  }
   0x1   :  { %v14_v0 = vld [vmem:[%s287_s0] sm:$0xff]  ;;  %v15_v1 = vld [vmem:[%s287_s0 + $0x8] sm:$0xff]  ;;  %v16_v4 = vld [vmem:[%s287_s0 + $0x10] sm:$0xff] }
   0x2   :  { %v169_v2 = vld [vmem:[%s288_s1] ss:$0 sm:$0xff]  ;;  %v17_v5 = vld [vmem:[%s287_s0 + $0x18] sm:$0xff]  ;;  %v19_v11 = vld [vmem:[%s287_s0 + $0x28] sm:$0xff] }
   0x3   :  { %v203_v3 = vld [vmem:[%s289_s2] ss:$0 sm:$0xff]  ;;  %v34_v7 = vmul.f32 %v169_v2, %v14_v0  ;;  %v35_v8 = vmul.f32 %v169_v2, %v15_v1  ;;  %v36_v9 = vmul.f32 %v169_v2, %v16_v4  ;;  %v37_v10 = vmul.f32 %v169_v2, %v17_v5  ;;  %v20_v12 = vld [vmem:[%s287_s0 + $0x30] sm:$0xff]  ;;  %v21_v13 = vld [vmem:[%s287_s0 + $0x38] sm:$0xff] }
   0x4   :  { %v18_v6 = vld [vmem:[%s287_s0 + $0x20] sm:$0xff]  ;;  %v39_v15 = vmul.f32 %v169_v2, %v19_v11  ;;  %v40_v16 = vmul.f32 %v169_v2, %v20_v12  ;;  %v41_v17 = vmul.f32 %v169_v2, %v21_v13  ;;  %v23_v27 = vld [vmem:[%s287_s0 + $0x48] sm:$0xff]  ;;  %v24_v32 = vld [vmem:[%s287_s0 + $0x50] sm:$0xff] }
   0x5   :  { %v38_v14 = vmul.f32 %v169_v2, %v18_v6  ;;  %v54_v18 = vadd.f32 %v203_v3, %v34_v7  ;;  %v55_v19 = vadd.f32 %v203_v3, %v35_v8  ;;  %v56_v20 = vadd.f32 %v203_v3, %v36_v9  ;;  %v22_v26 = vld [vmem:[%s287_s0 + $0x40] sm:$0xff]  ;;  %v25_v33 = vld [vmem:[%s287_s0 + $0x58] sm:$0xff]  ;;  %v27_v39 = vld [vmem:[%s287_s0 + $0x68] sm:$0xff] }
   0x6   :  { %v57_v21 = vadd.f32 %v203_v3, %v37_v10  ;;  %v59_v23 = vadd.f32 %v203_v3, %v39_v15  ;;  %v60_v24 = vadd.f32 %v203_v3, %v40_v16  ;;  %v61_v25 = vadd.f32 %v203_v3, %v41_v17  ;;  %v26_v38 = vld [vmem:[%s287_s0 + $0x60] sm:$0xff]  ;;  %v28_v44 = vld [vmem:[%s287_s0 + $0x70] sm:$0xff]  ;;  %v29_v45 = vld [vmem:[%s287_s0 + $0x78] sm:$0xff] }
   0x7   :  { %v58_v22 = vadd.f32 %v203_v3, %v38_v14  ;;  %v70_v28 = vmax.f32 %v54_v18, 0.0  ;;  %v71_v29 = vmax.f32 %v55_v19, 0.0  ;;  %v72_v30 = vmax.f32 %v56_v20, 0.0 }
   0x8   :  { %v73_v31 = vmax.f32 %v57_v21, 0.0  ;;  %v75_v35 = vmax.f32 %v59_v23, 0.0  ;;  %v76_v36 = vmax.f32 %v60_v24, 0.0  ;;  %v77_v37 = vmax.f32 %v61_v25, 0.0 }
   0x9   :  { %v74_v34 = vmax.f32 %v58_v22, 0.0  ;;  %v125_v40 = vpack.c.bf16 %v71_v29, %v70_v28  ;;  %v42_v42 = vmul.f32 %v169_v2, %v22_v26  ;;  %v43_v43 = vmul.f32 %v169_v2, %v23_v27 }
   0xa   :  { %v130_v41 = vpack.c.bf16 %v73_v31, %v72_v30  ;;  %v140_v47 = vpack.c.bf16 %v77_v37, %v76_v36  ;;  %v44_v48 = vmul.f32 %v169_v2, %v24_v32  ;;  %v45_v49 = vmul.f32 %v169_v2, %v25_v33 }
   0xb   :  { %v135_v46 = vpack.c.bf16 %v75_v35, %v74_v34  ;;  %126 = vst [vmem:[%s290_s3] sm:$0xff] %v125_v40   ;;  %v62_v50 = vadd.f32 %v203_v3, %v42_v42  ;;  %v63_v51 = vadd.f32 %v203_v3, %v43_v43  ;;  %v46_v52 = vmul.f32 %v169_v2, %v26_v38 }
   0xc   :  { %v47_v53 = vmul.f32 %v169_v2, %v27_v39  ;;  %162 = vst [vmem:[%s290_s3 + $0x8] sm:$0xff] %v130_v41   ;;  %v64_v54 = vadd.f32 %v203_v3, %v44_v48  ;;  %v65_v55 = vadd.f32 %v203_v3, %v45_v49  ;;  %v48_v56 = vmul.f32 %v169_v2, %v28_v44 }
   0xd   :  { %v49_v57 = vmul.f32 %v169_v2, %v29_v45  ;;  %163 = vst [vmem:[%s290_s3 + $0x10] sm:$0xff] %v135_v46   ;;  %v78_v58 = vmax.f32 %v62_v50, 0.0  ;;  %v79_v59 = vmax.f32 %v63_v51, 0.0  ;;  %v66_v60 = vadd.f32 %v203_v3, %v46_v52 }
   0xe   :  { %v67_v61 = vadd.f32 %v203_v3, %v47_v53  ;;  %164 = vst [vmem:[%s290_s3 + $0x18] sm:$0xff] %v140_v47   ;;  %v80_v62 = vmax.f32 %v64_v54, 0.0  ;;  %v81_v63 = vmax.f32 %v65_v55, 0.0  ;;  %v68_v0 = vadd.f32 %v203_v3, %v48_v56 }
   0xf   :  { %v69_v1 = vadd.f32 %v203_v3, %v49_v57  ;;  %v145_v2 = vpack.c.bf16 %v79_v59, %v78_v58  ;;  %v82_v4 = vmax.f32 %v66_v60, 0.0 }
  0x10   :  { %v83_v5 = vmax.f32 %v67_v61, 0.0  ;;  %v150_v6 = vpack.c.bf16 %v81_v63, %v80_v62  ;;  %v84_v7 = vmax.f32 %v68_v0, 0.0 }
  0x11   :  { %v85_v8 = vmax.f32 %v69_v1, 0.0  ;;  %165 = vst [vmem:[%s290_s3 + $0x20] sm:$0xff] %v145_v2  }
  0x12   :  { %v155_v9 = vpack.c.bf16 %v83_v5, %v82_v4  ;;  %166 = vst [vmem:[%s290_s3 + $0x28] sm:$0xff] %v150_v6  }
  0x13   :  { %v160_v10 = vpack.c.bf16 %v85_v8, %v84_v7 }
  0x14   :  { %167 = vst [vmem:[%s290_s3 + $0x30] sm:$0xff] %v155_v9  }
  0x15   :  { %168 = vst [vmem:[%s290_s3 + $0x38] sm:$0xff] %v160_v10  }

// kernel: forward.11
= control target key start
LH: loop header
LB: loop body
LE: loop exit
PB: predicated region body
PF: predicated region fallthrough
CT: control target
= control target key end

     0   :  { %10 = vsyncpa [#allocation3], 0  ;;  %s2087_s18 = smov [#allocation2]   ;;  %s2088_s20 = smov 64   ;;  %s2617_s0 = inlined_call_operand.vmem [shape: bf16[128,1024], index: 0, kind: input, shape index: {}]   ;;  %s2618_s1 = inlined_call_operand.hbm [shape: bf16[1024,128], index: 1, kind: input, shape index: {}]   ;;  %s2619_s2 = inlined_call_operand.vmem [shape: f32[128,128], index: 2, kind: output, shape index: {0}]   ;;  %s2620_s3 = inlined_call_operand.vmem [shape: f32[1,128], index: 3, kind: output, shape index: {1}]   ;;  %s2621_s4 = inlined_call_operand.vmem [shape: f32[1,128], index: 4, kind: output, shape index: {2}]  }
   0x1   :  { %s17_s17 = sshll.u32 %s2618_s1, 4  ;;  %s19_s19 = sshll.u32 %s2087_s18, 4  ;;  %s18_s17 = int_to_ptr.hbm [resolvable:$true] %s17_s17  ;;  %s20_s19 = int_to_ptr.vmem [resolvable:$true] %s19_s19 }
   0x2   :  { %s2089_s21 = smov 4  }
   0x3   :  { %25 = dma.hbm_to_vmem [thread:$0]  %s18_s17, 8192, %s20_s19, [#allocation3], %s2088_s20, %s2088_s20, %s2089_s21  }
   0x4   :  { %2085 = dma.done.wait [#allocation3], 8192  }
   0x5   :  { %2086 = vsyncadd [#allocation3], 4294959104  ;;  %v2000_v0 = vld [vmem:[#allocation2 + $0x38] sm:$0xff]  ;;  %v1999_v4 = vld [vmem:[#allocation2 + $0x30] sm:$0xff] }
   0x6   :  { %v2008_v1 = vld [vmem:[#allocation2 + $0x78] sm:$0xff]  ;;  %926 = vmatpush.bf16.msra.mxu0 %v2000_v0  ;;  %v2007_v5 = vld [vmem:[#allocation2 + $0x70] sm:$0xff]  ;;  %v1998_v8 = vld [vmem:[#allocation2 + $0x28] sm:$0xff] }
   0x7   :  { %v2016_v2 = vld [vmem:[#allocation2 + $0xb8] sm:$0xff]  ;;  %975 = vmatpush.bf16.msra.mxu1 %v2008_v1  ;;  %v2015_v6 = vld [vmem:[#allocation2 + $0xb0] sm:$0xff]  ;;  %v2006_v9 = vld [vmem:[#allocation2 + $0x68] sm:$0xff] }
   0x8   :  { %v2024_v3 = vld [vmem:[#allocation2 + $0xf8] sm:$0xff]  ;;  %1024 = vmatpush.bf16.msra.mxu2 %v2016_v2  ;;  %v2023_v7 = vld [vmem:[#allocation2 + $0xf0] sm:$0xff]  ;;  %v2014_v10 = vld [vmem:[#allocation2 + $0xa8] sm:$0xff] }
   0x9   :  { %1073 = vmatpush.bf16.msra.mxu3 %v2024_v3  ;;  %v2022_v11 = vld [vmem:[#allocation2 + $0xe8] sm:$0xff]  ;;  %v1997_v12 = vld [vmem:[#allocation2 + $0x20] sm:$0xff]  ;;  %v1996_v16 = vld [vmem:[#allocation2 + $0x18] sm:$0xff] }
   0xa   :  { %927 = vmatpush.bf16.msra.mxu0 %v1999_v4  ;;  %v2005_v13 = vld [vmem:[#allocation2 + $0x60] sm:$0xff]  ;;  %v2004_v17 = vld [vmem:[#allocation2 + $0x58] sm:$0xff]  ;;  %v1995_v20 = vld [vmem:[#allocation2 + $0x10] sm:$0xff] }
   0xb   :  { %976 = vmatpush.bf16.msra.mxu1 %v2007_v5  ;;  %v2013_v14 = vld [vmem:[#allocation2 + $0xa0] sm:$0xff]  ;;  %v2012_v18 = vld [vmem:[#allocation2 + $0x98] sm:$0xff]  ;;  %v2003_v21 = vld [vmem:[#allocation2 + $0x50] sm:$0xff] }
   0xc   :  { %1025 = vmatpush.bf16.msra.mxu2 %v2015_v6  ;;  %v2021_v15 = vld [vmem:[#allocation2 + $0xe0] sm:$0xff]  ;;  %v2020_v19 = vld [vmem:[#allocation2 + $0xd8] sm:$0xff]  ;;  %v2011_v22 = vld [vmem:[#allocation2 + $0x90] sm:$0xff] }
   0xd   :  { %1074 = vmatpush.bf16.msra.mxu3 %v2023_v7  ;;  %v2019_v23 = vld [vmem:[#allocation2 + $0xd0] sm:$0xff]  ;;  %v1994_v24 = vld [vmem:[#allocation2 + $0x8] sm:$0xff]  ;;  %v1993_v28 = vld [vmem:[#allocation2] sm:$0xff] }
   0xe   :  { %928 = vmatpush.bf16.msra.mxu0 %v1998_v8  ;;  %v2002_v25 = vld [vmem:[#allocation2 + $0x48] sm:$0xff]  ;;  %v2001_v29 = vld [vmem:[#allocation2 + $0x40] sm:$0xff]  ;;  %v2048_v40 = vld [vmem:[#allocation2 + $0x1b8] sm:$0xff] }
   0xf   :  { %977 = vmatpush.bf16.msra.mxu1 %v2006_v9  ;;  %v2010_v26 = vld [vmem:[#allocation2 + $0x88] sm:$0xff]  ;;  %v2009_v30 = vld [vmem:[#allocation2 + $0x80] sm:$0xff]  ;;  %v2032_v41 = vld [vmem:[#allocation2 + $0x138] sm:$0xff] }
  0x10   :  { %1026 = vmatpush.bf16.msra.mxu2 %v2014_v10  ;;  %v2018_v27 = vld [vmem:[#allocation2 + $0xc8] sm:$0xff]  ;;  %v2017_v31 = vld [vmem:[#allocation2 + $0xc0] sm:$0xff]  ;;  %v2056_v46 = vld [vmem:[#allocation2 + $0x1f8] sm:$0xff] }
  0x11   :  { %1075 = vmatpush.bf16.msra.mxu3 %v2022_v11  ;;  %v1419_v32 = vld [vmem:[%s2617_s0] sm:$0xf]  ;;  %v1929_v34 = vld [vmem:[%s2617_s0 + $0x4] sm:$0xf]  ;;  %v1427_v36 = vld [vmem:[%s2617_s0 + $0x8] sm:$0xf] }
  0x12   :  { %929 = vmatpush.bf16.msra.mxu0 %v1997_v12  ;;  %v1933_v33 = vld [vmem:[%s2617_s0 + $0x1c] sm:$0xf0]  ;;  %v1421_v35 = vld [vmem:[%s2617_s0 + $0x20] sm:$0xf0]  ;;  %v1934_v37 = vld [vmem:[%s2617_s0 + $0x24] sm:$0xf0] }
  0x13   :  { %978 = vmatpush.bf16.msra.mxu1 %v2005_v13  ;;  %v1930_v38 = vld [vmem:[%s2617_s0 + $0xc] sm:$0xf]  ;;  %v1420_v42 = vor.u32 %v1933_v33, %v1419_v32  ;;  %v1424_v43 = vor.u32 %v1929_v34, %v1421_v35  ;;  %v1428_v44 = vor.u32 %v1934_v37, %v1427_v36  ;;  %v2040_v47 = vld [vmem:[#allocation2 + $0x178] sm:$0xff]  ;;  %v2047_v48 = vld [vmem:[#allocation2 + $0x1b0] sm:$0xff] }
  0x14   :  { %1027 = vmatpush.bf16.msra.mxu2 %v2013_v14  ;;  %v1429_v39 = vld [vmem:[%s2617_s0 + $0x28] sm:$0xf0]  ;;  %v2031_v49 = vld [vmem:[#allocation2 + $0x130] sm:$0xff]  ;;  %v1451_v56 = vld [vmem:[%s2617_s0 + $0x40] sm:$0xf] }
  0x15   :  { %1076 = vmatpush.bf16.msra.mxu3 %v2021_v15  ;;  %v1432_v45 = vor.u32 %v1930_v38, %v1429_v39  ;;  %v2055_v50 = vld [vmem:[#allocation2 + $0x1f0] sm:$0xff]  ;;  %v2046_v52 = vld [vmem:[#allocation2 + $0x1a8] sm:$0xff]  ;;  %v1941_v57 = vld [vmem:[%s2617_s0 + $0x5c] sm:$0xf0] }
  0x16   :  { %930 = vmatpush.bf16.msra.mxu0 %v1996_v16  ;;  %v2039_v51 = vld [vmem:[#allocation2 + $0x170] sm:$0xff]  ;;  %v2030_v53 = vld [vmem:[#allocation2 + $0x128] sm:$0xff]  ;;  %v1937_v58 = vld [vmem:[%s2617_s0 + $0x44] sm:$0xf]  ;;  %v1452_v0 = vor.u32 %v1941_v57, %v1451_v56 }
  0x17   :  { %979 = vmatpush.bf16.msra.mxu1 %v2004_v17  ;;  %v2054_v54 = vld [vmem:[#allocation2 + $0x1e8] sm:$0xff]  ;;  %v1453_v59 = vld [vmem:[%s2617_s0 + $0x60] sm:$0xf0]  ;;  %v1483_v8 = vld [vmem:[%s2617_s0 + $0x80] sm:$0xf] }
  0x18   :  { %1028 = vmatpush.bf16.msra.mxu2 %v2012_v18  ;;  %v2038_v55 = vld [vmem:[#allocation2 + $0x168] sm:$0xff]  ;;  %v1456_v1 = vor.u32 %v1937_v58, %v1453_v59  ;;  %v2045_v4 = vld [vmem:[#allocation2 + $0x1a0] sm:$0xff]  ;;  %v2043_v36 = vld [vmem:[#allocation2 + $0x190] sm:$0xff] }
  0x19   :  { %1077 = vmatpush.bf16.msra.mxu3 %v2020_v19  ;;  %v1459_v60 = vld [vmem:[%s2617_s0 + $0x48] sm:$0xf]  ;;  %v1938_v62 = vld [vmem:[%s2617_s0 + $0x4c] sm:$0xf]  ;;  %v2029_v5 = vld [vmem:[#allocation2 + $0x120] sm:$0xff] }
  0x1a   :  { %931 = vmatpush.bf16.msra.mxu0 %v1995_v20  ;;  %v1942_v61 = vld [vmem:[%s2617_s0 + $0x64] sm:$0xf0]  ;;  %v1461_v63 = vld [vmem:[%s2617_s0 + $0x68] sm:$0xf0]  ;;  %v2053_v6 = vld [vmem:[#allocation2 + $0x1e0] sm:$0xff] }
  0x1b   :  { %980 = vmatpush.bf16.msra.mxu1 %v2003_v21  ;;  %v1460_v2 = vor.u32 %v1942_v61, %v1459_v60  ;;  %v1464_v3 = vor.u32 %v1938_v62, %v1461_v63  ;;  %v2037_v7 = vld [vmem:[#allocation2 + $0x160] sm:$0xff]  ;;  %v1491_v12 = vld [vmem:[%s2617_s0 + $0x88] sm:$0xf]  ;;  %v1946_v14 = vld [vmem:[%s2617_s0 + $0x8c] sm:$0xf] }
  0x1c   :  { %1029 = vmatpush.bf16.msra.mxu2 %v2011_v22  ;;  %v1949_v9 = vld [vmem:[%s2617_s0 + $0x9c] sm:$0xf0]  ;;  %v1945_v10 = vld [vmem:[%s2617_s0 + $0x84] sm:$0xf]  ;;  %v1950_v13 = vld [vmem:[%s2617_s0 + $0xa4] sm:$0xf0] }
  0x1d   :  { %1078 = vmatpush.bf16.msra.mxu3 %v2019_v23  ;;  %v1485_v11 = vld [vmem:[%s2617_s0 + $0xa0] sm:$0xf0]  ;;  %v1493_v15 = vld [vmem:[%s2617_s0 + $0xa8] sm:$0xf0]  ;;  %v1484_v16 = vor.u32 %v1949_v9, %v1483_v8  ;;  %v1492_v18 = vor.u32 %v1950_v13, %v1491_v12  ;;  %v2044_v20 = vld [vmem:[#allocation2 + $0x198] sm:$0xff] }
  0x1e   :  { %932 = vmatpush.bf16.msra.mxu0 %v1994_v24  ;;  %v1488_v17 = vor.u32 %v1945_v10, %v1485_v11  ;;  %v1496_v19 = vor.u32 %v1946_v14, %v1493_v15  ;;  %v2028_v21 = vld [vmem:[#allocation2 + $0x118] sm:$0xff]  ;;  %v1515_v24 = vld [vmem:[%s2617_s0 + $0xc0] sm:$0xf]  ;;  %v2027_v37 = vld [vmem:[#allocation2 + $0x110] sm:$0xff] }
  0x1f   :  { %981 = vmatpush.bf16.msra.mxu1 %v2002_v25  ;;  %v2052_v22 = vld [vmem:[#allocation2 + $0x1d8] sm:$0xff]  ;;  %v1957_v25 = vld [vmem:[%s2617_s0 + $0xdc] sm:$0xf0]  ;;  %v2051_v38 = vld [vmem:[#allocation2 + $0x1d0] sm:$0xff] }
  0x20   :  { %1030 = vmatpush.bf16.msra.mxu2 %v2010_v26  ;;  %v2036_v23 = vld [vmem:[#allocation2 + $0x158] sm:$0xff]  ;;  %v1953_v26 = vld [vmem:[%s2617_s0 + $0xc4] sm:$0xf]  ;;  %v1516_v32 = vor.u32 %v1957_v25, %v1515_v24  ;;  %v2035_v39 = vld [vmem:[#allocation2 + $0x150] sm:$0xff] }
  0x21   :  { %1079 = vmatpush.bf16.msra.mxu3 %v2018_v27  ;;  %v1517_v27 = vld [vmem:[%s2617_s0 + $0xe0] sm:$0xf0]  ;;  %v1579_v56 = vld [vmem:[%s2617_s0 + $0x140] sm:$0xf]  ;;  %v1587_v60 = vld [vmem:[%s2617_s0 + $0x148] sm:$0xf] }
  0x22   :  { %933 = vmatpush.bf16.msra.mxu0 %v1993_v28  ;;  %v1523_v28 = vld [vmem:[%s2617_s0 + $0xc8] sm:$0xf]  ;;  %v1520_v33 = vor.u32 %v1953_v26, %v1517_v27  ;;  %v1973_v57 = vld [vmem:[%s2617_s0 + $0x15c] sm:$0xf0]  ;;  %v1969_v58 = vld [vmem:[%s2617_s0 + $0x144] sm:$0xf] }
  0x23   :  { %982 = vmatpush.bf16.msra.mxu1 %v2001_v29  ;;  %v1958_v29 = vld [vmem:[%s2617_s0 + $0xe4] sm:$0xf0]  ;;  %v1581_v59 = vld [vmem:[%s2617_s0 + $0x160] sm:$0xf0]  ;;  %v1970_v62 = vld [vmem:[%s2617_s0 + $0x14c] sm:$0xf] }
  0x24   :  { %1031 = vmatpush.bf16.msra.mxu2 %v2009_v30  ;;  %v1954_v30 = vld [vmem:[%s2617_s0 + $0xcc] sm:$0xf]  ;;  %v1524_v34 = vor.u32 %v1958_v29, %v1523_v28  ;;  %v1974_v61 = vld [vmem:[%s2617_s0 + $0x164] sm:$0xf0]  ;;  %v1611_v8 = vld [vmem:[%s2617_s0 + $0x180] sm:$0xf] }
  0x25   :  { %1080 = vmatpush.bf16.msra.mxu3 %v2017_v31  ;;  %934 = vmatmul.bf16.vlgmr.msra.gmra.mxu0 %v1420_v42  ;;  %v1525_v31 = vld [vmem:[%s2617_s0 + $0xe8] sm:$0xf0]  ;;  %v1961_v42 = vld [vmem:[%s2617_s0 + $0x104] sm:$0xf]  ;;  %v1981_v9 = vld [vmem:[%s2617_s0 + $0x19c] sm:$0xf0] }
  0x26   :  { %1122 = vmatpush.bf16.msrb.mxu0 %v2032_v41  ;;  %983 = vmatmul.bf16.vlgmr.msra.gmra.mxu1 %v1424_v43  ;;  %v1528_v35 = vor.u32 %v1954_v30, %v1525_v31  ;;  %v1965_v41 = vld [vmem:[%s2617_s0 + $0x11c] sm:$0xf0]  ;;  %v1549_v43 = vld [vmem:[%s2617_s0 + $0x120] sm:$0xf0]  ;;  %v1589_v63 = vld [vmem:[%s2617_s0 + $0x168] sm:$0xf0] }
  0x27   :  { %1032 = vmatmul.bf16.vlgmr.msra.gmra.mxu2 %v1428_v44  ;;  %1171 = vmatpush.bf16.msrb.mxu1 %v2040_v47  ;;  %v1555_v44 = vld [vmem:[%s2617_s0 + $0x108] sm:$0xf]  ;;  %v1557_v47 = vld [vmem:[%s2617_s0 + $0x128] sm:$0xf0]  ;;  %v1977_v10 = vld [vmem:[%s2617_s0 + $0x184] sm:$0xf] }
  0x28   :  { %1220 = vmatpush.bf16.msrb.mxu2 %v2048_v40  ;;  %1081 = vmatmul.bf16.vlgmr.msra.gmra.mxu3 %v1432_v45  ;;  %v1547_v40 = vld [vmem:[%s2617_s0 + $0x100] sm:$0xf]  ;;  %v1966_v45 = vld [vmem:[%s2617_s0 + $0x124] sm:$0xf0]  ;;  %v1613_v11 = vld [vmem:[%s2617_s0 + $0x1a0] sm:$0xf0] }
  0x29   :  { %1269 = vmatpush.bf16.msrb.mxu3 %v2056_v46  ;;  %v1962_v46 = vld [vmem:[%s2617_s0 + $0x10c] sm:$0xf]  ;;  %v1619_v12 = vld [vmem:[%s2617_s0 + $0x188] sm:$0xf] }
  0x2a   :  { %1123 = vmatpush.bf16.msrb.mxu0 %v2031_v49  ;;  %v1552_v49 = vor.u32 %v1961_v42, %v1549_v43  ;;  %v1982_v13 = vld [vmem:[%s2617_s0 + $0x1a4] sm:$0xf0]  ;;  %v1978_v14 = vld [vmem:[%s2617_s0 + $0x18c] sm:$0xf] }
  0x2b   :  { %1172 = vmatpush.bf16.msrb.mxu1 %v2039_v51  ;;  %v1560_v51 = vor.u32 %v1962_v46, %v1557_v47  ;;  %v1621_v15 = vld [vmem:[%s2617_s0 + $0x1a8] sm:$0xf0]  ;;  %v1651_v24 = vld [vmem:[%s2617_s0 + $0x1c8] sm:$0xf] }
  0x2c   :  { %1221 = vmatpush.bf16.msrb.mxu2 %v2047_v48  ;;  %v1548_v48 = vor.u32 %v1965_v41, %v1547_v40  ;;  %v1990_v25 = vld [vmem:[%s2617_s0 + $0x1e4] sm:$0xf0]  ;;  %v1986_v26 = vld [vmem:[%s2617_s0 + $0x1cc] sm:$0xf] }
  0x2d   :  { %1270 = vmatpush.bf16.msrb.mxu3 %v2055_v50  ;;  %v1556_v50 = vor.u32 %v1966_v45, %v1555_v44  ;;  %v1653_v27 = vld [vmem:[%s2617_s0 + $0x1e8] sm:$0xf0]  ;;  %v1652_v30 = vor.u32 %v1990_v25, %v1651_v24 }
  0x2e   :  { %1124 = vmatpush.bf16.msrb.mxu0 %v2030_v53  ;;  %v2026_v53 = vld [vmem:[#allocation2 + $0x108] sm:$0xff]  ;;  %v1656_v31 = vor.u32 %v1986_v26, %v1653_v27 }
  0x2f   :  { %1173 = vmatpush.bf16.msrb.mxu1 %v2038_v55  ;;  %v2034_v55 = vld [vmem:[#allocation2 + $0x148] sm:$0xff] }
  0x30   :  { %1222 = vmatpush.bf16.msrb.mxu2 %v2046_v52  ;;  %v2042_v52 = vld [vmem:[#allocation2 + $0x188] sm:$0xff] }
  0x31   :  { %1271 = vmatpush.bf16.msrb.mxu3 %v2054_v54  ;;  %v2050_v54 = vld [vmem:[#allocation2 + $0x1c8] sm:$0xff] }
  0x32   :  { %1125 = vmatpush.bf16.msrb.mxu0 %v2029_v5  ;;  %v2025_v5 = vld [vmem:[#allocation2 + $0x100] sm:$0xff] }
  0x33   :  { %1174 = vmatpush.bf16.msrb.mxu1 %v2037_v7  ;;  %v2033_v7 = vld [vmem:[#allocation2 + $0x140] sm:$0xff] }
  0x34   :  { %1223 = vmatpush.bf16.msrb.mxu2 %v2045_v4  ;;  %v2041_v4 = vld [vmem:[#allocation2 + $0x180] sm:$0xff] }
  0x35   :  { %939 = vmatmul.bf16.gmra.mxu0 %v1452_v0  ;;  %1272 = vmatpush.bf16.msrb.mxu3 %v2053_v6  ;;  %v1580_v0 = vor.u32 %v1973_v57, %v1579_v56  ;;  %v2049_v6 = vld [vmem:[#allocation2 + $0x1c0] sm:$0xff]  ;;  %v1939_v56 = vld [vmem:[%s2617_s0 + $0x54] sm:$0xf] }
  0x36   :  { %988 = vmatmul.bf16.gmra.mxu1 %v1456_v1  ;;  %1126 = vmatpush.bf16.msrb.mxu0 %v2028_v21  ;;  %v1584_v1 = vor.u32 %v1969_v58, %v1581_v59  ;;  %v1989_v21 = vld [vmem:[%s2617_s0 + $0x1dc] sm:$0xf0]  ;;  %v1469_v57 = vld [vmem:[%s2617_s0 + $0x70] sm:$0xf0]  ;;  %v1475_v58 = vld [vmem:[%s2617_s0 + $0x58] sm:$0xf] }
  0x37   :  { %1037 = vmatmul.bf16.gmra.mxu2 %v1460_v2  ;;  %1175 = vmatpush.bf16.msrb.mxu1 %v2036_v23  ;;  %v1588_v2 = vor.u32 %v1974_v61, %v1587_v60  ;;  %v1645_v23 = vld [vmem:[%s2617_s0 + $0x1e0] sm:$0xf0]  ;;  %v1944_v59 = vld [vmem:[%s2617_s0 + $0x74] sm:$0xf0]  ;;  %v1940_v60 = vld [vmem:[%s2617_s0 + $0x5c] sm:$0xf] }
  0x38   :  { %1086 = vmatmul.bf16.gmra.mxu3 %v1464_v3  ;;  %1224 = vmatpush.bf16.msrb.mxu2 %v2044_v20  ;;  %v1592_v3 = vor.u32 %v1970_v62, %v1589_v63  ;;  %v1643_v20 = vld [vmem:[%s2617_s0 + $0x1c0] sm:$0xf]  ;;  %v1477_v61 = vld [vmem:[%s2617_s0 + $0x78] sm:$0xf0] }
  0x39   :  { %1273 = vmatpush.bf16.msrb.mxu3 %v2052_v22  ;;  %v1985_v22 = vld [vmem:[%s2617_s0 + $0x1c4] sm:$0xf]  ;;  %v1644_v28 = vor.u32 %v1989_v21, %v1643_v20  ;;  %v1507_v20 = vld [vmem:[%s2617_s0 + $0x98] sm:$0xf] }
  0x3a   :  { %1127 = vmatpush.bf16.msrb.mxu0 %v2027_v37  ;;  %v1648_v29 = vor.u32 %v1985_v22, %v1645_v23  ;;  %v1936_v37 = vld [vmem:[%s2617_s0 + $0x34] sm:$0xf0]  ;;  %v1948_v22 = vld [vmem:[%s2617_s0 + $0x9c] sm:$0xf] }
  0x3b   :  { %1176 = vmatpush.bf16.msrb.mxu1 %v2035_v39  ;;  %v1445_v39 = vld [vmem:[%s2617_s0 + $0x38] sm:$0xf0]  ;;  %v1952_v21 = vld [vmem:[%s2617_s0 + $0xb4] sm:$0xf0] }
  0x3c   :  { %1225 = vmatpush.bf16.msrb.mxu2 %v2043_v36  ;;  %v1443_v36 = vld [vmem:[%s2617_s0 + $0x18] sm:$0xf]  ;;  %v1509_v23 = vld [vmem:[%s2617_s0 + $0xb8] sm:$0xf0] }
  0x3d   :  { %1274 = vmatpush.bf16.msrb.mxu3 %v2051_v38  ;;  %v1932_v38 = vld [vmem:[%s2617_s0 + $0x1c] sm:$0xf]  ;;  %v1444_v44 = vor.u32 %v1936_v37, %v1443_v36 }
  0x3e   :  { %1128 = vmatpush.bf16.msrb.mxu0 %v2026_v53  ;;  %v1448_v45 = vor.u32 %v1932_v38, %v1445_v39 }
  0x3f   :  { %1177 = vmatpush.bf16.msrb.mxu1 %v2034_v55  ;;  %v1943_v55 = vld [vmem:[%s2617_s0 + $0x6c] sm:$0xf0] }
  0x40   :  { %1226 = vmatpush.bf16.msrb.mxu2 %v2042_v52 }
  0x41   :  { %1275 = vmatpush.bf16.msrb.mxu3 %v2050_v54  ;;  %v1467_v54 = vld [vmem:[%s2617_s0 + $0x50] sm:$0xf] }
  0x42   :  { %1129 = vmatpush.bf16.msrb.mxu0 %v2025_v5  ;;  %v1476_v5 = vor.u32 %v1944_v59, %v1475_v58 }
  0x43   :  { %1178 = vmatpush.bf16.msrb.mxu1 %v2033_v7 }
  0x44   :  { %1227 = vmatpush.bf16.msrb.mxu2 %v2041_v4 }
  0x45   :  { %944 = vmatmul.bf16.gmra.mxu0 %v1484_v16  ;;  %1276 = vmatpush.bf16.msrb.mxu3 %v2049_v6  ;;  %v1612_v16 = vor.u32 %v1981_v9, %v1611_v8  ;;  %v1480_v6 = vor.u32 %v1940_v60, %v1477_v61 }
  0x46   :  { %993 = vmatmul.bf16.gmra.mxu1 %v1488_v17  ;;  %v1616_v17 = vor.u32 %v1977_v10, %v1613_v11 }
  0x47   :  { %1042 = vmatmul.bf16.gmra.mxu2 %v1492_v18  ;;  %v1620_v18 = vor.u32 %v1982_v13, %v1619_v12 }
  0x48   :  { %1091 = vmatmul.bf16.gmra.mxu3 %v1496_v19  ;;  %v1624_v19 = vor.u32 %v1978_v14, %v1621_v15 }
  0x55   :  { %949 = vmatmul.bf16.gmra.mxu0 %v1516_v32  ;;  %v1435_v32 = vld [vmem:[%s2617_s0 + $0x10] sm:$0xf] }
  0x56   :  { %998 = vmatmul.bf16.gmra.mxu1 %v1520_v33  ;;  %v1935_v33 = vld [vmem:[%s2617_s0 + $0x2c] sm:$0xf0] }
  0x57   :  { %1047 = vmatmul.bf16.gmra.mxu2 %v1524_v34  ;;  %v1931_v34 = vld [vmem:[%s2617_s0 + $0x14] sm:$0xf]  ;;  %v1436_v40 = vor.u32 %v1935_v33, %v1435_v32  ;;  %v1512_v32 = vor.u32 %v1948_v22, %v1509_v23 }
  0x58   :  { %1096 = vmatmul.bf16.gmra.mxu3 %v1528_v35  ;;  %v1437_v35 = vld [vmem:[%s2617_s0 + $0x30] sm:$0xf0] }
  0x59   :  { %v1440_v41 = vor.u32 %v1931_v34, %v1437_v35 }
  0x65   :  { %954 = vmatmul.bf16.gmra.mxu0 %v1548_v48 }
  0x66   :  { %1003 = vmatmul.bf16.gmra.mxu1 %v1552_v49 }
  0x67   :  { %1052 = vmatmul.bf16.gmra.mxu2 %v1556_v50 }
  0x68   :  { %1101 = vmatmul.bf16.gmra.mxu3 %v1560_v51 }
  0x75   :  { %959 = vmatmul.bf16.gmra.mxu0 %v1580_v0  ;;  %v1468_v0 = vor.u32 %v1943_v55, %v1467_v54 }
  0x76   :  { %1008 = vmatmul.bf16.gmra.mxu1 %v1584_v1  ;;  %v1472_v1 = vor.u32 %v1939_v56, %v1469_v57 }
  0x77   :  { %1057 = vmatmul.bf16.gmra.mxu2 %v1588_v2 }
  0x78   :  { %1106 = vmatmul.bf16.gmra.mxu3 %v1592_v3 }
  0x85   :  { %964 = vmatmul.bf16.gmra.mxu0 %v1612_v16  ;;  %v1499_v16 = vld [vmem:[%s2617_s0 + $0x90] sm:$0xf] }
  0x86   :  { %1013 = vmatmul.bf16.gmra.mxu1 %v1616_v17  ;;  %v1951_v17 = vld [vmem:[%s2617_s0 + $0xac] sm:$0xf0] }
  0x87   :  { %1062 = vmatmul.bf16.gmra.mxu2 %v1620_v18  ;;  %v1947_v18 = vld [vmem:[%s2617_s0 + $0x94] sm:$0xf]  ;;  %v1500_v26 = vor.u32 %v1951_v17, %v1499_v16 }
  0x88   :  { %1111 = vmatmul.bf16.gmra.mxu3 %v1624_v19  ;;  %v1501_v19 = vld [vmem:[%s2617_s0 + $0xb0] sm:$0xf0] }
  0x89   :  { %v1504_v27 = vor.u32 %v1947_v18, %v1501_v19 }
  0x95   :  { %969 = vmatmul.bf16.gmra.mxu0 %v1644_v28 }
  0x96   :  { %1018 = vmatmul.bf16.gmra.mxu1 %v1648_v29 }
  0x97   :  { %1067 = vmatmul.bf16.gmra.mxu2 %v1652_v30 }
  0x98   :  { %1116 = vmatmul.bf16.gmra.mxu3 %v1656_v31  ;;  %v1508_v31 = vor.u32 %v1952_v21, %v1507_v20 }
  0xa2   :  { %v935_v42 = vpop.f32.mrf.mxu0 }
  0xa3   :  { %v984_v43 = vpop.f32.mrf.mxu1 }
  0xa4   :  { %v985_v46 = vadd.f32 %v984_v43, %v935_v42  ;;  %v1531_v42 = vld [vmem:[%s2617_s0 + $0xd0] sm:$0xf] }
  0xa5   :  { %1130 = vmatmul.bf16.vlgmr.msrb.gmra.mxu0 %v1436_v40  ;;  %v1959_v43 = vld [vmem:[%s2617_s0 + $0xec] sm:$0xf0] }
  0xa6   :  { %1179 = vmatmul.bf16.vlgmr.msrb.gmra.mxu1 %v1440_v41 }
  0xa7   :  { %1228 = vmatmul.bf16.vlgmr.msrb.gmra.mxu2 %v1444_v44  ;;  %v1955_v44 = vld [vmem:[%s2617_s0 + $0xd4] sm:$0xf] }
  0xa8   :  { %1277 = vmatmul.bf16.vlgmr.msrb.gmra.mxu3 %v1448_v45  ;;  %v1533_v45 = vld [vmem:[%s2617_s0 + $0xf0] sm:$0xf0] }
  0xa9   :  { %v1536_v54 = vor.u32 %v1955_v44, %v1533_v45 }
  0xaa   :  { %v1033_v47 = vpop.f32.mrf.mxu2  ;;  %v937_v50 = vpop.f32.mrf.mxu0 }
  0xab   :  { %v1082_v48 = vpop.f32.mrf.mxu3  ;;  %v1034_v49 = vadd.f32 %v1033_v47, %v985_v46  ;;  %v986_v51 = vpop.f32.mrf.mxu1  ;;  %v1539_v46 = vld [vmem:[%s2617_s0 + $0xd8] sm:$0xf] }
  0xac   :  { %v987_v52 = vadd.f32 %v986_v51, %v937_v50  ;;  %v1960_v47 = vld [vmem:[%s2617_s0 + $0xf4] sm:$0xf0] }
  0xad   :  { %v2335_v53 = vadd.f32 %v1082_v48, %v1034_v49  ;;  %v1956_v48 = vld [vmem:[%s2617_s0 + $0xdc] sm:$0xf]  ;;  %v1540_v58 = vor.u32 %v1960_v47, %v1539_v46 }
  0xae   :  { %v1541_v49 = vld [vmem:[%s2617_s0 + $0xf8] sm:$0xf0] }
  0xaf   :  { %v1544_v59 = vor.u32 %v1956_v48, %v1541_v49 }
  0xb2   :  { %v1035_v62 = vpop.f32.mrf.mxu2  ;;  %v940_v3 = vpop.f32.mrf.mxu0 }
  0xb3   :  { %v1084_v63 = vpop.f32.mrf.mxu3  ;;  %v1036_v2 = vadd.f32 %v1035_v62, %v987_v52  ;;  %v989_v4 = vpop.f32.mrf.mxu1  ;;  %v1532_v52 = vor.u32 %v1959_v43, %v1531_v42  ;;  %v1605_v42 = vld [vmem:[%s2617_s0 + $0x178] sm:$0xf0] }
  0xb4   :  { %v990_v7 = vadd.f32 %v989_v4, %v940_v3 }
  0xb5   :  { %v2361_v8 = vadd.f32 %v1084_v63, %v1036_v2  ;;  %1135 = vmatmul.bf16.gmra.mxu0 %v1468_v0 }
  0xb6   :  { %1184 = vmatmul.bf16.gmra.mxu1 %v1472_v1 }
  0xb7   :  { %1233 = vmatmul.bf16.gmra.mxu2 %v1476_v5  ;;  %v1563_v5 = vld [vmem:[%s2617_s0 + $0x110] sm:$0xf] }
  0xb8   :  { %1282 = vmatmul.bf16.gmra.mxu3 %v1480_v6  ;;  %v1967_v6 = vld [vmem:[%s2617_s0 + $0x12c] sm:$0xf0] }
  0xb9   :  { %v1564_v17 = vor.u32 %v1967_v6, %v1563_v5  ;;  %v1984_v5 = vld [vmem:[%s2617_s0 + $0x1b4] sm:$0xf0]  ;;  %v1980_v6 = vld [vmem:[%s2617_s0 + $0x19c] sm:$0xf] }
  0xba   :  { %v1038_v9 = vpop.f32.mrf.mxu2  ;;  %v942_v12 = vpop.f32.mrf.mxu0 }
  0xbb   :  { %v1087_v10 = vpop.f32.mrf.mxu3  ;;  %v1039_v11 = vadd.f32 %v1038_v9, %v990_v7  ;;  %v991_v13 = vpop.f32.mrf.mxu1  ;;  %v1963_v7 = vld [vmem:[%s2617_s0 + $0x114] sm:$0xf] }
  0xbc   :  { %v992_v14 = vadd.f32 %v991_v13, %v942_v12  ;;  %v1565_v9 = vld [vmem:[%s2617_s0 + $0x130] sm:$0xf0]  ;;  %v1964_v12 = vld [vmem:[%s2617_s0 + $0x11c] sm:$0xf] }
  0xbd   :  { %v2363_v15 = vadd.f32 %v1087_v10, %v1039_v11  ;;  %v1571_v10 = vld [vmem:[%s2617_s0 + $0x118] sm:$0xf]  ;;  %v1573_v13 = vld [vmem:[%s2617_s0 + $0x138] sm:$0xf0]  ;;  %v1568_v18 = vor.u32 %v1963_v7, %v1565_v9 }
  0xbe   :  { %v1968_v11 = vld [vmem:[%s2617_s0 + $0x134] sm:$0xf0]  ;;  %v1576_v23 = vor.u32 %v1964_v12, %v1573_v13  ;;  %v1637_v7 = vld [vmem:[%s2617_s0 + $0x1b8] sm:$0xf0] }
  0xbf   :  { %v1572_v22 = vor.u32 %v1968_v11, %v1571_v10 }
  0xc2   :  { %v1040_v24 = vpop.f32.mrf.mxu2  ;;  %v945_v29 = vpop.f32.mrf.mxu0 }
  0xc3   :  { %v1089_v25 = vpop.f32.mrf.mxu3  ;;  %v1041_v28 = vadd.f32 %v1040_v24, %v992_v14  ;;  %v994_v30 = vpop.f32.mrf.mxu1 }
  0xc4   :  { %v995_v33 = vadd.f32 %v994_v30, %v945_v29 }
  0xc5   :  { %v2389_v34 = vadd.f32 %v1089_v25, %v1041_v28  ;;  %1140 = vmatmul.bf16.gmra.mxu0 %v1500_v26 }
  0xc6   :  { %1189 = vmatmul.bf16.gmra.mxu1 %v1504_v27 }
  0xc7   :  { %1238 = vmatmul.bf16.gmra.mxu2 %v1508_v31 }
  0xc8   :  { %1287 = vmatmul.bf16.gmra.mxu3 %v1512_v32 }
  0xca   :  { %v1043_v35 = vpop.f32.mrf.mxu2  ;;  %v947_v38 = vpop.f32.mrf.mxu0 }
  0xcb   :  { %v1092_v36 = vpop.f32.mrf.mxu3  ;;  %v1044_v37 = vadd.f32 %v1043_v35, %v995_v33  ;;  %v996_v39 = vpop.f32.mrf.mxu1  ;;  %v1595_v33 = vld [vmem:[%s2617_s0 + $0x150] sm:$0xf] }
  0xcc   :  { %v997_v40 = vadd.f32 %v996_v39, %v947_v38  ;;  %v1975_v35 = vld [vmem:[%s2617_s0 + $0x16c] sm:$0xf0]  ;;  %v1603_v38 = vld [vmem:[%s2617_s0 + $0x158] sm:$0xf] }
  0xcd   :  { %v2391_v41 = vadd.f32 %v1092_v36, %v1044_v37  ;;  %v1971_v36 = vld [vmem:[%s2617_s0 + $0x154] sm:$0xf]  ;;  %v1976_v39 = vld [vmem:[%s2617_s0 + $0x174] sm:$0xf0]  ;;  %v1596_v45 = vor.u32 %v1975_v35, %v1595_v33 }
  0xce   :  { %v1597_v37 = vld [vmem:[%s2617_s0 + $0x170] sm:$0xf0]  ;;  %v1667_v35 = vld [vmem:[%s2617_s0 + $0x1d8] sm:$0xf] }
  0xcf   :  { %v1600_v46 = vor.u32 %v1971_v36, %v1597_v37  ;;  %v1661_v33 = vld [vmem:[%s2617_s0 + $0x1f0] sm:$0xf0]  ;;  %v1992_v36 = vld [vmem:[%s2617_s0 + $0x1f4] sm:$0xf0]  ;;  %v1988_v37 = vld [vmem:[%s2617_s0 + $0x1dc] sm:$0xf] }
  0xd2   :  { %v1045_v50 = vpop.f32.mrf.mxu2  ;;  %v950_v56 = vpop.f32.mrf.mxu0 }
  0xd3   :  { %v1094_v51 = vpop.f32.mrf.mxu3  ;;  %v1046_v55 = vadd.f32 %v1045_v50, %v997_v40  ;;  %v999_v57 = vpop.f32.mrf.mxu1  ;;  %v1972_v40 = vld [vmem:[%s2617_s0 + $0x15c] sm:$0xf]  ;;  %v1604_v50 = vor.u32 %v1976_v39, %v1603_v38 }
  0xd4   :  { %v1000_v60 = vadd.f32 %v999_v57, %v950_v56  ;;  %v1669_v38 = vld [vmem:[%s2617_s0 + $0x1f8] sm:$0xf0] }
  0xd5   :  { %v2417_v61 = vadd.f32 %v1094_v51, %v1046_v55  ;;  %1145 = vmatmul.bf16.gmra.mxu0 %v1532_v52  ;;  %v1608_v51 = vor.u32 %v1972_v40, %v1605_v42 }
  0xd6   :  { %1194 = vmatmul.bf16.gmra.mxu1 %v1536_v54 }
  0xd7   :  { %1243 = vmatmul.bf16.gmra.mxu2 %v1540_v58 }
  0xd8   :  { %1292 = vmatmul.bf16.gmra.mxu3 %v1544_v59 }
  0xda   :  { %v1048_v62 = vpop.f32.mrf.mxu2  ;;  %v952_v1 = vpop.f32.mrf.mxu0 }
  0xdb   :  { %v1097_v63 = vpop.f32.mrf.mxu3  ;;  %v1049_v0 = vadd.f32 %v1048_v62, %v1000_v60  ;;  %v1001_v2 = vpop.f32.mrf.mxu1 }
  0xdc   :  { %v1002_v3 = vadd.f32 %v1001_v2, %v952_v1  ;;  %v1979_v1 = vld [vmem:[%s2617_s0 + $0x194] sm:$0xf] }
  0xdd   :  { %v2419_v4 = vadd.f32 %v1097_v63, %v1049_v0  ;;  %v1627_v63 = vld [vmem:[%s2617_s0 + $0x190] sm:$0xf]  ;;  %v1629_v2 = vld [vmem:[%s2617_s0 + $0x1b0] sm:$0xf0] }
  0xde   :  { %v1983_v0 = vld [vmem:[%s2617_s0 + $0x1ac] sm:$0xf0]  ;;  %v1632_v12 = vor.u32 %v1979_v1, %v1629_v2 }
  0xdf   :  { %v1628_v11 = vor.u32 %v1983_v0, %v1627_v63 }
  0xe2   :  { %v1050_v14 = vpop.f32.mrf.mxu2  ;;  %v955_v20 = vpop.f32.mrf.mxu0 }
  0xe3   :  { %v1099_v16 = vpop.f32.mrf.mxu3  ;;  %v1051_v19 = vadd.f32 %v1050_v14, %v1002_v3  ;;  %v1004_v21 = vpop.f32.mrf.mxu1  ;;  %v1635_v3 = vld [vmem:[%s2617_s0 + $0x198] sm:$0xf] }
  0xe4   :  { %v1005_v24 = vadd.f32 %v1004_v21, %v955_v20 }
  0xe5   :  { %v2445_v25 = vadd.f32 %v1099_v16, %v1051_v19  ;;  %1150 = vmatmul.bf16.gmra.mxu0 %v1564_v17  ;;  %v1636_v17 = vor.u32 %v1984_v5, %v1635_v3 }
  0xe6   :  { %1199 = vmatmul.bf16.gmra.mxu1 %v1568_v18  ;;  %v1640_v18 = vor.u32 %v1980_v6, %v1637_v7 }
  0xe7   :  { %1248 = vmatmul.bf16.gmra.mxu2 %v1572_v22 }
  0xe8   :  { %1297 = vmatmul.bf16.gmra.mxu3 %v1576_v23 }
  0xea   :  { %v1053_v26 = vpop.f32.mrf.mxu2  ;;  %v957_v29 = vpop.f32.mrf.mxu0 }
  0xeb   :  { %v1102_v27 = vpop.f32.mrf.mxu3  ;;  %v1054_v28 = vadd.f32 %v1053_v26, %v1005_v24  ;;  %v1006_v30 = vpop.f32.mrf.mxu1 }
  0xec   :  { %v1007_v31 = vadd.f32 %v1006_v30, %v957_v29  ;;  %v1659_v29 = vld [vmem:[%s2617_s0 + $0x1d0] sm:$0xf] }
  0xed   :  { %v2447_v32 = vadd.f32 %v1102_v27, %v1054_v28  ;;  %v1991_v30 = vld [vmem:[%s2617_s0 + $0x1ec] sm:$0xf0] }
  0xee   :  { %v1660_v42 = vor.u32 %v1991_v30, %v1659_v29 }
  0xf2   :  { %v1055_v43 = vpop.f32.mrf.mxu2  ;;  %v960_v48 = vpop.f32.mrf.mxu0 }
  0xf3   :  { %v1104_v44 = vpop.f32.mrf.mxu3  ;;  %v1056_v47 = vadd.f32 %v1055_v43, %v1007_v31  ;;  %v1009_v49 = vpop.f32.mrf.mxu1  ;;  %v1987_v31 = vld [vmem:[%s2617_s0 + $0x1d4] sm:$0xf] }
  0xf4   :  { %v1010_v52 = vadd.f32 %v1009_v49, %v960_v48  ;;  %v1664_v43 = vor.u32 %v1987_v31, %v1661_v33  ;;  %v1672_v48 = vor.u32 %v1988_v37, %v1669_v38 }
  0xf5   :  { %v2473_v54 = vadd.f32 %v1104_v44, %v1056_v47  ;;  %1155 = vmatmul.bf16.gmra.mxu0 %v1596_v45  ;;  %v1668_v47 = vor.u32 %v1992_v36, %v1667_v35 }
  0xf6   :  { %1204 = vmatmul.bf16.gmra.mxu1 %v1600_v46 }
  0xf7   :  { %1253 = vmatmul.bf16.gmra.mxu2 %v1604_v50 }
  0xf8   :  { %1302 = vmatmul.bf16.gmra.mxu3 %v1608_v51 }
  0xfa   :  { %v1058_v55 = vpop.f32.mrf.mxu2  ;;  %v962_v58 = vpop.f32.mrf.mxu0 }
  0xfb   :  { %v1107_v56 = vpop.f32.mrf.mxu3  ;;  %v1059_v57 = vadd.f32 %v1058_v55, %v1010_v52  ;;  %v1011_v59 = vpop.f32.mrf.mxu1 }
  0xfc   :  { %v1012_v60 = vadd.f32 %v1011_v59, %v962_v58 }
  0xfd   :  { %v2475_v62 = vadd.f32 %v1107_v56, %v1059_v57 }
 0x102   :  { %v1060_v9 = vpop.f32.mrf.mxu2  ;;  %v965_v14 = vpop.f32.mrf.mxu0 }
 0x103   :  { %v1109_v10 = vpop.f32.mrf.mxu3  ;;  %v1061_v13 = vadd.f32 %v1060_v9, %v1012_v60  ;;  %v1014_v16 = vpop.f32.mrf.mxu1 }
 0x104   :  { %v1015_v19 = vadd.f32 %v1014_v16, %v965_v14 }
 0x105   :  { %v2501_v20 = vadd.f32 %v1109_v10, %v1061_v13  ;;  %1160 = vmatmul.bf16.gmra.mxu0 %v1628_v11 }
 0x106   :  { %1209 = vmatmul.bf16.gmra.mxu1 %v1632_v12 }
 0x107   :  { %1258 = vmatmul.bf16.gmra.mxu2 %v1636_v17 }
 0x108   :  { %1307 = vmatmul.bf16.gmra.mxu3 %v1640_v18 }
 0x10a   :  { %v1063_v21 = vpop.f32.mrf.mxu2  ;;  %v967_v24 = vpop.f32.mrf.mxu0 }
 0x10b   :  { %v1112_v22 = vpop.f32.mrf.mxu3  ;;  %v1064_v23 = vadd.f32 %v1063_v21, %v1015_v19  ;;  %v1016_v26 = vpop.f32.mrf.mxu1 }
 0x10c   :  { %v1017_v27 = vadd.f32 %v1016_v26, %v967_v24 }
 0x10d   :  { %v2503_v28 = vadd.f32 %v1112_v22, %v1064_v23 }
 0x112   :  { %v1065_v39 = vpop.f32.mrf.mxu2  ;;  %v970_v45 = vpop.f32.mrf.mxu0 }
 0x113   :  { %v1114_v40 = vpop.f32.mrf.mxu3  ;;  %v1066_v44 = vadd.f32 %v1065_v39, %v1017_v27  ;;  %v1019_v46 = vpop.f32.mrf.mxu1 }
 0x114   :  { %v1020_v49 = vadd.f32 %v1019_v46, %v970_v45 }
 0x115   :  { %v2529_v50 = vadd.f32 %v1114_v40, %v1066_v44  ;;  %1165 = vmatmul.bf16.gmra.mxu0 %v1660_v42 }
 0x116   :  { %1214 = vmatmul.bf16.gmra.mxu1 %v1664_v43 }
 0x117   :  { %1263 = vmatmul.bf16.gmra.mxu2 %v1668_v47 }
 0x118   :  { %1312 = vmatmul.bf16.gmra.mxu3 %v1672_v48 }
 0x11a   :  { %v1068_v51 = vpop.f32.mrf.mxu2  ;;  %v972_v56 = vpop.f32.mrf.mxu0 }
 0x11b   :  { %v1117_v52 = vpop.f32.mrf.mxu3  ;;  %v1069_v55 = vadd.f32 %v1068_v51, %v1020_v49  ;;  %v1021_v57 = vpop.f32.mrf.mxu1 }
 0x11c   :  { %v1022_v58 = vadd.f32 %v1021_v57, %v972_v56 }
 0x11d   :  { %v2531_v59 = vadd.f32 %v1117_v52, %v1069_v55 }
 0x122   :  { %v1070_v60 = vpop.f32.mrf.mxu2  ;;  %v1131_v1 = vpop.f32.mrf.mxu0 }
 0x123   :  { %v1119_v63 = vpop.f32.mrf.mxu3  ;;  %v1071_v0 = vadd.f32 %v1070_v60, %v1022_v58  ;;  %v1180_v2 = vpop.f32.mrf.mxu1  ;;  %v1132_v5 = vadd.f32 %v1131_v1, %v2335_v53 }
 0x125   :  { %v2533_v3 = vadd.f32 %v1119_v63, %v1071_v0  ;;  %v1181_v6 = vadd.f32 %v1180_v2, %v1132_v5 }
 0x12a   :  { %v1229_v7 = vpop.f32.mrf.mxu2  ;;  %v1133_v11 = vpop.f32.mrf.mxu0 }
 0x12b   :  { %v1278_v9 = vpop.f32.mrf.mxu3  ;;  %v1230_v10 = vadd.f32 %v1229_v7, %v1181_v6  ;;  %v1182_v12 = vpop.f32.mrf.mxu1  ;;  %v1134_v14 = vadd.f32 %v1133_v11, %v2361_v8 }
 0x12d   :  { %v1279_v13 = vadd.f32 %v1278_v9, %v1230_v10  ;;  %v1183_v16 = vadd.f32 %v1182_v12, %v1134_v14 }
 0x12f   :  { %1318 = vst [vmem:[%s2619_s2] sm:$0xff] %v1279_v13  ;;  %v1365_v24 = vmul.f32 %v1279_v13, %v1279_v13 }
 0x132   :  { %v1231_v17 = vpop.f32.mrf.mxu2  ;;  %v1136_v21 = vpop.f32.mrf.mxu0 }
 0x133   :  { %v1280_v18 = vpop.f32.mrf.mxu3  ;;  %v1232_v19 = vadd.f32 %v1231_v17, %v1183_v16  ;;  %v1185_v22 = vpop.f32.mrf.mxu1  ;;  %v1137_v23 = vadd.f32 %v1136_v21, %v2363_v15 }
 0x135   :  { %v1281_v53 = vadd.f32 %v1280_v18, %v1232_v19  ;;  %v1186_v29 = vadd.f32 %v1185_v22, %v1137_v23 }
 0x137   :  { %1319 = vst [vmem:[%s2619_s2 + $0x8] sm:$0xff] %v1281_v53  ;;  %v1341_v26 = vadd.f32 %v1281_v53, %v1279_v13  ;;  %v1366_v8 = vmul.f32 %v1281_v53, %v1281_v53 }
 0x139   :  { %v1381_v27 = vadd.f32 %v1366_v8, %v1365_v24 }
 0x13a   :  { %v1234_v30 = vpop.f32.mrf.mxu2  ;;  %v1138_v35 = vpop.f32.mrf.mxu0 }
 0x13b   :  { %v1283_v31 = vpop.f32.mrf.mxu3  ;;  %v1235_v33 = vadd.f32 %v1234_v30, %v1186_v29  ;;  %v1187_v36 = vpop.f32.mrf.mxu1  ;;  %v1139_v38 = vadd.f32 %v1138_v35, %v2389_v34 }
 0x13d   :  { %v1284_v37 = vadd.f32 %v1283_v31, %v1235_v33  ;;  %v1188_v42 = vadd.f32 %v1187_v36, %v1139_v38 }
 0x13f   :  { %1320 = vst [vmem:[%s2619_s2 + $0x10] sm:$0xff] %v1284_v37  ;;  %v1342_v15 = vadd.f32 %v1341_v26, %v1284_v37  ;;  %v1367_v39 = vmul.f32 %v1284_v37, %v1284_v37 }
 0x141   :  { %v1382_v40 = vadd.f32 %v1381_v27, %v1367_v39 }
 0x142   :  { %v1236_v43 = vpop.f32.mrf.mxu2  ;;  %v1141_v46 = vpop.f32.mrf.mxu0 }
 0x143   :  { %v1285_v44 = vpop.f32.mrf.mxu3  ;;  %v1237_v45 = vadd.f32 %v1236_v43, %v1188_v42  ;;  %v1190_v47 = vpop.f32.mrf.mxu1  ;;  %v1142_v49 = vadd.f32 %v1141_v46, %v2391_v41 }
 0x145   :  { %v1286_v48 = vadd.f32 %v1285_v44, %v1237_v45  ;;  %v1191_v55 = vadd.f32 %v1190_v47, %v1142_v49 }
 0x147   :  { %1321 = vst [vmem:[%s2619_s2 + $0x18] sm:$0xff] %v1286_v48  ;;  %v1343_v34 = vadd.f32 %v1342_v15, %v1286_v48  ;;  %v1368_v51 = vmul.f32 %v1286_v48, %v1286_v48 }
 0x149   :  { %v1383_v52 = vadd.f32 %v1382_v40, %v1368_v51 }
 0x14a   :  { %v1239_v56 = vpop.f32.mrf.mxu2  ;;  %v1143_v60 = vpop.f32.mrf.mxu0 }
 0x14b   :  { %v1288_v57 = vpop.f32.mrf.mxu3  ;;  %v1240_v58 = vadd.f32 %v1239_v56, %v1191_v55  ;;  %v1192_v63 = vpop.f32.mrf.mxu1  ;;  %v1144_v1 = vadd.f32 %v1143_v60, %v2417_v61 }
 0x14d   :  { %v1289_v0 = vadd.f32 %v1288_v57, %v1240_v58  ;;  %v1193_v6 = vadd.f32 %v1192_v63, %v1144_v1 }
 0x14f   :  { %1322 = vst [vmem:[%s2619_s2 + $0x20] sm:$0xff] %v1289_v0  ;;  %v1344_v41 = vadd.f32 %v1343_v34, %v1289_v0  ;;  %v1369_v2 = vmul.f32 %v1289_v0, %v1289_v0 }
 0x151   :  { %v1384_v5 = vadd.f32 %v1383_v52, %v1369_v2 }
 0x152   :  { %v1241_v7 = vpop.f32.mrf.mxu2  ;;  %v1146_v11 = vpop.f32.mrf.mxu0 }
 0x153   :  { %v1290_v9 = vpop.f32.mrf.mxu3  ;;  %v1242_v10 = vadd.f32 %v1241_v7, %v1193_v6  ;;  %v1195_v12 = vpop.f32.mrf.mxu1  ;;  %v1147_v14 = vadd.f32 %v1146_v11, %v2419_v4 }
 0x155   :  { %v1291_v13 = vadd.f32 %v1290_v9, %v1242_v10  ;;  %v1196_v18 = vadd.f32 %v1195_v12, %v1147_v14 }
 0x157   :  { %1323 = vst [vmem:[%s2619_s2 + $0x28] sm:$0xff] %v1291_v13  ;;  %v1345_v61 = vadd.f32 %v1344_v41, %v1291_v13  ;;  %v1370_v16 = vmul.f32 %v1291_v13, %v1291_v13 }
 0x159   :  { %v1385_v17 = vadd.f32 %v1384_v5, %v1370_v16 }
 0x15a   :  { %v1244_v19 = vpop.f32.mrf.mxu2  ;;  %v1148_v53 = vpop.f32.mrf.mxu0 }
 0x15b   :  { %v1293_v21 = vpop.f32.mrf.mxu3  ;;  %v1245_v22 = vadd.f32 %v1244_v19, %v1196_v18  ;;  %v1197_v23 = vpop.f32.mrf.mxu1  ;;  %v1149_v26 = vadd.f32 %v1148_v53, %v2445_v25 }
 0x15d   :  { %v1294_v24 = vadd.f32 %v1293_v21, %v1245_v22  ;;  %v1198_v29 = vadd.f32 %v1197_v23, %v1149_v26  ;;  %v2090_v23 = vmov 0.0  }
 0x15e   :  { %1338 = vst [vmem:[%s2620_s3] sm:$0x1] %v2090_v23 }
 0x15f   :  { %1324 = vst [vmem:[%s2619_s2 + $0x30] sm:$0xff] %v1294_v24  ;;  %v1346_v4 = vadd.f32 %v1345_v61, %v1294_v24  ;;  %v1371_v8 = vmul.f32 %v1294_v24, %v1294_v24 }
 0x160   :  { %1339 = vst [vmem:[%s2621_s4] sm:$0x1] %v2090_v23 }
 0x161   :  { %v1386_v27 = vadd.f32 %v1385_v17, %v1371_v8 }
 0x162   :  { %v1246_v30 = vpop.f32.mrf.mxu2  ;;  %v1151_v35 = vpop.f32.mrf.mxu0 }
 0x163   :  { %v1295_v31 = vpop.f32.mrf.mxu3  ;;  %v1247_v33 = vadd.f32 %v1246_v30, %v1198_v29  ;;  %v1200_v36 = vpop.f32.mrf.mxu1  ;;  %v1152_v38 = vadd.f32 %v1151_v35, %v2447_v32 }
 0x165   :  { %v1296_v37 = vadd.f32 %v1295_v31, %v1247_v33  ;;  %v1201_v40 = vadd.f32 %v1200_v36, %v1152_v38 }
 0x167   :  { %1325 = vst [vmem:[%s2619_s2 + $0x38] sm:$0xff] %v1296_v37  ;;  %v1347_v25 = vadd.f32 %v1346_v4, %v1296_v37  ;;  %v1372_v15 = vmul.f32 %v1296_v37, %v1296_v37 }
 0x169   :  { %v1387_v39 = vadd.f32 %v1386_v27, %v1372_v15 }
 0x16a   :  { %v1249_v42 = vpop.f32.mrf.mxu2  ;;  %v1153_v45 = vpop.f32.mrf.mxu0 }
 0x16b   :  { %v1298_v43 = vpop.f32.mrf.mxu3  ;;  %v1250_v44 = vadd.f32 %v1249_v42, %v1201_v40  ;;  %v1202_v46 = vpop.f32.mrf.mxu1  ;;  %v1154_v48 = vadd.f32 %v1153_v45, %v2473_v54 }
 0x16d   :  { %v1299_v47 = vadd.f32 %v1298_v43, %v1250_v44  ;;  %v1203_v51 = vadd.f32 %v1202_v46, %v1154_v48 }
 0x16f   :  { %1326 = vst [vmem:[%s2619_s2 + $0x40] sm:$0xff] %v1299_v47  ;;  %v1348_v32 = vadd.f32 %v1347_v25, %v1299_v47  ;;  %v1373_v49 = vmul.f32 %v1299_v47, %v1299_v47 }
 0x171   :  { %v1388_v34 = vadd.f32 %v1387_v39, %v1373_v49 }
 0x172   :  { %v1251_v52 = vpop.f32.mrf.mxu2  ;;  %v1156_v57 = vpop.f32.mrf.mxu0 }
 0x173   :  { %v1300_v55 = vpop.f32.mrf.mxu3  ;;  %v1252_v56 = vadd.f32 %v1251_v52, %v1203_v51  ;;  %v1205_v58 = vpop.f32.mrf.mxu1  ;;  %v1157_v63 = vadd.f32 %v1156_v57, %v2475_v62 }
 0x175   :  { %v1301_v60 = vadd.f32 %v1300_v55, %v1252_v56  ;;  %v1206_v41 = vadd.f32 %v1205_v58, %v1157_v63 }
 0x177   :  { %1327 = vst [vmem:[%s2619_s2 + $0x48] sm:$0xff] %v1301_v60  ;;  %v1349_v54 = vadd.f32 %v1348_v32, %v1301_v60  ;;  %v1374_v0 = vmul.f32 %v1301_v60, %v1301_v60 }
 0x179   :  { %v1389_v1 = vadd.f32 %v1388_v34, %v1374_v0 }
 0x17a   :  { %v1254_v2 = vpop.f32.mrf.mxu2  ;;  %v1158_v7 = vpop.f32.mrf.mxu0 }
 0x17b   :  { %v1303_v5 = vpop.f32.mrf.mxu3  ;;  %v1255_v6 = vadd.f32 %v1254_v2, %v1206_v41  ;;  %v1207_v9 = vpop.f32.mrf.mxu1  ;;  %v1159_v11 = vadd.f32 %v1158_v7, %v2501_v20 }
 0x17d   :  { %v1304_v10 = vadd.f32 %v1303_v5, %v1255_v6  ;;  %v1208_v14 = vadd.f32 %v1207_v9, %v1159_v11 }
 0x17f   :  { %1328 = vst [vmem:[%s2619_s2 + $0x50] sm:$0xff] %v1304_v10  ;;  %v1350_v62 = vadd.f32 %v1349_v54, %v1304_v10  ;;  %v1375_v12 = vmul.f32 %v1304_v10, %v1304_v10 }
 0x181   :  { %v1390_v13 = vadd.f32 %v1389_v1, %v1375_v12  ;;  %v1340_v12 = vld [vmem:[%s2620_s3] sm:$0x1] }
 0x182   :  { %v1256_v61 = vpop.f32.mrf.mxu2  ;;  %v1161_v18 = vpop.f32.mrf.mxu0 }
 0x183   :  { %v1305_v16 = vpop.f32.mrf.mxu3  ;;  %v1257_v17 = vadd.f32 %v1256_v61, %v1208_v14  ;;  %v1210_v19 = vpop.f32.mrf.mxu1  ;;  %v1162_v22 = vadd.f32 %v1161_v18, %v2503_v28  ;;  %v1364_v61 = vld [vmem:[%s2621_s4] sm:$0x1] }
 0x185   :  { %v1306_v21 = vadd.f32 %v1305_v16, %v1257_v17  ;;  %v1211_v26 = vadd.f32 %v1210_v19, %v1162_v22 }
 0x187   :  { %1329 = vst [vmem:[%s2619_s2 + $0x58] sm:$0xff] %v1306_v21  ;;  %v1351_v20 = vadd.f32 %v1350_v62, %v1306_v21  ;;  %v1376_v53 = vmul.f32 %v1306_v21, %v1306_v21 }
 0x189   :  { %v1391_v24 = vadd.f32 %v1390_v13, %v1376_v53 }
 0x18a   :  { %v1259_v4 = vpop.f32.mrf.mxu2  ;;  %v1163_v27 = vpop.f32.mrf.mxu0 }
 0x18b   :  { %v1308_v8 = vpop.f32.mrf.mxu3  ;;  %v1260_v28 = vadd.f32 %v1259_v4, %v1211_v26  ;;  %v1212_v29 = vpop.f32.mrf.mxu1  ;;  %v1164_v31 = vadd.f32 %v1163_v27, %v2529_v50 }
 0x18d   :  { %v1309_v30 = vadd.f32 %v1308_v8, %v1260_v28  ;;  %v1213_v37 = vadd.f32 %v1212_v29, %v1164_v31 }
 0x18f   :  { %1330 = vst [vmem:[%s2619_s2 + $0x60] sm:$0xff] %v1309_v30  ;;  %v1352_v33 = vadd.f32 %v1351_v20, %v1309_v30  ;;  %v1377_v35 = vmul.f32 %v1309_v30, %v1309_v30 }
 0x191   :  { %v1392_v36 = vadd.f32 %v1391_v24, %v1377_v35 }
 0x192   :  { %v1261_v38 = vpop.f32.mrf.mxu2  ;;  %v1166_v39 = vpop.f32.mrf.mxu0 }
 0x193   :  { %v1310_v25 = vpop.f32.mrf.mxu3  ;;  %v1262_v15 = vadd.f32 %v1261_v38, %v1213_v37  ;;  %v1167_v42 = vadd.f32 %v1166_v39, %v2531_v59  ;;  %v1215_v43 = vpop.f32.mrf.mxu1 }
 0x195   :  { %v1311_v40 = vadd.f32 %v1310_v25, %v1262_v15  ;;  %v1216_v46 = vadd.f32 %v1215_v43, %v1167_v42 }
 0x197   :  { %1331 = vst [vmem:[%s2619_s2 + $0x68] sm:$0xff] %v1311_v40  ;;  %v1353_v50 = vadd.f32 %v1352_v33, %v1311_v40  ;;  %v1378_v44 = vmul.f32 %v1311_v40, %v1311_v40 }
 0x199   :  { %v1393_v45 = vadd.f32 %v1392_v36, %v1378_v44 }
 0x19a   :  { %v1264_v47 = vpop.f32.mrf.mxu2  ;;  %v1168_v49 = vpop.f32.mrf.mxu0 }
 0x19b   :  { %v1313_v48 = vpop.f32.mrf.mxu3  ;;  %v1265_v32 = vadd.f32 %v1264_v47, %v1216_v46  ;;  %v1169_v51 = vadd.f32 %v1168_v49, %v2533_v3  ;;  %v1217_v55 = vpop.f32.mrf.mxu1 }
 0x19d   :  { %v1314_v34 = vadd.f32 %v1313_v48, %v1265_v32  ;;  %v1218_v57 = vadd.f32 %v1217_v55, %v1169_v51 }
 0x19f   :  { %1332 = vst [vmem:[%s2619_s2 + $0x70] sm:$0xff] %v1314_v34  ;;  %v1354_v59 = vadd.f32 %v1353_v50, %v1314_v34  ;;  %v1379_v52 = vmul.f32 %v1314_v34, %v1314_v34 }
 0x1a1   :  { %v1394_v56 = vadd.f32 %v1393_v45, %v1379_v52 }
 0x1a2   :  { %v1266_v58 = vpop.f32.mrf.mxu2 }
 0x1a3   :  { %v1267_v60 = vadd.f32 %v1266_v58, %v1218_v57  ;;  %v1315_v63 = vpop.f32.mrf.mxu3 }
 0x1a5   :  { %v1316_v54 = vadd.f32 %v1315_v63, %v1267_v60 }
 0x1a7   :  { %1333 = vst [vmem:[%s2619_s2 + $0x78] sm:$0xff] %v1316_v54  ;;  %v1355_v0 = vadd.f32 %v1354_v59, %v1316_v54  ;;  %v1380_v1 = vmul.f32 %v1316_v54, %v1316_v54 }
 0x1a9   :  { %v1356_v3 = vrot.slane %v1355_v0, 4  ;;  %v1395_v41 = vadd.f32 %v1394_v56, %v1380_v1 }
 0x1ab   :  { %v1357_v2 = vadd.f32 %v1356_v3, %v1355_v0  ;;  %v1396_v5 = vrot.slane %v1395_v41, 4 }
 0x1ad   :  { %v1358_v6 = vrot.slane %v1357_v2, 2  ;;  %v1397_v7 = vadd.f32 %v1396_v5, %v1395_v41 }
 0x1af   :  { %v1359_v9 = vadd.f32 %v1358_v6, %v1357_v2  ;;  %v1398_v10 = vrot.slane %v1397_v7, 2 }
 0x1b1   :  { %v1360_v11 = vrot.slane %v1359_v9, 1  ;;  %v1399_v62 = vadd.f32 %v1398_v10, %v1397_v7 }
 0x1b3   :  { %v1361_v13 = vadd.f32 %v1360_v11, %v1359_v9  ;;  %v1400_v14 = vrot.slane %v1399_v62, 1 }
 0x1b5   :  { %v1362_v16 = vadd.f32 %v1361_v13, %v1340_v12  ;;  %v1401_v17 = vadd.f32 %v1400_v14, %v1399_v62 }
 0x1b7   :  { %1363 = vst [vmem:[%s2620_s3] sm:$0x1] %v1362_v16  ;;  %v1402_v18 = vadd.f32 %v1401_v17, %v1364_v61 }
 0x1b9   :  { %1403 = vst [vmem:[%s2621_s4] sm:$0x1] %v1402_v18 }
 0x1ba   :  { %1416 = vsyncpa [#allocation3], 1 }

// kernel: forward.14
= control target key start
LH: loop header
LB: loop body
LE: loop exit
PB: predicated region body
PF: predicated region fallthrough
CT: control target
= control target key end

     0   :  { %s1049_s0 = inlined_call_operand.vmem [shape: f32[512,128], index: 0, kind: input, shape index: {}]   ;;  %s1050_s1 = inlined_call_operand.vmem [shape: f32[1,128], index: 1, kind: input, shape index: {}]   ;;  %s1051_s2 = inlined_call_operand.vmem [shape: f32[1,128], index: 2, kind: input, shape index: {}]   ;;  %s1052_s3 = inlined_call_operand.vmem [shape: bf16[512,128], index: 3, kind: output, shape index: {}]  }
   0x1   :  { %v14_v0 = vld [vmem:[%s1049_s0] sm:$0xff]  ;;  %v15_v1 = vld [vmem:[%s1049_s0 + $0x8] sm:$0xff]  ;;  %v16_v4 = vld [vmem:[%s1049_s0 + $0x10] sm:$0xff] }
   0x2   :  { %v632_v2 = vld [vmem:[%s1050_s1] ss:$0 sm:$0xff]  ;;  %v17_v5 = vld [vmem:[%s1049_s0 + $0x18] sm:$0xff]  ;;  %v19_v11 = vld [vmem:[%s1049_s0 + $0x28] sm:$0xff] }
   0x3   :  { %v637_v3 = vld [vmem:[%s1051_s2] ss:$0 sm:$0xff]  ;;  %v82_v7 = vmul.f32 %v632_v2, %v14_v0  ;;  %v83_v8 = vmul.f32 %v632_v2, %v15_v1  ;;  %v84_v9 = vmul.f32 %v632_v2, %v16_v4  ;;  %v85_v10 = vmul.f32 %v632_v2, %v17_v5  ;;  %v20_v12 = vld [vmem:[%s1049_s0 + $0x30] sm:$0xff]  ;;  %v21_v13 = vld [vmem:[%s1049_s0 + $0x38] sm:$0xff] }
   0x4   :  { %v18_v6 = vld [vmem:[%s1049_s0 + $0x20] sm:$0xff]  ;;  %v87_v15 = vmul.f32 %v632_v2, %v19_v11  ;;  %v88_v16 = vmul.f32 %v632_v2, %v20_v12  ;;  %v89_v17 = vmul.f32 %v632_v2, %v21_v13  ;;  %v23_v27 = vld [vmem:[%s1049_s0 + $0x48] sm:$0xff]  ;;  %v24_v32 = vld [vmem:[%s1049_s0 + $0x50] sm:$0xff] }
   0x5   :  { %v86_v14 = vmul.f32 %v632_v2, %v18_v6  ;;  %v150_v18 = vadd.f32 %v637_v3, %v82_v7  ;;  %v151_v19 = vadd.f32 %v637_v3, %v83_v8  ;;  %v152_v20 = vadd.f32 %v637_v3, %v84_v9  ;;  %v22_v26 = vld [vmem:[%s1049_s0 + $0x40] sm:$0xff]  ;;  %v25_v33 = vld [vmem:[%s1049_s0 + $0x58] sm:$0xff]  ;;  %v27_v39 = vld [vmem:[%s1049_s0 + $0x68] sm:$0xff] }
   0x6   :  { %v153_v21 = vadd.f32 %v637_v3, %v85_v10  ;;  %v155_v23 = vadd.f32 %v637_v3, %v87_v15  ;;  %v156_v24 = vadd.f32 %v637_v3, %v88_v16  ;;  %v157_v25 = vadd.f32 %v637_v3, %v89_v17  ;;  %v26_v38 = vld [vmem:[%s1049_s0 + $0x60] sm:$0xff]  ;;  %v28_v44 = vld [vmem:[%s1049_s0 + $0x70] sm:$0xff]  ;;  %v29_v45 = vld [vmem:[%s1049_s0 + $0x78] sm:$0xff] }
   0x7   :  { %v154_v22 = vadd.f32 %v637_v3, %v86_v14  ;;  %v214_v28 = vmax.f32 %v150_v18, 0.0  ;;  %v215_v29 = vmax.f32 %v151_v19, 0.0  ;;  %v216_v30 = vmax.f32 %v152_v20, 0.0  ;;  %v30_v58 = vld [vmem:[%s1049_s0 + $0x80] sm:$0xff]  ;;  %v31_v63 = vld [vmem:[%s1049_s0 + $0x88] sm:$0xff]  ;;  %v32_v6 = vld [vmem:[%s1049_s0 + $0x90] sm:$0xff] }
   0x8   :  { %v217_v31 = vmax.f32 %v153_v21, 0.0  ;;  %v219_v35 = vmax.f32 %v155_v23, 0.0  ;;  %v220_v36 = vmax.f32 %v156_v24, 0.0  ;;  %v221_v37 = vmax.f32 %v157_v25, 0.0  ;;  %v33_v7 = vld [vmem:[%s1049_s0 + $0x98] sm:$0xff]  ;;  %v34_v12 = vld [vmem:[%s1049_s0 + $0xa0] sm:$0xff] }
   0x9   :  { %v218_v34 = vmax.f32 %v154_v22, 0.0  ;;  %v413_v40 = vpack.c.bf16 %v215_v29, %v214_v28  ;;  %v90_v42 = vmul.f32 %v632_v2, %v22_v26  ;;  %v91_v43 = vmul.f32 %v632_v2, %v23_v27  ;;  %v35_v13 = vld [vmem:[%s1049_s0 + $0xa8] sm:$0xff]  ;;  %v36_v18 = vld [vmem:[%s1049_s0 + $0xb0] sm:$0xff]  ;;  %v37_v23 = vld [vmem:[%s1049_s0 + $0xb8] sm:$0xff] }
   0xa   :  { %v418_v41 = vpack.c.bf16 %v217_v31, %v216_v30  ;;  %v428_v47 = vpack.c.bf16 %v221_v37, %v220_v36  ;;  %v92_v48 = vmul.f32 %v632_v2, %v24_v32  ;;  %v93_v49 = vmul.f32 %v632_v2, %v25_v33  ;;  %v38_v28 = vld [vmem:[%s1049_s0 + $0xc0] sm:$0xff]  ;;  %v39_v37 = vld [vmem:[%s1049_s0 + $0xc8] sm:$0xff] }
   0xb   :  { %v423_v46 = vpack.c.bf16 %v219_v35, %v218_v34  ;;  %414 = vst [vmem:[%s1052_s3] sm:$0xff] %v413_v40   ;;  %v158_v50 = vadd.f32 %v637_v3, %v90_v42  ;;  %v159_v51 = vadd.f32 %v637_v3, %v91_v43  ;;  %v94_v52 = vmul.f32 %v632_v2, %v26_v38  ;;  %v40_v42 = vld [vmem:[%s1049_s0 + $0xd0] sm:$0xff]  ;;  %v41_v43 = vld [vmem:[%s1049_s0 + $0xd8] sm:$0xff] }
   0xc   :  { %v95_v53 = vmul.f32 %v632_v2, %v27_v39  ;;  %570 = vst [vmem:[%s1052_s3 + $0x8] sm:$0xff] %v418_v41   ;;  %v160_v54 = vadd.f32 %v637_v3, %v92_v48  ;;  %v161_v55 = vadd.f32 %v637_v3, %v93_v49  ;;  %v96_v56 = vmul.f32 %v632_v2, %v28_v44  ;;  %v42_v48 = vld [vmem:[%s1049_s0 + $0xe0] sm:$0xff]  ;;  %v43_v49 = vld [vmem:[%s1049_s0 + $0xe8] sm:$0xff] }
   0xd   :  { %v97_v57 = vmul.f32 %v632_v2, %v29_v45  ;;  %571 = vst [vmem:[%s1052_s3 + $0x10] sm:$0xff] %v423_v46   ;;  %v222_v59 = vmax.f32 %v158_v50, 0.0  ;;  %v223_v60 = vmax.f32 %v159_v51, 0.0  ;;  %v162_v61 = vadd.f32 %v637_v3, %v94_v52 }
   0xe   :  { %v163_v62 = vadd.f32 %v637_v3, %v95_v53  ;;  %572 = vst [vmem:[%s1052_s3 + $0x18] sm:$0xff] %v428_v47   ;;  %v224_v0 = vmax.f32 %v160_v54, 0.0  ;;  %v225_v1 = vmax.f32 %v161_v55, 0.0  ;;  %v164_v4 = vadd.f32 %v637_v3, %v96_v56  ;;  %v44_v54 = vld [vmem:[%s1049_s0 + $0xf0] sm:$0xff] }
   0xf   :  { %v165_v5 = vadd.f32 %v637_v3, %v97_v57  ;;  %v433_v8 = vpack.c.bf16 %v223_v60, %v222_v59  ;;  %v226_v9 = vmax.f32 %v162_v61, 0.0  ;;  %v98_v11 = vmul.f32 %v632_v2, %v30_v58  ;;  %v45_v59 = vld [vmem:[%s1049_s0 + $0xf8] sm:$0xff] }
  0x10   :  { %v227_v10 = vmax.f32 %v163_v62, 0.0  ;;  %v438_v14 = vpack.c.bf16 %v225_v1, %v224_v0  ;;  %v228_v15 = vmax.f32 %v164_v4, 0.0  ;;  %v99_v17 = vmul.f32 %v632_v2, %v31_v63  ;;  %v46_v0 = vld [vmem:[%s1049_s0 + $0x100] sm:$0xff] }
  0x11   :  { %v229_v16 = vmax.f32 %v165_v5, 0.0  ;;  %573 = vst [vmem:[%s1052_s3 + $0x20] sm:$0xff] %v433_v8   ;;  %v166_v20 = vadd.f32 %v637_v3, %v98_v11  ;;  %v100_v21 = vmul.f32 %v632_v2, %v32_v6  ;;  %v101_v22 = vmul.f32 %v632_v2, %v33_v7  ;;  %v47_v11 = vld [vmem:[%s1049_s0 + $0x108] sm:$0xff] }
  0x12   :  { %v443_v19 = vpack.c.bf16 %v227_v10, %v226_v9  ;;  %574 = vst [vmem:[%s1052_s3 + $0x28] sm:$0xff] %v438_v14   ;;  %v167_v25 = vadd.f32 %v637_v3, %v99_v17  ;;  %v102_v26 = vmul.f32 %v632_v2, %v34_v12  ;;  %v103_v27 = vmul.f32 %v632_v2, %v35_v13  ;;  %v49_v17 = vld [vmem:[%s1049_s0 + $0x118] sm:$0xff] }
  0x13   :  { %v448_v24 = vpack.c.bf16 %v229_v16, %v228_v15  ;;  %v230_v29 = vmax.f32 %v166_v20, 0.0  ;;  %v168_v30 = vadd.f32 %v637_v3, %v100_v21  ;;  %v169_v31 = vadd.f32 %v637_v3, %v101_v22  ;;  %v48_v16 = vld [vmem:[%s1049_s0 + $0x110] sm:$0xff]  ;;  %v50_v22 = vld [vmem:[%s1049_s0 + $0x120] sm:$0xff] }
  0x14   :  { %575 = vst [vmem:[%s1052_s3 + $0x30] sm:$0xff] %v443_v19   ;;  %v104_v32 = vmul.f32 %v632_v2, %v36_v18  ;;  %v231_v33 = vmax.f32 %v167_v25, 0.0  ;;  %v170_v34 = vadd.f32 %v637_v3, %v102_v26  ;;  %v171_v35 = vadd.f32 %v637_v3, %v103_v27 }
  0x15   :  { %576 = vst [vmem:[%s1052_s3 + $0x38] sm:$0xff] %v448_v24   ;;  %v105_v36 = vmul.f32 %v632_v2, %v37_v23  ;;  %v232_v38 = vmax.f32 %v168_v30, 0.0  ;;  %v233_v39 = vmax.f32 %v169_v31, 0.0  ;;  %v106_v41 = vmul.f32 %v632_v2, %v38_v28  ;;  %v51_v23 = vld [vmem:[%s1049_s0 + $0x128] sm:$0xff]  ;;  %v52_v28 = vld [vmem:[%s1049_s0 + $0x130] sm:$0xff] }
  0x16   :  { %v172_v40 = vadd.f32 %v637_v3, %v104_v32  ;;  %v453_v44 = vpack.c.bf16 %v231_v33, %v230_v29  ;;  %v234_v45 = vmax.f32 %v170_v34, 0.0  ;;  %v235_v46 = vmax.f32 %v171_v35, 0.0  ;;  %v53_v33 = vld [vmem:[%s1049_s0 + $0x138] sm:$0xff] }
  0x17   :  { %v173_v47 = vadd.f32 %v637_v3, %v105_v36  ;;  %v458_v50 = vpack.c.bf16 %v233_v39, %v232_v38  ;;  %v107_v52 = vmul.f32 %v632_v2, %v39_v37  ;;  %v174_v53 = vadd.f32 %v637_v3, %v106_v41  ;;  %v54_v38 = vld [vmem:[%s1049_s0 + $0x140] sm:$0xff] }
  0x18   :  { %v236_v51 = vmax.f32 %v172_v40, 0.0  ;;  %577 = vst [vmem:[%s1052_s3 + $0x40] sm:$0xff] %v453_v44   ;;  %v463_v55 = vpack.c.bf16 %v235_v46, %v234_v45  ;;  %v108_v57 = vmul.f32 %v632_v2, %v40_v42  ;;  %v109_v58 = vmul.f32 %v632_v2, %v41_v43 }
  0x19   :  { %v237_v56 = vmax.f32 %v173_v47, 0.0  ;;  %578 = vst [vmem:[%s1052_s3 + $0x48] sm:$0xff] %v458_v50   ;;  %v175_v60 = vadd.f32 %v637_v3, %v107_v52  ;;  %v238_v61 = vmax.f32 %v174_v53, 0.0  ;;  %v110_v62 = vmul.f32 %v632_v2, %v42_v48  ;;  %v55_v47 = vld [vmem:[%s1049_s0 + $0x148] sm:$0xff]  ;;  %v56_v52 = vld [vmem:[%s1049_s0 + $0x150] sm:$0xff]  ;;  %v57_v53 = vld [vmem:[%s1049_s0 + $0x158] sm:$0xff] }
  0x1a   :  { %v111_v63 = vmul.f32 %v632_v2, %v43_v49  ;;  %579 = vst [vmem:[%s1052_s3 + $0x50] sm:$0xff] %v463_v55   ;;  %v176_v4 = vadd.f32 %v637_v3, %v108_v57  ;;  %v177_v5 = vadd.f32 %v637_v3, %v109_v58  ;;  %v112_v6 = vmul.f32 %v632_v2, %v44_v54  ;;  %v58_v58 = vld [vmem:[%s1049_s0 + $0x160] sm:$0xff] }
  0x1b   :  { %v468_v1 = vpack.c.bf16 %v237_v56, %v236_v51  ;;  %v239_v7 = vmax.f32 %v175_v60, 0.0  ;;  %v178_v8 = vadd.f32 %v637_v3, %v110_v62  ;;  %v113_v10 = vmul.f32 %v632_v2, %v45_v59  ;;  %v59_v59 = vld [vmem:[%s1049_s0 + $0x168] sm:$0xff] }
  0x1c   :  { %v179_v9 = vadd.f32 %v637_v3, %v111_v63  ;;  %v240_v12 = vmax.f32 %v176_v4, 0.0  ;;  %v241_v13 = vmax.f32 %v177_v5, 0.0  ;;  %v180_v14 = vadd.f32 %v637_v3, %v112_v6 }
  0x1d   :  { %580 = vst [vmem:[%s1052_s3 + $0x58] sm:$0xff] %v468_v1   ;;  %v114_v15 = vmul.f32 %v632_v2, %v46_v0  ;;  %v473_v18 = vpack.c.bf16 %v239_v7, %v238_v61  ;;  %v242_v19 = vmax.f32 %v178_v8, 0.0  ;;  %v181_v21 = vadd.f32 %v637_v3, %v113_v10  ;;  %v60_v0 = vld [vmem:[%s1049_s0 + $0x170] sm:$0xff]  ;;  %v61_v7 = vld [vmem:[%s1049_s0 + $0x178] sm:$0xff] }
  0x1e   :  { %v243_v20 = vmax.f32 %v179_v9, 0.0  ;;  %v478_v24 = vpack.c.bf16 %v241_v13, %v240_v12  ;;  %v244_v25 = vmax.f32 %v180_v14, 0.0  ;;  %v115_v26 = vmul.f32 %v632_v2, %v47_v11  ;;  %v62_v12 = vld [vmem:[%s1049_s0 + $0x180] sm:$0xff] }
  0x1f   :  { %v182_v27 = vadd.f32 %v637_v3, %v114_v15  ;;  %581 = vst [vmem:[%s1052_s3 + $0x60] sm:$0xff] %v473_v18   ;;  %v245_v30 = vmax.f32 %v181_v21, 0.0  ;;  %v116_v31 = vmul.f32 %v632_v2, %v48_v16  ;;  %v117_v32 = vmul.f32 %v632_v2, %v49_v17  ;;  %v63_v21 = vld [vmem:[%s1049_s0 + $0x188] sm:$0xff] }
  0x20   :  { %v483_v29 = vpack.c.bf16 %v243_v20, %v242_v19  ;;  %582 = vst [vmem:[%s1052_s3 + $0x68] sm:$0xff] %v478_v24   ;;  %v183_v34 = vadd.f32 %v637_v3, %v115_v26  ;;  %v118_v36 = vmul.f32 %v632_v2, %v50_v22  ;;  %v119_v37 = vmul.f32 %v632_v2, %v51_v23  ;;  %v64_v26 = vld [vmem:[%s1049_s0 + $0x190] sm:$0xff] }
  0x21   :  { %v246_v35 = vmax.f32 %v182_v27, 0.0  ;;  %v488_v39 = vpack.c.bf16 %v245_v30, %v244_v25  ;;  %v184_v40 = vadd.f32 %v637_v3, %v116_v31  ;;  %v185_v41 = vadd.f32 %v637_v3, %v117_v32  ;;  %v65_v27 = vld [vmem:[%s1049_s0 + $0x198] sm:$0xff]  ;;  %v66_v32 = vld [vmem:[%s1049_s0 + $0x1a0] sm:$0xff] }
  0x22   :  { %583 = vst [vmem:[%s1052_s3 + $0x70] sm:$0xff] %v483_v29   ;;  %v120_v42 = vmul.f32 %v632_v2, %v52_v28  ;;  %v247_v43 = vmax.f32 %v183_v34, 0.0  ;;  %v186_v44 = vadd.f32 %v637_v3, %v118_v36  ;;  %v187_v45 = vadd.f32 %v637_v3, %v119_v37 }
  0x23   :  { %v121_v46 = vmul.f32 %v632_v2, %v53_v33  ;;  %584 = vst [vmem:[%s1052_s3 + $0x78] sm:$0xff] %v488_v39   ;;  %v248_v48 = vmax.f32 %v184_v40, 0.0  ;;  %v249_v49 = vmax.f32 %v185_v41, 0.0  ;;  %v122_v51 = vmul.f32 %v632_v2, %v54_v38  ;;  %v67_v33 = vld [vmem:[%s1049_s0 + $0x1a8] sm:$0xff]  ;;  %v68_v38 = vld [vmem:[%s1049_s0 + $0x1b0] sm:$0xff] }
  0x24   :  { %v188_v50 = vadd.f32 %v637_v3, %v120_v42  ;;  %v493_v54 = vpack.c.bf16 %v247_v43, %v246_v35  ;;  %v250_v55 = vmax.f32 %v186_v44, 0.0  ;;  %v251_v56 = vmax.f32 %v187_v45, 0.0  ;;  %v69_v43 = vld [vmem:[%s1049_s0 + $0x1b8] sm:$0xff] }
  0x25   :  { %v189_v57 = vadd.f32 %v637_v3, %v121_v46  ;;  %v498_v60 = vpack.c.bf16 %v249_v49, %v248_v48  ;;  %v123_v62 = vmul.f32 %v632_v2, %v55_v47  ;;  %v190_v63 = vadd.f32 %v637_v3, %v122_v51  ;;  %v70_v48 = vld [vmem:[%s1049_s0 + $0x1c0] sm:$0xff] }
  0x26   :  { %v252_v61 = vmax.f32 %v188_v50, 0.0  ;;  %585 = vst [vmem:[%s1052_s3 + $0x80] sm:$0xff] %v493_v54   ;;  %v503_v1 = vpack.c.bf16 %v251_v56, %v250_v55  ;;  %v124_v5 = vmul.f32 %v632_v2, %v56_v52  ;;  %v125_v6 = vmul.f32 %v632_v2, %v57_v53 }
  0x27   :  { %v253_v4 = vmax.f32 %v189_v57, 0.0  ;;  %586 = vst [vmem:[%s1052_s3 + $0x88] sm:$0xff] %v498_v60   ;;  %v191_v8 = vadd.f32 %v637_v3, %v123_v62  ;;  %v254_v9 = vmax.f32 %v190_v63, 0.0  ;;  %v126_v10 = vmul.f32 %v632_v2, %v58_v58  ;;  %v71_v57 = vld [vmem:[%s1049_s0 + $0x1c8] sm:$0xff]  ;;  %v72_v62 = vld [vmem:[%s1049_s0 + $0x1d0] sm:$0xff]  ;;  %v73_v63 = vld [vmem:[%s1049_s0 + $0x1d8] sm:$0xff] }
  0x28   :  { %v127_v11 = vmul.f32 %v632_v2, %v59_v59  ;;  %587 = vst [vmem:[%s1052_s3 + $0x90] sm:$0xff] %v503_v1   ;;  %v192_v14 = vadd.f32 %v637_v3, %v124_v5  ;;  %v193_v15 = vadd.f32 %v637_v3, %v125_v6  ;;  %v128_v16 = vmul.f32 %v632_v2, %v60_v0  ;;  %v74_v6 = vld [vmem:[%s1049_s0 + $0x1e0] sm:$0xff] }
  0x29   :  { %v508_v13 = vpack.c.bf16 %v253_v4, %v252_v61  ;;  %v255_v17 = vmax.f32 %v191_v8, 0.0  ;;  %v194_v18 = vadd.f32 %v637_v3, %v126_v10  ;;  %v129_v20 = vmul.f32 %v632_v2, %v61_v7  ;;  %v75_v7 = vld [vmem:[%s1049_s0 + $0x1e8] sm:$0xff] }
  0x2a   :  { %v195_v19 = vadd.f32 %v637_v3, %v127_v11  ;;  %v256_v22 = vmax.f32 %v192_v14, 0.0  ;;  %v257_v23 = vmax.f32 %v193_v15, 0.0  ;;  %v196_v24 = vadd.f32 %v637_v3, %v128_v16 }
  0x2b   :  { %588 = vst [vmem:[%s1052_s3 + $0x98] sm:$0xff] %v508_v13   ;;  %v130_v25 = vmul.f32 %v632_v2, %v62_v12  ;;  %v513_v28 = vpack.c.bf16 %v255_v17, %v254_v9  ;;  %v258_v29 = vmax.f32 %v194_v18, 0.0  ;;  %v197_v31 = vadd.f32 %v637_v3, %v129_v20  ;;  %v76_v12 = vld [vmem:[%s1049_s0 + $0x1f0] sm:$0xff]  ;;  %v77_v17 = vld [vmem:[%s1049_s0 + $0x1f8] sm:$0xff] }
  0x2c   :  { %v259_v30 = vmax.f32 %v195_v19, 0.0  ;;  %v518_v34 = vpack.c.bf16 %v257_v23, %v256_v22  ;;  %v260_v35 = vmax.f32 %v196_v24, 0.0  ;;  %v131_v36 = vmul.f32 %v632_v2, %v63_v21 }
  0x2d   :  { %v198_v37 = vadd.f32 %v637_v3, %v130_v25  ;;  %589 = vst [vmem:[%s1052_s3 + $0xa0] sm:$0xff] %v513_v28   ;;  %v261_v40 = vmax.f32 %v197_v31, 0.0  ;;  %v132_v41 = vmul.f32 %v632_v2, %v64_v26  ;;  %v133_v42 = vmul.f32 %v632_v2, %v65_v27 }
  0x2e   :  { %v523_v39 = vpack.c.bf16 %v259_v30, %v258_v29  ;;  %590 = vst [vmem:[%s1052_s3 + $0xa8] sm:$0xff] %v518_v34   ;;  %v199_v44 = vadd.f32 %v637_v3, %v131_v36  ;;  %v134_v46 = vmul.f32 %v632_v2, %v66_v32  ;;  %v135_v47 = vmul.f32 %v632_v2, %v67_v33 }
  0x2f   :  { %v262_v45 = vmax.f32 %v198_v37, 0.0  ;;  %v528_v49 = vpack.c.bf16 %v261_v40, %v260_v35  ;;  %v200_v50 = vadd.f32 %v637_v3, %v132_v41  ;;  %v201_v51 = vadd.f32 %v637_v3, %v133_v42 }
  0x30   :  { %591 = vst [vmem:[%s1052_s3 + $0xb0] sm:$0xff] %v523_v39   ;;  %v136_v52 = vmul.f32 %v632_v2, %v68_v38  ;;  %v263_v53 = vmax.f32 %v199_v44, 0.0  ;;  %v202_v54 = vadd.f32 %v637_v3, %v134_v46  ;;  %v203_v55 = vadd.f32 %v637_v3, %v135_v47 }
  0x31   :  { %v137_v56 = vmul.f32 %v632_v2, %v69_v43  ;;  %592 = vst [vmem:[%s1052_s3 + $0xb8] sm:$0xff] %v528_v49   ;;  %v264_v58 = vmax.f32 %v200_v50, 0.0  ;;  %v265_v59 = vmax.f32 %v201_v51, 0.0  ;;  %v138_v61 = vmul.f32 %v632_v2, %v70_v48 }
  0x32   :  { %v204_v60 = vadd.f32 %v637_v3, %v136_v52  ;;  %v533_v0 = vpack.c.bf16 %v263_v53, %v262_v45  ;;  %v266_v1 = vmax.f32 %v202_v54, 0.0  ;;  %v267_v4 = vmax.f32 %v203_v55, 0.0 }
  0x33   :  { %v205_v5 = vadd.f32 %v637_v3, %v137_v56  ;;  %v538_v8 = vpack.c.bf16 %v265_v59, %v264_v58  ;;  %v139_v10 = vmul.f32 %v632_v2, %v71_v57  ;;  %v206_v11 = vadd.f32 %v637_v3, %v138_v61 }
  0x34   :  { %v268_v9 = vmax.f32 %v204_v60, 0.0  ;;  %593 = vst [vmem:[%s1052_s3 + $0xc0] sm:$0xff] %v533_v0   ;;  %v543_v13 = vpack.c.bf16 %v267_v4, %v266_v1  ;;  %v140_v15 = vmul.f32 %v632_v2, %v72_v62  ;;  %v141_v16 = vmul.f32 %v632_v2, %v73_v63 }
  0x35   :  { %v269_v14 = vmax.f32 %v205_v5, 0.0  ;;  %594 = vst [vmem:[%s1052_s3 + $0xc8] sm:$0xff] %v538_v8   ;;  %v207_v18 = vadd.f32 %v637_v3, %v139_v10  ;;  %v270_v19 = vmax.f32 %v206_v11, 0.0  ;;  %v142_v20 = vmul.f32 %v632_v2, %v74_v6 }
  0x36   :  { %v143_v21 = vmul.f32 %v632_v2, %v75_v7  ;;  %595 = vst [vmem:[%s1052_s3 + $0xd0] sm:$0xff] %v543_v13   ;;  %v208_v23 = vadd.f32 %v637_v3, %v140_v15  ;;  %v209_v24 = vadd.f32 %v637_v3, %v141_v16  ;;  %v144_v25 = vmul.f32 %v632_v2, %v76_v12 }
  0x37   :  { %v548_v22 = vpack.c.bf16 %v269_v14, %v268_v9  ;;  %v271_v26 = vmax.f32 %v207_v18, 0.0  ;;  %v210_v27 = vadd.f32 %v637_v3, %v142_v20  ;;  %v145_v29 = vmul.f32 %v632_v2, %v77_v17 }
  0x38   :  { %v211_v28 = vadd.f32 %v637_v3, %v143_v21  ;;  %v272_v30 = vmax.f32 %v208_v23, 0.0  ;;  %v273_v31 = vmax.f32 %v209_v24, 0.0  ;;  %v212_v32 = vadd.f32 %v637_v3, %v144_v25 }
  0x39   :  { %596 = vst [vmem:[%s1052_s3 + $0xd8] sm:$0xff] %v548_v22   ;;  %v553_v33 = vpack.c.bf16 %v271_v26, %v270_v19  ;;  %v274_v34 = vmax.f32 %v210_v27, 0.0  ;;  %v213_v36 = vadd.f32 %v637_v3, %v145_v29 }
  0x3a   :  { %v275_v35 = vmax.f32 %v211_v28, 0.0  ;;  %v558_v37 = vpack.c.bf16 %v273_v31, %v272_v30  ;;  %v276_v38 = vmax.f32 %v212_v32, 0.0 }
  0x3b   :  { %597 = vst [vmem:[%s1052_s3 + $0xe0] sm:$0xff] %v553_v33   ;;  %v277_v39 = vmax.f32 %v213_v36, 0.0 }
  0x3c   :  { %v563_v2 = vpack.c.bf16 %v275_v35, %v274_v34  ;;  %598 = vst [vmem:[%s1052_s3 + $0xe8] sm:$0xff] %v558_v37  }
  0x3d   :  { %v568_v40 = vpack.c.bf16 %v277_v39, %v276_v38 }
  0x3e   :  { %599 = vst [vmem:[%s1052_s3 + $0xf0] sm:$0xff] %v563_v2  }
  0x3f   :  { %600 = vst [vmem:[%s1052_s3 + $0xf8] sm:$0xff] %v568_v40  }

// kernel: forward.13
= control target key start
LH: loop header
LB: loop body
LE: loop exit
PB: predicated region body
PF: predicated region fallthrough
CT: control target
= control target key end

     0   :  { %s3923_s1 = inlined_call_operand.vmem [shape: bf16[512,128], index: 1, kind: input, shape index: {}]   ;;  %s3924_s0 = inlined_call_operand.vmem [shape: bf16[512,512], index: 0, kind: input, shape index: {}]   ;;  %s3925_s2 = inlined_call_operand.vmem [shape: f32[512,128], index: 2, kind: output, shape index: {0}]   ;;  %s3926_s3 = inlined_call_operand.vmem [shape: f32[1,128], index: 3, kind: output, shape index: {1}]   ;;  %s3927_s4 = inlined_call_operand.vmem [shape: f32[1,128], index: 4, kind: output, shape index: {2}]  }
   0x1   :  { %v2779_v0 = vld [vmem:[%s3923_s1 + $0x38] sm:$0xff]  ;;  %v2778_v4 = vld [vmem:[%s3923_s1 + $0x30] sm:$0xff]  ;;  %v2777_v8 = vld [vmem:[%s3923_s1 + $0x28] sm:$0xff] }
   0x2   :  { %v2787_v1 = vld [vmem:[%s3923_s1 + $0x78] sm:$0xff]  ;;  %1038 = vmatpush.bf16.msra.mxu0 %v2779_v0  ;;  %v2786_v5 = vld [vmem:[%s3923_s1 + $0x70] sm:$0xff]  ;;  %v2785_v9 = vld [vmem:[%s3923_s1 + $0x68] sm:$0xff] }
   0x3   :  { %v2795_v2 = vld [vmem:[%s3923_s1 + $0xb8] sm:$0xff]  ;;  %1207 = vmatpush.bf16.msra.mxu1 %v2787_v1  ;;  %v2794_v6 = vld [vmem:[%s3923_s1 + $0xb0] sm:$0xff]  ;;  %v2793_v10 = vld [vmem:[%s3923_s1 + $0xa8] sm:$0xff] }
   0x4   :  { %v2803_v3 = vld [vmem:[%s3923_s1 + $0xf8] sm:$0xff]  ;;  %1376 = vmatpush.bf16.msra.mxu2 %v2795_v2  ;;  %v2802_v7 = vld [vmem:[%s3923_s1 + $0xf0] sm:$0xff]  ;;  %v2801_v11 = vld [vmem:[%s3923_s1 + $0xe8] sm:$0xff] }
   0x5   :  { %1545 = vmatpush.bf16.msra.mxu3 %v2803_v3  ;;  %v2776_v12 = vld [vmem:[%s3923_s1 + $0x20] sm:$0xff]  ;;  %v2775_v16 = vld [vmem:[%s3923_s1 + $0x18] sm:$0xff]  ;;  %v2774_v20 = vld [vmem:[%s3923_s1 + $0x10] sm:$0xff] }
   0x6   :  { %1039 = vmatpush.bf16.msra.mxu0 %v2778_v4  ;;  %v2784_v13 = vld [vmem:[%s3923_s1 + $0x60] sm:$0xff]  ;;  %v2783_v17 = vld [vmem:[%s3923_s1 + $0x58] sm:$0xff]  ;;  %v2782_v21 = vld [vmem:[%s3923_s1 + $0x50] sm:$0xff] }
   0x7   :  { %1208 = vmatpush.bf16.msra.mxu1 %v2786_v5  ;;  %v2792_v14 = vld [vmem:[%s3923_s1 + $0xa0] sm:$0xff]  ;;  %v2791_v18 = vld [vmem:[%s3923_s1 + $0x98] sm:$0xff]  ;;  %v2790_v22 = vld [vmem:[%s3923_s1 + $0x90] sm:$0xff] }
   0x8   :  { %1377 = vmatpush.bf16.msra.mxu2 %v2794_v6  ;;  %v2800_v15 = vld [vmem:[%s3923_s1 + $0xe0] sm:$0xff]  ;;  %v2799_v19 = vld [vmem:[%s3923_s1 + $0xd8] sm:$0xff]  ;;  %v2798_v23 = vld [vmem:[%s3923_s1 + $0xd0] sm:$0xff] }
   0x9   :  { %1546 = vmatpush.bf16.msra.mxu3 %v2802_v7  ;;  %v2773_v24 = vld [vmem:[%s3923_s1 + $0x8] sm:$0xff]  ;;  %v2772_v28 = vld [vmem:[%s3923_s1] sm:$0xff]  ;;  %v2646_v33 = vld [vmem:[%s3924_s0 + $0xc] sm:$0xf0] }
   0xa   :  { %1040 = vmatpush.bf16.msra.mxu0 %v2777_v8  ;;  %v2781_v25 = vld [vmem:[%s3923_s1 + $0x48] sm:$0xff]  ;;  %v2780_v29 = vld [vmem:[%s3923_s1 + $0x40] sm:$0xff]  ;;  %v2008_v35 = vld [vmem:[%s3924_s0 + $0x10] sm:$0xf0] }
   0xb   :  { %1209 = vmatpush.bf16.msra.mxu1 %v2785_v9  ;;  %v2789_v26 = vld [vmem:[%s3923_s1 + $0x88] sm:$0xff]  ;;  %v2788_v30 = vld [vmem:[%s3923_s1 + $0x80] sm:$0xff]  ;;  %v2647_v37 = vld [vmem:[%s3924_s0 + $0x14] sm:$0xf0] }
   0xc   :  { %1378 = vmatpush.bf16.msra.mxu2 %v2793_v10  ;;  %v2797_v27 = vld [vmem:[%s3923_s1 + $0xc8] sm:$0xff]  ;;  %v2796_v31 = vld [vmem:[%s3923_s1 + $0xc0] sm:$0xff]  ;;  %v2016_v39 = vld [vmem:[%s3924_s0 + $0x18] sm:$0xf0] }
   0xd   :  { %1547 = vmatpush.bf16.msra.mxu3 %v2801_v11  ;;  %v2006_v32 = vld [vmem:[%s3924_s0] sm:$0xf]  ;;  %v2644_v34 = vld [vmem:[%s3924_s0 + $0x4] sm:$0xf]  ;;  %v2014_v36 = vld [vmem:[%s3924_s0 + $0x8] sm:$0xf] }
   0xe   :  { %1041 = vmatpush.bf16.msra.mxu0 %v2776_v12  ;;  %v2645_v38 = vld [vmem:[%s3924_s0 + $0xc] sm:$0xf]  ;;  %v2007_v40 = vor.u32 %v2646_v33, %v2006_v32  ;;  %v2011_v41 = vor.u32 %v2644_v34, %v2008_v35  ;;  %v2015_v42 = vor.u32 %v2647_v37, %v2014_v36  ;;  %v2022_v44 = vld [vmem:[%s3924_s0 + $0x20] sm:$0xf]  ;;  %v2650_v45 = vld [vmem:[%s3924_s0 + $0x2c] sm:$0xf0] }
   0xf   :  { %1210 = vmatpush.bf16.msra.mxu1 %v2784_v13  ;;  %v2019_v43 = vor.u32 %v2645_v38, %v2016_v39  ;;  %v2648_v46 = vld [vmem:[%s3924_s0 + $0x24] sm:$0xf]  ;;  %v2024_v47 = vld [vmem:[%s3924_s0 + $0x30] sm:$0xf0]  ;;  %v2030_v48 = vld [vmem:[%s3924_s0 + $0x28] sm:$0xf]  ;;  %v2023_v52 = vor.u32 %v2650_v45, %v2022_v44 }
  0x10   :  { %1379 = vmatpush.bf16.msra.mxu2 %v2792_v14  ;;  %v2651_v49 = vld [vmem:[%s3924_s0 + $0x34] sm:$0xf0]  ;;  %v2649_v50 = vld [vmem:[%s3924_s0 + $0x2c] sm:$0xf]  ;;  %v2032_v51 = vld [vmem:[%s3924_s0 + $0x38] sm:$0xf0]  ;;  %v2027_v53 = vor.u32 %v2648_v46, %v2024_v47 }
  0x11   :  { %1548 = vmatpush.bf16.msra.mxu3 %v2800_v15  ;;  %v2031_v54 = vor.u32 %v2651_v49, %v2030_v48  ;;  %v2035_v55 = vor.u32 %v2649_v50, %v2032_v51  ;;  %v2038_v56 = vld [vmem:[%s3924_s0 + $0x40] sm:$0xf]  ;;  %v2654_v57 = vld [vmem:[%s3924_s0 + $0x4c] sm:$0xf0]  ;;  %v2652_v58 = vld [vmem:[%s3924_s0 + $0x44] sm:$0xf] }
  0x12   :  { %1042 = vmatpush.bf16.msra.mxu0 %v2775_v16  ;;  %v2040_v59 = vld [vmem:[%s3924_s0 + $0x50] sm:$0xf0]  ;;  %v2046_v60 = vld [vmem:[%s3924_s0 + $0x48] sm:$0xf]  ;;  %v2655_v61 = vld [vmem:[%s3924_s0 + $0x54] sm:$0xf0]  ;;  %v2039_v0 = vor.u32 %v2654_v57, %v2038_v56 }
  0x13   :  { %1211 = vmatpush.bf16.msra.mxu1 %v2783_v17  ;;  %v2653_v62 = vld [vmem:[%s3924_s0 + $0x4c] sm:$0xf]  ;;  %v2048_v63 = vld [vmem:[%s3924_s0 + $0x58] sm:$0xf0]  ;;  %v2043_v1 = vor.u32 %v2652_v58, %v2040_v59  ;;  %v2047_v2 = vor.u32 %v2655_v61, %v2046_v60  ;;  %v2054_v4 = vld [vmem:[%s3924_s0 + $0x60] sm:$0xf] }
  0x14   :  { %1380 = vmatpush.bf16.msra.mxu2 %v2791_v18  ;;  %v2051_v3 = vor.u32 %v2653_v62, %v2048_v63  ;;  %v2658_v5 = vld [vmem:[%s3924_s0 + $0x6c] sm:$0xf0]  ;;  %v2656_v6 = vld [vmem:[%s3924_s0 + $0x64] sm:$0xf]  ;;  %v2056_v7 = vld [vmem:[%s3924_s0 + $0x70] sm:$0xf0] }
  0x15   :  { %1549 = vmatpush.bf16.msra.mxu3 %v2799_v19  ;;  %v2062_v8 = vld [vmem:[%s3924_s0 + $0x68] sm:$0xf]  ;;  %v2659_v9 = vld [vmem:[%s3924_s0 + $0x74] sm:$0xf0]  ;;  %v2657_v10 = vld [vmem:[%s3924_s0 + $0x6c] sm:$0xf]  ;;  %v2055_v12 = vor.u32 %v2658_v5, %v2054_v4  ;;  %v2059_v13 = vor.u32 %v2656_v6, %v2056_v7 }
  0x16   :  { %1043 = vmatpush.bf16.msra.mxu0 %v2774_v20  ;;  %v2064_v11 = vld [vmem:[%s3924_s0 + $0x78] sm:$0xf0]  ;;  %v2063_v14 = vor.u32 %v2659_v9, %v2062_v8  ;;  %v2070_v16 = vld [vmem:[%s3924_s0 + $0x80] sm:$0xf]  ;;  %v2662_v17 = vld [vmem:[%s3924_s0 + $0x8c] sm:$0xf0] }
  0x17   :  { %1212 = vmatpush.bf16.msra.mxu1 %v2782_v21  ;;  %v2067_v15 = vor.u32 %v2657_v10, %v2064_v11  ;;  %v2660_v18 = vld [vmem:[%s3924_s0 + $0x84] sm:$0xf]  ;;  %v2072_v19 = vld [vmem:[%s3924_s0 + $0x90] sm:$0xf0]  ;;  %v2078_v20 = vld [vmem:[%s3924_s0 + $0x88] sm:$0xf] }
  0x18   :  { %1381 = vmatpush.bf16.msra.mxu2 %v2790_v22  ;;  %v2663_v21 = vld [vmem:[%s3924_s0 + $0x94] sm:$0xf0]  ;;  %v2661_v22 = vld [vmem:[%s3924_s0 + $0x8c] sm:$0xf]  ;;  %v2094_v32 = vld [vmem:[%s3924_s0 + $0xa8] sm:$0xf] }
  0x19   :  { %1550 = vmatpush.bf16.msra.mxu3 %v2798_v23  ;;  %v2080_v23 = vld [vmem:[%s3924_s0 + $0x98] sm:$0xf0]  ;;  %v2667_v33 = vld [vmem:[%s3924_s0 + $0xb4] sm:$0xf0]  ;;  %v2665_v34 = vld [vmem:[%s3924_s0 + $0xac] sm:$0xf] }
  0x1a   :  { %1044 = vmatpush.bf16.msra.mxu0 %v2773_v24  ;;  %v2071_v24 = vor.u32 %v2662_v17, %v2070_v16  ;;  %v2096_v35 = vld [vmem:[%s3924_s0 + $0xb8] sm:$0xf0]  ;;  %v2095_v38 = vor.u32 %v2667_v33, %v2094_v32  ;;  %v2110_v44 = vld [vmem:[%s3924_s0 + $0xc8] sm:$0xf]  ;;  %v2671_v45 = vld [vmem:[%s3924_s0 + $0xd4] sm:$0xf0] }
  0x1b   :  { %1213 = vmatpush.bf16.msra.mxu1 %v2781_v25  ;;  %v2075_v25 = vor.u32 %v2660_v18, %v2072_v19  ;;  %v2099_v39 = vor.u32 %v2665_v34, %v2096_v35  ;;  %v2669_v46 = vld [vmem:[%s3924_s0 + $0xcc] sm:$0xf]  ;;  %v2112_v47 = vld [vmem:[%s3924_s0 + $0xd8] sm:$0xf0]  ;;  %v2111_v50 = vor.u32 %v2671_v45, %v2110_v44  ;;  %v2126_v56 = vld [vmem:[%s3924_s0 + $0xe8] sm:$0xf] }
  0x1c   :  { %1382 = vmatpush.bf16.msra.mxu2 %v2789_v26  ;;  %v2079_v26 = vor.u32 %v2663_v21, %v2078_v20  ;;  %v2115_v51 = vor.u32 %v2669_v46, %v2112_v47  ;;  %v2675_v57 = vld [vmem:[%s3924_s0 + $0xf4] sm:$0xf0]  ;;  %v2673_v58 = vld [vmem:[%s3924_s0 + $0xec] sm:$0xf]  ;;  %v2128_v59 = vld [vmem:[%s3924_s0 + $0xf8] sm:$0xf0] }
  0x1d   :  { %1551 = vmatpush.bf16.msra.mxu3 %v2797_v27  ;;  %v2083_v27 = vor.u32 %v2661_v22, %v2080_v23  ;;  %v2127_v62 = vor.u32 %v2675_v57, %v2126_v56  ;;  %v2131_v63 = vor.u32 %v2673_v58, %v2128_v59  ;;  %v2142_v4 = vld [vmem:[%s3924_s0 + $0x108] sm:$0xf]  ;;  %v2679_v5 = vld [vmem:[%s3924_s0 + $0x114] sm:$0xf0]  ;;  %v2677_v6 = vld [vmem:[%s3924_s0 + $0x10c] sm:$0xf] }
  0x1e   :  { %1045 = vmatpush.bf16.msra.mxu0 %v2772_v28  ;;  %v2086_v28 = vld [vmem:[%s3924_s0 + $0xa0] sm:$0xf]  ;;  %v2144_v7 = vld [vmem:[%s3924_s0 + $0x118] sm:$0xf0]  ;;  %v2682_v22 = vld [vmem:[%s3924_s0 + $0x12c] sm:$0xf0] }
  0x1f   :  { %1214 = vmatpush.bf16.msra.mxu1 %v2780_v29  ;;  %v2666_v29 = vld [vmem:[%s3924_s0 + $0xac] sm:$0xf0]  ;;  %v2150_v21 = vld [vmem:[%s3924_s0 + $0x120] sm:$0xf]  ;;  %v2680_v23 = vld [vmem:[%s3924_s0 + $0x124] sm:$0xf] }
  0x20   :  { %1383 = vmatpush.bf16.msra.mxu2 %v2788_v30  ;;  %v2664_v30 = vld [vmem:[%s3924_s0 + $0xa4] sm:$0xf]  ;;  %v2087_v36 = vor.u32 %v2666_v29, %v2086_v28  ;;  %v2160_v28 = vld [vmem:[%s3924_s0 + $0x138] sm:$0xf0]  ;;  %v2151_v32 = vor.u32 %v2682_v22, %v2150_v21  ;;  %v2168_v56 = vld [vmem:[%s3924_s0 + $0x150] sm:$0xf0] }
  0x21   :  { %1552 = vmatpush.bf16.msra.mxu3 %v2796_v31  ;;  %1046 = vmatmul.bf16.vlgmr.msra.gmra.mxu0 %v2007_v40  ;;  %v2088_v31 = vld [vmem:[%s3924_s0 + $0xb0] sm:$0xf0]  ;;  %v2102_v40 = vld [vmem:[%s3924_s0 + $0xc0] sm:$0xf]  ;;  %v2174_v57 = vld [vmem:[%s3924_s0 + $0x148] sm:$0xf] }
  0x22   :  { %1215 = vmatmul.bf16.vlgmr.msra.gmra.mxu1 %v2011_v41  ;;  %v2091_v37 = vor.u32 %v2664_v30, %v2088_v31  ;;  %v2670_v41 = vld [vmem:[%s3924_s0 + $0xcc] sm:$0xf0]  ;;  %v2687_v58 = vld [vmem:[%s3924_s0 + $0x154] sm:$0xf0]  ;;  %v2685_v59 = vld [vmem:[%s3924_s0 + $0x14c] sm:$0xf] }
  0x23   :  { %1384 = vmatmul.bf16.vlgmr.msra.gmra.mxu2 %v2015_v42  ;;  %v2668_v42 = vld [vmem:[%s3924_s0 + $0xc4] sm:$0xf]  ;;  %v2103_v48 = vor.u32 %v2670_v41, %v2102_v40 }
  0x24   :  { %1553 = vmatmul.bf16.vlgmr.msra.gmra.mxu3 %v2019_v43  ;;  %v2104_v43 = vld [vmem:[%s3924_s0 + $0xd0] sm:$0xf0]  ;;  %v2688_v21 = vld [vmem:[%s3924_s0 + $0x164] sm:$0xf] }
  0x25   :  { %v2107_v49 = vor.u32 %v2668_v42, %v2104_v43 }
  0x31   :  { %1051 = vmatmul.bf16.gmra.mxu0 %v2023_v52  ;;  %v2118_v52 = vld [vmem:[%s3924_s0 + $0xe0] sm:$0xf] }
  0x32   :  { %1220 = vmatmul.bf16.gmra.mxu1 %v2027_v53  ;;  %v2674_v53 = vld [vmem:[%s3924_s0 + $0xec] sm:$0xf0] }
  0x33   :  { %1389 = vmatmul.bf16.gmra.mxu2 %v2031_v54  ;;  %v2672_v54 = vld [vmem:[%s3924_s0 + $0xe4] sm:$0xf]  ;;  %v2119_v60 = vor.u32 %v2674_v53, %v2118_v52  ;;  %v2686_v52 = vld [vmem:[%s3924_s0 + $0x14c] sm:$0xf0] }
  0x34   :  { %1558 = vmatmul.bf16.gmra.mxu3 %v2035_v55  ;;  %v2120_v55 = vld [vmem:[%s3924_s0 + $0xf0] sm:$0xf0]  ;;  %v2684_v53 = vld [vmem:[%s3924_s0 + $0x144] sm:$0xf] }
  0x35   :  { %v2123_v61 = vor.u32 %v2672_v54, %v2120_v55 }
  0x41   :  { %1056 = vmatmul.bf16.gmra.mxu0 %v2039_v0  ;;  %v2134_v0 = vld [vmem:[%s3924_s0 + $0x100] sm:$0xf] }
  0x42   :  { %1225 = vmatmul.bf16.gmra.mxu1 %v2043_v1  ;;  %v2678_v1 = vld [vmem:[%s3924_s0 + $0x10c] sm:$0xf0] }
  0x43   :  { %1394 = vmatmul.bf16.gmra.mxu2 %v2047_v2  ;;  %v2676_v2 = vld [vmem:[%s3924_s0 + $0x104] sm:$0xf]  ;;  %v2135_v8 = vor.u32 %v2678_v1, %v2134_v0 }
  0x44   :  { %1563 = vmatmul.bf16.gmra.mxu3 %v2051_v3  ;;  %v2136_v3 = vld [vmem:[%s3924_s0 + $0x110] sm:$0xf0] }
  0x45   :  { %v2139_v9 = vor.u32 %v2676_v2, %v2136_v3  ;;  %v2171_v2 = vor.u32 %v2684_v53, %v2168_v56  ;;  %v2692_v53 = vld [vmem:[%s3924_s0 + $0x184] sm:$0xf]  ;;  %v2200_v56 = vld [vmem:[%s3924_s0 + $0x190] sm:$0xf0] }
  0x51   :  { %1061 = vmatmul.bf16.gmra.mxu0 %v2055_v12  ;;  %v2143_v12 = vor.u32 %v2679_v5, %v2142_v4 }
  0x52   :  { %1230 = vmatmul.bf16.gmra.mxu1 %v2059_v13  ;;  %v2147_v13 = vor.u32 %v2677_v6, %v2144_v7  ;;  %v2175_v6 = vor.u32 %v2687_v58, %v2174_v57  ;;  %v2206_v57 = vld [vmem:[%s3924_s0 + $0x188] sm:$0xf]  ;;  %v2695_v58 = vld [vmem:[%s3924_s0 + $0x194] sm:$0xf0] }
  0x53   :  { %1399 = vmatmul.bf16.gmra.mxu2 %v2063_v14 }
  0x54   :  { %1568 = vmatmul.bf16.gmra.mxu3 %v2067_v15 }
  0x61   :  { %1066 = vmatmul.bf16.gmra.mxu0 %v2071_v24  ;;  %v2152_v24 = vld [vmem:[%s3924_s0 + $0x130] sm:$0xf0] }
  0x62   :  { %1235 = vmatmul.bf16.gmra.mxu1 %v2075_v25  ;;  %v2158_v25 = vld [vmem:[%s3924_s0 + $0x128] sm:$0xf]  ;;  %v2155_v33 = vor.u32 %v2680_v23, %v2152_v24  ;;  %v2184_v24 = vld [vmem:[%s3924_s0 + $0x170] sm:$0xf0] }
  0x63   :  { %1404 = vmatmul.bf16.gmra.mxu2 %v2079_v26  ;;  %v2683_v26 = vld [vmem:[%s3924_s0 + $0x134] sm:$0xf0] }
  0x64   :  { %1573 = vmatmul.bf16.gmra.mxu3 %v2083_v27  ;;  %v2681_v27 = vld [vmem:[%s3924_s0 + $0x12c] sm:$0xf] }
  0x71   :  { %1071 = vmatmul.bf16.gmra.mxu0 %v2087_v36 }
  0x72   :  { %1240 = vmatmul.bf16.gmra.mxu1 %v2091_v37  ;;  %v2159_v37 = vor.u32 %v2683_v26, %v2158_v25  ;;  %v2190_v25 = vld [vmem:[%s3924_s0 + $0x168] sm:$0xf]  ;;  %v2691_v26 = vld [vmem:[%s3924_s0 + $0x174] sm:$0xf0] }
  0x73   :  { %1409 = vmatmul.bf16.gmra.mxu2 %v2095_v38  ;;  %v2163_v38 = vor.u32 %v2681_v27, %v2160_v28  ;;  %v2689_v27 = vld [vmem:[%s3924_s0 + $0x16c] sm:$0xf]  ;;  %v2192_v28 = vld [vmem:[%s3924_s0 + $0x178] sm:$0xf0] }
  0x74   :  { %1578 = vmatmul.bf16.gmra.mxu3 %v2099_v39 }
  0x81   :  { %1076 = vmatmul.bf16.gmra.mxu0 %v2103_v48 }
  0x82   :  { %1245 = vmatmul.bf16.gmra.mxu1 %v2107_v49 }
  0x83   :  { %1414 = vmatmul.bf16.gmra.mxu2 %v2111_v50 }
  0x84   :  { %1583 = vmatmul.bf16.gmra.mxu3 %v2115_v51  ;;  %v2166_v51 = vld [vmem:[%s3924_s0 + $0x140] sm:$0xf] }
  0x85   :  { %v2167_v1 = vor.u32 %v2686_v52, %v2166_v51  ;;  %v2198_v51 = vld [vmem:[%s3924_s0 + $0x180] sm:$0xf]  ;;  %v2694_v52 = vld [vmem:[%s3924_s0 + $0x18c] sm:$0xf0] }
  0x91   :  { %1081 = vmatmul.bf16.gmra.mxu0 %v2119_v60  ;;  %v2176_v60 = vld [vmem:[%s3924_s0 + $0x158] sm:$0xf0] }
  0x92   :  { %1250 = vmatmul.bf16.gmra.mxu1 %v2123_v61  ;;  %v2179_v7 = vor.u32 %v2685_v59, %v2176_v60  ;;  %v2693_v59 = vld [vmem:[%s3924_s0 + $0x18c] sm:$0xf]  ;;  %v2208_v60 = vld [vmem:[%s3924_s0 + $0x198] sm:$0xf0] }
  0x93   :  { %1419 = vmatmul.bf16.gmra.mxu2 %v2127_v62 }
  0x94   :  { %1588 = vmatmul.bf16.gmra.mxu3 %v2131_v63 }
  0x9e   :  { %v1047_v10 = vpop.f32.mrf.mxu0 }
  0x9f   :  { %v1216_v11 = vpop.f32.mrf.mxu1 }
  0xa0   :  { %v1217_v14 = vadd.f32 %v1216_v11, %v1047_v10 }
  0xa1   :  { %1086 = vmatmul.bf16.gmra.mxu0 %v2135_v8 }
  0xa2   :  { %1255 = vmatmul.bf16.gmra.mxu1 %v2139_v9 }
  0xa3   :  { %1424 = vmatmul.bf16.gmra.mxu2 %v2143_v12 }
  0xa4   :  { %1593 = vmatmul.bf16.gmra.mxu3 %v2147_v13 }
  0xa6   :  { %v1385_v15 = vpop.f32.mrf.mxu2  ;;  %v1049_v18 = vpop.f32.mrf.mxu0 }
  0xa7   :  { %v1554_v16 = vpop.f32.mrf.mxu3  ;;  %v1386_v17 = vadd.f32 %v1385_v15, %v1217_v14  ;;  %v1218_v19 = vpop.f32.mrf.mxu1 }
  0xa8   :  { %v1219_v29 = vadd.f32 %v1218_v19, %v1049_v18  ;;  %v2182_v19 = vld [vmem:[%s3924_s0 + $0x160] sm:$0xf] }
  0xa9   :  { %v1555_v20 = vadd.f32 %v1554_v16, %v1386_v17 }
  0xab   :  { %1714 = vst [vmem:[%s3925_s2] sm:$0xff] %v1555_v20  ;;  %v1857_v40 = vmul.f32 %v1555_v20, %v1555_v20 }
  0xae   :  { %v1387_v30 = vpop.f32.mrf.mxu2  ;;  %v1052_v35 = vpop.f32.mrf.mxu0 }
  0xaf   :  { %v1556_v31 = vpop.f32.mrf.mxu3  ;;  %v1388_v34 = vadd.f32 %v1387_v30, %v1219_v29  ;;  %v1221_v36 = vpop.f32.mrf.mxu1 }
  0xb0   :  { %v1222_v43 = vadd.f32 %v1221_v36, %v1052_v35 }
  0xb1   :  { %v1557_v39 = vadd.f32 %v1556_v31, %v1388_v34  ;;  %1091 = vmatmul.bf16.gmra.mxu0 %v2151_v32  ;;  %v2187_v34 = vor.u32 %v2688_v21, %v2184_v24  ;;  %v2696_v21 = vld [vmem:[%s3924_s0 + $0x1a4] sm:$0xf]  ;;  %v2216_v24 = vld [vmem:[%s3924_s0 + $0x1b0] sm:$0xf0] }
  0xb2   :  { %1260 = vmatmul.bf16.gmra.mxu1 %v2155_v33 }
  0xb3   :  { %1715 = vst [vmem:[%s3925_s2 + $0x8] sm:$0xff] %v1557_v39  ;;  %v1785_v41 = vadd.f32 %v1557_v39, %v1555_v20  ;;  %v1858_v42 = vmul.f32 %v1557_v39, %v1557_v39  ;;  %1429 = vmatmul.bf16.gmra.mxu2 %v2159_v37  ;;  %v2690_v20 = vld [vmem:[%s3924_s0 + $0x16c] sm:$0xf0]  ;;  %v2195_v39 = vor.u32 %v2689_v27, %v2192_v28  ;;  %v2697_v27 = vld [vmem:[%s3924_s0 + $0x1ac] sm:$0xf] }
  0xb4   :  { %1598 = vmatmul.bf16.gmra.mxu3 %v2163_v38  ;;  %v2183_v33 = vor.u32 %v2690_v20, %v2182_v19  ;;  %v2191_v38 = vor.u32 %v2691_v26, %v2190_v25  ;;  %v2214_v19 = vld [vmem:[%s3924_s0 + $0x1a0] sm:$0xf]  ;;  %v2698_v20 = vld [vmem:[%s3924_s0 + $0x1ac] sm:$0xf0]  ;;  %v2222_v25 = vld [vmem:[%s3924_s0 + $0x1a8] sm:$0xf] }
  0xb5   :  { %v1921_v44 = vadd.f32 %v1858_v42, %v1857_v40  ;;  %v2699_v26 = vld [vmem:[%s3924_s0 + $0x1b4] sm:$0xf0]  ;;  %v2224_v28 = vld [vmem:[%s3924_s0 + $0x1b8] sm:$0xf0] }
  0xb6   :  { %v1390_v45 = vpop.f32.mrf.mxu2  ;;  %v1054_v48 = vpop.f32.mrf.mxu0 }
  0xb7   :  { %v1559_v46 = vpop.f32.mrf.mxu3  ;;  %v1391_v47 = vadd.f32 %v1390_v45, %v1222_v43  ;;  %v1223_v49 = vpop.f32.mrf.mxu1 }
  0xb8   :  { %v1224_v62 = vadd.f32 %v1223_v49, %v1054_v48 }
  0xb9   :  { %v1560_v50 = vadd.f32 %v1559_v46, %v1391_v47 }
  0xbb   :  { %1716 = vst [vmem:[%s3925_s2 + $0x10] sm:$0xff] %v1560_v50  ;;  %v1786_v54 = vadd.f32 %v1785_v41, %v1560_v50  ;;  %v1859_v55 = vmul.f32 %v1560_v50, %v1560_v50 }
  0xbd   :  { %v1922_v61 = vadd.f32 %v1921_v44, %v1859_v55 }
  0xbe   :  { %v1392_v63 = vpop.f32.mrf.mxu2  ;;  %v1057_v4 = vpop.f32.mrf.mxu0 }
  0xbf   :  { %v1561_v0 = vpop.f32.mrf.mxu3  ;;  %v1393_v3 = vadd.f32 %v1392_v63, %v1224_v62  ;;  %v1226_v5 = vpop.f32.mrf.mxu1 }
  0xc0   :  { %v1227_v11 = vadd.f32 %v1226_v5, %v1057_v4 }
  0xc1   :  { %v1562_v8 = vadd.f32 %v1561_v0, %v1393_v3  ;;  %1096 = vmatmul.bf16.gmra.mxu0 %v2167_v1  ;;  %v2199_v1 = vor.u32 %v2694_v52, %v2198_v51  ;;  %v2230_v51 = vld [vmem:[%s3924_s0 + $0x1c0] sm:$0xf]  ;;  %v2702_v52 = vld [vmem:[%s3924_s0 + $0x1cc] sm:$0xf0] }
  0xc2   :  { %1265 = vmatmul.bf16.gmra.mxu1 %v2171_v2  ;;  %v2203_v2 = vor.u32 %v2692_v53, %v2200_v56  ;;  %v2700_v53 = vld [vmem:[%s3924_s0 + $0x1c4] sm:$0xf]  ;;  %v2232_v56 = vld [vmem:[%s3924_s0 + $0x1d0] sm:$0xf0] }
  0xc3   :  { %1717 = vst [vmem:[%s3925_s2 + $0x18] sm:$0xff] %v1562_v8  ;;  %v1787_v9 = vadd.f32 %v1786_v54, %v1562_v8  ;;  %v1860_v10 = vmul.f32 %v1562_v8, %v1562_v8  ;;  %1434 = vmatmul.bf16.gmra.mxu2 %v2175_v6  ;;  %v2207_v6 = vor.u32 %v2695_v58, %v2206_v57  ;;  %v2238_v57 = vld [vmem:[%s3924_s0 + $0x1c8] sm:$0xf]  ;;  %v2703_v58 = vld [vmem:[%s3924_s0 + $0x1d4] sm:$0xf0] }
  0xc4   :  { %1603 = vmatmul.bf16.gmra.mxu3 %v2179_v7  ;;  %v2211_v7 = vor.u32 %v2693_v59, %v2208_v60  ;;  %v2701_v59 = vld [vmem:[%s3924_s0 + $0x1cc] sm:$0xf]  ;;  %v2240_v60 = vld [vmem:[%s3924_s0 + $0x1d8] sm:$0xf0] }
  0xc5   :  { %v1923_v12 = vadd.f32 %v1922_v61, %v1860_v10 }
  0xc6   :  { %v1395_v13 = vpop.f32.mrf.mxu2  ;;  %v1059_v16 = vpop.f32.mrf.mxu0 }
  0xc7   :  { %v1564_v14 = vpop.f32.mrf.mxu3  ;;  %v1396_v15 = vadd.f32 %v1395_v13, %v1227_v11  ;;  %v1228_v17 = vpop.f32.mrf.mxu1 }
  0xc8   :  { %v1229_v30 = vadd.f32 %v1228_v17, %v1059_v16 }
  0xc9   :  { %v1565_v18 = vadd.f32 %v1564_v14, %v1396_v15 }
  0xcb   :  { %1718 = vst [vmem:[%s3925_s2 + $0x20] sm:$0xff] %v1565_v18  ;;  %v1788_v22 = vadd.f32 %v1787_v9, %v1565_v18  ;;  %v1861_v23 = vmul.f32 %v1565_v18, %v1565_v18 }
  0xcd   :  { %v1924_v29 = vadd.f32 %v1923_v12, %v1861_v23 }
  0xce   :  { %v1397_v31 = vpop.f32.mrf.mxu2  ;;  %v1062_v36 = vpop.f32.mrf.mxu0 }
  0xcf   :  { %v1566_v32 = vpop.f32.mrf.mxu3  ;;  %v1398_v35 = vadd.f32 %v1397_v31, %v1229_v30  ;;  %v1231_v37 = vpop.f32.mrf.mxu1 }
  0xd0   :  { %v1232_v43 = vadd.f32 %v1231_v37, %v1062_v36 }
  0xd1   :  { %v1567_v40 = vadd.f32 %v1566_v32, %v1398_v35  ;;  %1101 = vmatmul.bf16.gmra.mxu0 %v2183_v33  ;;  %v2215_v33 = vor.u32 %v2698_v20, %v2214_v19  ;;  %v2246_v19 = vld [vmem:[%s3924_s0 + $0x1e0] sm:$0xf]  ;;  %v2706_v20 = vld [vmem:[%s3924_s0 + $0x1ec] sm:$0xf0] }
  0xd2   :  { %1270 = vmatmul.bf16.gmra.mxu1 %v2187_v34  ;;  %v2219_v34 = vor.u32 %v2696_v21, %v2216_v24  ;;  %v2704_v21 = vld [vmem:[%s3924_s0 + $0x1e4] sm:$0xf]  ;;  %v2248_v24 = vld [vmem:[%s3924_s0 + $0x1f0] sm:$0xf0] }
  0xd3   :  { %1719 = vst [vmem:[%s3925_s2 + $0x28] sm:$0xff] %v1567_v40  ;;  %v1789_v41 = vadd.f32 %v1788_v22, %v1567_v40  ;;  %v1862_v42 = vmul.f32 %v1567_v40, %v1567_v40  ;;  %1439 = vmatmul.bf16.gmra.mxu2 %v2191_v38  ;;  %v2223_v38 = vor.u32 %v2699_v26, %v2222_v25  ;;  %v2254_v25 = vld [vmem:[%s3924_s0 + $0x1e8] sm:$0xf]  ;;  %v2707_v26 = vld [vmem:[%s3924_s0 + $0x1f4] sm:$0xf0] }
  0xd4   :  { %1608 = vmatmul.bf16.gmra.mxu3 %v2195_v39  ;;  %v2227_v39 = vor.u32 %v2697_v27, %v2224_v28  ;;  %v2705_v27 = vld [vmem:[%s3924_s0 + $0x1ec] sm:$0xf]  ;;  %v2256_v28 = vld [vmem:[%s3924_s0 + $0x1f8] sm:$0xf0] }
  0xd5   :  { %v1925_v44 = vadd.f32 %v1924_v29, %v1862_v42 }
  0xd6   :  { %v1400_v45 = vpop.f32.mrf.mxu2  ;;  %v1064_v48 = vpop.f32.mrf.mxu0 }
  0xd7   :  { %v1569_v46 = vpop.f32.mrf.mxu3  ;;  %v1401_v47 = vadd.f32 %v1400_v45, %v1232_v43  ;;  %v1233_v49 = vpop.f32.mrf.mxu1 }
  0xd8   :  { %v1234_v62 = vadd.f32 %v1233_v49, %v1064_v48 }
  0xd9   :  { %v1570_v50 = vadd.f32 %v1569_v46, %v1401_v47 }
  0xdb   :  { %1720 = vst [vmem:[%s3925_s2 + $0x30] sm:$0xff] %v1570_v50  ;;  %v1790_v54 = vadd.f32 %v1789_v41, %v1570_v50  ;;  %v1863_v55 = vmul.f32 %v1570_v50, %v1570_v50 }
  0xdd   :  { %v1926_v61 = vadd.f32 %v1925_v44, %v1863_v55 }
  0xde   :  { %v1402_v63 = vpop.f32.mrf.mxu2  ;;  %v1067_v4 = vpop.f32.mrf.mxu0 }
  0xdf   :  { %v1571_v0 = vpop.f32.mrf.mxu3  ;;  %v1403_v3 = vadd.f32 %v1402_v63, %v1234_v62  ;;  %v1236_v5 = vpop.f32.mrf.mxu1 }
  0xe0   :  { %v1237_v11 = vadd.f32 %v1236_v5, %v1067_v4 }
  0xe1   :  { %v1572_v8 = vadd.f32 %v1571_v0, %v1403_v3  ;;  %1106 = vmatmul.bf16.gmra.mxu0 %v2199_v1  ;;  %v2231_v1 = vor.u32 %v2702_v52, %v2230_v51  ;;  %v2262_v51 = vld [vmem:[%s3924_s0 + $0x200] sm:$0xf]  ;;  %v2710_v52 = vld [vmem:[%s3924_s0 + $0x20c] sm:$0xf0] }
  0xe2   :  { %1275 = vmatmul.bf16.gmra.mxu1 %v2203_v2  ;;  %v2235_v2 = vor.u32 %v2700_v53, %v2232_v56  ;;  %v2708_v53 = vld [vmem:[%s3924_s0 + $0x204] sm:$0xf]  ;;  %v2264_v56 = vld [vmem:[%s3924_s0 + $0x210] sm:$0xf0] }
  0xe3   :  { %1721 = vst [vmem:[%s3925_s2 + $0x38] sm:$0xff] %v1572_v8  ;;  %v1791_v9 = vadd.f32 %v1790_v54, %v1572_v8  ;;  %v1864_v10 = vmul.f32 %v1572_v8, %v1572_v8  ;;  %1444 = vmatmul.bf16.gmra.mxu2 %v2207_v6  ;;  %v2239_v6 = vor.u32 %v2703_v58, %v2238_v57  ;;  %v2270_v57 = vld [vmem:[%s3924_s0 + $0x208] sm:$0xf]  ;;  %v2711_v58 = vld [vmem:[%s3924_s0 + $0x214] sm:$0xf0] }
  0xe4   :  { %1613 = vmatmul.bf16.gmra.mxu3 %v2211_v7  ;;  %v2243_v7 = vor.u32 %v2701_v59, %v2240_v60  ;;  %v2709_v59 = vld [vmem:[%s3924_s0 + $0x20c] sm:$0xf]  ;;  %v2272_v60 = vld [vmem:[%s3924_s0 + $0x218] sm:$0xf0] }
  0xe5   :  { %v1927_v12 = vadd.f32 %v1926_v61, %v1864_v10 }
  0xe6   :  { %v1405_v13 = vpop.f32.mrf.mxu2  ;;  %v1069_v16 = vpop.f32.mrf.mxu0 }
  0xe7   :  { %v1574_v14 = vpop.f32.mrf.mxu3  ;;  %v1406_v15 = vadd.f32 %v1405_v13, %v1237_v11  ;;  %v1238_v17 = vpop.f32.mrf.mxu1 }
  0xe8   :  { %v1239_v30 = vadd.f32 %v1238_v17, %v1069_v16 }
  0xe9   :  { %v1575_v18 = vadd.f32 %v1574_v14, %v1406_v15 }
  0xeb   :  { %1722 = vst [vmem:[%s3925_s2 + $0x40] sm:$0xff] %v1575_v18  ;;  %v1792_v22 = vadd.f32 %v1791_v9, %v1575_v18  ;;  %v1865_v23 = vmul.f32 %v1575_v18, %v1575_v18 }
  0xed   :  { %v1928_v29 = vadd.f32 %v1927_v12, %v1865_v23 }
  0xee   :  { %v1407_v31 = vpop.f32.mrf.mxu2  ;;  %v1072_v36 = vpop.f32.mrf.mxu0 }
  0xef   :  { %v1576_v32 = vpop.f32.mrf.mxu3  ;;  %v1408_v35 = vadd.f32 %v1407_v31, %v1239_v30  ;;  %v1241_v37 = vpop.f32.mrf.mxu1 }
  0xf0   :  { %v1242_v43 = vadd.f32 %v1241_v37, %v1072_v36 }
  0xf1   :  { %v1577_v40 = vadd.f32 %v1576_v32, %v1408_v35  ;;  %1111 = vmatmul.bf16.gmra.mxu0 %v2215_v33  ;;  %v2247_v33 = vor.u32 %v2706_v20, %v2246_v19  ;;  %v2278_v19 = vld [vmem:[%s3924_s0 + $0x220] sm:$0xf]  ;;  %v2714_v20 = vld [vmem:[%s3924_s0 + $0x22c] sm:$0xf0] }
  0xf2   :  { %1280 = vmatmul.bf16.gmra.mxu1 %v2219_v34  ;;  %v2251_v34 = vor.u32 %v2704_v21, %v2248_v24  ;;  %v2712_v21 = vld [vmem:[%s3924_s0 + $0x224] sm:$0xf]  ;;  %v2280_v24 = vld [vmem:[%s3924_s0 + $0x230] sm:$0xf0] }
  0xf3   :  { %1723 = vst [vmem:[%s3925_s2 + $0x48] sm:$0xff] %v1577_v40  ;;  %v1793_v41 = vadd.f32 %v1792_v22, %v1577_v40  ;;  %v1866_v42 = vmul.f32 %v1577_v40, %v1577_v40  ;;  %1449 = vmatmul.bf16.gmra.mxu2 %v2223_v38  ;;  %v2255_v38 = vor.u32 %v2707_v26, %v2254_v25  ;;  %v2286_v25 = vld [vmem:[%s3924_s0 + $0x228] sm:$0xf]  ;;  %v2715_v26 = vld [vmem:[%s3924_s0 + $0x234] sm:$0xf0] }
  0xf4   :  { %1618 = vmatmul.bf16.gmra.mxu3 %v2227_v39  ;;  %v2259_v39 = vor.u32 %v2705_v27, %v2256_v28  ;;  %v2713_v27 = vld [vmem:[%s3924_s0 + $0x22c] sm:$0xf]  ;;  %v2288_v28 = vld [vmem:[%s3924_s0 + $0x238] sm:$0xf0] }
  0xf5   :  { %v1929_v44 = vadd.f32 %v1928_v29, %v1866_v42 }
  0xf6   :  { %v1410_v45 = vpop.f32.mrf.mxu2  ;;  %v1074_v48 = vpop.f32.mrf.mxu0 }
  0xf7   :  { %v1579_v46 = vpop.f32.mrf.mxu3  ;;  %v1411_v47 = vadd.f32 %v1410_v45, %v1242_v43  ;;  %v1243_v49 = vpop.f32.mrf.mxu1 }
  0xf8   :  { %v1244_v62 = vadd.f32 %v1243_v49, %v1074_v48 }
  0xf9   :  { %v1580_v50 = vadd.f32 %v1579_v46, %v1411_v47 }
  0xfb   :  { %1724 = vst [vmem:[%s3925_s2 + $0x50] sm:$0xff] %v1580_v50  ;;  %v1794_v54 = vadd.f32 %v1793_v41, %v1580_v50  ;;  %v1867_v55 = vmul.f32 %v1580_v50, %v1580_v50 }
  0xfd   :  { %v1930_v61 = vadd.f32 %v1929_v44, %v1867_v55 }
  0xfe   :  { %v1412_v63 = vpop.f32.mrf.mxu2  ;;  %v1077_v4 = vpop.f32.mrf.mxu0 }
  0xff   :  { %v1581_v0 = vpop.f32.mrf.mxu3  ;;  %v1413_v3 = vadd.f32 %v1412_v63, %v1244_v62  ;;  %v1246_v5 = vpop.f32.mrf.mxu1 }
 0x100   :  { %v1247_v11 = vadd.f32 %v1246_v5, %v1077_v4 }
 0x101   :  { %v1582_v8 = vadd.f32 %v1581_v0, %v1413_v3  ;;  %1116 = vmatmul.bf16.gmra.mxu0 %v2231_v1  ;;  %v2263_v1 = vor.u32 %v2710_v52, %v2262_v51  ;;  %v2294_v51 = vld [vmem:[%s3924_s0 + $0x240] sm:$0xf]  ;;  %v2718_v52 = vld [vmem:[%s3924_s0 + $0x24c] sm:$0xf0] }
 0x102   :  { %1285 = vmatmul.bf16.gmra.mxu1 %v2235_v2  ;;  %v2267_v2 = vor.u32 %v2708_v53, %v2264_v56  ;;  %v2716_v53 = vld [vmem:[%s3924_s0 + $0x244] sm:$0xf]  ;;  %v2296_v56 = vld [vmem:[%s3924_s0 + $0x250] sm:$0xf0] }
 0x103   :  { %1725 = vst [vmem:[%s3925_s2 + $0x58] sm:$0xff] %v1582_v8  ;;  %v1795_v9 = vadd.f32 %v1794_v54, %v1582_v8  ;;  %v1868_v10 = vmul.f32 %v1582_v8, %v1582_v8  ;;  %1454 = vmatmul.bf16.gmra.mxu2 %v2239_v6  ;;  %v2271_v6 = vor.u32 %v2711_v58, %v2270_v57  ;;  %v2302_v57 = vld [vmem:[%s3924_s0 + $0x248] sm:$0xf]  ;;  %v2719_v58 = vld [vmem:[%s3924_s0 + $0x254] sm:$0xf0] }
 0x104   :  { %1623 = vmatmul.bf16.gmra.mxu3 %v2243_v7  ;;  %v2275_v7 = vor.u32 %v2709_v59, %v2272_v60  ;;  %v2717_v59 = vld [vmem:[%s3924_s0 + $0x24c] sm:$0xf]  ;;  %v2304_v60 = vld [vmem:[%s3924_s0 + $0x258] sm:$0xf0] }
 0x105   :  { %v1931_v12 = vadd.f32 %v1930_v61, %v1868_v10 }
 0x106   :  { %v1415_v13 = vpop.f32.mrf.mxu2  ;;  %v1079_v16 = vpop.f32.mrf.mxu0 }
 0x107   :  { %v1584_v14 = vpop.f32.mrf.mxu3  ;;  %v1416_v15 = vadd.f32 %v1415_v13, %v1247_v11  ;;  %v1248_v17 = vpop.f32.mrf.mxu1 }
 0x108   :  { %v1249_v30 = vadd.f32 %v1248_v17, %v1079_v16 }
 0x109   :  { %v1585_v18 = vadd.f32 %v1584_v14, %v1416_v15 }
 0x10b   :  { %1726 = vst [vmem:[%s3925_s2 + $0x60] sm:$0xff] %v1585_v18  ;;  %v1796_v22 = vadd.f32 %v1795_v9, %v1585_v18  ;;  %v1869_v23 = vmul.f32 %v1585_v18, %v1585_v18 }
 0x10d   :  { %v1932_v29 = vadd.f32 %v1931_v12, %v1869_v23 }
 0x10e   :  { %v1417_v31 = vpop.f32.mrf.mxu2  ;;  %v1082_v36 = vpop.f32.mrf.mxu0 }
 0x10f   :  { %v1586_v32 = vpop.f32.mrf.mxu3  ;;  %v1418_v35 = vadd.f32 %v1417_v31, %v1249_v30  ;;  %v1251_v37 = vpop.f32.mrf.mxu1 }
 0x110   :  { %v1252_v43 = vadd.f32 %v1251_v37, %v1082_v36 }
 0x111   :  { %v1587_v40 = vadd.f32 %v1586_v32, %v1418_v35  ;;  %1121 = vmatmul.bf16.gmra.mxu0 %v2247_v33  ;;  %v2279_v33 = vor.u32 %v2714_v20, %v2278_v19  ;;  %v2310_v19 = vld [vmem:[%s3924_s0 + $0x260] sm:$0xf]  ;;  %v2722_v20 = vld [vmem:[%s3924_s0 + $0x26c] sm:$0xf0] }
 0x112   :  { %1290 = vmatmul.bf16.gmra.mxu1 %v2251_v34  ;;  %v2283_v34 = vor.u32 %v2712_v21, %v2280_v24  ;;  %v2720_v21 = vld [vmem:[%s3924_s0 + $0x264] sm:$0xf]  ;;  %v2312_v24 = vld [vmem:[%s3924_s0 + $0x270] sm:$0xf0] }
 0x113   :  { %1727 = vst [vmem:[%s3925_s2 + $0x68] sm:$0xff] %v1587_v40  ;;  %v1797_v41 = vadd.f32 %v1796_v22, %v1587_v40  ;;  %v1870_v42 = vmul.f32 %v1587_v40, %v1587_v40  ;;  %1459 = vmatmul.bf16.gmra.mxu2 %v2255_v38  ;;  %v2287_v38 = vor.u32 %v2715_v26, %v2286_v25  ;;  %v2318_v25 = vld [vmem:[%s3924_s0 + $0x268] sm:$0xf]  ;;  %v2723_v26 = vld [vmem:[%s3924_s0 + $0x274] sm:$0xf0] }
 0x114   :  { %1628 = vmatmul.bf16.gmra.mxu3 %v2259_v39  ;;  %v2291_v39 = vor.u32 %v2713_v27, %v2288_v28  ;;  %v2721_v27 = vld [vmem:[%s3924_s0 + $0x26c] sm:$0xf]  ;;  %v2320_v28 = vld [vmem:[%s3924_s0 + $0x278] sm:$0xf0] }
 0x115   :  { %v1933_v44 = vadd.f32 %v1932_v29, %v1870_v42 }
 0x116   :  { %v1420_v45 = vpop.f32.mrf.mxu2  ;;  %v1084_v48 = vpop.f32.mrf.mxu0 }
 0x117   :  { %v1589_v46 = vpop.f32.mrf.mxu3  ;;  %v1421_v47 = vadd.f32 %v1420_v45, %v1252_v43  ;;  %v1253_v49 = vpop.f32.mrf.mxu1 }
 0x118   :  { %v1254_v62 = vadd.f32 %v1253_v49, %v1084_v48 }
 0x119   :  { %v1590_v50 = vadd.f32 %v1589_v46, %v1421_v47 }
 0x11b   :  { %1728 = vst [vmem:[%s3925_s2 + $0x70] sm:$0xff] %v1590_v50  ;;  %v1798_v54 = vadd.f32 %v1797_v41, %v1590_v50  ;;  %v1871_v55 = vmul.f32 %v1590_v50, %v1590_v50 }
 0x11d   :  { %v1934_v61 = vadd.f32 %v1933_v44, %v1871_v55 }
 0x11e   :  { %v1422_v63 = vpop.f32.mrf.mxu2  ;;  %v1087_v4 = vpop.f32.mrf.mxu0 }
 0x11f   :  { %v1591_v0 = vpop.f32.mrf.mxu3  ;;  %v1423_v3 = vadd.f32 %v1422_v63, %v1254_v62  ;;  %v1256_v5 = vpop.f32.mrf.mxu1 }
 0x120   :  { %v1257_v11 = vadd.f32 %v1256_v5, %v1087_v4 }
 0x121   :  { %v1592_v8 = vadd.f32 %v1591_v0, %v1423_v3  ;;  %1126 = vmatmul.bf16.gmra.mxu0 %v2263_v1  ;;  %v2295_v1 = vor.u32 %v2718_v52, %v2294_v51  ;;  %v2326_v51 = vld [vmem:[%s3924_s0 + $0x280] sm:$0xf]  ;;  %v2726_v52 = vld [vmem:[%s3924_s0 + $0x28c] sm:$0xf0] }
 0x122   :  { %1295 = vmatmul.bf16.gmra.mxu1 %v2267_v2  ;;  %v2299_v2 = vor.u32 %v2716_v53, %v2296_v56  ;;  %v2724_v53 = vld [vmem:[%s3924_s0 + $0x284] sm:$0xf]  ;;  %v2328_v56 = vld [vmem:[%s3924_s0 + $0x290] sm:$0xf0] }
 0x123   :  { %1729 = vst [vmem:[%s3925_s2 + $0x78] sm:$0xff] %v1592_v8  ;;  %v1799_v9 = vadd.f32 %v1798_v54, %v1592_v8  ;;  %v1872_v10 = vmul.f32 %v1592_v8, %v1592_v8  ;;  %1464 = vmatmul.bf16.gmra.mxu2 %v2271_v6  ;;  %v2303_v6 = vor.u32 %v2719_v58, %v2302_v57  ;;  %v2334_v57 = vld [vmem:[%s3924_s0 + $0x288] sm:$0xf]  ;;  %v2727_v58 = vld [vmem:[%s3924_s0 + $0x294] sm:$0xf0] }
 0x124   :  { %1633 = vmatmul.bf16.gmra.mxu3 %v2275_v7  ;;  %v2307_v7 = vor.u32 %v2717_v59, %v2304_v60  ;;  %v2725_v59 = vld [vmem:[%s3924_s0 + $0x28c] sm:$0xf]  ;;  %v2336_v60 = vld [vmem:[%s3924_s0 + $0x298] sm:$0xf0] }
 0x125   :  { %v1935_v12 = vadd.f32 %v1934_v61, %v1872_v10 }
 0x126   :  { %v1425_v13 = vpop.f32.mrf.mxu2  ;;  %v1089_v16 = vpop.f32.mrf.mxu0 }
 0x127   :  { %v1594_v14 = vpop.f32.mrf.mxu3  ;;  %v1426_v15 = vadd.f32 %v1425_v13, %v1257_v11  ;;  %v1258_v17 = vpop.f32.mrf.mxu1 }
 0x128   :  { %v1259_v30 = vadd.f32 %v1258_v17, %v1089_v16 }
 0x129   :  { %v1595_v18 = vadd.f32 %v1594_v14, %v1426_v15 }
 0x12b   :  { %1730 = vst [vmem:[%s3925_s2 + $0x80] sm:$0xff] %v1595_v18  ;;  %v1800_v22 = vadd.f32 %v1799_v9, %v1595_v18  ;;  %v1873_v23 = vmul.f32 %v1595_v18, %v1595_v18 }
 0x12d   :  { %v1936_v29 = vadd.f32 %v1935_v12, %v1873_v23 }
 0x12e   :  { %v1427_v31 = vpop.f32.mrf.mxu2  ;;  %v1092_v36 = vpop.f32.mrf.mxu0 }
 0x12f   :  { %v1596_v32 = vpop.f32.mrf.mxu3  ;;  %v1428_v35 = vadd.f32 %v1427_v31, %v1259_v30  ;;  %v1261_v37 = vpop.f32.mrf.mxu1 }
 0x130   :  { %v1262_v43 = vadd.f32 %v1261_v37, %v1092_v36 }
 0x131   :  { %v1597_v40 = vadd.f32 %v1596_v32, %v1428_v35  ;;  %1131 = vmatmul.bf16.gmra.mxu0 %v2279_v33  ;;  %v2311_v33 = vor.u32 %v2722_v20, %v2310_v19  ;;  %v2342_v19 = vld [vmem:[%s3924_s0 + $0x2a0] sm:$0xf]  ;;  %v2730_v20 = vld [vmem:[%s3924_s0 + $0x2ac] sm:$0xf0] }
 0x132   :  { %1300 = vmatmul.bf16.gmra.mxu1 %v2283_v34  ;;  %v2315_v34 = vor.u32 %v2720_v21, %v2312_v24  ;;  %v2728_v21 = vld [vmem:[%s3924_s0 + $0x2a4] sm:$0xf]  ;;  %v2344_v24 = vld [vmem:[%s3924_s0 + $0x2b0] sm:$0xf0] }
 0x133   :  { %1731 = vst [vmem:[%s3925_s2 + $0x88] sm:$0xff] %v1597_v40  ;;  %v1801_v41 = vadd.f32 %v1800_v22, %v1597_v40  ;;  %v1874_v42 = vmul.f32 %v1597_v40, %v1597_v40  ;;  %1469 = vmatmul.bf16.gmra.mxu2 %v2287_v38  ;;  %v2319_v38 = vor.u32 %v2723_v26, %v2318_v25  ;;  %v2350_v25 = vld [vmem:[%s3924_s0 + $0x2a8] sm:$0xf]  ;;  %v2731_v26 = vld [vmem:[%s3924_s0 + $0x2b4] sm:$0xf0] }
 0x134   :  { %1638 = vmatmul.bf16.gmra.mxu3 %v2291_v39  ;;  %v2323_v39 = vor.u32 %v2721_v27, %v2320_v28  ;;  %v2729_v27 = vld [vmem:[%s3924_s0 + $0x2ac] sm:$0xf]  ;;  %v2352_v28 = vld [vmem:[%s3924_s0 + $0x2b8] sm:$0xf0] }
 0x135   :  { %v1937_v44 = vadd.f32 %v1936_v29, %v1874_v42 }
 0x136   :  { %v1430_v45 = vpop.f32.mrf.mxu2  ;;  %v1094_v48 = vpop.f32.mrf.mxu0 }
 0x137   :  { %v1599_v46 = vpop.f32.mrf.mxu3  ;;  %v1431_v47 = vadd.f32 %v1430_v45, %v1262_v43  ;;  %v1263_v49 = vpop.f32.mrf.mxu1 }
 0x138   :  { %v1264_v62 = vadd.f32 %v1263_v49, %v1094_v48 }
 0x139   :  { %v1600_v50 = vadd.f32 %v1599_v46, %v1431_v47 }
 0x13b   :  { %1732 = vst [vmem:[%s3925_s2 + $0x90] sm:$0xff] %v1600_v50  ;;  %v1802_v54 = vadd.f32 %v1801_v41, %v1600_v50  ;;  %v1875_v55 = vmul.f32 %v1600_v50, %v1600_v50 }
 0x13d   :  { %v1938_v61 = vadd.f32 %v1937_v44, %v1875_v55 }
 0x13e   :  { %v1432_v63 = vpop.f32.mrf.mxu2  ;;  %v1097_v4 = vpop.f32.mrf.mxu0 }
 0x13f   :  { %v1601_v0 = vpop.f32.mrf.mxu3  ;;  %v1433_v3 = vadd.f32 %v1432_v63, %v1264_v62  ;;  %v1266_v5 = vpop.f32.mrf.mxu1 }
 0x140   :  { %v1267_v11 = vadd.f32 %v1266_v5, %v1097_v4 }
 0x141   :  { %v1602_v8 = vadd.f32 %v1601_v0, %v1433_v3  ;;  %1136 = vmatmul.bf16.gmra.mxu0 %v2295_v1  ;;  %v2327_v1 = vor.u32 %v2726_v52, %v2326_v51  ;;  %v2358_v51 = vld [vmem:[%s3924_s0 + $0x2c0] sm:$0xf]  ;;  %v2734_v52 = vld [vmem:[%s3924_s0 + $0x2cc] sm:$0xf0] }
 0x142   :  { %1305 = vmatmul.bf16.gmra.mxu1 %v2299_v2  ;;  %v2331_v2 = vor.u32 %v2724_v53, %v2328_v56  ;;  %v2732_v53 = vld [vmem:[%s3924_s0 + $0x2c4] sm:$0xf]  ;;  %v2360_v56 = vld [vmem:[%s3924_s0 + $0x2d0] sm:$0xf0] }
 0x143   :  { %1733 = vst [vmem:[%s3925_s2 + $0x98] sm:$0xff] %v1602_v8  ;;  %v1803_v9 = vadd.f32 %v1802_v54, %v1602_v8  ;;  %v1876_v10 = vmul.f32 %v1602_v8, %v1602_v8  ;;  %1474 = vmatmul.bf16.gmra.mxu2 %v2303_v6  ;;  %v2335_v6 = vor.u32 %v2727_v58, %v2334_v57  ;;  %v2366_v57 = vld [vmem:[%s3924_s0 + $0x2c8] sm:$0xf]  ;;  %v2735_v58 = vld [vmem:[%s3924_s0 + $0x2d4] sm:$0xf0] }
 0x144   :  { %1643 = vmatmul.bf16.gmra.mxu3 %v2307_v7  ;;  %v2339_v7 = vor.u32 %v2725_v59, %v2336_v60  ;;  %v2733_v59 = vld [vmem:[%s3924_s0 + $0x2cc] sm:$0xf]  ;;  %v2368_v60 = vld [vmem:[%s3924_s0 + $0x2d8] sm:$0xf0] }
 0x145   :  { %v1939_v12 = vadd.f32 %v1938_v61, %v1876_v10 }
 0x146   :  { %v1435_v13 = vpop.f32.mrf.mxu2  ;;  %v1099_v16 = vpop.f32.mrf.mxu0 }
 0x147   :  { %v1604_v14 = vpop.f32.mrf.mxu3  ;;  %v1436_v15 = vadd.f32 %v1435_v13, %v1267_v11  ;;  %v1268_v17 = vpop.f32.mrf.mxu1 }
 0x148   :  { %v1269_v30 = vadd.f32 %v1268_v17, %v1099_v16 }
 0x149   :  { %v1605_v18 = vadd.f32 %v1604_v14, %v1436_v15 }
 0x14b   :  { %1734 = vst [vmem:[%s3925_s2 + $0xa0] sm:$0xff] %v1605_v18  ;;  %v1804_v22 = vadd.f32 %v1803_v9, %v1605_v18  ;;  %v1877_v23 = vmul.f32 %v1605_v18, %v1605_v18 }
 0x14d   :  { %v1940_v29 = vadd.f32 %v1939_v12, %v1877_v23 }
 0x14e   :  { %v1437_v31 = vpop.f32.mrf.mxu2  ;;  %v1102_v36 = vpop.f32.mrf.mxu0 }
 0x14f   :  { %v1606_v32 = vpop.f32.mrf.mxu3  ;;  %v1438_v35 = vadd.f32 %v1437_v31, %v1269_v30  ;;  %v1271_v37 = vpop.f32.mrf.mxu1 }
 0x150   :  { %v1272_v43 = vadd.f32 %v1271_v37, %v1102_v36 }
 0x151   :  { %v1607_v40 = vadd.f32 %v1606_v32, %v1438_v35  ;;  %1141 = vmatmul.bf16.gmra.mxu0 %v2311_v33  ;;  %v2343_v33 = vor.u32 %v2730_v20, %v2342_v19  ;;  %v2374_v19 = vld [vmem:[%s3924_s0 + $0x2e0] sm:$0xf]  ;;  %v2738_v20 = vld [vmem:[%s3924_s0 + $0x2ec] sm:$0xf0] }
 0x152   :  { %1310 = vmatmul.bf16.gmra.mxu1 %v2315_v34  ;;  %v2347_v34 = vor.u32 %v2728_v21, %v2344_v24  ;;  %v2736_v21 = vld [vmem:[%s3924_s0 + $0x2e4] sm:$0xf]  ;;  %v2376_v24 = vld [vmem:[%s3924_s0 + $0x2f0] sm:$0xf0] }
 0x153   :  { %1735 = vst [vmem:[%s3925_s2 + $0xa8] sm:$0xff] %v1607_v40  ;;  %v1805_v41 = vadd.f32 %v1804_v22, %v1607_v40  ;;  %v1878_v42 = vmul.f32 %v1607_v40, %v1607_v40  ;;  %1479 = vmatmul.bf16.gmra.mxu2 %v2319_v38  ;;  %v2351_v38 = vor.u32 %v2731_v26, %v2350_v25  ;;  %v2382_v25 = vld [vmem:[%s3924_s0 + $0x2e8] sm:$0xf]  ;;  %v2739_v26 = vld [vmem:[%s3924_s0 + $0x2f4] sm:$0xf0] }
 0x154   :  { %1648 = vmatmul.bf16.gmra.mxu3 %v2323_v39  ;;  %v2355_v39 = vor.u32 %v2729_v27, %v2352_v28  ;;  %v2737_v27 = vld [vmem:[%s3924_s0 + $0x2ec] sm:$0xf]  ;;  %v2384_v28 = vld [vmem:[%s3924_s0 + $0x2f8] sm:$0xf0] }
 0x155   :  { %v1941_v44 = vadd.f32 %v1940_v29, %v1878_v42 }
 0x156   :  { %v1440_v45 = vpop.f32.mrf.mxu2  ;;  %v1104_v48 = vpop.f32.mrf.mxu0 }
 0x157   :  { %v1609_v46 = vpop.f32.mrf.mxu3  ;;  %v1441_v47 = vadd.f32 %v1440_v45, %v1272_v43  ;;  %v1273_v49 = vpop.f32.mrf.mxu1 }
 0x158   :  { %v1274_v62 = vadd.f32 %v1273_v49, %v1104_v48 }
 0x159   :  { %v1610_v50 = vadd.f32 %v1609_v46, %v1441_v47 }
 0x15b   :  { %1736 = vst [vmem:[%s3925_s2 + $0xb0] sm:$0xff] %v1610_v50  ;;  %v1806_v54 = vadd.f32 %v1805_v41, %v1610_v50  ;;  %v1879_v55 = vmul.f32 %v1610_v50, %v1610_v50 }
 0x15d   :  { %v1942_v61 = vadd.f32 %v1941_v44, %v1879_v55 }
 0x15e   :  { %v1442_v63 = vpop.f32.mrf.mxu2  ;;  %v1107_v4 = vpop.f32.mrf.mxu0 }
 0x15f   :  { %v1611_v0 = vpop.f32.mrf.mxu3  ;;  %v1443_v3 = vadd.f32 %v1442_v63, %v1274_v62  ;;  %v1276_v5 = vpop.f32.mrf.mxu1 }
 0x160   :  { %v1277_v11 = vadd.f32 %v1276_v5, %v1107_v4 }
 0x161   :  { %v1612_v8 = vadd.f32 %v1611_v0, %v1443_v3  ;;  %1146 = vmatmul.bf16.gmra.mxu0 %v2327_v1  ;;  %v2359_v1 = vor.u32 %v2734_v52, %v2358_v51  ;;  %v2390_v51 = vld [vmem:[%s3924_s0 + $0x300] sm:$0xf]  ;;  %v2742_v52 = vld [vmem:[%s3924_s0 + $0x30c] sm:$0xf0] }
 0x162   :  { %1315 = vmatmul.bf16.gmra.mxu1 %v2331_v2  ;;  %v2363_v2 = vor.u32 %v2732_v53, %v2360_v56  ;;  %v2740_v53 = vld [vmem:[%s3924_s0 + $0x304] sm:$0xf]  ;;  %v2392_v56 = vld [vmem:[%s3924_s0 + $0x310] sm:$0xf0] }
 0x163   :  { %1737 = vst [vmem:[%s3925_s2 + $0xb8] sm:$0xff] %v1612_v8  ;;  %v1807_v9 = vadd.f32 %v1806_v54, %v1612_v8  ;;  %v1880_v10 = vmul.f32 %v1612_v8, %v1612_v8  ;;  %1484 = vmatmul.bf16.gmra.mxu2 %v2335_v6  ;;  %v2367_v6 = vor.u32 %v2735_v58, %v2366_v57  ;;  %v2398_v57 = vld [vmem:[%s3924_s0 + $0x308] sm:$0xf]  ;;  %v2743_v58 = vld [vmem:[%s3924_s0 + $0x314] sm:$0xf0] }
 0x164   :  { %1653 = vmatmul.bf16.gmra.mxu3 %v2339_v7  ;;  %v2371_v7 = vor.u32 %v2733_v59, %v2368_v60  ;;  %v2741_v59 = vld [vmem:[%s3924_s0 + $0x30c] sm:$0xf]  ;;  %v2400_v60 = vld [vmem:[%s3924_s0 + $0x318] sm:$0xf0] }
 0x165   :  { %v1943_v12 = vadd.f32 %v1942_v61, %v1880_v10 }
 0x166   :  { %v1445_v13 = vpop.f32.mrf.mxu2  ;;  %v1109_v16 = vpop.f32.mrf.mxu0 }
 0x167   :  { %v1614_v14 = vpop.f32.mrf.mxu3  ;;  %v1446_v15 = vadd.f32 %v1445_v13, %v1277_v11  ;;  %v1278_v17 = vpop.f32.mrf.mxu1 }
 0x168   :  { %v1279_v30 = vadd.f32 %v1278_v17, %v1109_v16 }
 0x169   :  { %v1615_v18 = vadd.f32 %v1614_v14, %v1446_v15 }
 0x16b   :  { %1738 = vst [vmem:[%s3925_s2 + $0xc0] sm:$0xff] %v1615_v18  ;;  %v1808_v22 = vadd.f32 %v1807_v9, %v1615_v18  ;;  %v1881_v23 = vmul.f32 %v1615_v18, %v1615_v18 }
 0x16d   :  { %v1944_v29 = vadd.f32 %v1943_v12, %v1881_v23 }
 0x16e   :  { %v1447_v31 = vpop.f32.mrf.mxu2  ;;  %v1112_v36 = vpop.f32.mrf.mxu0 }
 0x16f   :  { %v1616_v32 = vpop.f32.mrf.mxu3  ;;  %v1448_v35 = vadd.f32 %v1447_v31, %v1279_v30  ;;  %v1281_v37 = vpop.f32.mrf.mxu1 }
 0x170   :  { %v1282_v43 = vadd.f32 %v1281_v37, %v1112_v36 }
 0x171   :  { %v1617_v40 = vadd.f32 %v1616_v32, %v1448_v35  ;;  %1151 = vmatmul.bf16.gmra.mxu0 %v2343_v33  ;;  %v2375_v33 = vor.u32 %v2738_v20, %v2374_v19  ;;  %v2406_v19 = vld [vmem:[%s3924_s0 + $0x320] sm:$0xf]  ;;  %v2746_v20 = vld [vmem:[%s3924_s0 + $0x32c] sm:$0xf0] }
 0x172   :  { %1320 = vmatmul.bf16.gmra.mxu1 %v2347_v34  ;;  %v2379_v34 = vor.u32 %v2736_v21, %v2376_v24  ;;  %v2744_v21 = vld [vmem:[%s3924_s0 + $0x324] sm:$0xf]  ;;  %v2408_v24 = vld [vmem:[%s3924_s0 + $0x330] sm:$0xf0] }
 0x173   :  { %1739 = vst [vmem:[%s3925_s2 + $0xc8] sm:$0xff] %v1617_v40  ;;  %v1809_v41 = vadd.f32 %v1808_v22, %v1617_v40  ;;  %v1882_v42 = vmul.f32 %v1617_v40, %v1617_v40  ;;  %1489 = vmatmul.bf16.gmra.mxu2 %v2351_v38  ;;  %v2383_v38 = vor.u32 %v2739_v26, %v2382_v25  ;;  %v2414_v25 = vld [vmem:[%s3924_s0 + $0x328] sm:$0xf]  ;;  %v2747_v26 = vld [vmem:[%s3924_s0 + $0x334] sm:$0xf0] }
 0x174   :  { %1658 = vmatmul.bf16.gmra.mxu3 %v2355_v39  ;;  %v2387_v39 = vor.u32 %v2737_v27, %v2384_v28  ;;  %v2745_v27 = vld [vmem:[%s3924_s0 + $0x32c] sm:$0xf]  ;;  %v2416_v28 = vld [vmem:[%s3924_s0 + $0x338] sm:$0xf0] }
 0x175   :  { %v1945_v44 = vadd.f32 %v1944_v29, %v1882_v42 }
 0x176   :  { %v1450_v45 = vpop.f32.mrf.mxu2  ;;  %v1114_v48 = vpop.f32.mrf.mxu0 }
 0x177   :  { %v1619_v46 = vpop.f32.mrf.mxu3  ;;  %v1451_v47 = vadd.f32 %v1450_v45, %v1282_v43  ;;  %v1283_v49 = vpop.f32.mrf.mxu1 }
 0x178   :  { %v1284_v62 = vadd.f32 %v1283_v49, %v1114_v48 }
 0x179   :  { %v1620_v50 = vadd.f32 %v1619_v46, %v1451_v47 }
 0x17b   :  { %1740 = vst [vmem:[%s3925_s2 + $0xd0] sm:$0xff] %v1620_v50  ;;  %v1810_v54 = vadd.f32 %v1809_v41, %v1620_v50  ;;  %v1883_v55 = vmul.f32 %v1620_v50, %v1620_v50 }
 0x17d   :  { %v1946_v61 = vadd.f32 %v1945_v44, %v1883_v55 }
 0x17e   :  { %v1452_v63 = vpop.f32.mrf.mxu2  ;;  %v1117_v4 = vpop.f32.mrf.mxu0 }
 0x17f   :  { %v1621_v0 = vpop.f32.mrf.mxu3  ;;  %v1453_v3 = vadd.f32 %v1452_v63, %v1284_v62  ;;  %v1286_v5 = vpop.f32.mrf.mxu1 }
 0x180   :  { %v1287_v11 = vadd.f32 %v1286_v5, %v1117_v4 }
 0x181   :  { %v1622_v8 = vadd.f32 %v1621_v0, %v1453_v3  ;;  %1156 = vmatmul.bf16.gmra.mxu0 %v2359_v1  ;;  %v2391_v1 = vor.u32 %v2742_v52, %v2390_v51  ;;  %v2422_v51 = vld [vmem:[%s3924_s0 + $0x340] sm:$0xf]  ;;  %v2750_v52 = vld [vmem:[%s3924_s0 + $0x34c] sm:$0xf0] }
 0x182   :  { %1325 = vmatmul.bf16.gmra.mxu1 %v2363_v2  ;;  %v2395_v2 = vor.u32 %v2740_v53, %v2392_v56  ;;  %v2748_v53 = vld [vmem:[%s3924_s0 + $0x344] sm:$0xf]  ;;  %v2424_v56 = vld [vmem:[%s3924_s0 + $0x350] sm:$0xf0] }
 0x183   :  { %1741 = vst [vmem:[%s3925_s2 + $0xd8] sm:$0xff] %v1622_v8  ;;  %v1811_v9 = vadd.f32 %v1810_v54, %v1622_v8  ;;  %v1884_v10 = vmul.f32 %v1622_v8, %v1622_v8  ;;  %1494 = vmatmul.bf16.gmra.mxu2 %v2367_v6  ;;  %v2399_v6 = vor.u32 %v2743_v58, %v2398_v57  ;;  %v2430_v57 = vld [vmem:[%s3924_s0 + $0x348] sm:$0xf]  ;;  %v2751_v58 = vld [vmem:[%s3924_s0 + $0x354] sm:$0xf0] }
 0x184   :  { %1663 = vmatmul.bf16.gmra.mxu3 %v2371_v7  ;;  %v2403_v7 = vor.u32 %v2741_v59, %v2400_v60  ;;  %v2749_v59 = vld [vmem:[%s3924_s0 + $0x34c] sm:$0xf]  ;;  %v2432_v60 = vld [vmem:[%s3924_s0 + $0x358] sm:$0xf0] }
 0x185   :  { %v1947_v12 = vadd.f32 %v1946_v61, %v1884_v10 }
 0x186   :  { %v1455_v13 = vpop.f32.mrf.mxu2  ;;  %v1119_v16 = vpop.f32.mrf.mxu0 }
 0x187   :  { %v1624_v14 = vpop.f32.mrf.mxu3  ;;  %v1456_v15 = vadd.f32 %v1455_v13, %v1287_v11  ;;  %v1288_v17 = vpop.f32.mrf.mxu1 }
 0x188   :  { %v1289_v30 = vadd.f32 %v1288_v17, %v1119_v16 }
 0x189   :  { %v1625_v18 = vadd.f32 %v1624_v14, %v1456_v15 }
 0x18b   :  { %1742 = vst [vmem:[%s3925_s2 + $0xe0] sm:$0xff] %v1625_v18  ;;  %v1812_v22 = vadd.f32 %v1811_v9, %v1625_v18  ;;  %v1885_v23 = vmul.f32 %v1625_v18, %v1625_v18 }
 0x18d   :  { %v1948_v29 = vadd.f32 %v1947_v12, %v1885_v23 }
 0x18e   :  { %v1457_v31 = vpop.f32.mrf.mxu2  ;;  %v1122_v36 = vpop.f32.mrf.mxu0 }
 0x18f   :  { %v1626_v32 = vpop.f32.mrf.mxu3  ;;  %v1458_v35 = vadd.f32 %v1457_v31, %v1289_v30  ;;  %v1291_v37 = vpop.f32.mrf.mxu1 }
 0x190   :  { %v1292_v43 = vadd.f32 %v1291_v37, %v1122_v36 }
 0x191   :  { %v1627_v40 = vadd.f32 %v1626_v32, %v1458_v35  ;;  %1161 = vmatmul.bf16.gmra.mxu0 %v2375_v33  ;;  %v2407_v33 = vor.u32 %v2746_v20, %v2406_v19  ;;  %v2438_v19 = vld [vmem:[%s3924_s0 + $0x360] sm:$0xf]  ;;  %v2754_v20 = vld [vmem:[%s3924_s0 + $0x36c] sm:$0xf0] }
 0x192   :  { %1330 = vmatmul.bf16.gmra.mxu1 %v2379_v34  ;;  %v2411_v34 = vor.u32 %v2744_v21, %v2408_v24  ;;  %v2752_v21 = vld [vmem:[%s3924_s0 + $0x364] sm:$0xf]  ;;  %v2440_v24 = vld [vmem:[%s3924_s0 + $0x370] sm:$0xf0] }
 0x193   :  { %1743 = vst [vmem:[%s3925_s2 + $0xe8] sm:$0xff] %v1627_v40  ;;  %v1813_v41 = vadd.f32 %v1812_v22, %v1627_v40  ;;  %v1886_v42 = vmul.f32 %v1627_v40, %v1627_v40  ;;  %1499 = vmatmul.bf16.gmra.mxu2 %v2383_v38  ;;  %v2415_v38 = vor.u32 %v2747_v26, %v2414_v25  ;;  %v2446_v25 = vld [vmem:[%s3924_s0 + $0x368] sm:$0xf]  ;;  %v2755_v26 = vld [vmem:[%s3924_s0 + $0x374] sm:$0xf0] }
 0x194   :  { %1668 = vmatmul.bf16.gmra.mxu3 %v2387_v39  ;;  %v2419_v39 = vor.u32 %v2745_v27, %v2416_v28  ;;  %v2753_v27 = vld [vmem:[%s3924_s0 + $0x36c] sm:$0xf]  ;;  %v2448_v28 = vld [vmem:[%s3924_s0 + $0x378] sm:$0xf0] }
 0x195   :  { %v1949_v44 = vadd.f32 %v1948_v29, %v1886_v42 }
 0x196   :  { %v1460_v45 = vpop.f32.mrf.mxu2  ;;  %v1124_v48 = vpop.f32.mrf.mxu0 }
 0x197   :  { %v1629_v46 = vpop.f32.mrf.mxu3  ;;  %v1461_v47 = vadd.f32 %v1460_v45, %v1292_v43  ;;  %v1293_v49 = vpop.f32.mrf.mxu1 }
 0x198   :  { %v1294_v62 = vadd.f32 %v1293_v49, %v1124_v48 }
 0x199   :  { %v1630_v50 = vadd.f32 %v1629_v46, %v1461_v47 }
 0x19b   :  { %1744 = vst [vmem:[%s3925_s2 + $0xf0] sm:$0xff] %v1630_v50  ;;  %v1814_v54 = vadd.f32 %v1813_v41, %v1630_v50  ;;  %v1887_v55 = vmul.f32 %v1630_v50, %v1630_v50 }
 0x19d   :  { %v1950_v61 = vadd.f32 %v1949_v44, %v1887_v55 }
 0x19e   :  { %v1462_v63 = vpop.f32.mrf.mxu2  ;;  %v1127_v4 = vpop.f32.mrf.mxu0 }
 0x19f   :  { %v1631_v0 = vpop.f32.mrf.mxu3  ;;  %v1463_v3 = vadd.f32 %v1462_v63, %v1294_v62  ;;  %v1296_v5 = vpop.f32.mrf.mxu1 }
 0x1a0   :  { %v1297_v11 = vadd.f32 %v1296_v5, %v1127_v4 }
 0x1a1   :  { %v1632_v8 = vadd.f32 %v1631_v0, %v1463_v3  ;;  %1166 = vmatmul.bf16.gmra.mxu0 %v2391_v1  ;;  %v2423_v1 = vor.u32 %v2750_v52, %v2422_v51  ;;  %v2454_v51 = vld [vmem:[%s3924_s0 + $0x380] sm:$0xf]  ;;  %v2758_v52 = vld [vmem:[%s3924_s0 + $0x38c] sm:$0xf0] }
 0x1a2   :  { %1335 = vmatmul.bf16.gmra.mxu1 %v2395_v2  ;;  %v2427_v2 = vor.u32 %v2748_v53, %v2424_v56  ;;  %v2756_v53 = vld [vmem:[%s3924_s0 + $0x384] sm:$0xf]  ;;  %v2456_v56 = vld [vmem:[%s3924_s0 + $0x390] sm:$0xf0] }
 0x1a3   :  { %1745 = vst [vmem:[%s3925_s2 + $0xf8] sm:$0xff] %v1632_v8  ;;  %v1815_v9 = vadd.f32 %v1814_v54, %v1632_v8  ;;  %v1888_v10 = vmul.f32 %v1632_v8, %v1632_v8  ;;  %1504 = vmatmul.bf16.gmra.mxu2 %v2399_v6  ;;  %v2431_v6 = vor.u32 %v2751_v58, %v2430_v57  ;;  %v2462_v57 = vld [vmem:[%s3924_s0 + $0x388] sm:$0xf]  ;;  %v2759_v58 = vld [vmem:[%s3924_s0 + $0x394] sm:$0xf0] }
 0x1a4   :  { %1673 = vmatmul.bf16.gmra.mxu3 %v2403_v7  ;;  %v2435_v7 = vor.u32 %v2749_v59, %v2432_v60  ;;  %v2757_v59 = vld [vmem:[%s3924_s0 + $0x38c] sm:$0xf]  ;;  %v2464_v60 = vld [vmem:[%s3924_s0 + $0x398] sm:$0xf0] }
 0x1a5   :  { %v1951_v12 = vadd.f32 %v1950_v61, %v1888_v10 }
 0x1a6   :  { %v1465_v13 = vpop.f32.mrf.mxu2  ;;  %v1129_v16 = vpop.f32.mrf.mxu0 }
 0x1a7   :  { %v1634_v14 = vpop.f32.mrf.mxu3  ;;  %v1466_v15 = vadd.f32 %v1465_v13, %v1297_v11  ;;  %v1298_v17 = vpop.f32.mrf.mxu1 }
 0x1a8   :  { %v1299_v30 = vadd.f32 %v1298_v17, %v1129_v16 }
 0x1a9   :  { %v1635_v18 = vadd.f32 %v1634_v14, %v1466_v15 }
 0x1ab   :  { %1746 = vst [vmem:[%s3925_s2 + $0x100] sm:$0xff] %v1635_v18  ;;  %v1816_v22 = vadd.f32 %v1815_v9, %v1635_v18  ;;  %v1889_v23 = vmul.f32 %v1635_v18, %v1635_v18 }
 0x1ad   :  { %v1952_v29 = vadd.f32 %v1951_v12, %v1889_v23 }
 0x1ae   :  { %v1467_v31 = vpop.f32.mrf.mxu2  ;;  %v1132_v36 = vpop.f32.mrf.mxu0 }
 0x1af   :  { %v1636_v32 = vpop.f32.mrf.mxu3  ;;  %v1468_v35 = vadd.f32 %v1467_v31, %v1299_v30  ;;  %v1301_v37 = vpop.f32.mrf.mxu1 }
 0x1b0   :  { %v1302_v43 = vadd.f32 %v1301_v37, %v1132_v36 }
 0x1b1   :  { %v1637_v40 = vadd.f32 %v1636_v32, %v1468_v35  ;;  %1171 = vmatmul.bf16.gmra.mxu0 %v2407_v33  ;;  %v2439_v33 = vor.u32 %v2754_v20, %v2438_v19  ;;  %v2470_v19 = vld [vmem:[%s3924_s0 + $0x3a0] sm:$0xf]  ;;  %v2762_v20 = vld [vmem:[%s3924_s0 + $0x3ac] sm:$0xf0] }
 0x1b2   :  { %1340 = vmatmul.bf16.gmra.mxu1 %v2411_v34  ;;  %v2443_v34 = vor.u32 %v2752_v21, %v2440_v24  ;;  %v2760_v21 = vld [vmem:[%s3924_s0 + $0x3a4] sm:$0xf]  ;;  %v2472_v24 = vld [vmem:[%s3924_s0 + $0x3b0] sm:$0xf0] }
 0x1b3   :  { %1747 = vst [vmem:[%s3925_s2 + $0x108] sm:$0xff] %v1637_v40  ;;  %v1817_v41 = vadd.f32 %v1816_v22, %v1637_v40  ;;  %v1890_v42 = vmul.f32 %v1637_v40, %v1637_v40  ;;  %1509 = vmatmul.bf16.gmra.mxu2 %v2415_v38  ;;  %v2447_v38 = vor.u32 %v2755_v26, %v2446_v25  ;;  %v2478_v25 = vld [vmem:[%s3924_s0 + $0x3a8] sm:$0xf]  ;;  %v2763_v26 = vld [vmem:[%s3924_s0 + $0x3b4] sm:$0xf0] }
 0x1b4   :  { %1678 = vmatmul.bf16.gmra.mxu3 %v2419_v39  ;;  %v2451_v39 = vor.u32 %v2753_v27, %v2448_v28  ;;  %v2761_v27 = vld [vmem:[%s3924_s0 + $0x3ac] sm:$0xf]  ;;  %v2480_v28 = vld [vmem:[%s3924_s0 + $0x3b8] sm:$0xf0] }
 0x1b5   :  { %v1953_v44 = vadd.f32 %v1952_v29, %v1890_v42 }
 0x1b6   :  { %v1470_v45 = vpop.f32.mrf.mxu2  ;;  %v1134_v48 = vpop.f32.mrf.mxu0 }
 0x1b7   :  { %v1639_v46 = vpop.f32.mrf.mxu3  ;;  %v1471_v47 = vadd.f32 %v1470_v45, %v1302_v43  ;;  %v1303_v49 = vpop.f32.mrf.mxu1 }
 0x1b8   :  { %v1304_v62 = vadd.f32 %v1303_v49, %v1134_v48 }
 0x1b9   :  { %v1640_v50 = vadd.f32 %v1639_v46, %v1471_v47 }
 0x1bb   :  { %1748 = vst [vmem:[%s3925_s2 + $0x110] sm:$0xff] %v1640_v50  ;;  %v1818_v54 = vadd.f32 %v1817_v41, %v1640_v50  ;;  %v1891_v55 = vmul.f32 %v1640_v50, %v1640_v50 }
 0x1bd   :  { %v1954_v61 = vadd.f32 %v1953_v44, %v1891_v55 }
 0x1be   :  { %v1472_v63 = vpop.f32.mrf.mxu2  ;;  %v1137_v4 = vpop.f32.mrf.mxu0 }
 0x1bf   :  { %v1641_v0 = vpop.f32.mrf.mxu3  ;;  %v1473_v3 = vadd.f32 %v1472_v63, %v1304_v62  ;;  %v1306_v5 = vpop.f32.mrf.mxu1 }
 0x1c0   :  { %v1307_v11 = vadd.f32 %v1306_v5, %v1137_v4 }
 0x1c1   :  { %v1642_v8 = vadd.f32 %v1641_v0, %v1473_v3  ;;  %1176 = vmatmul.bf16.gmra.mxu0 %v2423_v1  ;;  %v2455_v1 = vor.u32 %v2758_v52, %v2454_v51  ;;  %v2486_v51 = vld [vmem:[%s3924_s0 + $0x3c0] sm:$0xf]  ;;  %v2766_v52 = vld [vmem:[%s3924_s0 + $0x3cc] sm:$0xf0] }
 0x1c2   :  { %1345 = vmatmul.bf16.gmra.mxu1 %v2427_v2  ;;  %v2459_v2 = vor.u32 %v2756_v53, %v2456_v56  ;;  %v2764_v53 = vld [vmem:[%s3924_s0 + $0x3c4] sm:$0xf]  ;;  %v2488_v56 = vld [vmem:[%s3924_s0 + $0x3d0] sm:$0xf0] }
 0x1c3   :  { %1749 = vst [vmem:[%s3925_s2 + $0x118] sm:$0xff] %v1642_v8  ;;  %v1819_v9 = vadd.f32 %v1818_v54, %v1642_v8  ;;  %v1892_v10 = vmul.f32 %v1642_v8, %v1642_v8  ;;  %1514 = vmatmul.bf16.gmra.mxu2 %v2431_v6  ;;  %v2463_v6 = vor.u32 %v2759_v58, %v2462_v57  ;;  %v2494_v57 = vld [vmem:[%s3924_s0 + $0x3c8] sm:$0xf]  ;;  %v2767_v58 = vld [vmem:[%s3924_s0 + $0x3d4] sm:$0xf0] }
 0x1c4   :  { %1683 = vmatmul.bf16.gmra.mxu3 %v2435_v7  ;;  %v2467_v7 = vor.u32 %v2757_v59, %v2464_v60  ;;  %v2765_v59 = vld [vmem:[%s3924_s0 + $0x3cc] sm:$0xf]  ;;  %v2496_v60 = vld [vmem:[%s3924_s0 + $0x3d8] sm:$0xf0] }
 0x1c5   :  { %v1955_v12 = vadd.f32 %v1954_v61, %v1892_v10 }
 0x1c6   :  { %v1475_v13 = vpop.f32.mrf.mxu2  ;;  %v1139_v16 = vpop.f32.mrf.mxu0 }
 0x1c7   :  { %v1644_v14 = vpop.f32.mrf.mxu3  ;;  %v1476_v15 = vadd.f32 %v1475_v13, %v1307_v11  ;;  %v1308_v17 = vpop.f32.mrf.mxu1 }
 0x1c8   :  { %v1309_v30 = vadd.f32 %v1308_v17, %v1139_v16 }
 0x1c9   :  { %v1645_v18 = vadd.f32 %v1644_v14, %v1476_v15 }
 0x1cb   :  { %1750 = vst [vmem:[%s3925_s2 + $0x120] sm:$0xff] %v1645_v18  ;;  %v1820_v22 = vadd.f32 %v1819_v9, %v1645_v18  ;;  %v1893_v23 = vmul.f32 %v1645_v18, %v1645_v18 }
 0x1cd   :  { %v1956_v29 = vadd.f32 %v1955_v12, %v1893_v23 }
 0x1ce   :  { %v1477_v31 = vpop.f32.mrf.mxu2  ;;  %v1142_v36 = vpop.f32.mrf.mxu0 }
 0x1cf   :  { %v1646_v32 = vpop.f32.mrf.mxu3  ;;  %v1478_v35 = vadd.f32 %v1477_v31, %v1309_v30  ;;  %v1311_v37 = vpop.f32.mrf.mxu1 }
 0x1d0   :  { %v1312_v43 = vadd.f32 %v1311_v37, %v1142_v36 }
 0x1d1   :  { %v1647_v40 = vadd.f32 %v1646_v32, %v1478_v35  ;;  %1181 = vmatmul.bf16.gmra.mxu0 %v2439_v33  ;;  %v2471_v33 = vor.u32 %v2762_v20, %v2470_v19  ;;  %v2502_v19 = vld [vmem:[%s3924_s0 + $0x3e0] sm:$0xf]  ;;  %v2770_v20 = vld [vmem:[%s3924_s0 + $0x3ec] sm:$0xf0] }
 0x1d2   :  { %1350 = vmatmul.bf16.gmra.mxu1 %v2443_v34  ;;  %v2475_v34 = vor.u32 %v2760_v21, %v2472_v24  ;;  %v2768_v21 = vld [vmem:[%s3924_s0 + $0x3e4] sm:$0xf]  ;;  %v2504_v24 = vld [vmem:[%s3924_s0 + $0x3f0] sm:$0xf0] }
 0x1d3   :  { %1751 = vst [vmem:[%s3925_s2 + $0x128] sm:$0xff] %v1647_v40  ;;  %v1821_v41 = vadd.f32 %v1820_v22, %v1647_v40  ;;  %v1894_v42 = vmul.f32 %v1647_v40, %v1647_v40  ;;  %1519 = vmatmul.bf16.gmra.mxu2 %v2447_v38  ;;  %v2479_v38 = vor.u32 %v2763_v26, %v2478_v25  ;;  %v2510_v25 = vld [vmem:[%s3924_s0 + $0x3e8] sm:$0xf]  ;;  %v2771_v26 = vld [vmem:[%s3924_s0 + $0x3f4] sm:$0xf0] }
 0x1d4   :  { %1688 = vmatmul.bf16.gmra.mxu3 %v2451_v39  ;;  %v2483_v39 = vor.u32 %v2761_v27, %v2480_v28  ;;  %v2769_v27 = vld [vmem:[%s3924_s0 + $0x3ec] sm:$0xf]  ;;  %v2512_v28 = vld [vmem:[%s3924_s0 + $0x3f8] sm:$0xf0] }
 0x1d5   :  { %v1957_v44 = vadd.f32 %v1956_v29, %v1894_v42 }
 0x1d6   :  { %v1480_v45 = vpop.f32.mrf.mxu2  ;;  %v1144_v48 = vpop.f32.mrf.mxu0 }
 0x1d7   :  { %v1649_v46 = vpop.f32.mrf.mxu3  ;;  %v1481_v47 = vadd.f32 %v1480_v45, %v1312_v43  ;;  %v1313_v49 = vpop.f32.mrf.mxu1 }
 0x1d8   :  { %v1314_v62 = vadd.f32 %v1313_v49, %v1144_v48 }
 0x1d9   :  { %v1650_v50 = vadd.f32 %v1649_v46, %v1481_v47 }
 0x1db   :  { %1752 = vst [vmem:[%s3925_s2 + $0x130] sm:$0xff] %v1650_v50  ;;  %v1822_v54 = vadd.f32 %v1821_v41, %v1650_v50  ;;  %v1895_v55 = vmul.f32 %v1650_v50, %v1650_v50 }
 0x1dd   :  { %v1958_v61 = vadd.f32 %v1957_v44, %v1895_v55 }
 0x1de   :  { %v1482_v63 = vpop.f32.mrf.mxu2  ;;  %v1147_v4 = vpop.f32.mrf.mxu0 }
 0x1df   :  { %v1651_v0 = vpop.f32.mrf.mxu3  ;;  %v1483_v3 = vadd.f32 %v1482_v63, %v1314_v62  ;;  %v1316_v5 = vpop.f32.mrf.mxu1 }
 0x1e0   :  { %v1317_v11 = vadd.f32 %v1316_v5, %v1147_v4 }
 0x1e1   :  { %v1652_v8 = vadd.f32 %v1651_v0, %v1483_v3  ;;  %1186 = vmatmul.bf16.gmra.mxu0 %v2455_v1  ;;  %v2487_v1 = vor.u32 %v2766_v52, %v2486_v51 }
 0x1e2   :  { %1355 = vmatmul.bf16.gmra.mxu1 %v2459_v2  ;;  %v2491_v2 = vor.u32 %v2764_v53, %v2488_v56 }
 0x1e3   :  { %1753 = vst [vmem:[%s3925_s2 + $0x138] sm:$0xff] %v1652_v8  ;;  %v1823_v9 = vadd.f32 %v1822_v54, %v1652_v8  ;;  %v1896_v10 = vmul.f32 %v1652_v8, %v1652_v8  ;;  %1524 = vmatmul.bf16.gmra.mxu2 %v2463_v6  ;;  %v2495_v6 = vor.u32 %v2767_v58, %v2494_v57 }
 0x1e4   :  { %1693 = vmatmul.bf16.gmra.mxu3 %v2467_v7  ;;  %v2499_v7 = vor.u32 %v2765_v59, %v2496_v60 }
 0x1e5   :  { %v1959_v12 = vadd.f32 %v1958_v61, %v1896_v10 }
 0x1e6   :  { %v1485_v13 = vpop.f32.mrf.mxu2  ;;  %v1149_v16 = vpop.f32.mrf.mxu0 }
 0x1e7   :  { %v1654_v14 = vpop.f32.mrf.mxu3  ;;  %v1486_v15 = vadd.f32 %v1485_v13, %v1317_v11  ;;  %v1318_v17 = vpop.f32.mrf.mxu1 }
 0x1e8   :  { %v1319_v30 = vadd.f32 %v1318_v17, %v1149_v16 }
 0x1e9   :  { %v1655_v18 = vadd.f32 %v1654_v14, %v1486_v15 }
 0x1eb   :  { %1754 = vst [vmem:[%s3925_s2 + $0x140] sm:$0xff] %v1655_v18  ;;  %v1824_v22 = vadd.f32 %v1823_v9, %v1655_v18  ;;  %v1897_v23 = vmul.f32 %v1655_v18, %v1655_v18 }
 0x1ed   :  { %v1960_v29 = vadd.f32 %v1959_v12, %v1897_v23 }
 0x1ee   :  { %v1487_v31 = vpop.f32.mrf.mxu2  ;;  %v1152_v36 = vpop.f32.mrf.mxu0 }
 0x1ef   :  { %v1656_v32 = vpop.f32.mrf.mxu3  ;;  %v1488_v35 = vadd.f32 %v1487_v31, %v1319_v30  ;;  %v1321_v37 = vpop.f32.mrf.mxu1 }
 0x1f0   :  { %v1322_v43 = vadd.f32 %v1321_v37, %v1152_v36 }
 0x1f1   :  { %v1657_v40 = vadd.f32 %v1656_v32, %v1488_v35  ;;  %1191 = vmatmul.bf16.gmra.mxu0 %v2471_v33  ;;  %v2503_v33 = vor.u32 %v2770_v20, %v2502_v19 }
 0x1f2   :  { %1360 = vmatmul.bf16.gmra.mxu1 %v2475_v34  ;;  %v2507_v34 = vor.u32 %v2768_v21, %v2504_v24 }
 0x1f3   :  { %1755 = vst [vmem:[%s3925_s2 + $0x148] sm:$0xff] %v1657_v40  ;;  %v1825_v41 = vadd.f32 %v1824_v22, %v1657_v40  ;;  %v1898_v42 = vmul.f32 %v1657_v40, %v1657_v40  ;;  %1529 = vmatmul.bf16.gmra.mxu2 %v2479_v38  ;;  %v2511_v38 = vor.u32 %v2771_v26, %v2510_v25 }
 0x1f4   :  { %1698 = vmatmul.bf16.gmra.mxu3 %v2483_v39  ;;  %v2515_v39 = vor.u32 %v2769_v27, %v2512_v28 }
 0x1f5   :  { %v1961_v44 = vadd.f32 %v1960_v29, %v1898_v42 }
 0x1f6   :  { %v1490_v45 = vpop.f32.mrf.mxu2  ;;  %v1154_v48 = vpop.f32.mrf.mxu0 }
 0x1f7   :  { %v1659_v46 = vpop.f32.mrf.mxu3  ;;  %v1491_v47 = vadd.f32 %v1490_v45, %v1322_v43  ;;  %v1323_v49 = vpop.f32.mrf.mxu1 }
 0x1f8   :  { %v1324_v62 = vadd.f32 %v1323_v49, %v1154_v48 }
 0x1f9   :  { %v1660_v50 = vadd.f32 %v1659_v46, %v1491_v47 }
 0x1fb   :  { %1756 = vst [vmem:[%s3925_s2 + $0x150] sm:$0xff] %v1660_v50  ;;  %v1826_v54 = vadd.f32 %v1825_v41, %v1660_v50  ;;  %v1899_v55 = vmul.f32 %v1660_v50, %v1660_v50 }
 0x1fd   :  { %v1962_v61 = vadd.f32 %v1961_v44, %v1899_v55 }
 0x1fe   :  { %v1492_v63 = vpop.f32.mrf.mxu2  ;;  %v1157_v4 = vpop.f32.mrf.mxu0 }
 0x1ff   :  { %v1661_v0 = vpop.f32.mrf.mxu3  ;;  %v1493_v3 = vadd.f32 %v1492_v63, %v1324_v62  ;;  %v1326_v5 = vpop.f32.mrf.mxu1 }
 0x200   :  { %v1327_v11 = vadd.f32 %v1326_v5, %v1157_v4 }
 0x201   :  { %v1662_v8 = vadd.f32 %v1661_v0, %v1493_v3  ;;  %1196 = vmatmul.bf16.gmra.mxu0 %v2487_v1 }
 0x202   :  { %1365 = vmatmul.bf16.gmra.mxu1 %v2491_v2 }
 0x203   :  { %1757 = vst [vmem:[%s3925_s2 + $0x158] sm:$0xff] %v1662_v8  ;;  %v1827_v9 = vadd.f32 %v1826_v54, %v1662_v8  ;;  %v1900_v10 = vmul.f32 %v1662_v8, %v1662_v8  ;;  %1534 = vmatmul.bf16.gmra.mxu2 %v2495_v6 }
 0x204   :  { %1703 = vmatmul.bf16.gmra.mxu3 %v2499_v7 }
 0x205   :  { %v1963_v12 = vadd.f32 %v1962_v61, %v1900_v10 }
 0x206   :  { %v1495_v13 = vpop.f32.mrf.mxu2  ;;  %v1159_v16 = vpop.f32.mrf.mxu0 }
 0x207   :  { %v1664_v14 = vpop.f32.mrf.mxu3  ;;  %v1496_v15 = vadd.f32 %v1495_v13, %v1327_v11  ;;  %v1328_v17 = vpop.f32.mrf.mxu1 }
 0x208   :  { %v1329_v30 = vadd.f32 %v1328_v17, %v1159_v16 }
 0x209   :  { %v1665_v18 = vadd.f32 %v1664_v14, %v1496_v15 }
 0x20b   :  { %1758 = vst [vmem:[%s3925_s2 + $0x160] sm:$0xff] %v1665_v18  ;;  %v1828_v22 = vadd.f32 %v1827_v9, %v1665_v18  ;;  %v1901_v23 = vmul.f32 %v1665_v18, %v1665_v18 }
 0x20d   :  { %v1964_v29 = vadd.f32 %v1963_v12, %v1901_v23 }
 0x20e   :  { %v1497_v31 = vpop.f32.mrf.mxu2  ;;  %v1162_v36 = vpop.f32.mrf.mxu0 }
 0x20f   :  { %v1666_v32 = vpop.f32.mrf.mxu3  ;;  %v1498_v35 = vadd.f32 %v1497_v31, %v1329_v30  ;;  %v1331_v37 = vpop.f32.mrf.mxu1 }
 0x210   :  { %v1332_v43 = vadd.f32 %v1331_v37, %v1162_v36 }
 0x211   :  { %v1667_v40 = vadd.f32 %v1666_v32, %v1498_v35  ;;  %1201 = vmatmul.bf16.gmra.mxu0 %v2503_v33 }
 0x212   :  { %1370 = vmatmul.bf16.gmra.mxu1 %v2507_v34 }
 0x213   :  { %1759 = vst [vmem:[%s3925_s2 + $0x168] sm:$0xff] %v1667_v40  ;;  %v1829_v41 = vadd.f32 %v1828_v22, %v1667_v40  ;;  %v1902_v42 = vmul.f32 %v1667_v40, %v1667_v40  ;;  %1539 = vmatmul.bf16.gmra.mxu2 %v2511_v38 }
 0x214   :  { %1708 = vmatmul.bf16.gmra.mxu3 %v2515_v39 }
 0x215   :  { %v1965_v44 = vadd.f32 %v1964_v29, %v1902_v42 }
 0x216   :  { %v1500_v45 = vpop.f32.mrf.mxu2  ;;  %v1164_v48 = vpop.f32.mrf.mxu0 }
 0x217   :  { %v1669_v46 = vpop.f32.mrf.mxu3  ;;  %v1501_v47 = vadd.f32 %v1500_v45, %v1332_v43  ;;  %v1333_v49 = vpop.f32.mrf.mxu1 }
 0x218   :  { %v1334_v54 = vadd.f32 %v1333_v49, %v1164_v48 }
 0x219   :  { %v1670_v50 = vadd.f32 %v1669_v46, %v1501_v47 }
 0x21b   :  { %1760 = vst [vmem:[%s3925_s2 + $0x170] sm:$0xff] %v1670_v50  ;;  %v1830_v51 = vadd.f32 %v1829_v41, %v1670_v50  ;;  %v1903_v52 = vmul.f32 %v1670_v50, %v1670_v50 }
 0x21d   :  { %v1966_v53 = vadd.f32 %v1965_v44, %v1903_v52 }
 0x21e   :  { %v1502_v55 = vpop.f32.mrf.mxu2  ;;  %v1167_v58 = vpop.f32.mrf.mxu0 }
 0x21f   :  { %v1671_v56 = vpop.f32.mrf.mxu3  ;;  %v1503_v57 = vadd.f32 %v1502_v55, %v1334_v54  ;;  %v1336_v59 = vpop.f32.mrf.mxu1 }
 0x220   :  { %v1337_v63 = vadd.f32 %v1336_v59, %v1167_v58 }
 0x221   :  { %v1672_v60 = vadd.f32 %v1671_v56, %v1503_v57 }
 0x223   :  { %1761 = vst [vmem:[%s3925_s2 + $0x178] sm:$0xff] %v1672_v60  ;;  %v1831_v61 = vadd.f32 %v1830_v51, %v1672_v60  ;;  %v1904_v62 = vmul.f32 %v1672_v60, %v1672_v60 }
 0x225   :  { %v1967_v0 = vadd.f32 %v1966_v53, %v1904_v62 }
 0x226   :  { %v1505_v1 = vpop.f32.mrf.mxu2  ;;  %v1169_v4 = vpop.f32.mrf.mxu0 }
 0x227   :  { %v1674_v2 = vpop.f32.mrf.mxu3  ;;  %v1506_v3 = vadd.f32 %v1505_v1, %v1337_v63  ;;  %v1338_v5 = vpop.f32.mrf.mxu1 }
 0x228   :  { %v1339_v10 = vadd.f32 %v1338_v5, %v1169_v4 }
 0x229   :  { %v1675_v6 = vadd.f32 %v1674_v2, %v1506_v3 }
 0x22b   :  { %1762 = vst [vmem:[%s3925_s2 + $0x180] sm:$0xff] %v1675_v6  ;;  %v1832_v7 = vadd.f32 %v1831_v61, %v1675_v6  ;;  %v1905_v8 = vmul.f32 %v1675_v6, %v1675_v6 }
 0x22d   :  { %v1968_v9 = vadd.f32 %v1967_v0, %v1905_v8 }
 0x22e   :  { %v1507_v11 = vpop.f32.mrf.mxu2  ;;  %v1172_v14 = vpop.f32.mrf.mxu0 }
 0x22f   :  { %v1676_v12 = vpop.f32.mrf.mxu3  ;;  %v1508_v13 = vadd.f32 %v1507_v11, %v1339_v10  ;;  %v1341_v15 = vpop.f32.mrf.mxu1 }
 0x230   :  { %v1342_v19 = vadd.f32 %v1341_v15, %v1172_v14 }
 0x231   :  { %v1677_v16 = vadd.f32 %v1676_v12, %v1508_v13 }
 0x233   :  { %1763 = vst [vmem:[%s3925_s2 + $0x188] sm:$0xff] %v1677_v16  ;;  %v1833_v17 = vadd.f32 %v1832_v7, %v1677_v16  ;;  %v1906_v18 = vmul.f32 %v1677_v16, %v1677_v16 }
 0x235   :  { %v1969_v20 = vadd.f32 %v1968_v9, %v1906_v18 }
 0x236   :  { %v1510_v21 = vpop.f32.mrf.mxu2  ;;  %v1174_v24 = vpop.f32.mrf.mxu0 }
 0x237   :  { %v1679_v22 = vpop.f32.mrf.mxu3  ;;  %v1511_v23 = vadd.f32 %v1510_v21, %v1342_v19  ;;  %v1343_v25 = vpop.f32.mrf.mxu1 }
 0x238   :  { %v1344_v30 = vadd.f32 %v1343_v25, %v1174_v24 }
 0x239   :  { %v1680_v26 = vadd.f32 %v1679_v22, %v1511_v23 }
 0x23b   :  { %1764 = vst [vmem:[%s3925_s2 + $0x190] sm:$0xff] %v1680_v26  ;;  %v1834_v27 = vadd.f32 %v1833_v17, %v1680_v26  ;;  %v1907_v28 = vmul.f32 %v1680_v26, %v1680_v26 }
 0x23d   :  { %v1970_v29 = vadd.f32 %v1969_v20, %v1907_v28 }
 0x23e   :  { %v1512_v31 = vpop.f32.mrf.mxu2  ;;  %v1177_v34 = vpop.f32.mrf.mxu0 }
 0x23f   :  { %v1681_v32 = vpop.f32.mrf.mxu3  ;;  %v1513_v33 = vadd.f32 %v1512_v31, %v1344_v30  ;;  %v1346_v35 = vpop.f32.mrf.mxu1 }
 0x240   :  { %v1347_v39 = vadd.f32 %v1346_v35, %v1177_v34 }
 0x241   :  { %v1682_v36 = vadd.f32 %v1681_v32, %v1513_v33 }
 0x243   :  { %1765 = vst [vmem:[%s3925_s2 + $0x198] sm:$0xff] %v1682_v36  ;;  %v1835_v37 = vadd.f32 %v1834_v27, %v1682_v36  ;;  %v1908_v38 = vmul.f32 %v1682_v36, %v1682_v36  ;;  %v2805_v36 = vmov 0.0  }
 0x244   :  { %1782 = vst [vmem:[%s3926_s3] sm:$0x1] %v2805_v36 }
 0x245   :  { %v1971_v40 = vadd.f32 %v1970_v29, %v1908_v38  ;;  %1783 = vst [vmem:[%s3927_s4] sm:$0x1] %v2805_v36 }
 0x246   :  { %v1515_v41 = vpop.f32.mrf.mxu2  ;;  %v1179_v44 = vpop.f32.mrf.mxu0 }
 0x247   :  { %v1684_v42 = vpop.f32.mrf.mxu3  ;;  %v1516_v43 = vadd.f32 %v1515_v41, %v1347_v39  ;;  %v1348_v45 = vpop.f32.mrf.mxu1 }
 0x248   :  { %v1349_v50 = vadd.f32 %v1348_v45, %v1179_v44 }
 0x249   :  { %v1685_v46 = vadd.f32 %v1684_v42, %v1516_v43 }
 0x24b   :  { %1766 = vst [vmem:[%s3925_s2 + $0x1a0] sm:$0xff] %v1685_v46  ;;  %v3854_v47 = vadd.f32 %v1835_v37, %v1685_v46  ;;  %v1909_v48 = vmul.f32 %v1685_v46, %v1685_v46 }
 0x24d   :  { %v3856_v49 = vadd.f32 %v1971_v40, %v1909_v48 }
 0x24e   :  { %v1517_v51 = vpop.f32.mrf.mxu2  ;;  %v1182_v54 = vpop.f32.mrf.mxu0 }
 0x24f   :  { %v1686_v52 = vpop.f32.mrf.mxu3  ;;  %v1518_v53 = vadd.f32 %v1517_v51, %v1349_v50  ;;  %v1351_v55 = vpop.f32.mrf.mxu1 }
 0x250   :  { %v1352_v57 = vadd.f32 %v1351_v55, %v1182_v54 }
 0x251   :  { %v3858_v56 = vadd.f32 %v1686_v52, %v1518_v53 }
 0x253   :  { %1767 = vst [vmem:[%s3925_s2 + $0x1a8] sm:$0xff] %v3858_v56  ;;  %v1910_v43 = vmul.f32 %v3858_v56, %v3858_v56  ;;  %v1837_v48 = vadd.f32 %v3854_v47, %v3858_v56 }
 0x255   :  { %v1973_v54 = vadd.f32 %v3856_v49, %v1910_v43  ;;  %v1856_v43 = vld [vmem:[%s3927_s4] sm:$0x1] }
 0x256   :  { %v1520_v58 = vpop.f32.mrf.mxu2  ;;  %v1184_v61 = vpop.f32.mrf.mxu0 }
 0x257   :  { %v1689_v59 = vpop.f32.mrf.mxu3  ;;  %v1521_v60 = vadd.f32 %v1520_v58, %v1352_v57  ;;  %v1353_v62 = vpop.f32.mrf.mxu1 }
 0x258   :  { %v1354_v0 = vadd.f32 %v1353_v62, %v1184_v61 }
 0x259   :  { %v3864_v63 = vadd.f32 %v1689_v59, %v1521_v60 }
 0x25b   :  { %1768 = vst [vmem:[%s3925_s2 + $0x1b0] sm:$0xff] %v3864_v63  ;;  %v1911_v50 = vmul.f32 %v3864_v63, %v3864_v63  ;;  %v1838_v55 = vadd.f32 %v1837_v48, %v3864_v63 }
 0x25d   :  { %v1974_v59 = vadd.f32 %v1973_v54, %v1911_v50 }
 0x25e   :  { %v1522_v1 = vpop.f32.mrf.mxu2  ;;  %v1187_v4 = vpop.f32.mrf.mxu0 }
 0x25f   :  { %v1691_v2 = vpop.f32.mrf.mxu3  ;;  %v1523_v3 = vadd.f32 %v1522_v1, %v1354_v0  ;;  %v1356_v5 = vpop.f32.mrf.mxu1 }
 0x260   :  { %v1357_v7 = vadd.f32 %v1356_v5, %v1187_v4 }
 0x261   :  { %v1692_v6 = vadd.f32 %v1691_v2, %v1523_v3 }
 0x263   :  { %1769 = vst [vmem:[%s3925_s2 + $0x1b8] sm:$0xff] %v1692_v6  ;;  %v1912_v57 = vmul.f32 %v1692_v6, %v1692_v6  ;;  %v1839_v60 = vadd.f32 %v1838_v55, %v1692_v6 }
 0x265   :  { %v1975_v56 = vadd.f32 %v1974_v59, %v1912_v57 }
 0x266   :  { %v1525_v8 = vpop.f32.mrf.mxu2  ;;  %v1189_v11 = vpop.f32.mrf.mxu0 }
 0x267   :  { %v1694_v9 = vpop.f32.mrf.mxu3  ;;  %v1526_v10 = vadd.f32 %v1525_v8, %v1357_v7  ;;  %v1358_v12 = vpop.f32.mrf.mxu1 }
 0x268   :  { %v1359_v14 = vadd.f32 %v1358_v12, %v1189_v11 }
 0x269   :  { %v1695_v13 = vadd.f32 %v1694_v9, %v1526_v10 }
 0x26b   :  { %1770 = vst [vmem:[%s3925_s2 + $0x1c0] sm:$0xff] %v1695_v13  ;;  %v1913_v61 = vmul.f32 %v1695_v13, %v1695_v13  ;;  %v1840_v62 = vadd.f32 %v1839_v60, %v1695_v13 }
 0x26d   :  { %v1976_v3 = vadd.f32 %v1975_v56, %v1913_v61 }
 0x26e   :  { %v1527_v15 = vpop.f32.mrf.mxu2  ;;  %v1192_v18 = vpop.f32.mrf.mxu0 }
 0x26f   :  { %v1696_v16 = vpop.f32.mrf.mxu3  ;;  %v1528_v17 = vadd.f32 %v1527_v15, %v1359_v14  ;;  %v1361_v19 = vpop.f32.mrf.mxu1 }
 0x270   :  { %v1362_v21 = vadd.f32 %v1361_v19, %v1192_v18 }
 0x271   :  { %v1697_v20 = vadd.f32 %v1696_v16, %v1528_v17 }
 0x273   :  { %1771 = vst [vmem:[%s3925_s2 + $0x1c8] sm:$0xff] %v1697_v20  ;;  %v1914_v0 = vmul.f32 %v1697_v20, %v1697_v20  ;;  %v1841_v4 = vadd.f32 %v1840_v62, %v1697_v20 }
 0x275   :  { %v1977_v63 = vadd.f32 %v1976_v3, %v1914_v0 }
 0x276   :  { %v1530_v22 = vpop.f32.mrf.mxu2  ;;  %v1194_v25 = vpop.f32.mrf.mxu0 }
 0x277   :  { %v1699_v23 = vpop.f32.mrf.mxu3  ;;  %v1531_v24 = vadd.f32 %v1530_v22, %v1362_v21  ;;  %v1363_v26 = vpop.f32.mrf.mxu1 }
 0x278   :  { %v1364_v28 = vadd.f32 %v1363_v26, %v1194_v25 }
 0x279   :  { %v1700_v27 = vadd.f32 %v1699_v23, %v1531_v24 }
 0x27b   :  { %1772 = vst [vmem:[%s3925_s2 + $0x1d0] sm:$0xff] %v1700_v27  ;;  %v1915_v49 = vmul.f32 %v1700_v27, %v1700_v27  ;;  %v1842_v7 = vadd.f32 %v1841_v4, %v1700_v27 }
 0x27d   :  { %v1978_v11 = vadd.f32 %v1977_v63, %v1915_v49 }
 0x27e   :  { %v1532_v29 = vpop.f32.mrf.mxu2  ;;  %v1197_v32 = vpop.f32.mrf.mxu0 }
 0x27f   :  { %v1701_v30 = vpop.f32.mrf.mxu3  ;;  %v1533_v31 = vadd.f32 %v1532_v29, %v1364_v28  ;;  %v1366_v33 = vpop.f32.mrf.mxu1 }
 0x280   :  { %v1367_v35 = vadd.f32 %v1366_v33, %v1197_v32 }
 0x281   :  { %v1702_v34 = vadd.f32 %v1701_v30, %v1533_v31 }
 0x283   :  { %1773 = vst [vmem:[%s3925_s2 + $0x1d8] sm:$0xff] %v1702_v34  ;;  %v1916_v8 = vmul.f32 %v1702_v34, %v1702_v34  ;;  %v1843_v12 = vadd.f32 %v1842_v7, %v1702_v34 }
 0x285   :  { %v1979_v13 = vadd.f32 %v1978_v11, %v1916_v8 }
 0x286   :  { %v1535_v37 = vpop.f32.mrf.mxu2  ;;  %v1199_v40 = vpop.f32.mrf.mxu0 }
 0x287   :  { %v1704_v38 = vpop.f32.mrf.mxu3  ;;  %v1536_v39 = vadd.f32 %v1535_v37, %v1367_v35  ;;  %v1368_v41 = vpop.f32.mrf.mxu1 }
 0x288   :  { %v1369_v44 = vadd.f32 %v1368_v41, %v1199_v40  ;;  %v1784_v40 = vld [vmem:[%s3926_s3] sm:$0x1] }
 0x289   :  { %v1705_v42 = vadd.f32 %v1704_v38, %v1536_v39 }
 0x28b   :  { %1774 = vst [vmem:[%s3925_s2 + $0x1e0] sm:$0xff] %v1705_v42  ;;  %v1917_v14 = vmul.f32 %v1705_v42, %v1705_v42  ;;  %v1844_v15 = vadd.f32 %v1843_v12, %v1705_v42 }
 0x28d   :  { %v1980_v19 = vadd.f32 %v1979_v13, %v1917_v14 }
 0x28e   :  { %v1537_v45 = vpop.f32.mrf.mxu2  ;;  %v1202_v52 = vpop.f32.mrf.mxu0 }
 0x28f   :  { %v1706_v46 = vpop.f32.mrf.mxu3  ;;  %v1538_v51 = vadd.f32 %v1537_v45, %v1369_v44  ;;  %v1371_v53 = vpop.f32.mrf.mxu1 }
 0x290   :  { %v1372_v47 = vadd.f32 %v1371_v53, %v1202_v52 }
 0x291   :  { %v1707_v58 = vadd.f32 %v1706_v46, %v1538_v51 }
 0x293   :  { %1775 = vst [vmem:[%s3925_s2 + $0x1e8] sm:$0xff] %v1707_v58  ;;  %v1918_v16 = vmul.f32 %v1707_v58, %v1707_v58  ;;  %v1845_v20 = vadd.f32 %v1844_v15, %v1707_v58 }
 0x295   :  { %v1981_v24 = vadd.f32 %v1980_v19, %v1918_v16 }
 0x296   :  { %v1540_v1 = vpop.f32.mrf.mxu2  ;;  %v1204_v6 = vpop.f32.mrf.mxu0 }
 0x297   :  { %v1709_v2 = vpop.f32.mrf.mxu3  ;;  %v1541_v5 = vadd.f32 %v1540_v1, %v1372_v47  ;;  %v1373_v10 = vpop.f32.mrf.mxu1 }
 0x298   :  { %v1374_v17 = vadd.f32 %v1373_v10, %v1204_v6 }
 0x299   :  { %v1710_v9 = vadd.f32 %v1709_v2, %v1541_v5 }
 0x29b   :  { %1776 = vst [vmem:[%s3925_s2 + $0x1f0] sm:$0xff] %v1710_v9  ;;  %v1919_v21 = vmul.f32 %v1710_v9, %v1710_v9  ;;  %v1846_v25 = vadd.f32 %v1845_v20, %v1710_v9 }
 0x29d   :  { %v1982_v27 = vadd.f32 %v1981_v24, %v1919_v21 }
 0x29e   :  { %v1542_v18 = vpop.f32.mrf.mxu2 }
 0x29f   :  { %v1543_v22 = vadd.f32 %v1542_v18, %v1374_v17  ;;  %v1711_v23 = vpop.f32.mrf.mxu3 }
 0x2a1   :  { %v1712_v26 = vadd.f32 %v1711_v23, %v1543_v22 }
 0x2a3   :  { %1777 = vst [vmem:[%s3925_s2 + $0x1f8] sm:$0xff] %v1712_v26  ;;  %v1847_v28 = vadd.f32 %v1846_v25, %v1712_v26  ;;  %v1920_v29 = vmul.f32 %v1712_v26, %v1712_v26 }
 0x2a5   :  { %v1848_v30 = vrot.slane %v1847_v28, 4  ;;  %v1983_v31 = vadd.f32 %v1982_v27, %v1920_v29 }
 0x2a7   :  { %v1849_v32 = vadd.f32 %v1848_v30, %v1847_v28  ;;  %v1984_v33 = vrot.slane %v1983_v31, 4 }
 0x2a9   :  { %v1850_v34 = vrot.slane %v1849_v32, 2  ;;  %v1985_v35 = vadd.f32 %v1984_v33, %v1983_v31 }
 0x2ab   :  { %v1851_v36 = vadd.f32 %v1850_v34, %v1849_v32  ;;  %v1986_v37 = vrot.slane %v1985_v35, 2 }
 0x2ad   :  { %v1852_v38 = vrot.slane %v1851_v36, 1  ;;  %v1987_v39 = vadd.f32 %v1986_v37, %v1985_v35 }
 0x2af   :  { %v1853_v41 = vadd.f32 %v1852_v38, %v1851_v36  ;;  %v1988_v42 = vrot.slane %v1987_v39, 1 }
 0x2b1   :  { %v1854_v44 = vadd.f32 %v1853_v41, %v1784_v40  ;;  %v1989_v45 = vadd.f32 %v1988_v42, %v1987_v39 }
 0x2b3   :  { %1855 = vst [vmem:[%s3926_s3] sm:$0x1] %v1854_v44  ;;  %v1990_v46 = vadd.f32 %v1989_v45, %v1856_v43 }
 0x2b5   :  { %1991 = vst [vmem:[%s3927_s4] sm:$0x1] %v1990_v46 }

// kernel: forward.15
= control target key start
LH: loop header
LB: loop body
LE: loop exit
PB: predicated region body
PF: predicated region fallthrough
CT: control target
= control target key end

     0   :  { %s1868_s15 = smov 0   ;;  %s2542_s0 = inlined_call_operand.vmem [shape: bf16[2048,256], index: 0, kind: input, shape index: {}]   ;;  %s2543_s1 = inlined_call_operand.vmem [shape: bf16[256,128], index: 1, kind: input, shape index: {}]   ;;  %s2544_s2 = inlined_call_operand.vmem [shape: f32[2048,128], index: 2, kind: output, shape index: {0}]   ;;  %s2545_s3 = inlined_call_operand.vmem [shape: f32[1,128], index: 3, kind: output, shape index: {1}]   ;;  %s2546_s4 = inlined_call_operand.vmem [shape: f32[1,128], index: 4, kind: output, shape index: {2}]  }
   0x1 LB: > { %s1395_s16 = sadd.s32 4294967295, %s1840_s15   ;;  %p1399_p0 = scmp.ge.s32.totalorder %s1840_s15, 1  ;;  %s1840_s15 = sphi %s1868_s15, %s15_s15  }
   0x2   : > { %p159_p1 = scmp.lt.s32.totalorder %s1840_s15, 5 }
   0x4   : > { %p160_p2 = pnand %p1399_p0, %p159_p1 }
   0x6   : > { %163 = sbr.rel (%p160_p2) target bundleno = 574 (0x23e), region = 28 }
   0xb   : > { %v1800_v0 = vld [vmem:[%s2543_s1 + $0x38] sm:$0xff]  ;;  %v1799_v2 = vld [vmem:[%s2543_s1 + $0x30] sm:$0xff]  ;;  %v1798_v4 = vld [vmem:[%s2543_s1 + $0x28] sm:$0xff]  ;;  %s1400_s29 = sshll.u32 %s1395_s16, 6  ;;  %p1725_p4 = scmp.ne.s32.totalorder %s1395_s16, 0 }
   0xc   : > { %v1808_v1 = vld [vmem:[%s2543_s1 + $0x78] sm:$0xff]  ;;  %711 = vmatpush.bf16.msra.mxu0 %v1800_v0  ;;  %1809 = vmatpush.bf16.msra.mxu2 %v1800_v0  ;;  %v1807_v3 = vld [vmem:[%s2543_s1 + $0x70] sm:$0xff]  ;;  %v1806_v5 = vld [vmem:[%s2543_s1 + $0x68] sm:$0xff]  ;;  %p187_p3 = scmp.lt.s32.totalorder %s1400_s29, 255 }
   0xd   : > { %880 = vmatpush.bf16.msra.mxu1 %v1808_v1  ;;  %1817 = vmatpush.bf16.msra.mxu3 %v1808_v1  ;;  %v1797_v6 = vld [vmem:[%s2543_s1 + $0x20] sm:$0xff]  ;;  %v1796_v8 = vld [vmem:[%s2543_s1 + $0x18] sm:$0xff]  ;;  %v1795_v10 = vld [vmem:[%s2543_s1 + $0x10] sm:$0xff] }
   0xe   : > { %v1805_v7 = vld [vmem:[%s2543_s1 + $0x60] sm:$0xff]  ;;  %v1804_v9 = vld [vmem:[%s2543_s1 + $0x58] sm:$0xff]  ;;  %s2596_s29 = smov (!%p187_p3, %s1400_s29), 255  ;;  %v1803_v11 = vld [vmem:[%s2543_s1 + $0x50] sm:$0xff] }
   0xf   : > { %s1728_s18 = sshll.u32 %s2596_s29, 3  ;;  %v1794_v12 = vld [vmem:[%s2543_s1 + $0x8] sm:$0xff]  ;;  %v1793_v14 = vld [vmem:[%s2543_s1] sm:$0xff] }
  0x10   : > { %712 = vmatpush.bf16.msra.mxu0 %v1799_v2  ;;  %1810 = vmatpush.bf16.msra.mxu2 %v1799_v2  ;;  %s1925_s23 = scalar_lea.vmem %s2542_s0, %s1728_s18  ;;  %v1802_v13 = vld [vmem:[%s2543_s1 + $0x48] sm:$0xff]  ;;  %v1801_v15 = vld [vmem:[%s2543_s1 + $0x40] sm:$0xff]  ;;  %s2013_s7 = scalar_lea.vmem %s2544_s2, %s1728_s18 }
  0x11   : > { %881 = vmatpush.bf16.msra.mxu1 %v1807_v3  ;;  %1818 = vmatpush.bf16.msra.mxu3 %v1807_v3  ;;  %v1407_v16 = vld [vmem:[%s1925_s23] sm:$0xf]  ;;  %v1730_v17 = vld [vmem:[%s1925_s23 + $0x4] sm:$0xf0]  ;;  %v1729_v20 = vld [vmem:[%s1925_s23 + $0x4] sm:$0xf] }
  0x12   : > { %v1535_v18 = vld [vmem:[%s1925_s23 + $0x100] sm:$0xf]  ;;  %v1762_v19 = vld [vmem:[%s1925_s23 + $0x104] sm:$0xf0]  ;;  %v1409_v21 = vld [vmem:[%s1925_s23 + $0x8] sm:$0xf0]  ;;  %v1408_v24 = vor.u32 %v1730_v17, %v1407_v16 }
  0x13   : > { %v1761_v22 = vld [vmem:[%s1925_s23 + $0x104] sm:$0xf]  ;;  %v1537_v23 = vld [vmem:[%s1925_s23 + $0x108] sm:$0xf0]  ;;  %v1536_v25 = vor.u32 %v1762_v19, %v1535_v18  ;;  %v1412_v26 = vor.u32 %v1729_v20, %v1409_v21  ;;  %v1415_v28 = vld [vmem:[%s1925_s23 + $0x10] sm:$0xf] }
  0x14   : > { %713 = vmatpush.bf16.msra.mxu0 %v1798_v4  ;;  %1811 = vmatpush.bf16.msra.mxu2 %v1798_v4  ;;  %v1540_v27 = vor.u32 %v1761_v22, %v1537_v23  ;;  %v1732_v29 = vld [vmem:[%s1925_s23 + $0x14] sm:$0xf0]  ;;  %v1543_v30 = vld [vmem:[%s1925_s23 + $0x110] sm:$0xf]  ;;  %v1731_v32 = vld [vmem:[%s1925_s23 + $0x14] sm:$0xf] }
  0x15   : > { %882 = vmatpush.bf16.msra.mxu1 %v1806_v5  ;;  %1819 = vmatpush.bf16.msra.mxu3 %v1806_v5  ;;  %v1764_v31 = vld [vmem:[%s1925_s23 + $0x114] sm:$0xf0]  ;;  %v1417_v33 = vld [vmem:[%s1925_s23 + $0x18] sm:$0xf0]  ;;  %v1763_v34 = vld [vmem:[%s1925_s23 + $0x114] sm:$0xf]  ;;  %v1416_v36 = vor.u32 %v1732_v29, %v1415_v28 }
  0x16   : > { %v1545_v35 = vld [vmem:[%s1925_s23 + $0x118] sm:$0xf0]  ;;  %v1544_v37 = vor.u32 %v1764_v31, %v1543_v30  ;;  %v1420_v38 = vor.u32 %v1731_v32, %v1417_v33  ;;  %v1423_v40 = vld [vmem:[%s1925_s23 + $0x20] sm:$0xf]  ;;  %v1734_v41 = vld [vmem:[%s1925_s23 + $0x24] sm:$0xf0] }
  0x17   : > { %v1548_v39 = vor.u32 %v1763_v34, %v1545_v35  ;;  %v1551_v42 = vld [vmem:[%s1925_s23 + $0x120] sm:$0xf]  ;;  %v1766_v43 = vld [vmem:[%s1925_s23 + $0x124] sm:$0xf0]  ;;  %v1733_v44 = vld [vmem:[%s1925_s23 + $0x24] sm:$0xf]  ;;  %v1424_v48 = vor.u32 %v1734_v41, %v1423_v40 }
  0x18   : > { %714 = vmatpush.bf16.msra.mxu0 %v1797_v6  ;;  %1812 = vmatpush.bf16.msra.mxu2 %v1797_v6  ;;  %v1425_v45 = vld [vmem:[%s1925_s23 + $0x28] sm:$0xf0]  ;;  %v1765_v46 = vld [vmem:[%s1925_s23 + $0x124] sm:$0xf]  ;;  %v1552_v49 = vor.u32 %v1766_v43, %v1551_v42  ;;  %v1431_v52 = vld [vmem:[%s1925_s23 + $0x30] sm:$0xf] }
  0x19   : > { %883 = vmatpush.bf16.msra.mxu1 %v1805_v7  ;;  %1820 = vmatpush.bf16.msra.mxu3 %v1805_v7  ;;  %v1553_v47 = vld [vmem:[%s1925_s23 + $0x128] sm:$0xf0]  ;;  %v1428_v50 = vor.u32 %v1733_v44, %v1425_v45  ;;  %v1736_v53 = vld [vmem:[%s1925_s23 + $0x34] sm:$0xf0]  ;;  %v1559_v54 = vld [vmem:[%s1925_s23 + $0x130] sm:$0xf] }
  0x1a   : > { %v1556_v51 = vor.u32 %v1765_v46, %v1553_v47  ;;  %v1768_v55 = vld [vmem:[%s1925_s23 + $0x134] sm:$0xf0]  ;;  %v1735_v56 = vld [vmem:[%s1925_s23 + $0x34] sm:$0xf]  ;;  %v1433_v57 = vld [vmem:[%s1925_s23 + $0x38] sm:$0xf0]  ;;  %v1432_v60 = vor.u32 %v1736_v53, %v1431_v52 }
  0x1b   : > { %v1767_v58 = vld [vmem:[%s1925_s23 + $0x134] sm:$0xf]  ;;  %v1561_v59 = vld [vmem:[%s1925_s23 + $0x138] sm:$0xf0]  ;;  %v1560_v61 = vor.u32 %v1768_v55, %v1559_v54  ;;  %v1436_v62 = vor.u32 %v1735_v56, %v1433_v57  ;;  %v1439_v0 = vld [vmem:[%s1925_s23 + $0x40] sm:$0xf] }
  0x1c   : > { %715 = vmatpush.bf16.msra.mxu0 %v1796_v8  ;;  %1813 = vmatpush.bf16.msra.mxu2 %v1796_v8  ;;  %v1564_v63 = vor.u32 %v1767_v58, %v1561_v59  ;;  %v1738_v1 = vld [vmem:[%s1925_s23 + $0x44] sm:$0xf0]  ;;  %v1567_v2 = vld [vmem:[%s1925_s23 + $0x140] sm:$0xf]  ;;  %v1737_v4 = vld [vmem:[%s1925_s23 + $0x44] sm:$0xf] }
  0x1d   : > { %884 = vmatpush.bf16.msra.mxu1 %v1804_v9  ;;  %1821 = vmatpush.bf16.msra.mxu3 %v1804_v9  ;;  %v1770_v3 = vld [vmem:[%s1925_s23 + $0x144] sm:$0xf0]  ;;  %v1441_v5 = vld [vmem:[%s1925_s23 + $0x48] sm:$0xf0]  ;;  %v1769_v6 = vld [vmem:[%s1925_s23 + $0x144] sm:$0xf]  ;;  %v1440_v8 = vor.u32 %v1738_v1, %v1439_v0 }
  0x1e   : > { %v1569_v7 = vld [vmem:[%s1925_s23 + $0x148] sm:$0xf0]  ;;  %v1568_v9 = vor.u32 %v1770_v3, %v1567_v2  ;;  %v1739_v16 = vld [vmem:[%s1925_s23 + $0x54] sm:$0xf]  ;;  %v1449_v17 = vld [vmem:[%s1925_s23 + $0x58] sm:$0xf0] }
  0x1f   : > { %v1771_v18 = vld [vmem:[%s1925_s23 + $0x154] sm:$0xf]  ;;  %v1577_v19 = vld [vmem:[%s1925_s23 + $0x158] sm:$0xf0]  ;;  %v1452_v22 = vor.u32 %v1739_v16, %v1449_v17  ;;  %v1741_v28 = vld [vmem:[%s1925_s23 + $0x64] sm:$0xf] }
  0x20   : > { %716 = vmatpush.bf16.msra.mxu0 %v1795_v10  ;;  %1814 = vmatpush.bf16.msra.mxu2 %v1795_v10  ;;  %v1444_v10 = vor.u32 %v1737_v4, %v1441_v5  ;;  %v1580_v23 = vor.u32 %v1771_v18, %v1577_v19  ;;  %v1457_v29 = vld [vmem:[%s1925_s23 + $0x68] sm:$0xf0]  ;;  %v1773_v30 = vld [vmem:[%s1925_s23 + $0x164] sm:$0xf]  ;;  %v1743_v40 = vld [vmem:[%s1925_s23 + $0x74] sm:$0xf] }
  0x21   : > { %885 = vmatpush.bf16.msra.mxu1 %v1803_v11  ;;  %1822 = vmatpush.bf16.msra.mxu3 %v1803_v11  ;;  %v1572_v11 = vor.u32 %v1769_v6, %v1569_v7  ;;  %v1585_v31 = vld [vmem:[%s1925_s23 + $0x168] sm:$0xf0]  ;;  %v1460_v34 = vor.u32 %v1741_v28, %v1457_v29  ;;  %v1465_v41 = vld [vmem:[%s1925_s23 + $0x78] sm:$0xf0]  ;;  %v1775_v42 = vld [vmem:[%s1925_s23 + $0x174] sm:$0xf] }
  0x22   : > { %v1588_v35 = vor.u32 %v1773_v30, %v1585_v31  ;;  %v1593_v43 = vld [vmem:[%s1925_s23 + $0x178] sm:$0xf0]  ;;  %v1468_v46 = vor.u32 %v1743_v40, %v1465_v41  ;;  %v1745_v52 = vld [vmem:[%s1925_s23 + $0x84] sm:$0xf]  ;;  %v1473_v53 = vld [vmem:[%s1925_s23 + $0x88] sm:$0xf0] }
  0x23   : > { %v1596_v47 = vor.u32 %v1775_v42, %v1593_v43  ;;  %v1777_v54 = vld [vmem:[%s1925_s23 + $0x184] sm:$0xf]  ;;  %v1601_v55 = vld [vmem:[%s1925_s23 + $0x188] sm:$0xf0]  ;;  %v1476_v59 = vor.u32 %v1745_v52, %v1473_v53  ;;  %v1479_v5 = vld [vmem:[%s1925_s23 + $0x90] sm:$0xf] }
  0x24   : > { %717 = vmatpush.bf16.msra.mxu0 %v1794_v12  ;;  %1815 = vmatpush.bf16.msra.mxu2 %v1794_v12  ;;  %v1447_v12 = vld [vmem:[%s1925_s23 + $0x50] sm:$0xf]  ;;  %v1748_v6 = vld [vmem:[%s1925_s23 + $0x94] sm:$0xf0]  ;;  %v1487_v29 = vld [vmem:[%s1925_s23 + $0xa0] sm:$0xf] }
  0x25   : > { %886 = vmatpush.bf16.msra.mxu1 %v1802_v13  ;;  %1823 = vmatpush.bf16.msra.mxu3 %v1802_v13  ;;  %v1740_v13 = vld [vmem:[%s1925_s23 + $0x54] sm:$0xf0]  ;;  %v1607_v7 = vld [vmem:[%s1925_s23 + $0x190] sm:$0xf]  ;;  %v1750_v30 = vld [vmem:[%s1925_s23 + $0xa4] sm:$0xf0] }
  0x26   : > { %v1448_v20 = vor.u32 %v1740_v13, %v1447_v12  ;;  %v1609_v12 = vld [vmem:[%s1925_s23 + $0x198] sm:$0xf0]  ;;  %v1615_v31 = vld [vmem:[%s1925_s23 + $0x1a0] sm:$0xf]  ;;  %v1495_v53 = vld [vmem:[%s1925_s23 + $0xb0] sm:$0xf] }
  0x28   : > { %718 = vmatpush.bf16.msra.mxu0 %v1793_v14  ;;  %1816 = vmatpush.bf16.msra.mxu2 %v1793_v14  ;;  %v1575_v14 = vld [vmem:[%s1925_s23 + $0x150] sm:$0xf] }
  0x29   : > { %887 = vmatpush.bf16.msra.mxu1 %v1801_v15  ;;  %1824 = vmatpush.bf16.msra.mxu3 %v1801_v15  ;;  %v1772_v15 = vld [vmem:[%s1925_s23 + $0x154] sm:$0xf0] }
  0x2a   : > { %v1576_v21 = vor.u32 %v1772_v15, %v1575_v14  ;;  %v1480_v15 = vor.u32 %v1748_v6, %v1479_v5 }
  0x2b   : > { %719 = vmatmul.bf16.vlgmr.msra.gmra.mxu0 %v1408_v24  ;;  %799 = vmatmul.bf16.vlgmr.msra.gmra.mxu2 %v1536_v25  ;;  %v1455_v24 = vld [vmem:[%s1925_s23 + $0x60] sm:$0xf]  ;;  %v1742_v25 = vld [vmem:[%s1925_s23 + $0x64] sm:$0xf0] }
  0x2c   : > { %888 = vmatmul.bf16.vlgmr.msra.gmra.mxu1 %v1412_v26  ;;  %968 = vmatmul.bf16.vlgmr.msra.gmra.mxu3 %v1540_v27  ;;  %v1583_v26 = vld [vmem:[%s1925_s23 + $0x160] sm:$0xf]  ;;  %v1774_v27 = vld [vmem:[%s1925_s23 + $0x164] sm:$0xf0]  ;;  %v1456_v32 = vor.u32 %v1742_v25, %v1455_v24 }
  0x2d   : > { %v1584_v33 = vor.u32 %v1774_v27, %v1583_v26 }
  0x3b   : > { %724 = vmatmul.bf16.gmra.mxu0 %v1416_v36  ;;  %804 = vmatmul.bf16.gmra.mxu2 %v1544_v37  ;;  %v1463_v36 = vld [vmem:[%s1925_s23 + $0x70] sm:$0xf]  ;;  %v1744_v37 = vld [vmem:[%s1925_s23 + $0x74] sm:$0xf0] }
  0x3c   : > { %893 = vmatmul.bf16.gmra.mxu1 %v1420_v38  ;;  %973 = vmatmul.bf16.gmra.mxu3 %v1548_v39  ;;  %v1591_v38 = vld [vmem:[%s1925_s23 + $0x170] sm:$0xf]  ;;  %v1776_v39 = vld [vmem:[%s1925_s23 + $0x174] sm:$0xf0]  ;;  %v1464_v44 = vor.u32 %v1744_v37, %v1463_v36  ;;  %v1617_v36 = vld [vmem:[%s1925_s23 + $0x1a8] sm:$0xf0] }
  0x3d   : > { %v1592_v45 = vor.u32 %v1776_v39, %v1591_v38  ;;  %v1488_v39 = vor.u32 %v1750_v30, %v1487_v29 }
  0x4b   : > { %729 = vmatmul.bf16.gmra.mxu0 %v1424_v48  ;;  %809 = vmatmul.bf16.gmra.mxu2 %v1552_v49  ;;  %v1471_v48 = vld [vmem:[%s1925_s23 + $0x80] sm:$0xf]  ;;  %v1746_v49 = vld [vmem:[%s1925_s23 + $0x84] sm:$0xf0] }
  0x4c   : > { %898 = vmatmul.bf16.gmra.mxu1 %v1428_v50  ;;  %978 = vmatmul.bf16.gmra.mxu3 %v1556_v51  ;;  %v1599_v50 = vld [vmem:[%s1925_s23 + $0x180] sm:$0xf]  ;;  %v1778_v51 = vld [vmem:[%s1925_s23 + $0x184] sm:$0xf0]  ;;  %v1472_v56 = vor.u32 %v1746_v49, %v1471_v48 }
  0x4d   : > { %v1600_v57 = vor.u32 %v1778_v51, %v1599_v50 }
  0x5b   : > { %734 = vmatmul.bf16.gmra.mxu0 %v1432_v60  ;;  %814 = vmatmul.bf16.gmra.mxu2 %v1560_v61  ;;  %v1604_v60 = vor.u32 %v1777_v54, %v1601_v55  ;;  %v1752_v54 = vld [vmem:[%s1925_s23 + $0xb4] sm:$0xf0]  ;;  %v1623_v55 = vld [vmem:[%s1925_s23 + $0x1b0] sm:$0xf] }
  0x5c   : > { %903 = vmatmul.bf16.gmra.mxu1 %v1436_v62  ;;  %983 = vmatmul.bf16.gmra.mxu3 %v1564_v63 }
  0x6b   : > { %739 = vmatmul.bf16.gmra.mxu0 %v1440_v8  ;;  %819 = vmatmul.bf16.gmra.mxu2 %v1568_v9  ;;  %v1780_v8 = vld [vmem:[%s1925_s23 + $0x194] sm:$0xf0]  ;;  %v1747_v9 = vld [vmem:[%s1925_s23 + $0x94] sm:$0xf] }
  0x6c   : > { %908 = vmatmul.bf16.gmra.mxu1 %v1444_v10  ;;  %988 = vmatmul.bf16.gmra.mxu3 %v1572_v11  ;;  %v1481_v10 = vld [vmem:[%s1925_s23 + $0x98] sm:$0xf0]  ;;  %v1779_v11 = vld [vmem:[%s1925_s23 + $0x194] sm:$0xf]  ;;  %v1608_v16 = vor.u32 %v1780_v8, %v1607_v7 }
  0x6d   : > { %v1484_v19 = vor.u32 %v1747_v9, %v1481_v10 }
  0x7b   : > { %744 = vmatmul.bf16.gmra.mxu0 %v1448_v20  ;;  %824 = vmatmul.bf16.gmra.mxu2 %v1576_v21  ;;  %v1612_v20 = vor.u32 %v1779_v11, %v1609_v12 }
  0x7c   : > { %913 = vmatmul.bf16.gmra.mxu1 %v1452_v22  ;;  %993 = vmatmul.bf16.gmra.mxu3 %v1580_v23 }
  0x8b   : > { %749 = vmatmul.bf16.gmra.mxu0 %v1456_v32  ;;  %829 = vmatmul.bf16.gmra.mxu2 %v1584_v33  ;;  %v1782_v32 = vld [vmem:[%s1925_s23 + $0x1a4] sm:$0xf0]  ;;  %v1749_v33 = vld [vmem:[%s1925_s23 + $0xa4] sm:$0xf] }
  0x8c   : > { %918 = vmatmul.bf16.gmra.mxu1 %v1460_v34  ;;  %998 = vmatmul.bf16.gmra.mxu3 %v1588_v35  ;;  %v1489_v34 = vld [vmem:[%s1925_s23 + $0xa8] sm:$0xf0]  ;;  %v1781_v35 = vld [vmem:[%s1925_s23 + $0x1a4] sm:$0xf]  ;;  %v1616_v40 = vor.u32 %v1782_v32, %v1615_v31 }
  0x8d   : > { %v1492_v43 = vor.u32 %v1749_v33, %v1489_v34 }
  0x9b   : > { %754 = vmatmul.bf16.gmra.mxu0 %v1464_v44  ;;  %834 = vmatmul.bf16.gmra.mxu2 %v1592_v45  ;;  %v1620_v44 = vor.u32 %v1781_v35, %v1617_v36 }
  0x9c   : > { %923 = vmatmul.bf16.gmra.mxu1 %v1468_v46  ;;  %1003 = vmatmul.bf16.gmra.mxu3 %v1596_v47 }
  0xa8   : > { %v720_v58 = vpop.f32.mrf.mxu0 }
  0xa9   : > { %v889_v61 = vpop.f32.mrf.mxu1 }
  0xaa   : > { %v2015_v62 = vadd.f32 %v889_v61, %v720_v58  ;;  %v1497_v58 = vld [vmem:[%s1925_s23 + $0xb8] sm:$0xf0] }
  0xab   : > { %759 = vmatmul.bf16.gmra.mxu0 %v1472_v56  ;;  %839 = vmatmul.bf16.gmra.mxu2 %v1600_v57  ;;  %v1784_v56 = vld [vmem:[%s1925_s23 + $0x1b4] sm:$0xf0]  ;;  %v1751_v57 = vld [vmem:[%s1925_s23 + $0xb4] sm:$0xf] }
  0xac   : > { %1049 = vst [vmem:[%s2013_s7] sm:$0xff] %v2015_v62  ;;  %928 = vmatmul.bf16.gmra.mxu1 %v1476_v59  ;;  %1008 = vmatmul.bf16.gmra.mxu3 %v1604_v60  ;;  %v1783_v59 = vld [vmem:[%s1925_s23 + $0x1b4] sm:$0xf]  ;;  %v1625_v60 = vld [vmem:[%s1925_s23 + $0x1b8] sm:$0xf0]  ;;  %v1500_v6 = vor.u32 %v1751_v57, %v1497_v58 }
  0xad   : > { %v1628_v7 = vor.u32 %v1783_v59, %v1625_v60 }
  0xae   : > { %v800_v63 = vpop.f32.mrf.mxu2 }
  0xaf   : > { %v969_v0 = vpop.f32.mrf.mxu3 }
  0xb0   : > { %v2019_v1 = vadd.f32 %v969_v0, %v800_v63  ;;  %v722_v2 = vpop.f32.mrf.mxu0  ;;  %v1496_v0 = vor.u32 %v1752_v54, %v1495_v53  ;;  %v1513_v53 = vld [vmem:[%s1925_s23 + $0xd8] sm:$0xf0]  ;;  %v1787_v54 = vld [vmem:[%s1925_s23 + $0x1d4] sm:$0xf] }
  0xb1   : > { %v891_v3 = vpop.f32.mrf.mxu1 }
  0xb2   : > { %1081 = vst [vmem:[%s2013_s7 + $0x100] sm:$0xff] %v2019_v1  ;;  %v2023_v4 = vadd.f32 %v891_v3, %v722_v2  ;;  %v1624_v2 = vor.u32 %v1784_v56, %v1623_v55  ;;  %v1641_v55 = vld [vmem:[%s1925_s23 + $0x1d8] sm:$0xf0] }
  0xb4   : > { %1050 = vst [vmem:[%s2013_s7 + $0x8] sm:$0xff] %v2023_v4 }
  0xb6   : > { %v802_v13 = vpop.f32.mrf.mxu2 }
  0xb7   : > { %v971_v14 = vpop.f32.mrf.mxu3 }
  0xb8   : > { %v2035_v17 = vadd.f32 %v971_v14, %v802_v13  ;;  %v725_v18 = vpop.f32.mrf.mxu0 }
  0xb9   : > { %v894_v21 = vpop.f32.mrf.mxu1 }
  0xba   : > { %1082 = vst [vmem:[%s2013_s7 + $0x108] sm:$0xff] %v2035_v17  ;;  %v2039_v22 = vadd.f32 %v894_v21, %v725_v18  ;;  %v1754_v18 = vld [vmem:[%s1925_s23 + $0xc4] sm:$0xf0]  ;;  %v1753_v21 = vld [vmem:[%s1925_s23 + $0xc4] sm:$0xf] }
  0xbb   : > { %764 = vmatmul.bf16.gmra.mxu0 %v1480_v15  ;;  %844 = vmatmul.bf16.gmra.mxu2 %v1608_v16  ;;  %v1503_v16 = vld [vmem:[%s1925_s23 + $0xc0] sm:$0xf] }
  0xbc   : > { %1051 = vst [vmem:[%s2013_s7 + $0x10] sm:$0xff] %v2039_v22  ;;  %933 = vmatmul.bf16.gmra.mxu1 %v1484_v19  ;;  %1013 = vmatmul.bf16.gmra.mxu3 %v1612_v20  ;;  %v1631_v19 = vld [vmem:[%s1925_s23 + $0x1c0] sm:$0xf]  ;;  %v1786_v20 = vld [vmem:[%s1925_s23 + $0x1c4] sm:$0xf0]  ;;  %v1504_v30 = vor.u32 %v1754_v18, %v1503_v16 }
  0xbd   : > { %v1632_v31 = vor.u32 %v1786_v20, %v1631_v19  ;;  %v1758_v16 = vld [vmem:[%s1925_s23 + $0xe4] sm:$0xf0]  ;;  %v1647_v18 = vld [vmem:[%s1925_s23 + $0x1e0] sm:$0xf]  ;;  %v1757_v20 = vld [vmem:[%s1925_s23 + $0xe4] sm:$0xf] }
  0xbe   : > { %v805_v23 = vpop.f32.mrf.mxu2  ;;  %v1790_v19 = vld [vmem:[%s1925_s23 + $0x1e4] sm:$0xf0] }
  0xbf   : > { %v974_v24 = vpop.f32.mrf.mxu3 }
  0xc0   : > { %v2043_v25 = vadd.f32 %v974_v24, %v805_v23  ;;  %v727_v26 = vpop.f32.mrf.mxu0  ;;  %v1505_v23 = vld [vmem:[%s1925_s23 + $0xc8] sm:$0xf0]  ;;  %v1785_v24 = vld [vmem:[%s1925_s23 + $0x1c4] sm:$0xf] }
  0xc1   : > { %v896_v27 = vpop.f32.mrf.mxu1  ;;  %v1508_v34 = vor.u32 %v1753_v21, %v1505_v23  ;;  %v1521_v21 = vld [vmem:[%s1925_s23 + $0xe8] sm:$0xf0]  ;;  %v1789_v23 = vld [vmem:[%s1925_s23 + $0x1e4] sm:$0xf] }
  0xc2   : > { %1083 = vst [vmem:[%s2013_s7 + $0x110] sm:$0xff] %v2043_v25  ;;  %v2047_v28 = vadd.f32 %v896_v27, %v727_v26  ;;  %v1633_v26 = vld [vmem:[%s1925_s23 + $0x1c8] sm:$0xf0] }
  0xc3   : > { %v1636_v35 = vor.u32 %v1785_v24, %v1633_v26  ;;  %v1649_v24 = vld [vmem:[%s1925_s23 + $0x1e8] sm:$0xf0] }
  0xc4   : > { %1052 = vst [vmem:[%s2013_s7 + $0x18] sm:$0xff] %v2047_v28 }
  0xc6   : > { %v807_v37 = vpop.f32.mrf.mxu2 }
  0xc7   : > { %v976_v38 = vpop.f32.mrf.mxu3 }
  0xc8   : > { %v2059_v41 = vadd.f32 %v976_v38, %v807_v37  ;;  %v730_v42 = vpop.f32.mrf.mxu0 }
  0xc9   : > { %v899_v45 = vpop.f32.mrf.mxu1 }
  0xca   : > { %1084 = vst [vmem:[%s2013_s7 + $0x118] sm:$0xff] %v2059_v41  ;;  %v2063_v46 = vadd.f32 %v899_v45, %v730_v42  ;;  %v1511_v45 = vld [vmem:[%s1925_s23 + $0xd0] sm:$0xf] }
  0xcb   : > { %769 = vmatmul.bf16.gmra.mxu0 %v1488_v39  ;;  %849 = vmatmul.bf16.gmra.mxu2 %v1616_v40 }
  0xcc   : > { %1053 = vst [vmem:[%s2013_s7 + $0x20] sm:$0xff] %v2063_v46  ;;  %938 = vmatmul.bf16.gmra.mxu1 %v1492_v43  ;;  %1018 = vmatmul.bf16.gmra.mxu3 %v1620_v44 }
  0xce   : > { %v810_v47 = vpop.f32.mrf.mxu2 }
  0xcf   : > { %v979_v48 = vpop.f32.mrf.mxu3 }
  0xd0   : > { %v2067_v49 = vadd.f32 %v979_v48, %v810_v47  ;;  %v732_v50 = vpop.f32.mrf.mxu0  ;;  %v1756_v47 = vld [vmem:[%s1925_s23 + $0xd4] sm:$0xf0]  ;;  %v1639_v48 = vld [vmem:[%s1925_s23 + $0x1d0] sm:$0xf] }
  0xd1   : > { %v901_v51 = vpop.f32.mrf.mxu1  ;;  %v1512_v58 = vor.u32 %v1756_v47, %v1511_v45 }
  0xd2   : > { %1085 = vst [vmem:[%s2013_s7 + $0x120] sm:$0xff] %v2067_v49  ;;  %v2071_v52 = vadd.f32 %v901_v51, %v732_v50  ;;  %v1788_v50 = vld [vmem:[%s1925_s23 + $0x1d4] sm:$0xf0]  ;;  %v1755_v51 = vld [vmem:[%s1925_s23 + $0xd4] sm:$0xf] }
  0xd3   : > { %v1640_v59 = vor.u32 %v1788_v50, %v1639_v48  ;;  %v1527_v50 = vld [vmem:[%s1925_s23 + $0xf0] sm:$0xf] }
  0xd4   : > { %1054 = vst [vmem:[%s2013_s7 + $0x28] sm:$0xff] %v2071_v52 }
  0xd6   : > { %v812_v61 = vpop.f32.mrf.mxu2 }
  0xd7   : > { %v981_v63 = vpop.f32.mrf.mxu3 }
  0xd8   : > { %v2083_v3 = vadd.f32 %v981_v63, %v812_v61  ;;  %v735_v5 = vpop.f32.mrf.mxu0  ;;  %v1516_v63 = vor.u32 %v1755_v51, %v1513_v53  ;;  %v1760_v51 = vld [vmem:[%s1925_s23 + $0xf4] sm:$0xf0]  ;;  %v1655_v53 = vld [vmem:[%s1925_s23 + $0x1f0] sm:$0xf] }
  0xd9   : > { %v904_v8 = vpop.f32.mrf.mxu1 }
  0xda   : > { %1086 = vst [vmem:[%s2013_s7 + $0x128] sm:$0xff] %v2083_v3  ;;  %v2087_v9 = vadd.f32 %v904_v8, %v735_v5 }
  0xdb   : > { %774 = vmatmul.bf16.gmra.mxu0 %v1496_v0  ;;  %854 = vmatmul.bf16.gmra.mxu2 %v1624_v2  ;;  %v1644_v0 = vor.u32 %v1787_v54, %v1641_v55  ;;  %v1792_v54 = vld [vmem:[%s1925_s23 + $0x1f4] sm:$0xf0]  ;;  %v1759_v55 = vld [vmem:[%s1925_s23 + $0xf4] sm:$0xf] }
  0xdc   : > { %1055 = vst [vmem:[%s2013_s7 + $0x30] sm:$0xff] %v2087_v9  ;;  %943 = vmatmul.bf16.gmra.mxu1 %v1500_v6  ;;  %1023 = vmatmul.bf16.gmra.mxu3 %v1628_v7 }
  0xde   : > { %v815_v10 = vpop.f32.mrf.mxu2 }
  0xdf   : > { %v984_v11 = vpop.f32.mrf.mxu3 }
  0xe0   : > { %v2091_v12 = vadd.f32 %v984_v11, %v815_v10  ;;  %v737_v13 = vpop.f32.mrf.mxu0 }
  0xe1   : > { %v906_v14 = vpop.f32.mrf.mxu1 }
  0xe2   : > { %1087 = vst [vmem:[%s2013_s7 + $0x130] sm:$0xff] %v2091_v12  ;;  %v2095_v15 = vadd.f32 %v906_v14, %v737_v13  ;;  %v1519_v14 = vld [vmem:[%s1925_s23 + $0xe0] sm:$0xf] }
  0xe4   : > { %1056 = vst [vmem:[%s2013_s7 + $0x38] sm:$0xff] %v2095_v15 }
  0xe6   : > { %v817_v27 = vpop.f32.mrf.mxu2 }
  0xe7   : > { %v986_v29 = vpop.f32.mrf.mxu3 }
  0xe8   : > { %v2107_v32 = vadd.f32 %v986_v29, %v817_v27  ;;  %v740_v33 = vpop.f32.mrf.mxu0  ;;  %v1520_v29 = vor.u32 %v1758_v16, %v1519_v14 }
  0xe9   : > { %v909_v36 = vpop.f32.mrf.mxu1 }
  0xea   : > { %1088 = vst [vmem:[%s2013_s7 + $0x138] sm:$0xff] %v2107_v32  ;;  %v2111_v37 = vadd.f32 %v909_v36, %v740_v33 }
  0xeb   : > { %779 = vmatmul.bf16.gmra.mxu0 %v1504_v30  ;;  %859 = vmatmul.bf16.gmra.mxu2 %v1632_v31  ;;  %v1648_v30 = vor.u32 %v1790_v19, %v1647_v18 }
  0xec   : > { %1057 = vst [vmem:[%s2013_s7 + $0x40] sm:$0xff] %v2111_v37  ;;  %948 = vmatmul.bf16.gmra.mxu1 %v1508_v34  ;;  %1028 = vmatmul.bf16.gmra.mxu3 %v1636_v35  ;;  %v1524_v34 = vor.u32 %v1757_v20, %v1521_v21  ;;  %v1652_v35 = vor.u32 %v1789_v23, %v1649_v24 }
  0xee   : > { %v820_v38 = vpop.f32.mrf.mxu2 }
  0xef   : > { %v989_v39 = vpop.f32.mrf.mxu3 }
  0xf0   : > { %v2115_v40 = vadd.f32 %v989_v39, %v820_v38  ;;  %v742_v42 = vpop.f32.mrf.mxu0 }
  0xf1   : > { %v911_v43 = vpop.f32.mrf.mxu1 }
  0xf2   : > { %1089 = vst [vmem:[%s2013_s7 + $0x140] sm:$0xff] %v2115_v40  ;;  %v2119_v44 = vadd.f32 %v911_v43, %v742_v42 }
  0xf4   : > { %1058 = vst [vmem:[%s2013_s7 + $0x48] sm:$0xff] %v2119_v44 }
  0xf6   : > { %v822_v56 = vpop.f32.mrf.mxu2 }
  0xf7   : > { %v991_v57 = vpop.f32.mrf.mxu3 }
  0xf8   : > { %v2131_v60 = vadd.f32 %v991_v57, %v822_v56  ;;  %v745_v61 = vpop.f32.mrf.mxu0  ;;  %v1529_v56 = vld [vmem:[%s1925_s23 + $0xf8] sm:$0xf0]  ;;  %v1791_v57 = vld [vmem:[%s1925_s23 + $0x1f4] sm:$0xf] }
  0xf9   : > { %v914_v2 = vpop.f32.mrf.mxu1 }
  0xfa   : > { %1090 = vst [vmem:[%s2013_s7 + $0x148] sm:$0xff] %v2131_v60  ;;  %v2135_v5 = vadd.f32 %v914_v2, %v745_v61 }
  0xfb   : > { %784 = vmatmul.bf16.gmra.mxu0 %v1512_v58  ;;  %864 = vmatmul.bf16.gmra.mxu2 %v1640_v59  ;;  %v1657_v58 = vld [vmem:[%s1925_s23 + $0x1f8] sm:$0xf0] }
  0xfc   : > { %1059 = vst [vmem:[%s2013_s7 + $0x50] sm:$0xff] %v2135_v5  ;;  %953 = vmatmul.bf16.gmra.mxu1 %v1516_v63  ;;  %1033 = vmatmul.bf16.gmra.mxu3 %v1644_v0  ;;  %v1528_v63 = vor.u32 %v1760_v51, %v1527_v50  ;;  %v1656_v0 = vor.u32 %v1792_v54, %v1655_v53 }
  0xfe   : > { %v825_v6 = vpop.f32.mrf.mxu2 }
  0xff   : > { %v994_v7 = vpop.f32.mrf.mxu3 }
 0x100   : > { %v2139_v8 = vadd.f32 %v994_v7, %v825_v6  ;;  %v747_v10 = vpop.f32.mrf.mxu0  ;;  %v1532_v7 = vor.u32 %v1759_v55, %v1529_v56 }
 0x101   : > { %v916_v11 = vpop.f32.mrf.mxu1 }
 0x102   : > { %1091 = vst [vmem:[%s2013_s7 + $0x150] sm:$0xff] %v2139_v8  ;;  %v2143_v13 = vadd.f32 %v916_v11, %v747_v10  ;;  %v1660_v10 = vor.u32 %v1791_v57, %v1657_v58 }
 0x104   : > { %1060 = vst [vmem:[%s2013_s7 + $0x58] sm:$0xff] %v2143_v13 }
 0x106   : > { %v827_v26 = vpop.f32.mrf.mxu2 }
 0x107   : > { %v996_v27 = vpop.f32.mrf.mxu3 }
 0x108   : > { %v2155_v31 = vadd.f32 %v996_v27, %v827_v26  ;;  %v750_v33 = vpop.f32.mrf.mxu0 }
 0x109   : > { %v919_v36 = vpop.f32.mrf.mxu1 }
 0x10a   : > { %1092 = vst [vmem:[%s2013_s7 + $0x158] sm:$0xff] %v2155_v31  ;;  %v2159_v38 = vadd.f32 %v919_v36, %v750_v33 }
 0x10b   : > { %789 = vmatmul.bf16.gmra.mxu0 %v1520_v29  ;;  %869 = vmatmul.bf16.gmra.mxu2 %v1648_v30 }
 0x10c   : > { %1061 = vst [vmem:[%s2013_s7 + $0x60] sm:$0xff] %v2159_v38  ;;  %958 = vmatmul.bf16.gmra.mxu1 %v1524_v34  ;;  %1038 = vmatmul.bf16.gmra.mxu3 %v1652_v35 }
 0x10e   : > { %v830_v39 = vpop.f32.mrf.mxu2 }
 0x10f   : > { %v999_v42 = vpop.f32.mrf.mxu3 }
 0x110   : > { %v2163_v43 = vadd.f32 %v999_v42, %v830_v39  ;;  %v752_v45 = vpop.f32.mrf.mxu0 }
 0x111   : > { %v921_v47 = vpop.f32.mrf.mxu1 }
 0x112   : > { %1093 = vst [vmem:[%s2013_s7 + $0x160] sm:$0xff] %v2163_v43  ;;  %v2167_v48 = vadd.f32 %v921_v47, %v752_v45 }
 0x114   : > { %1062 = vst [vmem:[%s2013_s7 + $0x68] sm:$0xff] %v2167_v48 }
 0x116   : > { %v832_v59 = vpop.f32.mrf.mxu2 }
 0x117   : > { %v1001_v61 = vpop.f32.mrf.mxu3 }
 0x118   : > { %v2179_v2 = vadd.f32 %v1001_v61, %v832_v59  ;;  %v755_v6 = vpop.f32.mrf.mxu0 }
 0x119   : > { %v924_v11 = vpop.f32.mrf.mxu1 }
 0x11a   : > { %1094 = vst [vmem:[%s2013_s7 + $0x168] sm:$0xff] %v2179_v2  ;;  %v2183_v14 = vadd.f32 %v924_v11, %v755_v6 }
 0x11b   : > { %794 = vmatmul.bf16.gmra.mxu0 %v1528_v63  ;;  %874 = vmatmul.bf16.gmra.mxu2 %v1656_v0 }
 0x11c   : > { %1063 = vst [vmem:[%s2013_s7 + $0x70] sm:$0xff] %v2183_v14  ;;  %963 = vmatmul.bf16.gmra.mxu1 %v1532_v7  ;;  %1043 = vmatmul.bf16.gmra.mxu3 %v1660_v10 }
 0x11e   : > { %v835_v16 = vpop.f32.mrf.mxu2 }
 0x11f   : > { %v1004_v18 = vpop.f32.mrf.mxu3 }
 0x120   : > { %v2187_v19 = vadd.f32 %v1004_v18, %v835_v16  ;;  %v757_v20 = vpop.f32.mrf.mxu0 }
 0x121   : > { %v926_v21 = vpop.f32.mrf.mxu1 }
 0x122   : > { %1095 = vst [vmem:[%s2013_s7 + $0x170] sm:$0xff] %v2187_v19  ;;  %v2191_v23 = vadd.f32 %v926_v21, %v757_v20 }
 0x124   : > { %1064 = vst [vmem:[%s2013_s7 + $0x78] sm:$0xff] %v2191_v23 }
 0x126   : > { %v837_v24 = vpop.f32.mrf.mxu2 }
 0x127   : > { %v1006_v26 = vpop.f32.mrf.mxu3 }
 0x128   : > { %v2195_v27 = vadd.f32 %v1006_v26, %v837_v24  ;;  %v760_v29 = vpop.f32.mrf.mxu0 }
 0x129   : > { %v929_v30 = vpop.f32.mrf.mxu1 }
 0x12a   : > { %1096 = vst [vmem:[%s2013_s7 + $0x178] sm:$0xff] %v2195_v27  ;;  %v2199_v33 = vadd.f32 %v929_v30, %v760_v29 }
 0x12c   : > { %1065 = vst [vmem:[%s2013_s7 + $0x80] sm:$0xff] %v2199_v33 }
 0x12e   : > { %v840_v34 = vpop.f32.mrf.mxu2 }
 0x12f   : > { %v1009_v35 = vpop.f32.mrf.mxu3 }
 0x130   : > { %v2203_v36 = vadd.f32 %v1009_v35, %v840_v34  ;;  %v762_v39 = vpop.f32.mrf.mxu0 }
 0x131   : > { %v931_v42 = vpop.f32.mrf.mxu1 }
 0x132   : > { %1097 = vst [vmem:[%s2013_s7 + $0x180] sm:$0xff] %v2203_v36  ;;  %v2207_v45 = vadd.f32 %v931_v42, %v762_v39 }
 0x134   : > { %1066 = vst [vmem:[%s2013_s7 + $0x88] sm:$0xff] %v2207_v45 }
 0x136   : > { %v842_v47 = vpop.f32.mrf.mxu2 }
 0x137   : > { %v1011_v50 = vpop.f32.mrf.mxu3 }
 0x138   : > { %v2211_v51 = vadd.f32 %v1011_v50, %v842_v47  ;;  %v765_v53 = vpop.f32.mrf.mxu0 }
 0x139   : > { %v934_v54 = vpop.f32.mrf.mxu1 }
 0x13a   : > { %1098 = vst [vmem:[%s2013_s7 + $0x188] sm:$0xff] %v2211_v51  ;;  %v2215_v55 = vadd.f32 %v934_v54, %v765_v53 }
 0x13c   : > { %1067 = vst [vmem:[%s2013_s7 + $0x90] sm:$0xff] %v2215_v55 }
 0x13e   : > { %v845_v56 = vpop.f32.mrf.mxu2 }
 0x13f   : > { %v1014_v57 = vpop.f32.mrf.mxu3 }
 0x140   : > { %v2219_v58 = vadd.f32 %v1014_v57, %v845_v56  ;;  %v767_v59 = vpop.f32.mrf.mxu0 }
 0x141   : > { %v936_v61 = vpop.f32.mrf.mxu1 }
 0x142   : > { %1099 = vst [vmem:[%s2013_s7 + $0x190] sm:$0xff] %v2219_v58  ;;  %v2223_v63 = vadd.f32 %v936_v61, %v767_v59 }
 0x144   : > { %1068 = vst [vmem:[%s2013_s7 + $0x98] sm:$0xff] %v2223_v63 }
 0x146   : > { %v847_v0 = vpop.f32.mrf.mxu2 }
 0x147   : > { %v1016_v6 = vpop.f32.mrf.mxu3 }
 0x148   : > { %v2227_v7 = vadd.f32 %v1016_v6, %v847_v0  ;;  %v770_v10 = vpop.f32.mrf.mxu0 }
 0x149   : > { %v939_v11 = vpop.f32.mrf.mxu1 }
 0x14a   : > { %1100 = vst [vmem:[%s2013_s7 + $0x198] sm:$0xff] %v2227_v7  ;;  %v2231_v16 = vadd.f32 %v939_v11, %v770_v10 }
 0x14c   : > { %1069 = vst [vmem:[%s2013_s7 + $0xa0] sm:$0xff] %v2231_v16 }
 0x14e   : > { %v850_v18 = vpop.f32.mrf.mxu2 }
 0x14f   : > { %v1019_v20 = vpop.f32.mrf.mxu3 }
 0x150   : > { %v2235_v21 = vadd.f32 %v1019_v20, %v850_v18  ;;  %v772_v24 = vpop.f32.mrf.mxu0 }
 0x151   : > { %v941_v26 = vpop.f32.mrf.mxu1 }
 0x152   : > { %2571 = vst [vmem:[#allocation2_spill] sm:$0xff] %v2235_v21  ;;  %v2239_v29 = vadd.f32 %v941_v26, %v772_v24 }
 0x153   : > { %1101 = vst [vmem:[%s2013_s7 + $0x1a0] sm:$0xff] %v2235_v21 }
 0x154   : > { %1070 = vst [vmem:[%s2013_s7 + $0xa8] sm:$0xff] %v2239_v29 }
 0x156   : > { %v852_v30 = vpop.f32.mrf.mxu2 }
 0x157   : > { %v1021_v34 = vpop.f32.mrf.mxu3 }
 0x158   : > { %v2243_v35 = vadd.f32 %v1021_v34, %v852_v30  ;;  %v775_v39 = vpop.f32.mrf.mxu0 }
 0x159   : > { %v944_v42 = vpop.f32.mrf.mxu1 }
 0x15a   : > { %2572 = vst [vmem:[#allocation3_spill] sm:$0xff] %v2243_v35  ;;  %v2247_v47 = vadd.f32 %v944_v42, %v775_v39 }
 0x15b   : > { %1102 = vst [vmem:[%s2013_s7 + $0x1a8] sm:$0xff] %v2243_v35 }
 0x15c   : > { %1071 = vst [vmem:[%s2013_s7 + $0xb0] sm:$0xff] %v2247_v47 }
 0x15e   : > { %v855_v50 = vpop.f32.mrf.mxu2 }
 0x15f   : > { %v1024_v53 = vpop.f32.mrf.mxu3 }
 0x160   : > { %v2251_v54 = vadd.f32 %v1024_v53, %v855_v50  ;;  %v777_v56 = vpop.f32.mrf.mxu0 }
 0x161   : > { %v946_v57 = vpop.f32.mrf.mxu1 }
 0x162   : > { %2573 = vst [vmem:[#allocation4_spill] sm:$0xff] %v2251_v54  ;;  %v2255_v59 = vadd.f32 %v946_v57, %v777_v56 }
 0x163   : > { %1103 = vst [vmem:[%s2013_s7 + $0x1b0] sm:$0xff] %v2251_v54 }
 0x164   : > { %1072 = vst [vmem:[%s2013_s7 + $0xb8] sm:$0xff] %v2255_v59 }
 0x166   : > { %v857_v61 = vpop.f32.mrf.mxu2 }
 0x167   : > { %v1026_v0 = vpop.f32.mrf.mxu3 }
 0x168   : > { %v2259_v6 = vadd.f32 %v1026_v0, %v857_v61  ;;  %v780_v10 = vpop.f32.mrf.mxu0 }
 0x169   : > { %v949_v11 = vpop.f32.mrf.mxu1 }
 0x16a   : > { %2574 = vst [vmem:[#allocation5_spill] sm:$0xff] %v2259_v6  ;;  %v2263_v18 = vadd.f32 %v949_v11, %v780_v10 }
 0x16b   : > { %1104 = vst [vmem:[%s2013_s7 + $0x1b8] sm:$0xff] %v2259_v6 }
 0x16c   : > { %1073 = vst [vmem:[%s2013_s7 + $0xc0] sm:$0xff] %v2263_v18 }
 0x16e   : > { %v860_v20 = vpop.f32.mrf.mxu2 }
 0x16f   : > { %v1029_v24 = vpop.f32.mrf.mxu3 }
 0x170   : > { %v2267_v26 = vadd.f32 %v1029_v24, %v860_v20  ;;  %v782_v30 = vpop.f32.mrf.mxu0 }
 0x171   : > { %v951_v34 = vpop.f32.mrf.mxu1 }
 0x172   : > { %2575 = vst [vmem:[#allocation6_spill] sm:$0xff] %v2267_v26  ;;  %v2271_v39 = vadd.f32 %v951_v34, %v782_v30 }
 0x173   : > { %1105 = vst [vmem:[%s2013_s7 + $0x1c0] sm:$0xff] %v2267_v26 }
 0x174   : > { %1074 = vst [vmem:[%s2013_s7 + $0xc8] sm:$0xff] %v2271_v39 }
 0x176   : > { %v862_v42 = vpop.f32.mrf.mxu2 }
 0x177   : > { %v1031_v50 = vpop.f32.mrf.mxu3 }
 0x178   : > { %v2275_v53 = vadd.f32 %v1031_v50, %v862_v42  ;;  %v785_v56 = vpop.f32.mrf.mxu0 }
 0x179   : > { %v954_v57 = vpop.f32.mrf.mxu1 }
 0x17a   : > { %2576 = vst [vmem:[#allocation7_spill] sm:$0xff] %v2275_v53  ;;  %v2279_v61 = vadd.f32 %v954_v57, %v785_v56 }
 0x17b   : > { %1106 = vst [vmem:[%s2013_s7 + $0x1c8] sm:$0xff] %v2275_v53 }
 0x17c   : > { %1075 = vst [vmem:[%s2013_s7 + $0xd0] sm:$0xff] %v2279_v61 }
 0x17e   : > { %v865_v0 = vpop.f32.mrf.mxu2 }
 0x17f   : > { %v1034_v10 = vpop.f32.mrf.mxu3 }
 0x180   : > { %v2283_v11 = vadd.f32 %v1034_v10, %v865_v0  ;;  %v787_v20 = vpop.f32.mrf.mxu0 }
 0x181   : > { %v956_v24 = vpop.f32.mrf.mxu1 }
 0x182   : > { %2577 = vst [vmem:[#allocation8_spill] sm:$0xff] %v2283_v11  ;;  %v2287_v30 = vadd.f32 %v956_v24, %v787_v20 }
 0x183   : > { %1107 = vst [vmem:[%s2013_s7 + $0x1d0] sm:$0xff] %v2283_v11 }
 0x184   : > { %1076 = vst [vmem:[%s2013_s7 + $0xd8] sm:$0xff] %v2287_v30 }
 0x186   : > { %v867_v34 = vpop.f32.mrf.mxu2 }
 0x187   : > { %v1036_v42 = vpop.f32.mrf.mxu3 }
 0x188   : > { %v2291_v50 = vadd.f32 %v1036_v42, %v867_v34  ;;  %v790_v56 = vpop.f32.mrf.mxu0 }
 0x189   : > { %v959_v57 = vpop.f32.mrf.mxu1 }
 0x18a   : > { %2578 = vst [vmem:[#allocation9_spill] sm:$0xff] %v2291_v50  ;;  %v2295_v0 = vadd.f32 %v959_v57, %v790_v56 }
 0x18b   : > { %1108 = vst [vmem:[%s2013_s7 + $0x1d8] sm:$0xff] %v2291_v50 }
 0x18c   : > { %1077 = vst [vmem:[%s2013_s7 + $0xe0] sm:$0xff] %v2295_v0 }
 0x18e   : > { %v870_v10 = vpop.f32.mrf.mxu2 }
 0x18f   : > { %v1039_v20 = vpop.f32.mrf.mxu3 }
 0x190   : > { %v2299_v24 = vadd.f32 %v1039_v20, %v870_v10  ;;  %v792_v11 = vpop.f32.mrf.mxu0 }
 0x191   : > { %v961_v53 = vpop.f32.mrf.mxu1 }
 0x192   : > { %2579 = vst [vmem:[#allocation10_spill] sm:$0xff] %v2299_v24  ;;  %v2303_v34 = vadd.f32 %v961_v53, %v792_v11 }
 0x193   : > { %1109 = vst [vmem:[%s2013_s7 + $0x1e0] sm:$0xff] %v2299_v24 }
 0x194   : > { %1078 = vst [vmem:[%s2013_s7 + $0xe8] sm:$0xff] %v2303_v34 }
 0x196   : > { %v872_v42 = vpop.f32.mrf.mxu2 }
 0x197   : > { %v1041_v56 = vpop.f32.mrf.mxu3 }
 0x198   : > { %v2307_v57 = vadd.f32 %v1041_v56, %v872_v42  ;;  %v795_v50 = vpop.f32.mrf.mxu0 }
 0x199   : > { %v964_v26 = vpop.f32.mrf.mxu1 }
 0x19a   : > { %2580 = vst [vmem:[#allocation11_spill] sm:$0xff] %v2307_v57  ;;  %v2311_v10 = vadd.f32 %v964_v26, %v795_v50 }
 0x19b   : > { %1110 = vst [vmem:[%s2013_s7 + $0x1e8] sm:$0xff] %v2307_v57 }
 0x19c   : > { %1079 = vst [vmem:[%s2013_s7 + $0xf0] sm:$0xff] %v2311_v10 }
 0x19e   : > { %v875_v20 = vpop.f32.mrf.mxu2 }
 0x19f   : > { %v1044_v24 = vpop.f32.mrf.mxu3 }
 0x1a0   : > { %v2315_v53 = vadd.f32 %v1044_v24, %v875_v20  ;;  %v797_v11 = vpop.f32.mrf.mxu0 }
 0x1a1   : > { %v966_v6 = vpop.f32.mrf.mxu1 }
 0x1a2   : > { %2581 = vst [vmem:[#allocation12_spill] sm:$0xff] %v2315_v53  ;;  %v2319_v54 = vadd.f32 %v966_v6, %v797_v11 }
 0x1a3   : > { %1111 = vst [vmem:[%s2013_s7 + $0x1f0] sm:$0xff] %v2315_v53 }
 0x1a4   : > { %1080 = vst [vmem:[%s2013_s7 + $0xf8] sm:$0xff] %v2319_v54 }
 0x1a6   : > { %v877_v42 = vpop.f32.mrf.mxu2 }
 0x1a7   : > { %v1046_v56 = vpop.f32.mrf.mxu3  ;;  %1116 = sbr.rel (%p1725_p4) target bundleno = 431 (0x1af), region = 32 }
 0x1a8   : > { %v2323_v35 = vadd.f32 %v1046_v56, %v877_v42 }
 0x1aa   : > { %2582 = vst [vmem:[#allocation13_spill] sm:$0xff] %v2323_v35 }
 0x1ab   : > { %1112 = vst [vmem:[%s2013_s7 + $0x1f8] sm:$0xff] %v2323_v35 }
 0x1ac   : > { %v1842_v26 = vmov 0.0  }
 0x1ad   : > { %1117 = vst [vmem:[%s2545_s3] sm:$0x1] %v1842_v26 }
 0x1ae   : > { %1118 = vst [vmem:[%s2546_s4] sm:$0x1] %v1842_v26 }
 0x1af PF: > { %v1120_v6 = vadd.f32 %v2023_v4, %v2015_v62  ;;  %v1192_v50 = vmul.f32 %v2015_v62, %v2015_v62  ;;  %v1193_v24 = vmul.f32 %v2023_v4, %v2023_v4  ;;  %v1194_v11 = vmul.f32 %v2039_v22, %v2039_v22 }
 0x1b0   : > { %v1195_v56 = vmul.f32 %v2047_v28, %v2047_v28  ;;  %v1196_v53 = vmul.f32 %v2063_v46, %v2063_v46  ;;  %v1197_v4 = vmul.f32 %v2071_v52, %v2071_v52 }
 0x1b1   : > { %v1121_v20 = vadd.f32 %v1120_v6, %v2039_v22  ;;  %v1256_v26 = vadd.f32 %v1193_v24, %v1192_v50  ;;  %v1199_v50 = vmul.f32 %v2095_v15, %v2095_v15 }
 0x1b3   : > { %v1122_v42 = vadd.f32 %v1121_v20, %v2047_v28  ;;  %v1257_v62 = vadd.f32 %v1256_v26, %v1194_v11  ;;  %v1198_v20 = vmul.f32 %v2087_v9, %v2087_v9 }
 0x1b5   : > { %v1123_v35 = vadd.f32 %v1122_v42, %v2063_v46  ;;  %v1258_v6 = vadd.f32 %v1257_v62, %v1195_v56  ;;  %v1204_v62 = vmul.f32 %v2159_v38, %v2159_v38 }
 0x1b7   : > { %v1124_v57 = vadd.f32 %v1123_v35, %v2071_v52  ;;  %v1259_v21 = vadd.f32 %v1258_v6, %v1196_v53  ;;  %v1200_v35 = vmul.f32 %v2111_v37, %v2111_v37  ;;  %v1202_v53 = vmul.f32 %v2135_v5, %v2135_v5 }
 0x1b8   : > { %v1205_v6 = vmul.f32 %v2167_v48, %v2167_v48 }
 0x1b9   : > { %v1125_v22 = vadd.f32 %v1124_v57, %v2087_v9  ;;  %v1260_v24 = vadd.f32 %v1259_v21, %v1197_v4  ;;  %v1201_v57 = vmul.f32 %v2119_v44, %v2119_v44  ;;  %v1203_v21 = vmul.f32 %v2143_v13, %v2143_v13 }
 0x1bb   : > { %v1126_v28 = vadd.f32 %v1125_v22, %v2095_v15  ;;  %v1261_v11 = vadd.f32 %v1260_v24, %v1198_v20  ;;  %v1206_v20 = vmul.f32 %v2183_v14, %v2183_v14 }
 0x1bd   : > { %v1127_v46 = vadd.f32 %v1126_v28, %v2111_v37  ;;  %v1262_v42 = vadd.f32 %v1261_v11, %v1199_v50  ;;  %v1207_v50 = vmul.f32 %v2191_v23, %v2191_v23  ;;  %v1209_v11 = vmul.f32 %v2207_v45, %v2207_v45 }
 0x1bf   : > { %v1128_v52 = vadd.f32 %v1127_v46, %v2119_v44  ;;  %v1263_v56 = vadd.f32 %v1262_v42, %v1200_v35  ;;  %v1208_v46 = vmul.f32 %v2199_v33, %v2199_v33 }
 0x1c1   : > { %v1129_v9 = vadd.f32 %v1128_v52, %v2135_v5  ;;  %v1264_v26 = vadd.f32 %v1263_v56, %v1201_v57  ;;  %v1210_v57 = vmul.f32 %v2215_v55, %v2215_v55  ;;  %v1212_v56 = vmul.f32 %v2231_v16, %v2231_v16 }
 0x1c3   : > { %v1130_v15 = vadd.f32 %v1129_v9, %v2143_v13  ;;  %v1265_v4 = vadd.f32 %v1264_v26, %v1202_v53  ;;  %v1211_v9 = vmul.f32 %v2223_v63, %v2223_v63 }
 0x1c5   : > { %v1131_v37 = vadd.f32 %v1130_v15, %v2159_v38  ;;  %v1266_v22 = vadd.f32 %v1265_v4, %v1203_v21  ;;  %v1213_v21 = vmul.f32 %v2239_v29, %v2239_v29  ;;  %v1215_v4 = vmul.f32 %v2255_v59, %v2255_v59 }
 0x1c7   : > { %v1132_v44 = vadd.f32 %v1131_v37, %v2167_v48  ;;  %v1267_v28 = vadd.f32 %v1266_v22, %v1204_v62  ;;  %v1214_v37 = vmul.f32 %v2247_v47, %v2247_v47 }
 0x1c9   : > { %v1133_v5 = vadd.f32 %v1132_v44, %v2183_v14  ;;  %v1268_v24 = vadd.f32 %v1267_v28, %v1205_v6  ;;  %v1216_v6 = vmul.f32 %v2263_v18, %v2263_v18  ;;  %v1218_v28 = vmul.f32 %v2279_v61, %v2279_v61 }
 0x1cb   : > { %v1134_v13 = vadd.f32 %v1133_v5, %v2191_v23  ;;  %v1269_v35 = vadd.f32 %v1268_v24, %v1206_v20  ;;  %v1217_v5 = vmul.f32 %v2271_v39, %v2271_v39 }
 0x1cd   : > { %v1135_v38 = vadd.f32 %v1134_v13, %v2199_v33  ;;  %v1270_v52 = vadd.f32 %v1269_v35, %v1207_v50  ;;  %v1219_v50 = vmul.f32 %v2287_v30, %v2287_v30  ;;  %v1221_v35 = vmul.f32 %v2303_v34, %v2303_v34 }
 0x1cf   : > { %v1136_v48 = vadd.f32 %v1135_v38, %v2207_v45  ;;  %v1271_v42 = vadd.f32 %v1270_v52, %v1208_v46  ;;  %v1220_v38 = vmul.f32 %v2295_v0, %v2295_v0 }
 0x1d1   : > { %v1137_v14 = vadd.f32 %v1136_v48, %v2215_v55  ;;  %v1272_v53 = vadd.f32 %v1271_v42, %v1209_v11  ;;  %v1222_v11 = vmul.f32 %v2311_v10, %v2311_v10  ;;  %v1224_v42 = vmul.f32 %v2019_v1, %v2019_v1 }
 0x1d3   : > { %v1138_v23 = vadd.f32 %v1137_v14, %v2223_v63  ;;  %v1273_v15 = vadd.f32 %v1272_v53, %v1210_v57  ;;  %v1223_v14 = vmul.f32 %v2319_v54, %v2319_v54 }
 0x1d5   : > { %v1139_v33 = vadd.f32 %v1138_v23, %v2231_v16  ;;  %v1274_v26 = vadd.f32 %v1273_v15, %v1211_v9  ;;  %v1225_v9 = vmul.f32 %v2035_v17, %v2035_v17  ;;  %v1227_v15 = vmul.f32 %v2059_v41, %v2059_v41 }
 0x1d7   : > { %v1140_v45 = vadd.f32 %v1139_v33, %v2239_v29  ;;  %v1275_v62 = vadd.f32 %v1274_v26, %v1212_v56  ;;  %v1226_v33 = vmul.f32 %v2043_v25, %v2043_v25 }
 0x1d9   : > { %v1141_v55 = vadd.f32 %v1140_v45, %v2247_v47  ;;  %v1276_v44 = vadd.f32 %v1275_v62, %v1213_v21  ;;  %v1228_v21 = vmul.f32 %v2067_v49, %v2067_v49  ;;  %v1230_v62 = vmul.f32 %v2091_v12, %v2091_v12 }
 0x1db   : > { %v1142_v63 = vadd.f32 %v1141_v55, %v2255_v59  ;;  %v1277_v22 = vadd.f32 %v1276_v44, %v1214_v37  ;;  %v1229_v55 = vmul.f32 %v2083_v3, %v2083_v3 }
 0x1dd   : > { %v1143_v16 = vadd.f32 %v1142_v63, %v2263_v18  ;;  %v1278_v20 = vadd.f32 %v1277_v22, %v1215_v4  ;;  %v1231_v4 = vmul.f32 %v2107_v32, %v2107_v32  ;;  %v1233_v22 = vmul.f32 %v2131_v60, %v2131_v60 }
 0x1df   : > { %v1144_v29 = vadd.f32 %v1143_v16, %v2271_v39  ;;  %v1279_v13 = vadd.f32 %v1278_v20, %v1216_v6  ;;  %v1232_v16 = vmul.f32 %v2115_v40, %v2115_v40 }
 0x1e1   : > { %v1145_v47 = vadd.f32 %v1144_v29, %v2279_v61  ;;  %v1280_v24 = vadd.f32 %v1279_v13, %v1217_v5  ;;  %v1234_v5 = vmul.f32 %v2139_v8, %v2139_v8  ;;  %v1236_v13 = vmul.f32 %v2163_v43, %v2163_v43 }
 0x1e3   : > { %v1146_v59 = vadd.f32 %v1145_v47, %v2287_v30  ;;  %v1281_v46 = vadd.f32 %v1280_v24, %v1218_v28  ;;  %v1235_v47 = vmul.f32 %v2155_v31, %v2155_v31 }
 0x1e5   : > { %v1147_v18 = vadd.f32 %v1146_v59, %v2295_v0  ;;  %v1282_v48 = vadd.f32 %v1281_v46, %v1219_v50  ;;  %v1237_v50 = vmul.f32 %v2179_v2, %v2179_v2  ;;  %v1239_v46 = vmul.f32 %v2195_v27, %v2195_v27 }
 0x1e7   : > { %v1148_v39 = vadd.f32 %v1147_v18, %v2303_v34  ;;  %v1283_v52 = vadd.f32 %v1282_v48, %v1220_v38  ;;  %v1238_v18 = vmul.f32 %v2187_v19, %v2187_v19 }
 0x1e9   : > { %v1149_v61 = vadd.f32 %v1148_v39, %v2311_v10  ;;  %v1284_v57 = vadd.f32 %v1283_v52, %v1221_v35  ;;  %v1240_v35 = vmul.f32 %v2203_v36, %v2203_v36  ;;  %v1242_v52 = vmul.f32 %v2219_v58, %v2219_v58 }
 0x1eb   : > { %v1150_v30 = vadd.f32 %v1149_v61, %v2319_v54  ;;  %v1285_v23 = vadd.f32 %v1284_v57, %v1222_v11  ;;  %v1241_v61 = vmul.f32 %v2211_v51, %v2211_v51 }
 0x1ed   : > { %v1151_v0 = vadd.f32 %v1150_v30, %v2019_v1  ;;  %v1286_v53 = vadd.f32 %v1285_v23, %v1223_v14  ;;  %v1243_v14 = vmul.f32 %v2227_v7, %v2227_v7 }
 0x1ef   : > { %v1152_v34 = vadd.f32 %v1151_v0, %v2035_v17  ;;  %v1287_v56 = vadd.f32 %v1286_v53, %v1224_v42 }
 0x1f1   : > { %v1153_v10 = vadd.f32 %v1152_v34, %v2043_v25  ;;  %v1288_v45 = vadd.f32 %v1287_v56, %v1225_v9 }
 0x1f3   : > { %v1154_v54 = vadd.f32 %v1153_v10, %v2059_v41  ;;  %v1289_v26 = vadd.f32 %v1288_v45, %v1226_v33 }
 0x1f5   : > { %v1155_v1 = vadd.f32 %v1154_v54, %v2067_v49  ;;  %v1290_v37 = vadd.f32 %v1289_v26, %v1227_v15 }
 0x1f7   : > { %v1156_v17 = vadd.f32 %v1155_v1, %v2083_v3  ;;  %v1291_v63 = vadd.f32 %v1290_v37, %v1228_v21  ;;  %v2587_v1 = vld [vmem:[#allocation6_spill] sm:$0xff] }
 0x1f8   : > { %v1248_v26 = vmul.f32 %v2587_v1, %v2587_v1 }
 0x1f9   : > { %v1157_v25 = vadd.f32 %v1156_v17, %v2091_v12  ;;  %v1292_v44 = vadd.f32 %v1291_v63, %v1229_v55  ;;  %v2588_v55 = vld [vmem:[#allocation7_spill] sm:$0xff]  ;;  %v2589_v63 = vld [vmem:[#allocation8_spill] sm:$0xff] }
 0x1fb   : > { %v1158_v41 = vadd.f32 %v1157_v25, %v2107_v32  ;;  %v1293_v6 = vadd.f32 %v1292_v44, %v1230_v62  ;;  %v1249_v25 = vmul.f32 %v2588_v55, %v2588_v55 }
 0x1fd   : > { %v1159_v49 = vadd.f32 %v1158_v41, %v2115_v40  ;;  %v1294_v29 = vadd.f32 %v1293_v6, %v1231_v4  ;;  %v1250_v4 = vmul.f32 %v2589_v63, %v2589_v63 }
 0x1ff   : > { %v1160_v3 = vadd.f32 %v1159_v49, %v2131_v60  ;;  %v1295_v20 = vadd.f32 %v1294_v29, %v1232_v16  ;;  %v2590_v49 = vld [vmem:[#allocation9_spill] sm:$0xff] }
 0x200   : > { %v1251_v6 = vmul.f32 %v2590_v49, %v2590_v49 }
 0x201   : > { %v1161_v12 = vadd.f32 %v1160_v3, %v2139_v8  ;;  %v1296_v28 = vadd.f32 %v1295_v20, %v1233_v22  ;;  %v2591_v22 = vld [vmem:[#allocation10_spill] sm:$0xff]  ;;  %v2592_v20 = vld [vmem:[#allocation11_spill] sm:$0xff] }
 0x203   : > { %v1162_v32 = vadd.f32 %v1161_v12, %v2155_v31  ;;  %v1297_v59 = vadd.f32 %v1296_v28, %v1234_v5  ;;  %v1252_v12 = vmul.f32 %v2591_v22, %v2591_v22 }
 0x205   : > { %v1163_v40 = vadd.f32 %v1162_v32, %v2163_v43  ;;  %v1298_v24 = vadd.f32 %v1297_v59, %v1235_v47  ;;  %v1253_v47 = vmul.f32 %v2592_v20, %v2592_v20 }
 0x207   : > { %v1164_v60 = vadd.f32 %v1163_v40, %v2179_v2  ;;  %v1299_v38 = vadd.f32 %v1298_v24, %v1236_v13  ;;  %v2593_v40 = vld [vmem:[#allocation12_spill] sm:$0xff] }
 0x208   : > { %v1254_v59 = vmul.f32 %v2593_v40, %v2593_v40 }
 0x209   : > { %v1165_v8 = vadd.f32 %v1164_v60, %v2187_v19  ;;  %v1300_v39 = vadd.f32 %v1299_v38, %v1237_v50  ;;  %v2594_v50 = vld [vmem:[#allocation13_spill] sm:$0xff] }
 0x20b   : > { %v1166_v31 = vadd.f32 %v1165_v8, %v2195_v27  ;;  %v1301_v48 = vadd.f32 %v1300_v39, %v1238_v18  ;;  %v1255_v8 = vmul.f32 %v2594_v50, %v2594_v50 }
 0x20d   : > { %v1167_v43 = vadd.f32 %v1166_v31, %v2203_v36  ;;  %v1302_v11 = vadd.f32 %v1301_v48, %v1239_v46  ;;  %v2583_v36 = vld [vmem:[#allocation2_spill] sm:$0xff] }
 0x20e   : > { %v1244_v42 = vmul.f32 %v2583_v36, %v2583_v36 }
 0x20f   : > { %v1168_v2 = vadd.f32 %v1167_v43, %v2211_v51  ;;  %v1303_v30 = vadd.f32 %v1302_v11, %v1240_v35  ;;  %v2584_v51 = vld [vmem:[#allocation3_spill] sm:$0xff]  ;;  %v1119_v11 = vld [vmem:[%s2545_s3] sm:$0x1] }
 0x210   : > { %v1245_v9 = vmul.f32 %v2584_v51, %v2584_v51 }
 0x211   : > { %v1169_v19 = vadd.f32 %v1168_v2, %v2219_v58  ;;  %v1304_v57 = vadd.f32 %v1303_v30, %v1241_v61  ;;  %v2585_v58 = vld [vmem:[#allocation4_spill] sm:$0xff] }
 0x212   : > { %v1246_v33 = vmul.f32 %v2585_v58, %v2585_v58 }
 0x213   : > { %v1170_v27 = vadd.f32 %v1169_v19, %v2227_v7  ;;  %v1305_v23 = vadd.f32 %v1304_v57, %v1242_v52  ;;  %v2586_v7 = vld [vmem:[#allocation5_spill] sm:$0xff]  ;;  %v1191_v57 = vld [vmem:[%s2546_s4] sm:$0x1] }
 0x214   : > { %v1247_v15 = vmul.f32 %v2586_v7, %v2586_v7 }
 0x215   : > { %v1171_v0 = vadd.f32 %v1170_v27, %v2583_v36  ;;  %v1306_v53 = vadd.f32 %v1305_v23, %v1243_v14 }
 0x217   : > { %v1172_v34 = vadd.f32 %v1171_v0, %v2584_v51  ;;  %v1307_v56 = vadd.f32 %v1306_v53, %v1244_v42 }
 0x219   : > { %v1173_v10 = vadd.f32 %v1172_v34, %v2585_v58  ;;  %v1308_v45 = vadd.f32 %v1307_v56, %v1245_v9 }
 0x21b   : > { %v1174_v54 = vadd.f32 %v1173_v10, %v2586_v7  ;;  %v1309_v17 = vadd.f32 %v1308_v45, %v1246_v33 }
 0x21d   : > { %v1175_v21 = vadd.f32 %v1174_v54, %v2587_v1  ;;  %v1310_v62 = vadd.f32 %v1309_v17, %v1247_v15 }
 0x21f   : > { %v1176_v37 = vadd.f32 %v1175_v21, %v2588_v55  ;;  %v1311_v44 = vadd.f32 %v1310_v62, %v1248_v26 }
 0x221   : > { %v1177_v41 = vadd.f32 %v1176_v37, %v2589_v63  ;;  %v1312_v3 = vadd.f32 %v1311_v44, %v1249_v25 }
 0x223   : > { %v1178_v16 = vadd.f32 %v1177_v41, %v2590_v49  ;;  %v1313_v5 = vadd.f32 %v1312_v3, %v1250_v4 }
 0x225   : > { %v1179_v29 = vadd.f32 %v1178_v16, %v2591_v22  ;;  %v1314_v28 = vadd.f32 %v1313_v5, %v1251_v6 }
 0x227   : > { %v1180_v32 = vadd.f32 %v1179_v29, %v2592_v20  ;;  %v1315_v60 = vadd.f32 %v1314_v28, %v1252_v12 }
 0x229   : > { %v1181_v13 = vadd.f32 %v1180_v32, %v2593_v40  ;;  %v1316_v18 = vadd.f32 %v1315_v60, %v1253_v47 }
 0x22b   : > { %v1182_v24 = vadd.f32 %v1181_v13, %v2594_v50  ;;  %v1317_v31 = vadd.f32 %v1316_v18, %v1254_v59 }
 0x22d   : > { %v1183_v38 = vrot.slane %v1182_v24, 4  ;;  %v1318_v39 = vadd.f32 %v1317_v31, %v1255_v8 }
 0x22f   : > { %v1184_v46 = vadd.f32 %v1183_v38, %v1182_v24  ;;  %v1319_v35 = vrot.slane %v1318_v39, 4 }
 0x231   : > { %v1185_v43 = vrot.slane %v1184_v46, 2  ;;  %v1320_v2 = vadd.f32 %v1319_v35, %v1318_v39 }
 0x233   : > { %v1186_v48 = vadd.f32 %v1185_v43, %v1184_v46  ;;  %v1321_v19 = vrot.slane %v1320_v2, 2 }
 0x235   : > { %v1187_v61 = vrot.slane %v1186_v48, 1  ;;  %v1322_v30 = vadd.f32 %v1321_v19, %v1320_v2 }
 0x237   : > { %v1188_v52 = vadd.f32 %v1187_v61, %v1186_v48  ;;  %v1323_v14 = vrot.slane %v1322_v30, 1 }
 0x239   : > { %v1189_v27 = vadd.f32 %v1188_v52, %v1119_v11  ;;  %v1324_v36 = vadd.f32 %v1323_v14, %v1322_v30 }
 0x23b   : > { %1190 = vst [vmem:[%s2545_s3] sm:$0x1] %v1189_v27  ;;  %v1325_v0 = vadd.f32 %v1324_v36, %v1191_v57 }
 0x23d   : > { %1326 = vst [vmem:[%s2546_s4] sm:$0x1] %v1325_v0 }
 0x23e PF: > { %s15_s15 = sadd.s32 1, %s1840_s15  }
 0x23f   : > { %p12_p5 = scmp.ge.s32.totalorder %s15_s15, 6  }
 0x241   :  { %14 = sbr.rel (!%p12_p5) target bundleno = 1 (0x1), region = 78 }

// kernel: forward.16
= control target key start
LH: loop header
LB: loop body
LE: loop exit
PB: predicated region body
PF: predicated region fallthrough
CT: control target
= control target key end

     0   :  { %s4049_s0 = inlined_call_operand.vmem [shape: f32[2048,128], index: 0, kind: input, shape index: {}]   ;;  %s4050_s1 = inlined_call_operand.vmem [shape: f32[1,128], index: 1, kind: input, shape index: {}]   ;;  %s4051_s2 = inlined_call_operand.vmem [shape: f32[1,128], index: 2, kind: input, shape index: {}]   ;;  %s4052_s3 = inlined_call_operand.vmem [shape: bf16[2048,128], index: 3, kind: output, shape index: {}]  }
   0x1   :  { %v14_v0 = vld [vmem:[%s4049_s0] sm:$0xff]  ;;  %v15_v1 = vld [vmem:[%s4049_s0 + $0x8] sm:$0xff]  ;;  %v16_v4 = vld [vmem:[%s4049_s0 + $0x10] sm:$0xff] }
   0x2   :  { %v2364_v2 = vld [vmem:[%s4050_s1] ss:$0 sm:$0xff]  ;;  %v17_v5 = vld [vmem:[%s4049_s0 + $0x18] sm:$0xff]  ;;  %v19_v11 = vld [vmem:[%s4049_s0 + $0x28] sm:$0xff] }
   0x3   :  { %v2369_v3 = vld [vmem:[%s4051_s2] ss:$0 sm:$0xff]  ;;  %v274_v7 = vmul.f32 %v2364_v2, %v14_v0  ;;  %v275_v8 = vmul.f32 %v2364_v2, %v15_v1  ;;  %v276_v9 = vmul.f32 %v2364_v2, %v16_v4  ;;  %v277_v10 = vmul.f32 %v2364_v2, %v17_v5  ;;  %v20_v12 = vld [vmem:[%s4049_s0 + $0x30] sm:$0xff]  ;;  %v21_v13 = vld [vmem:[%s4049_s0 + $0x38] sm:$0xff] }
   0x4   :  { %v18_v6 = vld [vmem:[%s4049_s0 + $0x20] sm:$0xff]  ;;  %v279_v15 = vmul.f32 %v2364_v2, %v19_v11  ;;  %v280_v16 = vmul.f32 %v2364_v2, %v20_v12  ;;  %v281_v17 = vmul.f32 %v2364_v2, %v21_v13  ;;  %v23_v27 = vld [vmem:[%s4049_s0 + $0x48] sm:$0xff]  ;;  %v24_v32 = vld [vmem:[%s4049_s0 + $0x50] sm:$0xff] }
   0x5   :  { %v278_v14 = vmul.f32 %v2364_v2, %v18_v6  ;;  %v534_v18 = vadd.f32 %v2369_v3, %v274_v7  ;;  %v535_v19 = vadd.f32 %v2369_v3, %v275_v8  ;;  %v536_v20 = vadd.f32 %v2369_v3, %v276_v9  ;;  %v22_v26 = vld [vmem:[%s4049_s0 + $0x40] sm:$0xff]  ;;  %v25_v33 = vld [vmem:[%s4049_s0 + $0x58] sm:$0xff]  ;;  %v27_v39 = vld [vmem:[%s4049_s0 + $0x68] sm:$0xff] }
   0x6   :  { %v537_v21 = vadd.f32 %v2369_v3, %v277_v10  ;;  %v539_v23 = vadd.f32 %v2369_v3, %v279_v15  ;;  %v540_v24 = vadd.f32 %v2369_v3, %v280_v16  ;;  %v541_v25 = vadd.f32 %v2369_v3, %v281_v17  ;;  %v26_v38 = vld [vmem:[%s4049_s0 + $0x60] sm:$0xff]  ;;  %v28_v44 = vld [vmem:[%s4049_s0 + $0x70] sm:$0xff]  ;;  %v29_v45 = vld [vmem:[%s4049_s0 + $0x78] sm:$0xff] }
   0x7   :  { %v538_v22 = vadd.f32 %v2369_v3, %v278_v14  ;;  %v790_v28 = vmax.f32 %v534_v18, 0.0  ;;  %v791_v29 = vmax.f32 %v535_v19, 0.0  ;;  %v792_v30 = vmax.f32 %v536_v20, 0.0  ;;  %v30_v58 = vld [vmem:[%s4049_s0 + $0x80] sm:$0xff]  ;;  %v31_v63 = vld [vmem:[%s4049_s0 + $0x88] sm:$0xff]  ;;  %v32_v6 = vld [vmem:[%s4049_s0 + $0x90] sm:$0xff] }
   0x8   :  { %v793_v31 = vmax.f32 %v537_v21, 0.0  ;;  %v795_v35 = vmax.f32 %v539_v23, 0.0  ;;  %v796_v36 = vmax.f32 %v540_v24, 0.0  ;;  %v797_v37 = vmax.f32 %v541_v25, 0.0  ;;  %v33_v7 = vld [vmem:[%s4049_s0 + $0x98] sm:$0xff]  ;;  %v34_v12 = vld [vmem:[%s4049_s0 + $0xa0] sm:$0xff] }
   0x9   :  { %v794_v34 = vmax.f32 %v538_v22, 0.0  ;;  %v1565_v40 = vpack.c.bf16 %v791_v29, %v790_v28  ;;  %v282_v42 = vmul.f32 %v2364_v2, %v22_v26  ;;  %v283_v43 = vmul.f32 %v2364_v2, %v23_v27  ;;  %v35_v13 = vld [vmem:[%s4049_s0 + $0xa8] sm:$0xff]  ;;  %v36_v18 = vld [vmem:[%s4049_s0 + $0xb0] sm:$0xff]  ;;  %v37_v23 = vld [vmem:[%s4049_s0 + $0xb8] sm:$0xff] }
   0xa   :  { %v1570_v41 = vpack.c.bf16 %v793_v31, %v792_v30  ;;  %v1580_v47 = vpack.c.bf16 %v797_v37, %v796_v36  ;;  %v284_v48 = vmul.f32 %v2364_v2, %v24_v32  ;;  %v285_v49 = vmul.f32 %v2364_v2, %v25_v33  ;;  %v38_v28 = vld [vmem:[%s4049_s0 + $0xc0] sm:$0xff]  ;;  %v39_v37 = vld [vmem:[%s4049_s0 + $0xc8] sm:$0xff] }
   0xb   :  { %v1575_v46 = vpack.c.bf16 %v795_v35, %v794_v34  ;;  %1566 = vst [vmem:[%s4052_s3] sm:$0xff] %v1565_v40   ;;  %v542_v50 = vadd.f32 %v2369_v3, %v282_v42  ;;  %v543_v51 = vadd.f32 %v2369_v3, %v283_v43  ;;  %v286_v52 = vmul.f32 %v2364_v2, %v26_v38  ;;  %v40_v42 = vld [vmem:[%s4049_s0 + $0xd0] sm:$0xff]  ;;  %v41_v43 = vld [vmem:[%s4049_s0 + $0xd8] sm:$0xff] }
   0xc   :  { %v287_v53 = vmul.f32 %v2364_v2, %v27_v39  ;;  %2202 = vst [vmem:[%s4052_s3 + $0x8] sm:$0xff] %v1570_v41   ;;  %v544_v54 = vadd.f32 %v2369_v3, %v284_v48  ;;  %v545_v55 = vadd.f32 %v2369_v3, %v285_v49  ;;  %v288_v56 = vmul.f32 %v2364_v2, %v28_v44  ;;  %v42_v48 = vld [vmem:[%s4049_s0 + $0xe0] sm:$0xff]  ;;  %v43_v49 = vld [vmem:[%s4049_s0 + $0xe8] sm:$0xff] }
   0xd   :  { %v289_v57 = vmul.f32 %v2364_v2, %v29_v45  ;;  %2203 = vst [vmem:[%s4052_s3 + $0x10] sm:$0xff] %v1575_v46   ;;  %v798_v59 = vmax.f32 %v542_v50, 0.0  ;;  %v799_v60 = vmax.f32 %v543_v51, 0.0  ;;  %v546_v61 = vadd.f32 %v2369_v3, %v286_v52 }
   0xe   :  { %v547_v62 = vadd.f32 %v2369_v3, %v287_v53  ;;  %2204 = vst [vmem:[%s4052_s3 + $0x18] sm:$0xff] %v1580_v47   ;;  %v800_v0 = vmax.f32 %v544_v54, 0.0  ;;  %v801_v1 = vmax.f32 %v545_v55, 0.0  ;;  %v548_v4 = vadd.f32 %v2369_v3, %v288_v56  ;;  %v44_v54 = vld [vmem:[%s4049_s0 + $0xf0] sm:$0xff] }
   0xf   :  { %v549_v5 = vadd.f32 %v2369_v3, %v289_v57  ;;  %v1585_v8 = vpack.c.bf16 %v799_v60, %v798_v59  ;;  %v802_v9 = vmax.f32 %v546_v61, 0.0  ;;  %v290_v11 = vmul.f32 %v2364_v2, %v30_v58  ;;  %v45_v59 = vld [vmem:[%s4049_s0 + $0xf8] sm:$0xff] }
  0x10   :  { %v803_v10 = vmax.f32 %v547_v62, 0.0  ;;  %v1590_v14 = vpack.c.bf16 %v801_v1, %v800_v0  ;;  %v804_v15 = vmax.f32 %v548_v4, 0.0  ;;  %v291_v17 = vmul.f32 %v2364_v2, %v31_v63  ;;  %v46_v0 = vld [vmem:[%s4049_s0 + $0x100] sm:$0xff] }
  0x11   :  { %v805_v16 = vmax.f32 %v549_v5, 0.0  ;;  %2205 = vst [vmem:[%s4052_s3 + $0x20] sm:$0xff] %v1585_v8   ;;  %v550_v20 = vadd.f32 %v2369_v3, %v290_v11  ;;  %v292_v21 = vmul.f32 %v2364_v2, %v32_v6  ;;  %v293_v22 = vmul.f32 %v2364_v2, %v33_v7  ;;  %v47_v11 = vld [vmem:[%s4049_s0 + $0x108] sm:$0xff] }
  0x12   :  { %v1595_v19 = vpack.c.bf16 %v803_v10, %v802_v9  ;;  %2206 = vst [vmem:[%s4052_s3 + $0x28] sm:$0xff] %v1590_v14   ;;  %v551_v25 = vadd.f32 %v2369_v3, %v291_v17  ;;  %v294_v26 = vmul.f32 %v2364_v2, %v34_v12  ;;  %v295_v27 = vmul.f32 %v2364_v2, %v35_v13  ;;  %v49_v17 = vld [vmem:[%s4049_s0 + $0x118] sm:$0xff] }
  0x13   :  { %v1600_v24 = vpack.c.bf16 %v805_v16, %v804_v15  ;;  %v806_v29 = vmax.f32 %v550_v20, 0.0  ;;  %v552_v30 = vadd.f32 %v2369_v3, %v292_v21  ;;  %v553_v31 = vadd.f32 %v2369_v3, %v293_v22  ;;  %v48_v16 = vld [vmem:[%s4049_s0 + $0x110] sm:$0xff]  ;;  %v50_v22 = vld [vmem:[%s4049_s0 + $0x120] sm:$0xff] }
  0x14   :  { %2207 = vst [vmem:[%s4052_s3 + $0x30] sm:$0xff] %v1595_v19   ;;  %v296_v32 = vmul.f32 %v2364_v2, %v36_v18  ;;  %v807_v33 = vmax.f32 %v551_v25, 0.0  ;;  %v554_v34 = vadd.f32 %v2369_v3, %v294_v26  ;;  %v555_v35 = vadd.f32 %v2369_v3, %v295_v27 }
  0x15   :  { %2208 = vst [vmem:[%s4052_s3 + $0x38] sm:$0xff] %v1600_v24   ;;  %v297_v36 = vmul.f32 %v2364_v2, %v37_v23  ;;  %v808_v38 = vmax.f32 %v552_v30, 0.0  ;;  %v809_v39 = vmax.f32 %v553_v31, 0.0  ;;  %v298_v41 = vmul.f32 %v2364_v2, %v38_v28  ;;  %v51_v23 = vld [vmem:[%s4049_s0 + $0x128] sm:$0xff]  ;;  %v52_v28 = vld [vmem:[%s4049_s0 + $0x130] sm:$0xff] }
  0x16   :  { %v556_v40 = vadd.f32 %v2369_v3, %v296_v32  ;;  %v1605_v44 = vpack.c.bf16 %v807_v33, %v806_v29  ;;  %v810_v45 = vmax.f32 %v554_v34, 0.0  ;;  %v811_v46 = vmax.f32 %v555_v35, 0.0  ;;  %v53_v33 = vld [vmem:[%s4049_s0 + $0x138] sm:$0xff] }
  0x17   :  { %v557_v47 = vadd.f32 %v2369_v3, %v297_v36  ;;  %v1610_v50 = vpack.c.bf16 %v809_v39, %v808_v38  ;;  %v299_v52 = vmul.f32 %v2364_v2, %v39_v37  ;;  %v558_v53 = vadd.f32 %v2369_v3, %v298_v41  ;;  %v54_v38 = vld [vmem:[%s4049_s0 + $0x140] sm:$0xff] }
  0x18   :  { %v812_v51 = vmax.f32 %v556_v40, 0.0  ;;  %2209 = vst [vmem:[%s4052_s3 + $0x40] sm:$0xff] %v1605_v44   ;;  %v1615_v55 = vpack.c.bf16 %v811_v46, %v810_v45  ;;  %v300_v57 = vmul.f32 %v2364_v2, %v40_v42  ;;  %v301_v58 = vmul.f32 %v2364_v2, %v41_v43 }
  0x19   :  { %v813_v56 = vmax.f32 %v557_v47, 0.0  ;;  %2210 = vst [vmem:[%s4052_s3 + $0x48] sm:$0xff] %v1610_v50   ;;  %v559_v60 = vadd.f32 %v2369_v3, %v299_v52  ;;  %v814_v61 = vmax.f32 %v558_v53, 0.0  ;;  %v302_v62 = vmul.f32 %v2364_v2, %v42_v48  ;;  %v55_v47 = vld [vmem:[%s4049_s0 + $0x148] sm:$0xff]  ;;  %v56_v52 = vld [vmem:[%s4049_s0 + $0x150] sm:$0xff]  ;;  %v57_v53 = vld [vmem:[%s4049_s0 + $0x158] sm:$0xff] }
  0x1a   :  { %v303_v63 = vmul.f32 %v2364_v2, %v43_v49  ;;  %2211 = vst [vmem:[%s4052_s3 + $0x50] sm:$0xff] %v1615_v55   ;;  %v560_v4 = vadd.f32 %v2369_v3, %v300_v57  ;;  %v561_v5 = vadd.f32 %v2369_v3, %v301_v58  ;;  %v304_v6 = vmul.f32 %v2364_v2, %v44_v54  ;;  %v58_v58 = vld [vmem:[%s4049_s0 + $0x160] sm:$0xff] }
  0x1b   :  { %v1620_v1 = vpack.c.bf16 %v813_v56, %v812_v51  ;;  %v815_v7 = vmax.f32 %v559_v60, 0.0  ;;  %v562_v8 = vadd.f32 %v2369_v3, %v302_v62  ;;  %v305_v10 = vmul.f32 %v2364_v2, %v45_v59  ;;  %v59_v59 = vld [vmem:[%s4049_s0 + $0x168] sm:$0xff] }
  0x1c   :  { %v563_v9 = vadd.f32 %v2369_v3, %v303_v63  ;;  %v816_v12 = vmax.f32 %v560_v4, 0.0  ;;  %v817_v13 = vmax.f32 %v561_v5, 0.0  ;;  %v564_v14 = vadd.f32 %v2369_v3, %v304_v6 }
  0x1d   :  { %2212 = vst [vmem:[%s4052_s3 + $0x58] sm:$0xff] %v1620_v1   ;;  %v306_v15 = vmul.f32 %v2364_v2, %v46_v0  ;;  %v1625_v18 = vpack.c.bf16 %v815_v7, %v814_v61  ;;  %v818_v19 = vmax.f32 %v562_v8, 0.0  ;;  %v565_v21 = vadd.f32 %v2369_v3, %v305_v10  ;;  %v60_v0 = vld [vmem:[%s4049_s0 + $0x170] sm:$0xff]  ;;  %v61_v7 = vld [vmem:[%s4049_s0 + $0x178] sm:$0xff] }
  0x1e   :  { %v819_v20 = vmax.f32 %v563_v9, 0.0  ;;  %v1630_v24 = vpack.c.bf16 %v817_v13, %v816_v12  ;;  %v820_v25 = vmax.f32 %v564_v14, 0.0  ;;  %v307_v26 = vmul.f32 %v2364_v2, %v47_v11  ;;  %v62_v12 = vld [vmem:[%s4049_s0 + $0x180] sm:$0xff] }
  0x1f   :  { %v566_v27 = vadd.f32 %v2369_v3, %v306_v15  ;;  %2213 = vst [vmem:[%s4052_s3 + $0x60] sm:$0xff] %v1625_v18   ;;  %v821_v30 = vmax.f32 %v565_v21, 0.0  ;;  %v308_v31 = vmul.f32 %v2364_v2, %v48_v16  ;;  %v309_v32 = vmul.f32 %v2364_v2, %v49_v17  ;;  %v63_v21 = vld [vmem:[%s4049_s0 + $0x188] sm:$0xff] }
  0x20   :  { %v1635_v29 = vpack.c.bf16 %v819_v20, %v818_v19  ;;  %2214 = vst [vmem:[%s4052_s3 + $0x68] sm:$0xff] %v1630_v24   ;;  %v567_v34 = vadd.f32 %v2369_v3, %v307_v26  ;;  %v310_v36 = vmul.f32 %v2364_v2, %v50_v22  ;;  %v311_v37 = vmul.f32 %v2364_v2, %v51_v23  ;;  %v64_v26 = vld [vmem:[%s4049_s0 + $0x190] sm:$0xff] }
  0x21   :  { %v822_v35 = vmax.f32 %v566_v27, 0.0  ;;  %v1640_v39 = vpack.c.bf16 %v821_v30, %v820_v25  ;;  %v568_v40 = vadd.f32 %v2369_v3, %v308_v31  ;;  %v569_v41 = vadd.f32 %v2369_v3, %v309_v32  ;;  %v65_v27 = vld [vmem:[%s4049_s0 + $0x198] sm:$0xff]  ;;  %v66_v32 = vld [vmem:[%s4049_s0 + $0x1a0] sm:$0xff] }
  0x22   :  { %2215 = vst [vmem:[%s4052_s3 + $0x70] sm:$0xff] %v1635_v29   ;;  %v312_v42 = vmul.f32 %v2364_v2, %v52_v28  ;;  %v823_v43 = vmax.f32 %v567_v34, 0.0  ;;  %v570_v44 = vadd.f32 %v2369_v3, %v310_v36  ;;  %v571_v45 = vadd.f32 %v2369_v3, %v311_v37 }
  0x23   :  { %v313_v46 = vmul.f32 %v2364_v2, %v53_v33  ;;  %2216 = vst [vmem:[%s4052_s3 + $0x78] sm:$0xff] %v1640_v39   ;;  %v824_v48 = vmax.f32 %v568_v40, 0.0  ;;  %v825_v49 = vmax.f32 %v569_v41, 0.0  ;;  %v314_v51 = vmul.f32 %v2364_v2, %v54_v38  ;;  %v67_v33 = vld [vmem:[%s4049_s0 + $0x1a8] sm:$0xff]  ;;  %v68_v38 = vld [vmem:[%s4049_s0 + $0x1b0] sm:$0xff] }
  0x24   :  { %v572_v50 = vadd.f32 %v2369_v3, %v312_v42  ;;  %v1645_v54 = vpack.c.bf16 %v823_v43, %v822_v35  ;;  %v826_v55 = vmax.f32 %v570_v44, 0.0  ;;  %v827_v56 = vmax.f32 %v571_v45, 0.0  ;;  %v69_v43 = vld [vmem:[%s4049_s0 + $0x1b8] sm:$0xff] }
  0x25   :  { %v573_v57 = vadd.f32 %v2369_v3, %v313_v46  ;;  %v1650_v60 = vpack.c.bf16 %v825_v49, %v824_v48  ;;  %v315_v62 = vmul.f32 %v2364_v2, %v55_v47  ;;  %v574_v63 = vadd.f32 %v2369_v3, %v314_v51  ;;  %v70_v48 = vld [vmem:[%s4049_s0 + $0x1c0] sm:$0xff] }
  0x26   :  { %v828_v61 = vmax.f32 %v572_v50, 0.0  ;;  %2217 = vst [vmem:[%s4052_s3 + $0x80] sm:$0xff] %v1645_v54   ;;  %v1655_v1 = vpack.c.bf16 %v827_v56, %v826_v55  ;;  %v316_v5 = vmul.f32 %v2364_v2, %v56_v52  ;;  %v317_v6 = vmul.f32 %v2364_v2, %v57_v53 }
  0x27   :  { %v829_v4 = vmax.f32 %v573_v57, 0.0  ;;  %2218 = vst [vmem:[%s4052_s3 + $0x88] sm:$0xff] %v1650_v60   ;;  %v575_v8 = vadd.f32 %v2369_v3, %v315_v62  ;;  %v830_v9 = vmax.f32 %v574_v63, 0.0  ;;  %v318_v10 = vmul.f32 %v2364_v2, %v58_v58  ;;  %v71_v57 = vld [vmem:[%s4049_s0 + $0x1c8] sm:$0xff]  ;;  %v72_v62 = vld [vmem:[%s4049_s0 + $0x1d0] sm:$0xff]  ;;  %v73_v63 = vld [vmem:[%s4049_s0 + $0x1d8] sm:$0xff] }
  0x28   :  { %v319_v11 = vmul.f32 %v2364_v2, %v59_v59  ;;  %2219 = vst [vmem:[%s4052_s3 + $0x90] sm:$0xff] %v1655_v1   ;;  %v576_v14 = vadd.f32 %v2369_v3, %v316_v5  ;;  %v577_v15 = vadd.f32 %v2369_v3, %v317_v6  ;;  %v320_v16 = vmul.f32 %v2364_v2, %v60_v0  ;;  %v74_v6 = vld [vmem:[%s4049_s0 + $0x1e0] sm:$0xff] }
  0x29   :  { %v1660_v13 = vpack.c.bf16 %v829_v4, %v828_v61  ;;  %v831_v17 = vmax.f32 %v575_v8, 0.0  ;;  %v578_v18 = vadd.f32 %v2369_v3, %v318_v10  ;;  %v321_v20 = vmul.f32 %v2364_v2, %v61_v7  ;;  %v75_v7 = vld [vmem:[%s4049_s0 + $0x1e8] sm:$0xff] }
  0x2a   :  { %v579_v19 = vadd.f32 %v2369_v3, %v319_v11  ;;  %v832_v22 = vmax.f32 %v576_v14, 0.0  ;;  %v833_v23 = vmax.f32 %v577_v15, 0.0  ;;  %v580_v24 = vadd.f32 %v2369_v3, %v320_v16 }
  0x2b   :  { %2220 = vst [vmem:[%s4052_s3 + $0x98] sm:$0xff] %v1660_v13   ;;  %v322_v25 = vmul.f32 %v2364_v2, %v62_v12  ;;  %v1665_v28 = vpack.c.bf16 %v831_v17, %v830_v9  ;;  %v834_v29 = vmax.f32 %v578_v18, 0.0  ;;  %v581_v31 = vadd.f32 %v2369_v3, %v321_v20  ;;  %v76_v12 = vld [vmem:[%s4049_s0 + $0x1f0] sm:$0xff]  ;;  %v77_v17 = vld [vmem:[%s4049_s0 + $0x1f8] sm:$0xff] }
  0x2c   :  { %v835_v30 = vmax.f32 %v579_v19, 0.0  ;;  %v1670_v34 = vpack.c.bf16 %v833_v23, %v832_v22  ;;  %v836_v35 = vmax.f32 %v580_v24, 0.0  ;;  %v323_v36 = vmul.f32 %v2364_v2, %v63_v21  ;;  %v78_v22 = vld [vmem:[%s4049_s0 + $0x200] sm:$0xff] }
  0x2d   :  { %v582_v37 = vadd.f32 %v2369_v3, %v322_v25  ;;  %2221 = vst [vmem:[%s4052_s3 + $0xa0] sm:$0xff] %v1665_v28   ;;  %v837_v40 = vmax.f32 %v581_v31, 0.0  ;;  %v324_v41 = vmul.f32 %v2364_v2, %v64_v26  ;;  %v325_v42 = vmul.f32 %v2364_v2, %v65_v27  ;;  %v79_v31 = vld [vmem:[%s4049_s0 + $0x208] sm:$0xff] }
  0x2e   :  { %v1675_v39 = vpack.c.bf16 %v835_v30, %v834_v29  ;;  %2222 = vst [vmem:[%s4052_s3 + $0xa8] sm:$0xff] %v1670_v34   ;;  %v583_v44 = vadd.f32 %v2369_v3, %v323_v36  ;;  %v326_v46 = vmul.f32 %v2364_v2, %v66_v32  ;;  %v327_v47 = vmul.f32 %v2364_v2, %v67_v33  ;;  %v80_v36 = vld [vmem:[%s4049_s0 + $0x210] sm:$0xff] }
  0x2f   :  { %v838_v45 = vmax.f32 %v582_v37, 0.0  ;;  %v1680_v49 = vpack.c.bf16 %v837_v40, %v836_v35  ;;  %v584_v50 = vadd.f32 %v2369_v3, %v324_v41  ;;  %v585_v51 = vadd.f32 %v2369_v3, %v325_v42  ;;  %v81_v37 = vld [vmem:[%s4049_s0 + $0x218] sm:$0xff]  ;;  %v82_v42 = vld [vmem:[%s4049_s0 + $0x220] sm:$0xff] }
  0x30   :  { %2223 = vst [vmem:[%s4052_s3 + $0xb0] sm:$0xff] %v1675_v39   ;;  %v328_v52 = vmul.f32 %v2364_v2, %v68_v38  ;;  %v839_v53 = vmax.f32 %v583_v44, 0.0  ;;  %v586_v54 = vadd.f32 %v2369_v3, %v326_v46  ;;  %v587_v55 = vadd.f32 %v2369_v3, %v327_v47 }
  0x31   :  { %v329_v56 = vmul.f32 %v2364_v2, %v69_v43  ;;  %2224 = vst [vmem:[%s4052_s3 + $0xb8] sm:$0xff] %v1680_v49   ;;  %v840_v58 = vmax.f32 %v584_v50, 0.0  ;;  %v841_v59 = vmax.f32 %v585_v51, 0.0  ;;  %v330_v61 = vmul.f32 %v2364_v2, %v70_v48  ;;  %v83_v43 = vld [vmem:[%s4049_s0 + $0x228] sm:$0xff]  ;;  %v84_v48 = vld [vmem:[%s4049_s0 + $0x230] sm:$0xff] }
  0x32   :  { %v588_v60 = vadd.f32 %v2369_v3, %v328_v52  ;;  %v1685_v0 = vpack.c.bf16 %v839_v53, %v838_v45  ;;  %v842_v1 = vmax.f32 %v586_v54, 0.0  ;;  %v843_v4 = vmax.f32 %v587_v55, 0.0  ;;  %v85_v53 = vld [vmem:[%s4049_s0 + $0x238] sm:$0xff] }
  0x33   :  { %v589_v5 = vadd.f32 %v2369_v3, %v329_v56  ;;  %v1690_v8 = vpack.c.bf16 %v841_v59, %v840_v58  ;;  %v331_v10 = vmul.f32 %v2364_v2, %v71_v57  ;;  %v590_v11 = vadd.f32 %v2369_v3, %v330_v61  ;;  %v86_v58 = vld [vmem:[%s4049_s0 + $0x240] sm:$0xff] }
  0x34   :  { %v844_v9 = vmax.f32 %v588_v60, 0.0  ;;  %2225 = vst [vmem:[%s4052_s3 + $0xc0] sm:$0xff] %v1685_v0   ;;  %v1695_v13 = vpack.c.bf16 %v843_v4, %v842_v1  ;;  %v332_v15 = vmul.f32 %v2364_v2, %v72_v62  ;;  %v333_v16 = vmul.f32 %v2364_v2, %v73_v63 }
  0x35   :  { %v845_v14 = vmax.f32 %v589_v5, 0.0  ;;  %2226 = vst [vmem:[%s4052_s3 + $0xc8] sm:$0xff] %v1690_v8   ;;  %v591_v18 = vadd.f32 %v2369_v3, %v331_v10  ;;  %v846_v19 = vmax.f32 %v590_v11, 0.0  ;;  %v334_v20 = vmul.f32 %v2364_v2, %v74_v6  ;;  %v87_v5 = vld [vmem:[%s4049_s0 + $0x248] sm:$0xff]  ;;  %v88_v10 = vld [vmem:[%s4049_s0 + $0x250] sm:$0xff]  ;;  %v89_v11 = vld [vmem:[%s4049_s0 + $0x258] sm:$0xff] }
  0x36   :  { %v335_v21 = vmul.f32 %v2364_v2, %v75_v7  ;;  %2227 = vst [vmem:[%s4052_s3 + $0xd0] sm:$0xff] %v1695_v13   ;;  %v592_v24 = vadd.f32 %v2369_v3, %v332_v15  ;;  %v593_v25 = vadd.f32 %v2369_v3, %v333_v16  ;;  %v336_v26 = vmul.f32 %v2364_v2, %v76_v12  ;;  %v90_v16 = vld [vmem:[%s4049_s0 + $0x260] sm:$0xff] }
  0x37   :  { %v1700_v23 = vpack.c.bf16 %v845_v14, %v844_v9  ;;  %v847_v27 = vmax.f32 %v591_v18, 0.0  ;;  %v594_v28 = vadd.f32 %v2369_v3, %v334_v20  ;;  %v337_v30 = vmul.f32 %v2364_v2, %v77_v17  ;;  %v91_v17 = vld [vmem:[%s4049_s0 + $0x268] sm:$0xff] }
  0x38   :  { %v595_v29 = vadd.f32 %v2369_v3, %v335_v21  ;;  %v848_v32 = vmax.f32 %v592_v24, 0.0  ;;  %v849_v33 = vmax.f32 %v593_v25, 0.0  ;;  %v596_v34 = vadd.f32 %v2369_v3, %v336_v26 }
  0x39   :  { %2228 = vst [vmem:[%s4052_s3 + $0xd8] sm:$0xff] %v1700_v23   ;;  %v338_v35 = vmul.f32 %v2364_v2, %v78_v22  ;;  %v1705_v38 = vpack.c.bf16 %v847_v27, %v846_v19  ;;  %v850_v39 = vmax.f32 %v594_v28, 0.0  ;;  %v597_v41 = vadd.f32 %v2369_v3, %v337_v30  ;;  %v92_v22 = vld [vmem:[%s4049_s0 + $0x270] sm:$0xff]  ;;  %v93_v27 = vld [vmem:[%s4049_s0 + $0x278] sm:$0xff] }
  0x3a   :  { %v851_v40 = vmax.f32 %v595_v29, 0.0  ;;  %v1710_v44 = vpack.c.bf16 %v849_v33, %v848_v32  ;;  %v852_v45 = vmax.f32 %v596_v34, 0.0  ;;  %v339_v46 = vmul.f32 %v2364_v2, %v79_v31  ;;  %v94_v32 = vld [vmem:[%s4049_s0 + $0x280] sm:$0xff] }
  0x3b   :  { %v598_v47 = vadd.f32 %v2369_v3, %v338_v35  ;;  %2229 = vst [vmem:[%s4052_s3 + $0xe0] sm:$0xff] %v1705_v38   ;;  %v853_v50 = vmax.f32 %v597_v41, 0.0  ;;  %v340_v51 = vmul.f32 %v2364_v2, %v80_v36  ;;  %v341_v52 = vmul.f32 %v2364_v2, %v81_v37  ;;  %v95_v41 = vld [vmem:[%s4049_s0 + $0x288] sm:$0xff] }
  0x3c   :  { %v1715_v49 = vpack.c.bf16 %v851_v40, %v850_v39  ;;  %2230 = vst [vmem:[%s4052_s3 + $0xe8] sm:$0xff] %v1710_v44   ;;  %v599_v54 = vadd.f32 %v2369_v3, %v339_v46  ;;  %v342_v56 = vmul.f32 %v2364_v2, %v82_v42  ;;  %v343_v57 = vmul.f32 %v2364_v2, %v83_v43  ;;  %v96_v46 = vld [vmem:[%s4049_s0 + $0x290] sm:$0xff] }
  0x3d   :  { %v854_v55 = vmax.f32 %v598_v47, 0.0  ;;  %v1720_v59 = vpack.c.bf16 %v853_v50, %v852_v45  ;;  %v600_v60 = vadd.f32 %v2369_v3, %v340_v51  ;;  %v601_v61 = vadd.f32 %v2369_v3, %v341_v52  ;;  %v97_v47 = vld [vmem:[%s4049_s0 + $0x298] sm:$0xff]  ;;  %v98_v52 = vld [vmem:[%s4049_s0 + $0x2a0] sm:$0xff] }
  0x3e   :  { %2231 = vst [vmem:[%s4052_s3 + $0xf0] sm:$0xff] %v1715_v49   ;;  %v344_v62 = vmul.f32 %v2364_v2, %v84_v48  ;;  %v855_v63 = vmax.f32 %v599_v54, 0.0  ;;  %v602_v0 = vadd.f32 %v2369_v3, %v342_v56  ;;  %v603_v1 = vadd.f32 %v2369_v3, %v343_v57 }
  0x3f   :  { %v345_v4 = vmul.f32 %v2364_v2, %v85_v53  ;;  %2232 = vst [vmem:[%s4052_s3 + $0xf8] sm:$0xff] %v1720_v59   ;;  %v856_v6 = vmax.f32 %v600_v60, 0.0  ;;  %v857_v7 = vmax.f32 %v601_v61, 0.0  ;;  %v346_v9 = vmul.f32 %v2364_v2, %v86_v58  ;;  %v99_v53 = vld [vmem:[%s4049_s0 + $0x2a8] sm:$0xff]  ;;  %v100_v58 = vld [vmem:[%s4049_s0 + $0x2b0] sm:$0xff] }
  0x40   :  { %v604_v8 = vadd.f32 %v2369_v3, %v344_v62  ;;  %v1725_v12 = vpack.c.bf16 %v855_v63, %v854_v55  ;;  %v858_v13 = vmax.f32 %v602_v0, 0.0  ;;  %v859_v14 = vmax.f32 %v603_v1, 0.0  ;;  %v101_v63 = vld [vmem:[%s4049_s0 + $0x2b8] sm:$0xff] }
  0x41   :  { %v605_v15 = vadd.f32 %v2369_v3, %v345_v4  ;;  %v1730_v18 = vpack.c.bf16 %v857_v7, %v856_v6  ;;  %v347_v20 = vmul.f32 %v2364_v2, %v87_v5  ;;  %v606_v21 = vadd.f32 %v2369_v3, %v346_v9  ;;  %v102_v6 = vld [vmem:[%s4049_s0 + $0x2c0] sm:$0xff] }
  0x42   :  { %v860_v19 = vmax.f32 %v604_v8, 0.0  ;;  %2233 = vst [vmem:[%s4052_s3 + $0x100] sm:$0xff] %v1725_v12   ;;  %v1735_v23 = vpack.c.bf16 %v859_v14, %v858_v13  ;;  %v348_v25 = vmul.f32 %v2364_v2, %v88_v10  ;;  %v349_v26 = vmul.f32 %v2364_v2, %v89_v11 }
  0x43   :  { %v861_v24 = vmax.f32 %v605_v15, 0.0  ;;  %2234 = vst [vmem:[%s4052_s3 + $0x108] sm:$0xff] %v1730_v18   ;;  %v607_v28 = vadd.f32 %v2369_v3, %v347_v20  ;;  %v862_v29 = vmax.f32 %v606_v21, 0.0  ;;  %v350_v30 = vmul.f32 %v2364_v2, %v90_v16  ;;  %v103_v15 = vld [vmem:[%s4049_s0 + $0x2c8] sm:$0xff]  ;;  %v104_v20 = vld [vmem:[%s4049_s0 + $0x2d0] sm:$0xff]  ;;  %v105_v21 = vld [vmem:[%s4049_s0 + $0x2d8] sm:$0xff] }
  0x44   :  { %v351_v31 = vmul.f32 %v2364_v2, %v91_v17  ;;  %2235 = vst [vmem:[%s4052_s3 + $0x110] sm:$0xff] %v1735_v23   ;;  %v608_v34 = vadd.f32 %v2369_v3, %v348_v25  ;;  %v609_v35 = vadd.f32 %v2369_v3, %v349_v26  ;;  %v352_v36 = vmul.f32 %v2364_v2, %v92_v22  ;;  %v106_v26 = vld [vmem:[%s4049_s0 + $0x2e0] sm:$0xff] }
  0x45   :  { %v1740_v33 = vpack.c.bf16 %v861_v24, %v860_v19  ;;  %v863_v37 = vmax.f32 %v607_v28, 0.0  ;;  %v610_v38 = vadd.f32 %v2369_v3, %v350_v30  ;;  %v353_v40 = vmul.f32 %v2364_v2, %v93_v27  ;;  %v107_v27 = vld [vmem:[%s4049_s0 + $0x2e8] sm:$0xff] }
  0x46   :  { %v611_v39 = vadd.f32 %v2369_v3, %v351_v31  ;;  %v864_v42 = vmax.f32 %v608_v34, 0.0  ;;  %v865_v43 = vmax.f32 %v609_v35, 0.0  ;;  %v612_v44 = vadd.f32 %v2369_v3, %v352_v36 }
  0x47   :  { %2236 = vst [vmem:[%s4052_s3 + $0x118] sm:$0xff] %v1740_v33   ;;  %v354_v45 = vmul.f32 %v2364_v2, %v94_v32  ;;  %v1745_v48 = vpack.c.bf16 %v863_v37, %v862_v29  ;;  %v866_v49 = vmax.f32 %v610_v38, 0.0  ;;  %v613_v51 = vadd.f32 %v2369_v3, %v353_v40  ;;  %v108_v32 = vld [vmem:[%s4049_s0 + $0x2f0] sm:$0xff]  ;;  %v109_v37 = vld [vmem:[%s4049_s0 + $0x2f8] sm:$0xff] }
  0x48   :  { %v867_v50 = vmax.f32 %v611_v39, 0.0  ;;  %v1750_v54 = vpack.c.bf16 %v865_v43, %v864_v42  ;;  %v868_v55 = vmax.f32 %v612_v44, 0.0  ;;  %v355_v56 = vmul.f32 %v2364_v2, %v95_v41  ;;  %v110_v42 = vld [vmem:[%s4049_s0 + $0x300] sm:$0xff] }
  0x49   :  { %v614_v57 = vadd.f32 %v2369_v3, %v354_v45  ;;  %2237 = vst [vmem:[%s4052_s3 + $0x120] sm:$0xff] %v1745_v48   ;;  %v869_v60 = vmax.f32 %v613_v51, 0.0  ;;  %v356_v61 = vmul.f32 %v2364_v2, %v96_v46  ;;  %v357_v62 = vmul.f32 %v2364_v2, %v97_v47  ;;  %v111_v51 = vld [vmem:[%s4049_s0 + $0x308] sm:$0xff] }
  0x4a   :  { %v1755_v59 = vpack.c.bf16 %v867_v50, %v866_v49  ;;  %2238 = vst [vmem:[%s4052_s3 + $0x128] sm:$0xff] %v1750_v54   ;;  %v615_v0 = vadd.f32 %v2369_v3, %v355_v56  ;;  %v358_v4 = vmul.f32 %v2364_v2, %v98_v52  ;;  %v359_v5 = vmul.f32 %v2364_v2, %v99_v53  ;;  %v112_v56 = vld [vmem:[%s4049_s0 + $0x310] sm:$0xff] }
  0x4b   :  { %v870_v1 = vmax.f32 %v614_v57, 0.0  ;;  %v1760_v7 = vpack.c.bf16 %v869_v60, %v868_v55  ;;  %v616_v8 = vadd.f32 %v2369_v3, %v356_v61  ;;  %v617_v9 = vadd.f32 %v2369_v3, %v357_v62  ;;  %v113_v57 = vld [vmem:[%s4049_s0 + $0x318] sm:$0xff]  ;;  %v114_v62 = vld [vmem:[%s4049_s0 + $0x320] sm:$0xff] }
  0x4c   :  { %2239 = vst [vmem:[%s4052_s3 + $0x130] sm:$0xff] %v1755_v59   ;;  %v360_v10 = vmul.f32 %v2364_v2, %v100_v58  ;;  %v871_v11 = vmax.f32 %v615_v0, 0.0  ;;  %v618_v12 = vadd.f32 %v2369_v3, %v358_v4  ;;  %v619_v13 = vadd.f32 %v2369_v3, %v359_v5 }
  0x4d   :  { %v361_v14 = vmul.f32 %v2364_v2, %v101_v63  ;;  %2240 = vst [vmem:[%s4052_s3 + $0x138] sm:$0xff] %v1760_v7   ;;  %v872_v16 = vmax.f32 %v616_v8, 0.0  ;;  %v873_v17 = vmax.f32 %v617_v9, 0.0  ;;  %v362_v19 = vmul.f32 %v2364_v2, %v102_v6  ;;  %v115_v63 = vld [vmem:[%s4049_s0 + $0x328] sm:$0xff]  ;;  %v116_v6 = vld [vmem:[%s4049_s0 + $0x330] sm:$0xff] }
  0x4e   :  { %v620_v18 = vadd.f32 %v2369_v3, %v360_v10  ;;  %v1765_v22 = vpack.c.bf16 %v871_v11, %v870_v1  ;;  %v874_v23 = vmax.f32 %v618_v12, 0.0  ;;  %v875_v24 = vmax.f32 %v619_v13, 0.0  ;;  %v117_v11 = vld [vmem:[%s4049_s0 + $0x338] sm:$0xff] }
  0x4f   :  { %v621_v25 = vadd.f32 %v2369_v3, %v361_v14  ;;  %v1770_v28 = vpack.c.bf16 %v873_v17, %v872_v16  ;;  %v363_v30 = vmul.f32 %v2364_v2, %v103_v15  ;;  %v622_v31 = vadd.f32 %v2369_v3, %v362_v19  ;;  %v118_v16 = vld [vmem:[%s4049_s0 + $0x340] sm:$0xff] }
  0x50   :  { %v876_v29 = vmax.f32 %v620_v18, 0.0  ;;  %2241 = vst [vmem:[%s4052_s3 + $0x140] sm:$0xff] %v1765_v22   ;;  %v1775_v33 = vpack.c.bf16 %v875_v24, %v874_v23  ;;  %v364_v35 = vmul.f32 %v2364_v2, %v104_v20  ;;  %v365_v36 = vmul.f32 %v2364_v2, %v105_v21 }
  0x51   :  { %v877_v34 = vmax.f32 %v621_v25, 0.0  ;;  %2242 = vst [vmem:[%s4052_s3 + $0x148] sm:$0xff] %v1770_v28   ;;  %v623_v38 = vadd.f32 %v2369_v3, %v363_v30  ;;  %v878_v39 = vmax.f32 %v622_v31, 0.0  ;;  %v366_v40 = vmul.f32 %v2364_v2, %v106_v26  ;;  %v119_v25 = vld [vmem:[%s4049_s0 + $0x348] sm:$0xff]  ;;  %v120_v30 = vld [vmem:[%s4049_s0 + $0x350] sm:$0xff]  ;;  %v121_v31 = vld [vmem:[%s4049_s0 + $0x358] sm:$0xff] }
  0x52   :  { %v367_v41 = vmul.f32 %v2364_v2, %v107_v27  ;;  %2243 = vst [vmem:[%s4052_s3 + $0x150] sm:$0xff] %v1775_v33   ;;  %v624_v44 = vadd.f32 %v2369_v3, %v364_v35  ;;  %v625_v45 = vadd.f32 %v2369_v3, %v365_v36  ;;  %v368_v46 = vmul.f32 %v2364_v2, %v108_v32  ;;  %v3044_v35 = vld [vmem:[%s4051_s2] ss:$0 sm:$0xff]  ;;  %v123_v36 = vld [vmem:[%s4049_s0 + $0x368] sm:$0xff] }
  0x53   :  { %v1780_v43 = vpack.c.bf16 %v877_v34, %v876_v29  ;;  %v879_v47 = vmax.f32 %v623_v38, 0.0  ;;  %v626_v48 = vadd.f32 %v2369_v3, %v366_v40  ;;  %v369_v50 = vmul.f32 %v2364_v2, %v109_v37 }
  0x54   :  { %v627_v49 = vadd.f32 %v2369_v3, %v367_v41  ;;  %v880_v52 = vmax.f32 %v624_v44, 0.0  ;;  %v881_v53 = vmax.f32 %v625_v45, 0.0  ;;  %v628_v54 = vadd.f32 %v2369_v3, %v368_v46 }
  0x55   :  { %2244 = vst [vmem:[%s4052_s3 + $0x158] sm:$0xff] %v1780_v43   ;;  %v370_v55 = vmul.f32 %v2364_v2, %v110_v42  ;;  %v1785_v58 = vpack.c.bf16 %v879_v47, %v878_v39  ;;  %v882_v59 = vmax.f32 %v626_v48, 0.0  ;;  %v629_v61 = vadd.f32 %v2369_v3, %v369_v50  ;;  %v3056_v39 = vld [vmem:[%s4050_s1] ss:$0 sm:$0xff]  ;;  %v124_v42 = vld [vmem:[%s4049_s0 + $0x370] sm:$0xff]  ;;  %v125_v47 = vld [vmem:[%s4049_s0 + $0x378] sm:$0xff] }
  0x56   :  { %v883_v60 = vmax.f32 %v627_v49, 0.0  ;;  %v1790_v0 = vpack.c.bf16 %v881_v53, %v880_v52  ;;  %v884_v1 = vmax.f32 %v628_v54, 0.0  ;;  %v371_v4 = vmul.f32 %v2364_v2, %v111_v51  ;;  %v126_v52 = vld [vmem:[%s4049_s0 + $0x380] sm:$0xff] }
  0x57   :  { %v630_v5 = vadd.f32 %v2369_v3, %v370_v55  ;;  %2245 = vst [vmem:[%s4052_s3 + $0x160] sm:$0xff] %v1785_v58   ;;  %v885_v8 = vmax.f32 %v629_v61, 0.0  ;;  %v372_v9 = vmul.f32 %v2364_v2, %v112_v56  ;;  %v373_v10 = vmul.f32 %v2364_v2, %v113_v57  ;;  %v127_v61 = vld [vmem:[%s4049_s0 + $0x388] sm:$0xff] }
  0x58   :  { %v1795_v7 = vpack.c.bf16 %v883_v60, %v882_v59  ;;  %2246 = vst [vmem:[%s4052_s3 + $0x168] sm:$0xff] %v1790_v0   ;;  %v631_v12 = vadd.f32 %v2369_v3, %v371_v4  ;;  %v374_v14 = vmul.f32 %v2364_v2, %v114_v62  ;;  %v375_v15 = vmul.f32 %v2364_v2, %v115_v63  ;;  %v128_v4 = vld [vmem:[%s4049_s0 + $0x390] sm:$0xff] }
  0x59   :  { %v886_v13 = vmax.f32 %v630_v5, 0.0  ;;  %v1800_v17 = vpack.c.bf16 %v885_v8, %v884_v1  ;;  %v632_v18 = vadd.f32 %v2369_v3, %v372_v9  ;;  %v633_v19 = vadd.f32 %v2369_v3, %v373_v10  ;;  %v129_v5 = vld [vmem:[%s4049_s0 + $0x398] sm:$0xff]  ;;  %v130_v10 = vld [vmem:[%s4049_s0 + $0x3a0] sm:$0xff] }
  0x5a   :  { %2247 = vst [vmem:[%s4052_s3 + $0x170] sm:$0xff] %v1795_v7   ;;  %v376_v20 = vmul.f32 %v2364_v2, %v116_v6  ;;  %v887_v21 = vmax.f32 %v631_v12, 0.0  ;;  %v634_v22 = vadd.f32 %v2369_v3, %v374_v14  ;;  %v635_v23 = vadd.f32 %v2369_v3, %v375_v15 }
  0x5b   :  { %v377_v24 = vmul.f32 %v2364_v2, %v117_v11  ;;  %2248 = vst [vmem:[%s4052_s3 + $0x178] sm:$0xff] %v1800_v17   ;;  %v888_v26 = vmax.f32 %v632_v18, 0.0  ;;  %v889_v27 = vmax.f32 %v633_v19, 0.0  ;;  %v378_v29 = vmul.f32 %v2364_v2, %v118_v16  ;;  %v122_v2 = vld [vmem:[%s4049_s0 + $0x360] sm:$0xff]  ;;  %v131_v11 = vld [vmem:[%s4049_s0 + $0x3a8] sm:$0xff]  ;;  %v132_v16 = vld [vmem:[%s4049_s0 + $0x3b0] sm:$0xff] }
  0x5c   :  { %v636_v28 = vadd.f32 %v2369_v3, %v376_v20  ;;  %v1805_v32 = vpack.c.bf16 %v887_v21, %v886_v13  ;;  %v890_v33 = vmax.f32 %v634_v22, 0.0  ;;  %v891_v34 = vmax.f32 %v635_v23, 0.0  ;;  %v133_v21 = vld [vmem:[%s4049_s0 + $0x3b8] sm:$0xff] }
  0x5d   :  { %v637_v3 = vadd.f32 %v3044_v35, %v377_v24  ;;  %v1810_v37 = vpack.c.bf16 %v889_v27, %v888_v26  ;;  %v379_v40 = vmul.f32 %v3056_v39, %v119_v25  ;;  %v638_v41 = vadd.f32 %v3044_v35, %v378_v29  ;;  %v134_v26 = vld [vmem:[%s4049_s0 + $0x3c0] sm:$0xff] }
  0x5e   :  { %v892_v38 = vmax.f32 %v636_v28, 0.0  ;;  %2249 = vst [vmem:[%s4052_s3 + $0x180] sm:$0xff] %v1805_v32   ;;  %v1815_v43 = vpack.c.bf16 %v891_v34, %v890_v33  ;;  %v380_v45 = vmul.f32 %v3056_v39, %v120_v30  ;;  %v381_v46 = vmul.f32 %v3056_v39, %v121_v31 }
  0x5f   :  { %v893_v44 = vmax.f32 %v637_v3, 0.0  ;;  %2250 = vst [vmem:[%s4052_s3 + $0x188] sm:$0xff] %v1810_v37   ;;  %v639_v48 = vadd.f32 %v3044_v35, %v379_v40  ;;  %v894_v49 = vmax.f32 %v638_v41, 0.0  ;;  %v382_v50 = vmul.f32 %v3056_v39, %v122_v2  ;;  %v135_v3 = vld [vmem:[%s4049_s0 + $0x3c8] sm:$0xff]  ;;  %v136_v40 = vld [vmem:[%s4049_s0 + $0x3d0] sm:$0xff]  ;;  %v137_v41 = vld [vmem:[%s4049_s0 + $0x3d8] sm:$0xff] }
  0x60   :  { %v383_v51 = vmul.f32 %v3056_v39, %v123_v36  ;;  %2251 = vst [vmem:[%s4052_s3 + $0x190] sm:$0xff] %v1815_v43   ;;  %v640_v54 = vadd.f32 %v3044_v35, %v380_v45  ;;  %v641_v55 = vadd.f32 %v3044_v35, %v381_v46  ;;  %v384_v56 = vmul.f32 %v3056_v39, %v124_v42  ;;  %v138_v46 = vld [vmem:[%s4049_s0 + $0x3e0] sm:$0xff] }
  0x61   :  { %v1820_v53 = vpack.c.bf16 %v893_v44, %v892_v38  ;;  %v895_v57 = vmax.f32 %v639_v48, 0.0  ;;  %v642_v58 = vadd.f32 %v3044_v35, %v382_v50  ;;  %v385_v60 = vmul.f32 %v3056_v39, %v125_v47  ;;  %v139_v47 = vld [vmem:[%s4049_s0 + $0x3e8] sm:$0xff] }
  0x62   :  { %v643_v59 = vadd.f32 %v3044_v35, %v383_v51  ;;  %v896_v62 = vmax.f32 %v640_v54, 0.0  ;;  %v897_v63 = vmax.f32 %v641_v55, 0.0  ;;  %v644_v0 = vadd.f32 %v3044_v35, %v384_v56 }
  0x63   :  { %2252 = vst [vmem:[%s4052_s3 + $0x198] sm:$0xff] %v1820_v53   ;;  %v386_v1 = vmul.f32 %v3056_v39, %v126_v52  ;;  %v1825_v6 = vpack.c.bf16 %v895_v57, %v894_v49  ;;  %v898_v7 = vmax.f32 %v642_v58, 0.0  ;;  %v645_v9 = vadd.f32 %v3044_v35, %v385_v60  ;;  %v140_v52 = vld [vmem:[%s4049_s0 + $0x3f0] sm:$0xff]  ;;  %v141_v57 = vld [vmem:[%s4049_s0 + $0x3f8] sm:$0xff] }
  0x64   :  { %v899_v8 = vmax.f32 %v643_v59, 0.0  ;;  %v1830_v12 = vpack.c.bf16 %v897_v63, %v896_v62  ;;  %v900_v13 = vmax.f32 %v644_v0, 0.0  ;;  %v387_v14 = vmul.f32 %v3056_v39, %v127_v61  ;;  %v142_v62 = vld [vmem:[%s4049_s0 + $0x400] sm:$0xff] }
  0x65   :  { %v646_v15 = vadd.f32 %v3044_v35, %v386_v1  ;;  %2253 = vst [vmem:[%s4052_s3 + $0x1a0] sm:$0xff] %v1825_v6   ;;  %v901_v18 = vmax.f32 %v645_v9, 0.0  ;;  %v388_v19 = vmul.f32 %v3056_v39, %v128_v4  ;;  %v389_v20 = vmul.f32 %v3056_v39, %v129_v5  ;;  %v143_v9 = vld [vmem:[%s4049_s0 + $0x408] sm:$0xff] }
  0x66   :  { %v1835_v17 = vpack.c.bf16 %v899_v8, %v898_v7  ;;  %2254 = vst [vmem:[%s4052_s3 + $0x1a8] sm:$0xff] %v1830_v12   ;;  %v647_v22 = vadd.f32 %v3044_v35, %v387_v14  ;;  %v390_v24 = vmul.f32 %v3056_v39, %v130_v10  ;;  %v391_v25 = vmul.f32 %v3056_v39, %v131_v11  ;;  %v144_v14 = vld [vmem:[%s4049_s0 + $0x410] sm:$0xff] }
  0x67   :  { %v902_v23 = vmax.f32 %v646_v15, 0.0  ;;  %v1840_v27 = vpack.c.bf16 %v901_v18, %v900_v13  ;;  %v648_v28 = vadd.f32 %v3044_v35, %v388_v19  ;;  %v649_v29 = vadd.f32 %v3044_v35, %v389_v20  ;;  %v145_v15 = vld [vmem:[%s4049_s0 + $0x418] sm:$0xff]  ;;  %v146_v20 = vld [vmem:[%s4049_s0 + $0x420] sm:$0xff] }
  0x68   :  { %2255 = vst [vmem:[%s4052_s3 + $0x1b0] sm:$0xff] %v1835_v17   ;;  %v392_v30 = vmul.f32 %v3056_v39, %v132_v16  ;;  %v903_v31 = vmax.f32 %v647_v22, 0.0  ;;  %v650_v32 = vadd.f32 %v3044_v35, %v390_v24  ;;  %v651_v33 = vadd.f32 %v3044_v35, %v391_v25 }
  0x69   :  { %v393_v34 = vmul.f32 %v3056_v39, %v133_v21  ;;  %2256 = vst [vmem:[%s4052_s3 + $0x1b8] sm:$0xff] %v1840_v27   ;;  %v904_v2 = vmax.f32 %v648_v28, 0.0  ;;  %v905_v36 = vmax.f32 %v649_v29, 0.0  ;;  %v394_v38 = vmul.f32 %v3056_v39, %v134_v26  ;;  %v147_v21 = vld [vmem:[%s4049_s0 + $0x428] sm:$0xff]  ;;  %v148_v26 = vld [vmem:[%s4049_s0 + $0x430] sm:$0xff] }
  0x6a   :  { %v652_v37 = vadd.f32 %v3044_v35, %v392_v30  ;;  %v1845_v42 = vpack.c.bf16 %v903_v31, %v902_v23  ;;  %v906_v43 = vmax.f32 %v650_v32, 0.0  ;;  %v907_v44 = vmax.f32 %v651_v33, 0.0  ;;  %v149_v31 = vld [vmem:[%s4049_s0 + $0x438] sm:$0xff] }
  0x6b   :  { %v653_v45 = vadd.f32 %v3044_v35, %v393_v34  ;;  %v1850_v48 = vpack.c.bf16 %v905_v36, %v904_v2  ;;  %v395_v50 = vmul.f32 %v3056_v39, %v135_v3  ;;  %v654_v51 = vadd.f32 %v3044_v35, %v394_v38  ;;  %v150_v2 = vld [vmem:[%s4049_s0 + $0x440] sm:$0xff] }
  0x6c   :  { %v908_v49 = vmax.f32 %v652_v37, 0.0  ;;  %2257 = vst [vmem:[%s4052_s3 + $0x1c0] sm:$0xff] %v1845_v42   ;;  %v1855_v53 = vpack.c.bf16 %v907_v44, %v906_v43  ;;  %v396_v55 = vmul.f32 %v3056_v39, %v136_v40  ;;  %v397_v56 = vmul.f32 %v3056_v39, %v137_v41 }
  0x6d   :  { %v909_v54 = vmax.f32 %v653_v45, 0.0  ;;  %2258 = vst [vmem:[%s4052_s3 + $0x1c8] sm:$0xff] %v1850_v48   ;;  %v655_v58 = vadd.f32 %v3044_v35, %v395_v50  ;;  %v910_v59 = vmax.f32 %v654_v51, 0.0  ;;  %v398_v60 = vmul.f32 %v3056_v39, %v138_v46  ;;  %v151_v45 = vld [vmem:[%s4049_s0 + $0x448] sm:$0xff]  ;;  %v152_v50 = vld [vmem:[%s4049_s0 + $0x450] sm:$0xff]  ;;  %v153_v51 = vld [vmem:[%s4049_s0 + $0x458] sm:$0xff] }
  0x6e   :  { %v399_v61 = vmul.f32 %v3056_v39, %v139_v47  ;;  %2259 = vst [vmem:[%s4052_s3 + $0x1d0] sm:$0xff] %v1855_v53   ;;  %v656_v0 = vadd.f32 %v3044_v35, %v396_v55  ;;  %v657_v1 = vadd.f32 %v3044_v35, %v397_v56  ;;  %v400_v4 = vmul.f32 %v3056_v39, %v140_v52  ;;  %v154_v56 = vld [vmem:[%s4049_s0 + $0x460] sm:$0xff] }
  0x6f   :  { %v1860_v63 = vpack.c.bf16 %v909_v54, %v908_v49  ;;  %v911_v5 = vmax.f32 %v655_v58, 0.0  ;;  %v658_v6 = vadd.f32 %v3044_v35, %v398_v60  ;;  %v401_v8 = vmul.f32 %v3056_v39, %v141_v57  ;;  %v155_v57 = vld [vmem:[%s4049_s0 + $0x468] sm:$0xff] }
  0x70   :  { %v659_v7 = vadd.f32 %v3044_v35, %v399_v61  ;;  %v912_v10 = vmax.f32 %v656_v0, 0.0  ;;  %v913_v11 = vmax.f32 %v657_v1, 0.0  ;;  %v660_v12 = vadd.f32 %v3044_v35, %v400_v4 }
  0x71   :  { %2260 = vst [vmem:[%s4052_s3 + $0x1d8] sm:$0xff] %v1860_v63   ;;  %v402_v13 = vmul.f32 %v3056_v39, %v142_v62  ;;  %v1865_v16 = vpack.c.bf16 %v911_v5, %v910_v59  ;;  %v914_v17 = vmax.f32 %v658_v6, 0.0  ;;  %v661_v19 = vadd.f32 %v3044_v35, %v401_v8  ;;  %v156_v62 = vld [vmem:[%s4049_s0 + $0x470] sm:$0xff]  ;;  %v157_v5 = vld [vmem:[%s4049_s0 + $0x478] sm:$0xff] }
  0x72   :  { %v915_v18 = vmax.f32 %v659_v7, 0.0  ;;  %v1870_v22 = vpack.c.bf16 %v913_v11, %v912_v10  ;;  %v916_v23 = vmax.f32 %v660_v12, 0.0  ;;  %v403_v24 = vmul.f32 %v3056_v39, %v143_v9  ;;  %v158_v10 = vld [vmem:[%s4049_s0 + $0x480] sm:$0xff] }
  0x73   :  { %v662_v25 = vadd.f32 %v3044_v35, %v402_v13  ;;  %2261 = vst [vmem:[%s4052_s3 + $0x1e0] sm:$0xff] %v1865_v16   ;;  %v917_v28 = vmax.f32 %v661_v19, 0.0  ;;  %v404_v29 = vmul.f32 %v3056_v39, %v144_v14  ;;  %v405_v30 = vmul.f32 %v3056_v39, %v145_v15  ;;  %v159_v19 = vld [vmem:[%s4049_s0 + $0x488] sm:$0xff] }
  0x74   :  { %v1875_v27 = vpack.c.bf16 %v915_v18, %v914_v17  ;;  %2262 = vst [vmem:[%s4052_s3 + $0x1e8] sm:$0xff] %v1870_v22   ;;  %v663_v32 = vadd.f32 %v3044_v35, %v403_v24  ;;  %v406_v34 = vmul.f32 %v3056_v39, %v146_v20  ;;  %v407_v3 = vmul.f32 %v3056_v39, %v147_v21  ;;  %v160_v24 = vld [vmem:[%s4049_s0 + $0x490] sm:$0xff] }
  0x75   :  { %v918_v33 = vmax.f32 %v662_v25, 0.0  ;;  %v1880_v36 = vpack.c.bf16 %v917_v28, %v916_v23  ;;  %v664_v37 = vadd.f32 %v3044_v35, %v404_v29  ;;  %v665_v38 = vadd.f32 %v3044_v35, %v405_v30  ;;  %v161_v25 = vld [vmem:[%s4049_s0 + $0x498] sm:$0xff]  ;;  %v162_v30 = vld [vmem:[%s4049_s0 + $0x4a0] sm:$0xff] }
  0x76   :  { %2263 = vst [vmem:[%s4052_s3 + $0x1f0] sm:$0xff] %v1875_v27   ;;  %v408_v40 = vmul.f32 %v3056_v39, %v148_v26  ;;  %v919_v41 = vmax.f32 %v663_v32, 0.0  ;;  %v666_v42 = vadd.f32 %v3044_v35, %v406_v34  ;;  %v667_v43 = vadd.f32 %v3044_v35, %v407_v3 }
  0x77   :  { %v409_v44 = vmul.f32 %v3056_v39, %v149_v31  ;;  %2264 = vst [vmem:[%s4052_s3 + $0x1f8] sm:$0xff] %v1880_v36   ;;  %v920_v46 = vmax.f32 %v664_v37, 0.0  ;;  %v921_v47 = vmax.f32 %v665_v38, 0.0  ;;  %v410_v49 = vmul.f32 %v3056_v39, %v150_v2  ;;  %v163_v31 = vld [vmem:[%s4049_s0 + $0x4a8] sm:$0xff]  ;;  %v164_v2 = vld [vmem:[%s4049_s0 + $0x4b0] sm:$0xff] }
  0x78   :  { %v668_v48 = vadd.f32 %v3044_v35, %v408_v40  ;;  %v1885_v52 = vpack.c.bf16 %v919_v41, %v918_v33  ;;  %v922_v53 = vmax.f32 %v666_v42, 0.0  ;;  %v923_v54 = vmax.f32 %v667_v43, 0.0  ;;  %v165_v41 = vld [vmem:[%s4049_s0 + $0x4b8] sm:$0xff] }
  0x79   :  { %v669_v55 = vadd.f32 %v3044_v35, %v409_v44  ;;  %v1890_v58 = vpack.c.bf16 %v921_v47, %v920_v46  ;;  %v411_v60 = vmul.f32 %v3056_v39, %v151_v45  ;;  %v670_v61 = vadd.f32 %v3044_v35, %v410_v49  ;;  %v166_v46 = vld [vmem:[%s4049_s0 + $0x4c0] sm:$0xff] }
  0x7a   :  { %v924_v59 = vmax.f32 %v668_v48, 0.0  ;;  %2265 = vst [vmem:[%s4052_s3 + $0x200] sm:$0xff] %v1885_v52   ;;  %v1895_v63 = vpack.c.bf16 %v923_v54, %v922_v53  ;;  %v412_v1 = vmul.f32 %v3056_v39, %v152_v50  ;;  %v413_v4 = vmul.f32 %v3056_v39, %v153_v51 }
  0x7b   :  { %v925_v0 = vmax.f32 %v669_v55, 0.0  ;;  %2266 = vst [vmem:[%s4052_s3 + $0x208] sm:$0xff] %v1890_v58   ;;  %v671_v6 = vadd.f32 %v3044_v35, %v411_v60  ;;  %v926_v7 = vmax.f32 %v670_v61, 0.0  ;;  %v414_v8 = vmul.f32 %v3056_v39, %v154_v56  ;;  %v167_v55 = vld [vmem:[%s4049_s0 + $0x4c8] sm:$0xff]  ;;  %v168_v60 = vld [vmem:[%s4049_s0 + $0x4d0] sm:$0xff]  ;;  %v169_v61 = vld [vmem:[%s4049_s0 + $0x4d8] sm:$0xff] }
  0x7c   :  { %v415_v9 = vmul.f32 %v3056_v39, %v155_v57  ;;  %2267 = vst [vmem:[%s4052_s3 + $0x210] sm:$0xff] %v1895_v63   ;;  %v672_v12 = vadd.f32 %v3044_v35, %v412_v1  ;;  %v673_v13 = vadd.f32 %v3044_v35, %v413_v4  ;;  %v416_v14 = vmul.f32 %v3056_v39, %v156_v62  ;;  %v170_v4 = vld [vmem:[%s4049_s0 + $0x4e0] sm:$0xff] }
  0x7d   :  { %v1900_v11 = vpack.c.bf16 %v925_v0, %v924_v59  ;;  %v927_v15 = vmax.f32 %v671_v6, 0.0  ;;  %v674_v16 = vadd.f32 %v3044_v35, %v414_v8  ;;  %v417_v18 = vmul.f32 %v3056_v39, %v157_v5  ;;  %v171_v5 = vld [vmem:[%s4049_s0 + $0x4e8] sm:$0xff] }
  0x7e   :  { %v675_v17 = vadd.f32 %v3044_v35, %v415_v9  ;;  %v928_v20 = vmax.f32 %v672_v12, 0.0  ;;  %v929_v21 = vmax.f32 %v673_v13, 0.0  ;;  %v676_v22 = vadd.f32 %v3044_v35, %v416_v14 }
  0x7f   :  { %2268 = vst [vmem:[%s4052_s3 + $0x218] sm:$0xff] %v1900_v11   ;;  %v418_v23 = vmul.f32 %v3056_v39, %v158_v10  ;;  %v1905_v26 = vpack.c.bf16 %v927_v15, %v926_v7  ;;  %v930_v27 = vmax.f32 %v674_v16, 0.0  ;;  %v677_v29 = vadd.f32 %v3044_v35, %v417_v18  ;;  %v172_v10 = vld [vmem:[%s4049_s0 + $0x4f0] sm:$0xff]  ;;  %v173_v15 = vld [vmem:[%s4049_s0 + $0x4f8] sm:$0xff] }
  0x80   :  { %v931_v28 = vmax.f32 %v675_v17, 0.0  ;;  %v1910_v32 = vpack.c.bf16 %v929_v21, %v928_v20  ;;  %v932_v33 = vmax.f32 %v676_v22, 0.0  ;;  %v419_v34 = vmul.f32 %v3056_v39, %v159_v19  ;;  %v174_v20 = vld [vmem:[%s4049_s0 + $0x500] sm:$0xff] }
  0x81   :  { %v678_v3 = vadd.f32 %v3044_v35, %v418_v23  ;;  %2269 = vst [vmem:[%s4052_s3 + $0x220] sm:$0xff] %v1905_v26   ;;  %v933_v37 = vmax.f32 %v677_v29, 0.0  ;;  %v420_v38 = vmul.f32 %v3056_v39, %v160_v24  ;;  %v421_v40 = vmul.f32 %v3056_v39, %v161_v25  ;;  %v175_v29 = vld [vmem:[%s4049_s0 + $0x508] sm:$0xff] }
  0x82   :  { %v1915_v36 = vpack.c.bf16 %v931_v28, %v930_v27  ;;  %2270 = vst [vmem:[%s4052_s3 + $0x228] sm:$0xff] %v1910_v32   ;;  %v679_v42 = vadd.f32 %v3044_v35, %v419_v34  ;;  %v422_v44 = vmul.f32 %v3056_v39, %v162_v30  ;;  %v423_v45 = vmul.f32 %v3056_v39, %v163_v31  ;;  %v176_v34 = vld [vmem:[%s4049_s0 + $0x510] sm:$0xff] }
  0x83   :  { %v934_v43 = vmax.f32 %v678_v3, 0.0  ;;  %v1920_v47 = vpack.c.bf16 %v933_v37, %v932_v33  ;;  %v680_v48 = vadd.f32 %v3044_v35, %v420_v38  ;;  %v681_v49 = vadd.f32 %v3044_v35, %v421_v40  ;;  %v177_v3 = vld [vmem:[%s4049_s0 + $0x518] sm:$0xff]  ;;  %v178_v40 = vld [vmem:[%s4049_s0 + $0x520] sm:$0xff] }
  0x84   :  { %2271 = vst [vmem:[%s4052_s3 + $0x230] sm:$0xff] %v1915_v36   ;;  %v424_v50 = vmul.f32 %v3056_v39, %v164_v2  ;;  %v935_v51 = vmax.f32 %v679_v42, 0.0  ;;  %v682_v52 = vadd.f32 %v3044_v35, %v422_v44  ;;  %v683_v53 = vadd.f32 %v3044_v35, %v423_v45 }
  0x85   :  { %v425_v54 = vmul.f32 %v3056_v39, %v165_v41  ;;  %2272 = vst [vmem:[%s4052_s3 + $0x238] sm:$0xff] %v1920_v47   ;;  %v936_v56 = vmax.f32 %v680_v48, 0.0  ;;  %v937_v57 = vmax.f32 %v681_v49, 0.0  ;;  %v426_v59 = vmul.f32 %v3056_v39, %v166_v46  ;;  %v179_v41 = vld [vmem:[%s4049_s0 + $0x528] sm:$0xff]  ;;  %v180_v46 = vld [vmem:[%s4049_s0 + $0x530] sm:$0xff] }
  0x86   :  { %v684_v58 = vadd.f32 %v3044_v35, %v424_v50  ;;  %v1925_v62 = vpack.c.bf16 %v935_v51, %v934_v43  ;;  %v938_v63 = vmax.f32 %v682_v52, 0.0  ;;  %v939_v0 = vmax.f32 %v683_v53, 0.0  ;;  %v181_v51 = vld [vmem:[%s4049_s0 + $0x538] sm:$0xff] }
  0x87   :  { %v685_v1 = vadd.f32 %v3044_v35, %v425_v54  ;;  %v1930_v6 = vpack.c.bf16 %v937_v57, %v936_v56  ;;  %v427_v8 = vmul.f32 %v3056_v39, %v167_v55  ;;  %v686_v9 = vadd.f32 %v3044_v35, %v426_v59  ;;  %v182_v56 = vld [vmem:[%s4049_s0 + $0x540] sm:$0xff] }
  0x88   :  { %v940_v7 = vmax.f32 %v684_v58, 0.0  ;;  %2273 = vst [vmem:[%s4052_s3 + $0x240] sm:$0xff] %v1925_v62   ;;  %v1935_v11 = vpack.c.bf16 %v939_v0, %v938_v63  ;;  %v428_v13 = vmul.f32 %v3056_v39, %v168_v60  ;;  %v429_v14 = vmul.f32 %v3056_v39, %v169_v61 }
  0x89   :  { %v941_v12 = vmax.f32 %v685_v1, 0.0  ;;  %2274 = vst [vmem:[%s4052_s3 + $0x248] sm:$0xff] %v1930_v6   ;;  %v687_v16 = vadd.f32 %v3044_v35, %v427_v8  ;;  %v942_v17 = vmax.f32 %v686_v9, 0.0  ;;  %v430_v18 = vmul.f32 %v3056_v39, %v170_v4  ;;  %v183_v1 = vld [vmem:[%s4049_s0 + $0x548] sm:$0xff]  ;;  %v184_v8 = vld [vmem:[%s4049_s0 + $0x550] sm:$0xff]  ;;  %v185_v9 = vld [vmem:[%s4049_s0 + $0x558] sm:$0xff] }
  0x8a   :  { %v431_v19 = vmul.f32 %v3056_v39, %v171_v5  ;;  %2275 = vst [vmem:[%s4052_s3 + $0x250] sm:$0xff] %v1935_v11   ;;  %v688_v22 = vadd.f32 %v3044_v35, %v428_v13  ;;  %v689_v23 = vadd.f32 %v3044_v35, %v429_v14  ;;  %v432_v24 = vmul.f32 %v3056_v39, %v172_v10  ;;  %v186_v14 = vld [vmem:[%s4049_s0 + $0x560] sm:$0xff] }
  0x8b   :  { %v1940_v21 = vpack.c.bf16 %v941_v12, %v940_v7  ;;  %v943_v25 = vmax.f32 %v687_v16, 0.0  ;;  %v690_v26 = vadd.f32 %v3044_v35, %v430_v18  ;;  %v433_v28 = vmul.f32 %v3056_v39, %v173_v15  ;;  %v187_v15 = vld [vmem:[%s4049_s0 + $0x568] sm:$0xff] }
  0x8c   :  { %v691_v27 = vadd.f32 %v3044_v35, %v431_v19  ;;  %v944_v30 = vmax.f32 %v688_v22, 0.0  ;;  %v945_v31 = vmax.f32 %v689_v23, 0.0  ;;  %v692_v32 = vadd.f32 %v3044_v35, %v432_v24 }
  0x8d   :  { %2276 = vst [vmem:[%s4052_s3 + $0x258] sm:$0xff] %v1940_v21   ;;  %v434_v33 = vmul.f32 %v3056_v39, %v174_v20  ;;  %v1945_v2 = vpack.c.bf16 %v943_v25, %v942_v17  ;;  %v946_v36 = vmax.f32 %v690_v26, 0.0  ;;  %v693_v38 = vadd.f32 %v3044_v35, %v433_v28  ;;  %v188_v20 = vld [vmem:[%s4049_s0 + $0x570] sm:$0xff]  ;;  %v189_v25 = vld [vmem:[%s4049_s0 + $0x578] sm:$0xff] }
  0x8e   :  { %v947_v37 = vmax.f32 %v691_v27, 0.0  ;;  %v1950_v42 = vpack.c.bf16 %v945_v31, %v944_v30  ;;  %v948_v43 = vmax.f32 %v692_v32, 0.0  ;;  %v435_v44 = vmul.f32 %v3056_v39, %v175_v29  ;;  %v190_v30 = vld [vmem:[%s4049_s0 + $0x580] sm:$0xff] }
  0x8f   :  { %v694_v45 = vadd.f32 %v3044_v35, %v434_v33  ;;  %2277 = vst [vmem:[%s4052_s3 + $0x260] sm:$0xff] %v1945_v2   ;;  %v949_v48 = vmax.f32 %v693_v38, 0.0  ;;  %v436_v49 = vmul.f32 %v3056_v39, %v176_v34  ;;  %v437_v50 = vmul.f32 %v3056_v39, %v177_v3  ;;  %v191_v38 = vld [vmem:[%s4049_s0 + $0x588] sm:$0xff] }
  0x90   :  { %v1955_v47 = vpack.c.bf16 %v947_v37, %v946_v36  ;;  %2278 = vst [vmem:[%s4052_s3 + $0x268] sm:$0xff] %v1950_v42   ;;  %v695_v52 = vadd.f32 %v3044_v35, %v435_v44  ;;  %v438_v54 = vmul.f32 %v3056_v39, %v178_v40  ;;  %v439_v55 = vmul.f32 %v3056_v39, %v179_v41  ;;  %v192_v44 = vld [vmem:[%s4049_s0 + $0x590] sm:$0xff] }
  0x91   :  { %v950_v53 = vmax.f32 %v694_v45, 0.0  ;;  %v1960_v57 = vpack.c.bf16 %v949_v48, %v948_v43  ;;  %v696_v58 = vadd.f32 %v3044_v35, %v436_v49  ;;  %v697_v59 = vadd.f32 %v3044_v35, %v437_v50  ;;  %v193_v45 = vld [vmem:[%s4049_s0 + $0x598] sm:$0xff]  ;;  %v194_v50 = vld [vmem:[%s4049_s0 + $0x5a0] sm:$0xff] }
  0x92   :  { %2279 = vst [vmem:[%s4052_s3 + $0x270] sm:$0xff] %v1955_v47   ;;  %v440_v60 = vmul.f32 %v3056_v39, %v180_v46  ;;  %v951_v61 = vmax.f32 %v695_v52, 0.0  ;;  %v698_v62 = vadd.f32 %v3044_v35, %v438_v54  ;;  %v699_v63 = vadd.f32 %v3044_v35, %v439_v55 }
  0x93   :  { %v441_v0 = vmul.f32 %v3056_v39, %v181_v51  ;;  %2280 = vst [vmem:[%s4052_s3 + $0x278] sm:$0xff] %v1960_v57   ;;  %v952_v4 = vmax.f32 %v696_v58, 0.0  ;;  %v953_v5 = vmax.f32 %v697_v59, 0.0  ;;  %v442_v7 = vmul.f32 %v3056_v39, %v182_v56  ;;  %v195_v51 = vld [vmem:[%s4049_s0 + $0x5a8] sm:$0xff]  ;;  %v196_v56 = vld [vmem:[%s4049_s0 + $0x5b0] sm:$0xff] }
  0x94   :  { %v700_v6 = vadd.f32 %v3044_v35, %v440_v60  ;;  %v1965_v10 = vpack.c.bf16 %v951_v61, %v950_v53  ;;  %v954_v11 = vmax.f32 %v698_v62, 0.0  ;;  %v955_v12 = vmax.f32 %v699_v63, 0.0  ;;  %v197_v61 = vld [vmem:[%s4049_s0 + $0x5b8] sm:$0xff] }
  0x95   :  { %v701_v13 = vadd.f32 %v3044_v35, %v441_v0  ;;  %v1970_v16 = vpack.c.bf16 %v953_v5, %v952_v4  ;;  %v443_v18 = vmul.f32 %v3056_v39, %v183_v1  ;;  %v702_v19 = vadd.f32 %v3044_v35, %v442_v7  ;;  %v198_v4 = vld [vmem:[%s4049_s0 + $0x5c0] sm:$0xff] }
  0x96   :  { %v956_v17 = vmax.f32 %v700_v6, 0.0  ;;  %2281 = vst [vmem:[%s4052_s3 + $0x280] sm:$0xff] %v1965_v10   ;;  %v1975_v21 = vpack.c.bf16 %v955_v12, %v954_v11  ;;  %v444_v23 = vmul.f32 %v3056_v39, %v184_v8  ;;  %v445_v24 = vmul.f32 %v3056_v39, %v185_v9 }
  0x97   :  { %v957_v22 = vmax.f32 %v701_v13, 0.0  ;;  %2282 = vst [vmem:[%s4052_s3 + $0x288] sm:$0xff] %v1970_v16   ;;  %v703_v26 = vadd.f32 %v3044_v35, %v443_v18  ;;  %v958_v27 = vmax.f32 %v702_v19, 0.0  ;;  %v446_v28 = vmul.f32 %v3056_v39, %v186_v14  ;;  %v199_v13 = vld [vmem:[%s4049_s0 + $0x5c8] sm:$0xff]  ;;  %v200_v18 = vld [vmem:[%s4049_s0 + $0x5d0] sm:$0xff]  ;;  %v201_v19 = vld [vmem:[%s4049_s0 + $0x5d8] sm:$0xff] }
  0x98   :  { %v447_v29 = vmul.f32 %v3056_v39, %v187_v15  ;;  %2283 = vst [vmem:[%s4052_s3 + $0x290] sm:$0xff] %v1975_v21   ;;  %v704_v32 = vadd.f32 %v3044_v35, %v444_v23  ;;  %v705_v33 = vadd.f32 %v3044_v35, %v445_v24  ;;  %v448_v34 = vmul.f32 %v3056_v39, %v188_v20  ;;  %v202_v24 = vld [vmem:[%s4049_s0 + $0x5e0] sm:$0xff] }
  0x99   :  { %v1980_v31 = vpack.c.bf16 %v957_v22, %v956_v17  ;;  %v959_v3 = vmax.f32 %v703_v26, 0.0  ;;  %v706_v2 = vadd.f32 %v3044_v35, %v446_v28  ;;  %v449_v37 = vmul.f32 %v3056_v39, %v189_v25  ;;  %v203_v25 = vld [vmem:[%s4049_s0 + $0x5e8] sm:$0xff] }
  0x9a   :  { %v707_v36 = vadd.f32 %v3044_v35, %v447_v29  ;;  %v960_v40 = vmax.f32 %v704_v32, 0.0  ;;  %v961_v41 = vmax.f32 %v705_v33, 0.0  ;;  %v708_v42 = vadd.f32 %v3044_v35, %v448_v34 }
  0x9b   :  { %2284 = vst [vmem:[%s4052_s3 + $0x298] sm:$0xff] %v1980_v31   ;;  %v450_v43 = vmul.f32 %v3056_v39, %v190_v30  ;;  %v1985_v46 = vpack.c.bf16 %v959_v3, %v958_v27  ;;  %v962_v47 = vmax.f32 %v706_v2, 0.0  ;;  %v709_v49 = vadd.f32 %v3044_v35, %v449_v37  ;;  %v204_v30 = vld [vmem:[%s4049_s0 + $0x5f0] sm:$0xff]  ;;  %v205_v3 = vld [vmem:[%s4049_s0 + $0x5f8] sm:$0xff] }
  0x9c   :  { %v963_v48 = vmax.f32 %v707_v36, 0.0  ;;  %v1990_v52 = vpack.c.bf16 %v961_v41, %v960_v40  ;;  %v964_v53 = vmax.f32 %v708_v42, 0.0  ;;  %v451_v54 = vmul.f32 %v3056_v39, %v191_v38  ;;  %v206_v40 = vld [vmem:[%s4049_s0 + $0x600] sm:$0xff] }
  0x9d   :  { %v710_v55 = vadd.f32 %v3044_v35, %v450_v43  ;;  %2285 = vst [vmem:[%s4052_s3 + $0x2a0] sm:$0xff] %v1985_v46   ;;  %v965_v58 = vmax.f32 %v709_v49, 0.0  ;;  %v452_v59 = vmul.f32 %v3056_v39, %v192_v44  ;;  %v453_v60 = vmul.f32 %v3056_v39, %v193_v45  ;;  %v207_v49 = vld [vmem:[%s4049_s0 + $0x608] sm:$0xff] }
  0x9e   :  { %v1995_v57 = vpack.c.bf16 %v963_v48, %v962_v47  ;;  %2286 = vst [vmem:[%s4052_s3 + $0x2a8] sm:$0xff] %v1990_v52   ;;  %v711_v62 = vadd.f32 %v3044_v35, %v451_v54  ;;  %v454_v0 = vmul.f32 %v3056_v39, %v194_v50  ;;  %v455_v1 = vmul.f32 %v3056_v39, %v195_v51  ;;  %v208_v54 = vld [vmem:[%s4049_s0 + $0x610] sm:$0xff] }
  0x9f   :  { %v966_v63 = vmax.f32 %v710_v55, 0.0  ;;  %v2000_v5 = vpack.c.bf16 %v965_v58, %v964_v53  ;;  %v712_v6 = vadd.f32 %v3044_v35, %v452_v59  ;;  %v713_v7 = vadd.f32 %v3044_v35, %v453_v60  ;;  %v209_v55 = vld [vmem:[%s4049_s0 + $0x618] sm:$0xff]  ;;  %v210_v60 = vld [vmem:[%s4049_s0 + $0x620] sm:$0xff] }
  0xa0   :  { %2287 = vst [vmem:[%s4052_s3 + $0x2b0] sm:$0xff] %v1995_v57   ;;  %v456_v8 = vmul.f32 %v3056_v39, %v196_v56  ;;  %v967_v9 = vmax.f32 %v711_v62, 0.0  ;;  %v714_v10 = vadd.f32 %v3044_v35, %v454_v0  ;;  %v715_v11 = vadd.f32 %v3044_v35, %v455_v1 }
  0xa1   :  { %v457_v12 = vmul.f32 %v3056_v39, %v197_v61  ;;  %2288 = vst [vmem:[%s4052_s3 + $0x2b8] sm:$0xff] %v2000_v5   ;;  %v968_v14 = vmax.f32 %v712_v6, 0.0  ;;  %v969_v15 = vmax.f32 %v713_v7, 0.0  ;;  %v458_v17 = vmul.f32 %v3056_v39, %v198_v4  ;;  %v211_v61 = vld [vmem:[%s4049_s0 + $0x628] sm:$0xff]  ;;  %v212_v4 = vld [vmem:[%s4049_s0 + $0x630] sm:$0xff] }
  0xa2   :  { %v716_v16 = vadd.f32 %v3044_v35, %v456_v8  ;;  %v2005_v20 = vpack.c.bf16 %v967_v9, %v966_v63  ;;  %v970_v21 = vmax.f32 %v714_v10, 0.0  ;;  %v971_v22 = vmax.f32 %v715_v11, 0.0  ;;  %v213_v9 = vld [vmem:[%s4049_s0 + $0x638] sm:$0xff] }
  0xa3   :  { %v717_v23 = vadd.f32 %v3044_v35, %v457_v12  ;;  %v2010_v26 = vpack.c.bf16 %v969_v15, %v968_v14  ;;  %v459_v28 = vmul.f32 %v3056_v39, %v199_v13  ;;  %v718_v29 = vadd.f32 %v3044_v35, %v458_v17  ;;  %v214_v14 = vld [vmem:[%s4049_s0 + $0x640] sm:$0xff] }
  0xa4   :  { %v972_v27 = vmax.f32 %v716_v16, 0.0  ;;  %2289 = vst [vmem:[%s4052_s3 + $0x2c0] sm:$0xff] %v2005_v20   ;;  %v2015_v31 = vpack.c.bf16 %v971_v22, %v970_v21  ;;  %v460_v33 = vmul.f32 %v3056_v39, %v200_v18  ;;  %v461_v34 = vmul.f32 %v3056_v39, %v201_v19 }
  0xa5   :  { %v973_v32 = vmax.f32 %v717_v23, 0.0  ;;  %2290 = vst [vmem:[%s4052_s3 + $0x2c8] sm:$0xff] %v2010_v26   ;;  %v719_v2 = vadd.f32 %v3044_v35, %v459_v28  ;;  %v974_v36 = vmax.f32 %v718_v29, 0.0  ;;  %v462_v37 = vmul.f32 %v3056_v39, %v202_v24  ;;  %v215_v23 = vld [vmem:[%s4049_s0 + $0x648] sm:$0xff]  ;;  %v216_v28 = vld [vmem:[%s4049_s0 + $0x650] sm:$0xff]  ;;  %v217_v29 = vld [vmem:[%s4049_s0 + $0x658] sm:$0xff] }
  0xa6   :  { %v463_v38 = vmul.f32 %v3056_v39, %v203_v25  ;;  %2291 = vst [vmem:[%s4052_s3 + $0x2d0] sm:$0xff] %v2015_v31   ;;  %v720_v42 = vadd.f32 %v3044_v35, %v460_v33  ;;  %v721_v43 = vadd.f32 %v3044_v35, %v461_v34  ;;  %v464_v44 = vmul.f32 %v3056_v39, %v204_v30  ;;  %v218_v34 = vld [vmem:[%s4049_s0 + $0x660] sm:$0xff] }
  0xa7   :  { %v2020_v41 = vpack.c.bf16 %v973_v32, %v972_v27  ;;  %v975_v45 = vmax.f32 %v719_v2, 0.0  ;;  %v722_v46 = vadd.f32 %v3044_v35, %v462_v37  ;;  %v465_v48 = vmul.f32 %v3056_v39, %v205_v3  ;;  %v219_v3 = vld [vmem:[%s4049_s0 + $0x668] sm:$0xff] }
  0xa8   :  { %v723_v47 = vadd.f32 %v3044_v35, %v463_v38  ;;  %v976_v50 = vmax.f32 %v720_v42, 0.0  ;;  %v977_v51 = vmax.f32 %v721_v43, 0.0  ;;  %v724_v52 = vadd.f32 %v3044_v35, %v464_v44 }
  0xa9   :  { %2292 = vst [vmem:[%s4052_s3 + $0x2d8] sm:$0xff] %v2020_v41   ;;  %v466_v53 = vmul.f32 %v3056_v39, %v206_v40  ;;  %v2025_v56 = vpack.c.bf16 %v975_v45, %v974_v36  ;;  %v978_v57 = vmax.f32 %v722_v46, 0.0  ;;  %v725_v59 = vadd.f32 %v3044_v35, %v465_v48  ;;  %v220_v40 = vld [vmem:[%s4049_s0 + $0x670] sm:$0xff]  ;;  %v221_v45 = vld [vmem:[%s4049_s0 + $0x678] sm:$0xff] }
  0xaa   :  { %v979_v58 = vmax.f32 %v723_v47, 0.0  ;;  %v2030_v62 = vpack.c.bf16 %v977_v51, %v976_v50  ;;  %v980_v63 = vmax.f32 %v724_v52, 0.0  ;;  %v467_v0 = vmul.f32 %v3056_v39, %v207_v49  ;;  %v222_v50 = vld [vmem:[%s4049_s0 + $0x680] sm:$0xff] }
  0xab   :  { %v726_v1 = vadd.f32 %v3044_v35, %v466_v53  ;;  %2293 = vst [vmem:[%s4052_s3 + $0x2e0] sm:$0xff] %v2025_v56   ;;  %v981_v6 = vmax.f32 %v725_v59, 0.0  ;;  %v468_v7 = vmul.f32 %v3056_v39, %v208_v54  ;;  %v469_v8 = vmul.f32 %v3056_v39, %v209_v55  ;;  %v223_v59 = vld [vmem:[%s4049_s0 + $0x688] sm:$0xff] }
  0xac   :  { %v2035_v5 = vpack.c.bf16 %v979_v58, %v978_v57  ;;  %2294 = vst [vmem:[%s4052_s3 + $0x2e8] sm:$0xff] %v2030_v62   ;;  %v727_v10 = vadd.f32 %v3044_v35, %v467_v0  ;;  %v470_v12 = vmul.f32 %v3056_v39, %v210_v60  ;;  %v471_v13 = vmul.f32 %v3056_v39, %v211_v61  ;;  %v3722_v62 = vld [vmem:[%s4051_s2] ss:$0 sm:$0xff]  ;;  %v224_v0 = vld [vmem:[%s4049_s0 + $0x690] sm:$0xff] }
  0xad   :  { %v982_v11 = vmax.f32 %v726_v1, 0.0  ;;  %v2040_v15 = vpack.c.bf16 %v981_v6, %v980_v63  ;;  %v728_v16 = vadd.f32 %v3044_v35, %v468_v7  ;;  %v729_v17 = vadd.f32 %v3044_v35, %v469_v8  ;;  %v225_v1 = vld [vmem:[%s4049_s0 + $0x698] sm:$0xff]  ;;  %v226_v8 = vld [vmem:[%s4049_s0 + $0x6a0] sm:$0xff] }
  0xae   :  { %2295 = vst [vmem:[%s4052_s3 + $0x2f0] sm:$0xff] %v2035_v5   ;;  %v472_v18 = vmul.f32 %v3056_v39, %v212_v4  ;;  %v983_v19 = vmax.f32 %v727_v10, 0.0  ;;  %v730_v20 = vadd.f32 %v3044_v35, %v470_v12  ;;  %v731_v21 = vadd.f32 %v3044_v35, %v471_v13 }
  0xaf   :  { %v473_v22 = vmul.f32 %v3056_v39, %v213_v9  ;;  %2296 = vst [vmem:[%s4052_s3 + $0x2f8] sm:$0xff] %v2040_v15   ;;  %v984_v24 = vmax.f32 %v728_v16, 0.0  ;;  %v985_v25 = vmax.f32 %v729_v17, 0.0  ;;  %v474_v27 = vmul.f32 %v3056_v39, %v214_v14  ;;  %v228_v14 = vld [vmem:[%s4049_s0 + $0x6b0] sm:$0xff] }
  0xb0   :  { %v732_v26 = vadd.f32 %v3044_v35, %v472_v18  ;;  %v2045_v30 = vpack.c.bf16 %v983_v19, %v982_v11  ;;  %v986_v31 = vmax.f32 %v730_v20, 0.0  ;;  %v987_v32 = vmax.f32 %v731_v21, 0.0  ;;  %v3742_v11 = vld [vmem:[%s4050_s1] ss:$0 sm:$0xff]  ;;  %v229_v19 = vld [vmem:[%s4049_s0 + $0x6b8] sm:$0xff] }
  0xb1   :  { %v733_v33 = vadd.f32 %v3044_v35, %v473_v22  ;;  %v2050_v2 = vpack.c.bf16 %v985_v25, %v984_v24  ;;  %v475_v37 = vmul.f32 %v3056_v39, %v215_v23  ;;  %v734_v38 = vadd.f32 %v3044_v35, %v474_v27  ;;  %v230_v24 = vld [vmem:[%s4049_s0 + $0x6c0] sm:$0xff] }
  0xb2   :  { %v988_v36 = vmax.f32 %v732_v26, 0.0  ;;  %2297 = vst [vmem:[%s4052_s3 + $0x300] sm:$0xff] %v2045_v30   ;;  %v2055_v41 = vpack.c.bf16 %v987_v32, %v986_v31  ;;  %v476_v43 = vmul.f32 %v3056_v39, %v216_v28  ;;  %v477_v44 = vmul.f32 %v3056_v39, %v217_v29 }
  0xb3   :  { %v989_v42 = vmax.f32 %v733_v33, 0.0  ;;  %2298 = vst [vmem:[%s4052_s3 + $0x308] sm:$0xff] %v2050_v2   ;;  %v735_v46 = vadd.f32 %v3044_v35, %v475_v37  ;;  %v990_v47 = vmax.f32 %v734_v38, 0.0  ;;  %v478_v48 = vmul.f32 %v3056_v39, %v218_v34  ;;  %v231_v33 = vld [vmem:[%s4049_s0 + $0x6c8] sm:$0xff]  ;;  %v232_v37 = vld [vmem:[%s4049_s0 + $0x6d0] sm:$0xff]  ;;  %v233_v38 = vld [vmem:[%s4049_s0 + $0x6d8] sm:$0xff] }
  0xb4   :  { %v479_v49 = vmul.f32 %v3056_v39, %v219_v3  ;;  %2299 = vst [vmem:[%s4052_s3 + $0x310] sm:$0xff] %v2055_v41   ;;  %v736_v52 = vadd.f32 %v3044_v35, %v476_v43  ;;  %v737_v53 = vadd.f32 %v3044_v35, %v477_v44  ;;  %v480_v54 = vmul.f32 %v3056_v39, %v220_v40  ;;  %v234_v44 = vld [vmem:[%s4049_s0 + $0x6e0] sm:$0xff] }
  0xb5   :  { %v2060_v51 = vpack.c.bf16 %v989_v42, %v988_v36  ;;  %v991_v55 = vmax.f32 %v735_v46, 0.0  ;;  %v738_v56 = vadd.f32 %v3044_v35, %v478_v48  ;;  %v481_v58 = vmul.f32 %v3056_v39, %v221_v45  ;;  %v235_v45 = vld [vmem:[%s4049_s0 + $0x6e8] sm:$0xff] }
  0xb6   :  { %v739_v57 = vadd.f32 %v3044_v35, %v479_v49  ;;  %v992_v60 = vmax.f32 %v736_v52, 0.0  ;;  %v993_v61 = vmax.f32 %v737_v53, 0.0  ;;  %v740_v63 = vadd.f32 %v3722_v62, %v480_v54 }
  0xb7   :  { %2300 = vst [vmem:[%s4052_s3 + $0x318] sm:$0xff] %v2060_v51   ;;  %v482_v35 = vmul.f32 %v3056_v39, %v222_v50  ;;  %v2065_v4 = vpack.c.bf16 %v991_v55, %v990_v47  ;;  %v994_v5 = vmax.f32 %v738_v56, 0.0  ;;  %v741_v7 = vadd.f32 %v3722_v62, %v481_v58  ;;  %v227_v39 = vld [vmem:[%s4049_s0 + $0x6a8] sm:$0xff]  ;;  %v236_v50 = vld [vmem:[%s4049_s0 + $0x6f0] sm:$0xff]  ;;  %v237_v55 = vld [vmem:[%s4049_s0 + $0x6f8] sm:$0xff] }
  0xb8   :  { %v995_v6 = vmax.f32 %v739_v57, 0.0  ;;  %v2070_v9 = vpack.c.bf16 %v993_v61, %v992_v60  ;;  %v996_v10 = vmax.f32 %v740_v63, 0.0  ;;  %v483_v12 = vmul.f32 %v3742_v11, %v223_v59  ;;  %v238_v60 = vld [vmem:[%s4049_s0 + $0x700] sm:$0xff] }
  0xb9   :  { %v742_v13 = vadd.f32 %v3722_v62, %v482_v35  ;;  %2301 = vst [vmem:[%s4052_s3 + $0x320] sm:$0xff] %v2065_v4   ;;  %v997_v16 = vmax.f32 %v741_v7, 0.0  ;;  %v484_v17 = vmul.f32 %v3742_v11, %v224_v0  ;;  %v485_v18 = vmul.f32 %v3742_v11, %v225_v1  ;;  %v239_v7 = vld [vmem:[%s4049_s0 + $0x708] sm:$0xff] }
  0xba   :  { %v2075_v15 = vpack.c.bf16 %v995_v6, %v994_v5  ;;  %2302 = vst [vmem:[%s4052_s3 + $0x328] sm:$0xff] %v2070_v9   ;;  %v743_v20 = vadd.f32 %v3722_v62, %v483_v12  ;;  %v486_v22 = vmul.f32 %v3742_v11, %v226_v8  ;;  %v487_v23 = vmul.f32 %v3742_v11, %v227_v39  ;;  %v240_v12 = vld [vmem:[%s4049_s0 + $0x710] sm:$0xff] }
  0xbb   :  { %v998_v21 = vmax.f32 %v742_v13, 0.0  ;;  %v2080_v25 = vpack.c.bf16 %v997_v16, %v996_v10  ;;  %v744_v26 = vadd.f32 %v3722_v62, %v484_v17  ;;  %v745_v27 = vadd.f32 %v3722_v62, %v485_v18  ;;  %v241_v13 = vld [vmem:[%s4049_s0 + $0x718] sm:$0xff]  ;;  %v242_v18 = vld [vmem:[%s4049_s0 + $0x720] sm:$0xff] }
  0xbc   :  { %2303 = vst [vmem:[%s4052_s3 + $0x330] sm:$0xff] %v2075_v15   ;;  %v488_v28 = vmul.f32 %v3742_v11, %v228_v14  ;;  %v999_v29 = vmax.f32 %v743_v20, 0.0  ;;  %v746_v30 = vadd.f32 %v3722_v62, %v486_v22  ;;  %v747_v31 = vadd.f32 %v3722_v62, %v487_v23 }
  0xbd   :  { %v489_v32 = vmul.f32 %v3742_v11, %v229_v19  ;;  %2304 = vst [vmem:[%s4052_s3 + $0x338] sm:$0xff] %v2080_v25   ;;  %v1000_v34 = vmax.f32 %v744_v26, 0.0  ;;  %v1001_v3 = vmax.f32 %v745_v27, 0.0  ;;  %v490_v36 = vmul.f32 %v3742_v11, %v230_v24  ;;  %v243_v19 = vld [vmem:[%s4049_s0 + $0x728] sm:$0xff]  ;;  %v244_v24 = vld [vmem:[%s4049_s0 + $0x730] sm:$0xff] }
  0xbe   :  { %v748_v2 = vadd.f32 %v3722_v62, %v488_v28  ;;  %v2085_v40 = vpack.c.bf16 %v999_v29, %v998_v21  ;;  %v1002_v41 = vmax.f32 %v746_v30, 0.0  ;;  %v1003_v42 = vmax.f32 %v747_v31, 0.0  ;;  %v245_v29 = vld [vmem:[%s4049_s0 + $0x738] sm:$0xff] }
  0xbf   :  { %v749_v43 = vadd.f32 %v3722_v62, %v489_v32  ;;  %v2090_v46 = vpack.c.bf16 %v1001_v3, %v1000_v34  ;;  %v491_v48 = vmul.f32 %v3742_v11, %v231_v33  ;;  %v750_v49 = vadd.f32 %v3722_v62, %v490_v36  ;;  %v246_v34 = vld [vmem:[%s4049_s0 + $0x740] sm:$0xff] }
  0xc0   :  { %v1004_v47 = vmax.f32 %v748_v2, 0.0  ;;  %2305 = vst [vmem:[%s4052_s3 + $0x340] sm:$0xff] %v2085_v40   ;;  %v2095_v51 = vpack.c.bf16 %v1003_v42, %v1002_v41  ;;  %v492_v53 = vmul.f32 %v3742_v11, %v232_v37  ;;  %v493_v54 = vmul.f32 %v3742_v11, %v233_v38 }
  0xc1   :  { %v1005_v52 = vmax.f32 %v749_v43, 0.0  ;;  %2306 = vst [vmem:[%s4052_s3 + $0x348] sm:$0xff] %v2090_v46   ;;  %v751_v56 = vadd.f32 %v3722_v62, %v491_v48  ;;  %v1006_v57 = vmax.f32 %v750_v49, 0.0  ;;  %v494_v58 = vmul.f32 %v3742_v11, %v234_v44  ;;  %v247_v43 = vld [vmem:[%s4049_s0 + $0x748] sm:$0xff]  ;;  %v248_v48 = vld [vmem:[%s4049_s0 + $0x750] sm:$0xff]  ;;  %v249_v49 = vld [vmem:[%s4049_s0 + $0x758] sm:$0xff] }
  0xc2   :  { %v495_v59 = vmul.f32 %v3742_v11, %v235_v45  ;;  %2307 = vst [vmem:[%s4052_s3 + $0x350] sm:$0xff] %v2095_v51   ;;  %v752_v63 = vadd.f32 %v3722_v62, %v492_v53  ;;  %v753_v35 = vadd.f32 %v3722_v62, %v493_v54  ;;  %v496_v0 = vmul.f32 %v3742_v11, %v236_v50  ;;  %v250_v54 = vld [vmem:[%s4049_s0 + $0x760] sm:$0xff] }
  0xc3   :  { %v2100_v61 = vpack.c.bf16 %v1005_v52, %v1004_v47  ;;  %v1007_v1 = vmax.f32 %v751_v56, 0.0  ;;  %v754_v4 = vadd.f32 %v3722_v62, %v494_v58  ;;  %v497_v6 = vmul.f32 %v3742_v11, %v237_v55  ;;  %v251_v55 = vld [vmem:[%s4049_s0 + $0x768] sm:$0xff] }
  0xc4   :  { %v755_v5 = vadd.f32 %v3722_v62, %v495_v59  ;;  %v1008_v8 = vmax.f32 %v752_v63, 0.0  ;;  %v1009_v39 = vmax.f32 %v753_v35, 0.0  ;;  %v756_v9 = vadd.f32 %v3722_v62, %v496_v0 }
  0xc5   :  { %2308 = vst [vmem:[%s4052_s3 + $0x358] sm:$0xff] %v2100_v61   ;;  %v498_v10 = vmul.f32 %v3742_v11, %v238_v60  ;;  %v2105_v14 = vpack.c.bf16 %v1007_v1, %v1006_v57  ;;  %v1010_v15 = vmax.f32 %v754_v4, 0.0  ;;  %v757_v17 = vadd.f32 %v3722_v62, %v497_v6  ;;  %v252_v60 = vld [vmem:[%s4049_s0 + $0x770] sm:$0xff]  ;;  %v253_v1 = vld [vmem:[%s4049_s0 + $0x778] sm:$0xff] }
  0xc6   :  { %v1011_v16 = vmax.f32 %v755_v5, 0.0  ;;  %v2110_v20 = vpack.c.bf16 %v1009_v39, %v1008_v8  ;;  %v1012_v21 = vmax.f32 %v756_v9, 0.0  ;;  %v499_v22 = vmul.f32 %v3742_v11, %v239_v7  ;;  %v254_v8 = vld [vmem:[%s4049_s0 + $0x780] sm:$0xff] }
  0xc7   :  { %v758_v23 = vadd.f32 %v3722_v62, %v498_v10  ;;  %2309 = vst [vmem:[%s4052_s3 + $0x360] sm:$0xff] %v2105_v14   ;;  %v1013_v26 = vmax.f32 %v757_v17, 0.0  ;;  %v500_v27 = vmul.f32 %v3742_v11, %v240_v12  ;;  %v501_v28 = vmul.f32 %v3742_v11, %v241_v13  ;;  %v255_v17 = vld [vmem:[%s4049_s0 + $0x788] sm:$0xff] }
  0xc8   :  { %v2115_v25 = vpack.c.bf16 %v1011_v16, %v1010_v15  ;;  %2310 = vst [vmem:[%s4052_s3 + $0x368] sm:$0xff] %v2110_v20   ;;  %v759_v30 = vadd.f32 %v3722_v62, %v499_v22  ;;  %v502_v32 = vmul.f32 %v3742_v11, %v242_v18  ;;  %v503_v33 = vmul.f32 %v3742_v11, %v243_v19  ;;  %v256_v22 = vld [vmem:[%s4049_s0 + $0x790] sm:$0xff] }
  0xc9   :  { %v1014_v31 = vmax.f32 %v758_v23, 0.0  ;;  %v2120_v3 = vpack.c.bf16 %v1013_v26, %v1012_v21  ;;  %v760_v2 = vadd.f32 %v3722_v62, %v500_v27  ;;  %v761_v36 = vadd.f32 %v3722_v62, %v501_v28  ;;  %v257_v23 = vld [vmem:[%s4049_s0 + $0x798] sm:$0xff]  ;;  %v258_v28 = vld [vmem:[%s4049_s0 + $0x7a0] sm:$0xff] }
  0xca   :  { %2311 = vst [vmem:[%s4052_s3 + $0x370] sm:$0xff] %v2115_v25   ;;  %v504_v37 = vmul.f32 %v3742_v11, %v244_v24  ;;  %v1015_v38 = vmax.f32 %v759_v30, 0.0  ;;  %v762_v40 = vadd.f32 %v3722_v62, %v502_v32  ;;  %v763_v41 = vadd.f32 %v3722_v62, %v503_v33 }
  0xcb   :  { %v505_v42 = vmul.f32 %v3742_v11, %v245_v29  ;;  %2312 = vst [vmem:[%s4052_s3 + $0x378] sm:$0xff] %v2120_v3   ;;  %v1016_v44 = vmax.f32 %v760_v2, 0.0  ;;  %v1017_v45 = vmax.f32 %v761_v36, 0.0  ;;  %v506_v47 = vmul.f32 %v3742_v11, %v246_v34  ;;  %v259_v29 = vld [vmem:[%s4049_s0 + $0x7a8] sm:$0xff]  ;;  %v260_v34 = vld [vmem:[%s4049_s0 + $0x7b0] sm:$0xff] }
  0xcc   :  { %v764_v46 = vadd.f32 %v3722_v62, %v504_v37  ;;  %v2125_v50 = vpack.c.bf16 %v1015_v38, %v1014_v31  ;;  %v1018_v51 = vmax.f32 %v762_v40, 0.0  ;;  %v1019_v52 = vmax.f32 %v763_v41, 0.0  ;;  %v261_v38 = vld [vmem:[%s4049_s0 + $0x7b8] sm:$0xff] }
  0xcd   :  { %v765_v53 = vadd.f32 %v3722_v62, %v505_v42  ;;  %v2130_v56 = vpack.c.bf16 %v1017_v45, %v1016_v44  ;;  %v507_v58 = vmul.f32 %v3742_v11, %v247_v43  ;;  %v766_v59 = vadd.f32 %v3722_v62, %v506_v47  ;;  %v262_v44 = vld [vmem:[%s4049_s0 + $0x7c0] sm:$0xff] }
  0xce   :  { %v1020_v57 = vmax.f32 %v764_v46, 0.0  ;;  %2313 = vst [vmem:[%s4052_s3 + $0x380] sm:$0xff] %v2125_v50   ;;  %v2135_v61 = vpack.c.bf16 %v1019_v52, %v1018_v51  ;;  %v508_v35 = vmul.f32 %v3742_v11, %v248_v48  ;;  %v509_v0 = vmul.f32 %v3742_v11, %v249_v49 }
  0xcf   :  { %v1021_v63 = vmax.f32 %v765_v53, 0.0  ;;  %2314 = vst [vmem:[%s4052_s3 + $0x388] sm:$0xff] %v2130_v56   ;;  %v767_v4 = vadd.f32 %v3722_v62, %v507_v58  ;;  %v1022_v5 = vmax.f32 %v766_v59, 0.0  ;;  %v510_v6 = vmul.f32 %v3742_v11, %v250_v54  ;;  %v263_v53 = vld [vmem:[%s4049_s0 + $0x7c8] sm:$0xff]  ;;  %v264_v58 = vld [vmem:[%s4049_s0 + $0x7d0] sm:$0xff]  ;;  %v265_v59 = vld [vmem:[%s4049_s0 + $0x7d8] sm:$0xff] }
  0xd0   :  { %v511_v7 = vmul.f32 %v3742_v11, %v251_v55  ;;  %2315 = vst [vmem:[%s4052_s3 + $0x390] sm:$0xff] %v2135_v61   ;;  %v768_v9 = vadd.f32 %v3722_v62, %v508_v35  ;;  %v769_v10 = vadd.f32 %v3722_v62, %v509_v0  ;;  %v512_v12 = vmul.f32 %v3742_v11, %v252_v60  ;;  %v266_v0 = vld [vmem:[%s4049_s0 + $0x7e0] sm:$0xff] }
  0xd1   :  { %v2140_v39 = vpack.c.bf16 %v1021_v63, %v1020_v57  ;;  %v1023_v13 = vmax.f32 %v767_v4, 0.0  ;;  %v770_v14 = vadd.f32 %v3722_v62, %v510_v6  ;;  %v513_v16 = vmul.f32 %v3742_v11, %v253_v1  ;;  %v267_v1 = vld [vmem:[%s4049_s0 + $0x7e8] sm:$0xff] }
  0xd2   :  { %v771_v15 = vadd.f32 %v3722_v62, %v511_v7  ;;  %v1024_v18 = vmax.f32 %v768_v9, 0.0  ;;  %v1025_v19 = vmax.f32 %v769_v10, 0.0  ;;  %v772_v20 = vadd.f32 %v3722_v62, %v512_v12 }
  0xd3   :  { %2316 = vst [vmem:[%s4052_s3 + $0x398] sm:$0xff] %v2140_v39   ;;  %v514_v21 = vmul.f32 %v3742_v11, %v254_v8  ;;  %v2145_v24 = vpack.c.bf16 %v1023_v13, %v1022_v5  ;;  %v1026_v25 = vmax.f32 %v770_v14, 0.0  ;;  %v773_v27 = vadd.f32 %v3722_v62, %v513_v16  ;;  %v268_v8 = vld [vmem:[%s4049_s0 + $0x7f0] sm:$0xff]  ;;  %v269_v13 = vld [vmem:[%s4049_s0 + $0x7f8] sm:$0xff] }
  0xd4   :  { %v1027_v26 = vmax.f32 %v771_v15, 0.0  ;;  %v2150_v30 = vpack.c.bf16 %v1025_v19, %v1024_v18  ;;  %v1028_v31 = vmax.f32 %v772_v20, 0.0  ;;  %v515_v32 = vmul.f32 %v3742_v11, %v255_v17 }
  0xd5   :  { %v774_v33 = vadd.f32 %v3722_v62, %v514_v21  ;;  %2317 = vst [vmem:[%s4052_s3 + $0x3a0] sm:$0xff] %v2145_v24   ;;  %v1029_v2 = vmax.f32 %v773_v27, 0.0  ;;  %v516_v36 = vmul.f32 %v3742_v11, %v256_v22  ;;  %v517_v37 = vmul.f32 %v3742_v11, %v257_v23 }
  0xd6   :  { %v2155_v3 = vpack.c.bf16 %v1027_v26, %v1026_v25  ;;  %2318 = vst [vmem:[%s4052_s3 + $0x3a8] sm:$0xff] %v2150_v30   ;;  %v775_v40 = vadd.f32 %v3722_v62, %v515_v32  ;;  %v518_v42 = vmul.f32 %v3742_v11, %v258_v28  ;;  %v519_v43 = vmul.f32 %v3742_v11, %v259_v29 }
  0xd7   :  { %v1030_v41 = vmax.f32 %v774_v33, 0.0  ;;  %v2160_v45 = vpack.c.bf16 %v1029_v2, %v1028_v31  ;;  %v776_v46 = vadd.f32 %v3722_v62, %v516_v36  ;;  %v777_v47 = vadd.f32 %v3722_v62, %v517_v37 }
  0xd8   :  { %2319 = vst [vmem:[%s4052_s3 + $0x3b0] sm:$0xff] %v2155_v3   ;;  %v520_v48 = vmul.f32 %v3742_v11, %v260_v34  ;;  %v1031_v49 = vmax.f32 %v775_v40, 0.0  ;;  %v778_v50 = vadd.f32 %v3722_v62, %v518_v42  ;;  %v779_v51 = vadd.f32 %v3722_v62, %v519_v43 }
  0xd9   :  { %v521_v52 = vmul.f32 %v3742_v11, %v261_v38  ;;  %2320 = vst [vmem:[%s4052_s3 + $0x3b8] sm:$0xff] %v2160_v45   ;;  %v1032_v54 = vmax.f32 %v776_v46, 0.0  ;;  %v1033_v55 = vmax.f32 %v777_v47, 0.0  ;;  %v522_v57 = vmul.f32 %v3742_v11, %v262_v44 }
  0xda   :  { %v780_v56 = vadd.f32 %v3722_v62, %v520_v48  ;;  %v2165_v60 = vpack.c.bf16 %v1031_v49, %v1030_v41  ;;  %v1034_v61 = vmax.f32 %v778_v50, 0.0  ;;  %v1035_v63 = vmax.f32 %v779_v51, 0.0 }
  0xdb   :  { %v781_v35 = vadd.f32 %v3722_v62, %v521_v52  ;;  %v2170_v4 = vpack.c.bf16 %v1033_v55, %v1032_v54  ;;  %v523_v6 = vmul.f32 %v3742_v11, %v263_v53  ;;  %v782_v7 = vadd.f32 %v3722_v62, %v522_v57 }
  0xdc   :  { %v1036_v5 = vmax.f32 %v780_v56, 0.0  ;;  %2321 = vst [vmem:[%s4052_s3 + $0x3c0] sm:$0xff] %v2165_v60   ;;  %v2175_v39 = vpack.c.bf16 %v1035_v63, %v1034_v61  ;;  %v524_v10 = vmul.f32 %v3742_v11, %v264_v58  ;;  %v525_v12 = vmul.f32 %v3742_v11, %v265_v59 }
  0xdd   :  { %v1037_v9 = vmax.f32 %v781_v35, 0.0  ;;  %2322 = vst [vmem:[%s4052_s3 + $0x3c8] sm:$0xff] %v2170_v4   ;;  %v783_v14 = vadd.f32 %v3722_v62, %v523_v6  ;;  %v1038_v15 = vmax.f32 %v782_v7, 0.0  ;;  %v526_v16 = vmul.f32 %v3742_v11, %v266_v0 }
  0xde   :  { %v527_v17 = vmul.f32 %v3742_v11, %v267_v1  ;;  %2323 = vst [vmem:[%s4052_s3 + $0x3d0] sm:$0xff] %v2175_v39   ;;  %v784_v19 = vadd.f32 %v3722_v62, %v524_v10  ;;  %v785_v20 = vadd.f32 %v3722_v62, %v525_v12  ;;  %v528_v21 = vmul.f32 %v3742_v11, %v268_v8 }
  0xdf   :  { %v2180_v18 = vpack.c.bf16 %v1037_v9, %v1036_v5  ;;  %v1039_v22 = vmax.f32 %v783_v14, 0.0  ;;  %v786_v23 = vadd.f32 %v3722_v62, %v526_v16  ;;  %v529_v25 = vmul.f32 %v3742_v11, %v269_v13 }
  0xe0   :  { %v787_v24 = vadd.f32 %v3722_v62, %v527_v17  ;;  %v1040_v26 = vmax.f32 %v784_v19, 0.0  ;;  %v1041_v27 = vmax.f32 %v785_v20, 0.0  ;;  %v788_v28 = vadd.f32 %v3722_v62, %v528_v21 }
  0xe1   :  { %2324 = vst [vmem:[%s4052_s3 + $0x3d8] sm:$0xff] %v2180_v18   ;;  %v2185_v29 = vpack.c.bf16 %v1039_v22, %v1038_v15  ;;  %v1042_v30 = vmax.f32 %v786_v23, 0.0  ;;  %v789_v32 = vadd.f32 %v3722_v62, %v529_v25 }
  0xe2   :  { %v1043_v31 = vmax.f32 %v787_v24, 0.0  ;;  %v2190_v33 = vpack.c.bf16 %v1041_v27, %v1040_v26  ;;  %v1044_v34 = vmax.f32 %v788_v28, 0.0 }
  0xe3   :  { %2325 = vst [vmem:[%s4052_s3 + $0x3e0] sm:$0xff] %v2185_v29   ;;  %v1045_v3 = vmax.f32 %v789_v32, 0.0 }
  0xe4   :  { %v2195_v11 = vpack.c.bf16 %v1043_v31, %v1042_v30  ;;  %2326 = vst [vmem:[%s4052_s3 + $0x3e8] sm:$0xff] %v2190_v33  }
  0xe5   :  { %v2200_v2 = vpack.c.bf16 %v1045_v3, %v1044_v34 }
  0xe6   :  { %2327 = vst [vmem:[%s4052_s3 + $0x3f0] sm:$0xff] %v2195_v11  }
  0xe7   :  { %2328 = vst [vmem:[%s4052_s3 + $0x3f8] sm:$0xff] %v2200_v2  }

// kernel: forward.17
= control target key start
LH: loop header
LB: loop body
LE: loop exit
PB: predicated region body
PF: predicated region fallthrough
CT: control target
= control target key end

     0   :  { %s5612_s9 = smov 0   ;;  %s6456_s0 = inlined_call_operand.vmem [shape: bf16[18432,256], index: 0, kind: input, shape index: {}]   ;;  %s6457_s1 = inlined_call_operand.vmem [shape: bf16[256,128], index: 1, kind: input, shape index: {}]   ;;  %s6458_s2 = inlined_call_operand.vmem [shape: f32[18432,128], index: 2, kind: output, shape index: {}]  }
   0x1 LB: > { %s3680_s10 = sadd.s32 4294967295, %s5595_s9   ;;  %p3684_p0 = scmp.ge.s32.totalorder %s5595_s9, 1  ;;  %s5595_s9 = sphi %s5612_s9, %s12_s9  }
   0x2   : > { %p114_p1 = scmp.lt.s32.totalorder %s5595_s9, 10 }
   0x4   : > { %p115_p2 = pnand %p3684_p0, %p114_p1 }
   0x5   : > { %s3685_s23 = sshll.u32 (!%p115_p2), %s3680_s10, 8 }
   0x6   : > { %118 = sbr.rel (%p115_p2) target bundleno = 1202 (0x4b2), region = 28  ;;  %p138_p3 = scmp.lt.s32.totalorder (!%p115_p2), %s3685_s23, 2303 }
   0xb   : > { %v5044_v0 = vld [vmem:[%s6457_s1 + $0x38] sm:$0xff]  ;;  %v5043_v2 = vld [vmem:[%s6457_s1 + $0x30] sm:$0xff]  ;;  %v5042_v4 = vld [vmem:[%s6457_s1 + $0x28] sm:$0xff]  ;;  %s6460_s23 = smov (!%p138_p3, %s3685_s23), 2303 }
   0xc   : > { %v5052_v1 = vld [vmem:[%s6457_s1 + $0x78] sm:$0xff]  ;;  %1814 = vmatpush.bf16.msra.mxu0 %v5044_v0  ;;  %5053 = vmatpush.bf16.msra.mxu2 %v5044_v0  ;;  %v5051_v3 = vld [vmem:[%s6457_s1 + $0x70] sm:$0xff]  ;;  %v5050_v5 = vld [vmem:[%s6457_s1 + $0x68] sm:$0xff]  ;;  %s4780_s8 = sshll.u32 %s6460_s23, 3 }
   0xd   : > { %2463 = vmatpush.bf16.msra.mxu1 %v5052_v1  ;;  %5061 = vmatpush.bf16.msra.mxu3 %v5052_v1  ;;  %v5041_v6 = vld [vmem:[%s6457_s1 + $0x20] sm:$0xff]  ;;  %v5040_v8 = vld [vmem:[%s6457_s1 + $0x18] sm:$0xff]  ;;  %v5039_v10 = vld [vmem:[%s6457_s1 + $0x10] sm:$0xff]  ;;  %s5667_s14 = scalar_lea.vmem %s6456_s0, %s4780_s8  ;;  %s5755_s24 = scalar_lea.vmem %s6458_s2, %s4780_s8 }
   0xe   : > { %v5049_v7 = vld [vmem:[%s6457_s1 + $0x60] sm:$0xff]  ;;  %v5048_v9 = vld [vmem:[%s6457_s1 + $0x58] sm:$0xff]  ;;  %v5047_v11 = vld [vmem:[%s6457_s1 + $0x50] sm:$0xff] }
   0xf   : > { %v5038_v12 = vld [vmem:[%s6457_s1 + $0x8] sm:$0xff]  ;;  %v5037_v14 = vld [vmem:[%s6457_s1] sm:$0xff]  ;;  %v3700_v28 = vld [vmem:[%s5667_s14 + $0x10] sm:$0xf] }
  0x10   : > { %1815 = vmatpush.bf16.msra.mxu0 %v5043_v2  ;;  %5054 = vmatpush.bf16.msra.mxu2 %v5043_v2  ;;  %v5046_v13 = vld [vmem:[%s6457_s1 + $0x48] sm:$0xff]  ;;  %v5045_v15 = vld [vmem:[%s6457_s1 + $0x40] sm:$0xff]  ;;  %v4784_v29 = vld [vmem:[%s5667_s14 + $0x14] sm:$0xf0] }
  0x11   : > { %2464 = vmatpush.bf16.msra.mxu1 %v5051_v3  ;;  %5062 = vmatpush.bf16.msra.mxu3 %v5051_v3  ;;  %v3692_v16 = vld [vmem:[%s5667_s14] sm:$0xf]  ;;  %v4782_v17 = vld [vmem:[%s5667_s14 + $0x4] sm:$0xf0]  ;;  %v4781_v20 = vld [vmem:[%s5667_s14 + $0x4] sm:$0xf]  ;;  %v3701_v36 = vor.u32 %v4784_v29, %v3700_v28 }
  0x12   : > { %v4204_v18 = vld [vmem:[%s5667_s14 + $0x400] sm:$0xf]  ;;  %v4910_v19 = vld [vmem:[%s5667_s14 + $0x404] sm:$0xf0]  ;;  %v3694_v21 = vld [vmem:[%s5667_s14 + $0x8] sm:$0xf0]  ;;  %v3693_v24 = vor.u32 %v4782_v17, %v3692_v16 }
  0x13   : > { %v4909_v22 = vld [vmem:[%s5667_s14 + $0x404] sm:$0xf]  ;;  %v4206_v23 = vld [vmem:[%s5667_s14 + $0x408] sm:$0xf0]  ;;  %v4205_v25 = vor.u32 %v4910_v19, %v4204_v18  ;;  %v3697_v26 = vor.u32 %v4781_v20, %v3694_v21  ;;  %v4212_v30 = vld [vmem:[%s5667_s14 + $0x410] sm:$0xf] }
  0x14   : > { %1816 = vmatpush.bf16.msra.mxu0 %v5042_v4  ;;  %5055 = vmatpush.bf16.msra.mxu2 %v5042_v4  ;;  %v4209_v27 = vor.u32 %v4909_v22, %v4206_v23  ;;  %v4912_v31 = vld [vmem:[%s5667_s14 + $0x414] sm:$0xf0]  ;;  %v4783_v32 = vld [vmem:[%s5667_s14 + $0x14] sm:$0xf]  ;;  %v3702_v33 = vld [vmem:[%s5667_s14 + $0x18] sm:$0xf0] }
  0x15   : > { %2465 = vmatpush.bf16.msra.mxu1 %v5050_v5  ;;  %5063 = vmatpush.bf16.msra.mxu3 %v5050_v5  ;;  %v4911_v34 = vld [vmem:[%s5667_s14 + $0x414] sm:$0xf]  ;;  %v4214_v35 = vld [vmem:[%s5667_s14 + $0x418] sm:$0xf0]  ;;  %v4213_v37 = vor.u32 %v4912_v31, %v4212_v30  ;;  %v3705_v38 = vor.u32 %v4783_v32, %v3702_v33  ;;  %v3708_v40 = vld [vmem:[%s5667_s14 + $0x20] sm:$0xf] }
  0x16   : > { %v4217_v39 = vor.u32 %v4911_v34, %v4214_v35  ;;  %v4786_v41 = vld [vmem:[%s5667_s14 + $0x24] sm:$0xf0]  ;;  %v4220_v42 = vld [vmem:[%s5667_s14 + $0x420] sm:$0xf]  ;;  %v4785_v44 = vld [vmem:[%s5667_s14 + $0x24] sm:$0xf] }
  0x17   : > { %v4914_v43 = vld [vmem:[%s5667_s14 + $0x424] sm:$0xf0]  ;;  %v3710_v45 = vld [vmem:[%s5667_s14 + $0x28] sm:$0xf0]  ;;  %v4913_v46 = vld [vmem:[%s5667_s14 + $0x424] sm:$0xf]  ;;  %v3709_v48 = vor.u32 %v4786_v41, %v3708_v40 }
  0x18   : > { %1817 = vmatpush.bf16.msra.mxu0 %v5041_v6  ;;  %5056 = vmatpush.bf16.msra.mxu2 %v5041_v6  ;;  %v4222_v47 = vld [vmem:[%s5667_s14 + $0x428] sm:$0xf0]  ;;  %v4221_v49 = vor.u32 %v4914_v43, %v4220_v42  ;;  %v3713_v50 = vor.u32 %v4785_v44, %v3710_v45  ;;  %v3716_v52 = vld [vmem:[%s5667_s14 + $0x30] sm:$0xf]  ;;  %v4788_v53 = vld [vmem:[%s5667_s14 + $0x34] sm:$0xf0] }
  0x19   : > { %2466 = vmatpush.bf16.msra.mxu1 %v5049_v7  ;;  %5064 = vmatpush.bf16.msra.mxu3 %v5049_v7  ;;  %v4225_v51 = vor.u32 %v4913_v46, %v4222_v47  ;;  %v4228_v54 = vld [vmem:[%s5667_s14 + $0x430] sm:$0xf]  ;;  %v4916_v55 = vld [vmem:[%s5667_s14 + $0x434] sm:$0xf0]  ;;  %v4787_v56 = vld [vmem:[%s5667_s14 + $0x34] sm:$0xf]  ;;  %v3717_v60 = vor.u32 %v4788_v53, %v3716_v52 }
  0x1a   : > { %v3718_v57 = vld [vmem:[%s5667_s14 + $0x38] sm:$0xf0]  ;;  %v4915_v58 = vld [vmem:[%s5667_s14 + $0x434] sm:$0xf]  ;;  %v4229_v61 = vor.u32 %v4916_v55, %v4228_v54  ;;  %v3724_v0 = vld [vmem:[%s5667_s14 + $0x40] sm:$0xf] }
  0x1b   : > { %v4230_v59 = vld [vmem:[%s5667_s14 + $0x438] sm:$0xf0]  ;;  %v3721_v62 = vor.u32 %v4787_v56, %v3718_v57  ;;  %v4790_v1 = vld [vmem:[%s5667_s14 + $0x44] sm:$0xf0]  ;;  %v4236_v2 = vld [vmem:[%s5667_s14 + $0x440] sm:$0xf] }
  0x1c   : > { %1818 = vmatpush.bf16.msra.mxu0 %v5040_v8  ;;  %5057 = vmatpush.bf16.msra.mxu2 %v5040_v8  ;;  %v4233_v63 = vor.u32 %v4915_v58, %v4230_v59  ;;  %v4918_v3 = vld [vmem:[%s5667_s14 + $0x444] sm:$0xf0]  ;;  %v4789_v4 = vld [vmem:[%s5667_s14 + $0x44] sm:$0xf]  ;;  %v3726_v5 = vld [vmem:[%s5667_s14 + $0x48] sm:$0xf0]  ;;  %v3725_v8 = vor.u32 %v4790_v1, %v3724_v0 }
  0x1d   : > { %2467 = vmatpush.bf16.msra.mxu1 %v5048_v9  ;;  %5065 = vmatpush.bf16.msra.mxu3 %v5048_v9  ;;  %v4917_v6 = vld [vmem:[%s5667_s14 + $0x444] sm:$0xf]  ;;  %v4238_v7 = vld [vmem:[%s5667_s14 + $0x448] sm:$0xf0]  ;;  %v4237_v9 = vor.u32 %v4918_v3, %v4236_v2  ;;  %v4791_v16 = vld [vmem:[%s5667_s14 + $0x54] sm:$0xf] }
  0x1e   : > { %v3734_v17 = vld [vmem:[%s5667_s14 + $0x58] sm:$0xf0]  ;;  %v4919_v18 = vld [vmem:[%s5667_s14 + $0x454] sm:$0xf]  ;;  %v4793_v28 = vld [vmem:[%s5667_s14 + $0x64] sm:$0xf] }
  0x1f   : > { %v4246_v19 = vld [vmem:[%s5667_s14 + $0x458] sm:$0xf0]  ;;  %v3737_v22 = vor.u32 %v4791_v16, %v3734_v17  ;;  %v3742_v29 = vld [vmem:[%s5667_s14 + $0x68] sm:$0xf0]  ;;  %v4921_v30 = vld [vmem:[%s5667_s14 + $0x464] sm:$0xf] }
  0x20   : > { %1819 = vmatpush.bf16.msra.mxu0 %v5039_v10  ;;  %5058 = vmatpush.bf16.msra.mxu2 %v5039_v10  ;;  %v3729_v10 = vor.u32 %v4789_v4, %v3726_v5  ;;  %v4249_v23 = vor.u32 %v4919_v18, %v4246_v19  ;;  %v4254_v31 = vld [vmem:[%s5667_s14 + $0x468] sm:$0xf0]  ;;  %v3745_v34 = vor.u32 %v4793_v28, %v3742_v29  ;;  %v4795_v40 = vld [vmem:[%s5667_s14 + $0x74] sm:$0xf]  ;;  %v3750_v41 = vld [vmem:[%s5667_s14 + $0x78] sm:$0xf0] }
  0x21   : > { %2468 = vmatpush.bf16.msra.mxu1 %v5047_v11  ;;  %5066 = vmatpush.bf16.msra.mxu3 %v5047_v11  ;;  %v4241_v11 = vor.u32 %v4917_v6, %v4238_v7  ;;  %v4257_v35 = vor.u32 %v4921_v30, %v4254_v31  ;;  %v4923_v42 = vld [vmem:[%s5667_s14 + $0x474] sm:$0xf]  ;;  %v4262_v43 = vld [vmem:[%s5667_s14 + $0x478] sm:$0xf0]  ;;  %v3753_v46 = vor.u32 %v4795_v40, %v3750_v41  ;;  %v4797_v52 = vld [vmem:[%s5667_s14 + $0x84] sm:$0xf] }
  0x22   : > { %v4265_v47 = vor.u32 %v4923_v42, %v4262_v43  ;;  %v3758_v53 = vld [vmem:[%s5667_s14 + $0x88] sm:$0xf0]  ;;  %v4925_v54 = vld [vmem:[%s5667_s14 + $0x484] sm:$0xf]  ;;  %v3764_v6 = vld [vmem:[%s5667_s14 + $0x90] sm:$0xf] }
  0x23   : > { %v4270_v55 = vld [vmem:[%s5667_s14 + $0x488] sm:$0xf0]  ;;  %v3761_v59 = vor.u32 %v4797_v52, %v3758_v53  ;;  %v4800_v7 = vld [vmem:[%s5667_s14 + $0x94] sm:$0xf0]  ;;  %v4929_v40 = vld [vmem:[%s5667_s14 + $0x4a4] sm:$0xf] }
  0x24   : > { %1820 = vmatpush.bf16.msra.mxu0 %v5038_v12  ;;  %5059 = vmatpush.bf16.msra.mxu2 %v5038_v12  ;;  %v3732_v12 = vld [vmem:[%s5667_s14 + $0x50] sm:$0xf]  ;;  %v3765_v16 = vor.u32 %v4800_v7, %v3764_v6  ;;  %v4286_v41 = vld [vmem:[%s5667_s14 + $0x4a8] sm:$0xf0] }
  0x25   : > { %2469 = vmatpush.bf16.msra.mxu1 %v5046_v13  ;;  %5067 = vmatpush.bf16.msra.mxu3 %v5046_v13  ;;  %v4792_v13 = vld [vmem:[%s5667_s14 + $0x54] sm:$0xf0] }
  0x26   : > { %v3733_v20 = vor.u32 %v4792_v13, %v3732_v12  ;;  %v4927_v12 = vld [vmem:[%s5667_s14 + $0x494] sm:$0xf]  ;;  %v4278_v13 = vld [vmem:[%s5667_s14 + $0x498] sm:$0xf0] }
  0x28   : > { %1821 = vmatpush.bf16.msra.mxu0 %v5037_v14  ;;  %5060 = vmatpush.bf16.msra.mxu2 %v5037_v14  ;;  %v4244_v14 = vld [vmem:[%s5667_s14 + $0x450] sm:$0xf] }
  0x29   : > { %2470 = vmatpush.bf16.msra.mxu1 %v5045_v15  ;;  %5068 = vmatpush.bf16.msra.mxu3 %v5045_v15  ;;  %v4920_v15 = vld [vmem:[%s5667_s14 + $0x454] sm:$0xf0] }
  0x2a   : > { %v4245_v21 = vor.u32 %v4920_v15, %v4244_v14 }
  0x2b   : > { %1822 = vmatmul.bf16.vlgmr.msra.gmra.mxu0 %v3693_v24  ;;  %2142 = vmatmul.bf16.vlgmr.msra.gmra.mxu2 %v4205_v25  ;;  %v3740_v24 = vld [vmem:[%s5667_s14 + $0x60] sm:$0xf]  ;;  %v4794_v25 = vld [vmem:[%s5667_s14 + $0x64] sm:$0xf0] }
  0x2c   : > { %2471 = vmatmul.bf16.vlgmr.msra.gmra.mxu1 %v3697_v26  ;;  %2791 = vmatmul.bf16.vlgmr.msra.gmra.mxu3 %v4209_v27  ;;  %v4252_v26 = vld [vmem:[%s5667_s14 + $0x460] sm:$0xf]  ;;  %v4922_v27 = vld [vmem:[%s5667_s14 + $0x464] sm:$0xf0]  ;;  %v3741_v32 = vor.u32 %v4794_v25, %v3740_v24 }
  0x2d   : > { %v4253_v33 = vor.u32 %v4922_v27, %v4252_v26 }
  0x3b   : > { %1827 = vmatmul.bf16.gmra.mxu0 %v3701_v36  ;;  %2147 = vmatmul.bf16.gmra.mxu2 %v4213_v37  ;;  %v3748_v36 = vld [vmem:[%s5667_s14 + $0x70] sm:$0xf]  ;;  %v4796_v37 = vld [vmem:[%s5667_s14 + $0x74] sm:$0xf0] }
  0x3c   : > { %2476 = vmatmul.bf16.gmra.mxu1 %v3705_v38  ;;  %2796 = vmatmul.bf16.gmra.mxu3 %v4217_v39  ;;  %v4260_v38 = vld [vmem:[%s5667_s14 + $0x470] sm:$0xf]  ;;  %v4924_v39 = vld [vmem:[%s5667_s14 + $0x474] sm:$0xf0]  ;;  %v3749_v44 = vor.u32 %v4796_v37, %v3748_v36  ;;  %v4284_v36 = vld [vmem:[%s5667_s14 + $0x4a0] sm:$0xf] }
  0x3d   : > { %v4261_v45 = vor.u32 %v4924_v39, %v4260_v38  ;;  %v4930_v37 = vld [vmem:[%s5667_s14 + $0x4a4] sm:$0xf0]  ;;  %v4801_v38 = vld [vmem:[%s5667_s14 + $0xa4] sm:$0xf]  ;;  %v3774_v39 = vld [vmem:[%s5667_s14 + $0xa8] sm:$0xf0] }
  0x4b   : > { %1832 = vmatmul.bf16.gmra.mxu0 %v3709_v48  ;;  %2152 = vmatmul.bf16.gmra.mxu2 %v4221_v49  ;;  %v3756_v48 = vld [vmem:[%s5667_s14 + $0x80] sm:$0xf]  ;;  %v4798_v49 = vld [vmem:[%s5667_s14 + $0x84] sm:$0xf0] }
  0x4c   : > { %2481 = vmatmul.bf16.gmra.mxu1 %v3713_v50  ;;  %2801 = vmatmul.bf16.gmra.mxu3 %v4225_v51  ;;  %v4268_v50 = vld [vmem:[%s5667_s14 + $0x480] sm:$0xf]  ;;  %v4926_v51 = vld [vmem:[%s5667_s14 + $0x484] sm:$0xf0]  ;;  %v3757_v56 = vor.u32 %v4798_v49, %v3756_v48  ;;  %v3777_v49 = vor.u32 %v4801_v38, %v3774_v39 }
  0x4d   : > { %v4269_v57 = vor.u32 %v4926_v51, %v4268_v50  ;;  %v4289_v50 = vor.u32 %v4929_v40, %v4286_v41 }
  0x5b   : > { %1837 = vmatmul.bf16.gmra.mxu0 %v3717_v60  ;;  %2157 = vmatmul.bf16.gmra.mxu2 %v4229_v61  ;;  %v4273_v60 = vor.u32 %v4925_v54, %v4270_v55 }
  0x5c   : > { %2486 = vmatmul.bf16.gmra.mxu1 %v3721_v62  ;;  %2806 = vmatmul.bf16.gmra.mxu3 %v4233_v63 }
  0x6b   : > { %1842 = vmatmul.bf16.gmra.mxu0 %v3725_v8  ;;  %2162 = vmatmul.bf16.gmra.mxu2 %v4237_v9  ;;  %v4276_v8 = vld [vmem:[%s5667_s14 + $0x490] sm:$0xf]  ;;  %v4928_v9 = vld [vmem:[%s5667_s14 + $0x494] sm:$0xf0] }
  0x6c   : > { %2491 = vmatmul.bf16.gmra.mxu1 %v3729_v10  ;;  %2811 = vmatmul.bf16.gmra.mxu3 %v4241_v11  ;;  %v4799_v10 = vld [vmem:[%s5667_s14 + $0x94] sm:$0xf]  ;;  %v3766_v11 = vld [vmem:[%s5667_s14 + $0x98] sm:$0xf0]  ;;  %v4277_v17 = vor.u32 %v4928_v9, %v4276_v8 }
  0x7b   : > { %1847 = vmatmul.bf16.gmra.mxu0 %v3733_v20  ;;  %2167 = vmatmul.bf16.gmra.mxu2 %v4245_v21  ;;  %v3769_v21 = vor.u32 %v4799_v10, %v3766_v11 }
  0x7c   : > { %2496 = vmatmul.bf16.gmra.mxu1 %v3737_v22  ;;  %2816 = vmatmul.bf16.gmra.mxu3 %v4249_v23  ;;  %v4281_v22 = vor.u32 %v4927_v12, %v4278_v13 }
  0x8b   : > { %1852 = vmatmul.bf16.gmra.mxu0 %v3741_v32  ;;  %2172 = vmatmul.bf16.gmra.mxu2 %v4253_v33 }
  0x8c   : > { %2501 = vmatmul.bf16.gmra.mxu1 %v3745_v34  ;;  %2821 = vmatmul.bf16.gmra.mxu3 %v4257_v35  ;;  %v3772_v34 = vld [vmem:[%s5667_s14 + $0xa0] sm:$0xf]  ;;  %v4802_v35 = vld [vmem:[%s5667_s14 + $0xa4] sm:$0xf0] }
  0x9b   : > { %1857 = vmatmul.bf16.gmra.mxu0 %v3749_v44  ;;  %2177 = vmatmul.bf16.gmra.mxu2 %v4261_v45  ;;  %v3773_v44 = vor.u32 %v4802_v35, %v3772_v34  ;;  %v4285_v45 = vor.u32 %v4930_v37, %v4284_v36 }
  0x9c   : > { %2506 = vmatmul.bf16.gmra.mxu1 %v3753_v46  ;;  %2826 = vmatmul.bf16.gmra.mxu3 %v4265_v47 }
  0xa8   : > { %v1823_v58 = vpop.f32.mrf.mxu0 }
  0xa9   : > { %v2472_v61 = vpop.f32.mrf.mxu1 }
  0xaa   : > { %v2473_v62 = vadd.f32 %v2472_v61, %v1823_v58 }
  0xab   : > { %1862 = vmatmul.bf16.gmra.mxu0 %v3757_v56  ;;  %2182 = vmatmul.bf16.gmra.mxu2 %v4269_v57 }
  0xac   : > { %5077 = vtanh.f32 %v2473_v62  ;;  %2511 = vmatmul.bf16.gmra.mxu1 %v3761_v59  ;;  %2831 = vmatmul.bf16.gmra.mxu3 %v4273_v60  ;;  %v3780_v62 = vld [vmem:[%s5667_s14 + $0xb0] sm:$0xf] }
  0xae   : > { %v2143_v63 = vpop.f32.mrf.mxu2 }
  0xaf   : > { %v2792_v0 = vpop.f32.mrf.mxu3 }
  0xb0   : > { %v2793_v1 = vadd.f32 %v2792_v0, %v2143_v63  ;;  %v1825_v2 = vpop.f32.mrf.mxu0  ;;  %v4804_v63 = vld [vmem:[%s5667_s14 + $0xb4] sm:$0xf0]  ;;  %v4292_v0 = vld [vmem:[%s5667_s14 + $0x4b0] sm:$0xf] }
  0xb1   : > { %v2474_v3 = vpop.f32.mrf.mxu1  ;;  %v3781_v8 = vor.u32 %v4804_v63, %v3780_v62 }
  0xb2   : > { %v5078_v4 = vpop.eup %5077  ;;  %5079 = vtanh.f32 %v2793_v1  ;;  %v2475_v5 = vadd.f32 %v2474_v3, %v1825_v2  ;;  %v4932_v1 = vld [vmem:[%s5667_s14 + $0x4b4] sm:$0xf0]  ;;  %v4803_v2 = vld [vmem:[%s5667_s14 + $0xb4] sm:$0xf]  ;;  %v3782_v3 = vld [vmem:[%s5667_s14 + $0xb8] sm:$0xf0] }
  0xb3   : > { %3368 = vst [vmem:[%s5755_s24] sm:$0xff] %v5078_v4  ;;  %v4931_v4 = vld [vmem:[%s5667_s14 + $0x4b4] sm:$0xf]  ;;  %v4293_v9 = vor.u32 %v4932_v1, %v4292_v0  ;;  %v3785_v13 = vor.u32 %v4803_v2, %v3782_v3 }
  0xb4   : > { %5081 = vtanh.f32 %v2475_v5  ;;  %v4294_v5 = vld [vmem:[%s5667_s14 + $0x4b8] sm:$0xf0] }
  0xb6   : > { %v2145_v14 = vpop.f32.mrf.mxu2 }
  0xb7   : > { %v2794_v15 = vpop.f32.mrf.mxu3 }
  0xb8   : > { %v5080_v18 = vpop.eup %5079  ;;  %v2795_v19 = vadd.f32 %v2794_v15, %v2145_v14  ;;  %v1828_v20 = vpop.f32.mrf.mxu0  ;;  %v4297_v14 = vor.u32 %v4931_v4, %v4294_v5 }
  0xb9   : > { %3496 = vst [vmem:[%s5755_s24 + $0x400] sm:$0xff] %v5080_v18  ;;  %v2477_v23 = vpop.f32.mrf.mxu1 }
  0xba   : > { %v5082_v24 = vpop.eup %5081  ;;  %5083 = vtanh.f32 %v2795_v19  ;;  %v2478_v25 = vadd.f32 %v2477_v23, %v1828_v20 }
  0xbb   : > { %3369 = vst [vmem:[%s5755_s24 + $0x8] sm:$0xff] %v5082_v24  ;;  %1867 = vmatmul.bf16.gmra.mxu0 %v3765_v16  ;;  %2187 = vmatmul.bf16.gmra.mxu2 %v4277_v17 }
  0xbc   : > { %5085 = vtanh.f32 %v2478_v25  ;;  %2516 = vmatmul.bf16.gmra.mxu1 %v3769_v21  ;;  %2836 = vmatmul.bf16.gmra.mxu3 %v4281_v22 }
  0xbe   : > { %v2148_v26 = vpop.f32.mrf.mxu2 }
  0xbf   : > { %v2797_v27 = vpop.f32.mrf.mxu3 }
  0xc0   : > { %v5084_v28 = vpop.eup %5083  ;;  %v2798_v29 = vadd.f32 %v2797_v27, %v2148_v26  ;;  %v1830_v30 = vpop.f32.mrf.mxu0  ;;  %v3788_v26 = vld [vmem:[%s5667_s14 + $0xc0] sm:$0xf]  ;;  %v4806_v27 = vld [vmem:[%s5667_s14 + $0xc4] sm:$0xf0] }
  0xc1   : > { %3497 = vst [vmem:[%s5755_s24 + $0x408] sm:$0xff] %v5084_v28  ;;  %v2479_v31 = vpop.f32.mrf.mxu1  ;;  %v4300_v28 = vld [vmem:[%s5667_s14 + $0x4c0] sm:$0xf]  ;;  %v3789_v36 = vor.u32 %v4806_v27, %v3788_v26 }
  0xc2   : > { %v5086_v32 = vpop.eup %5085  ;;  %5087 = vtanh.f32 %v2798_v29  ;;  %v2480_v33 = vadd.f32 %v2479_v31, %v1830_v30  ;;  %v4934_v29 = vld [vmem:[%s5667_s14 + $0x4c4] sm:$0xf0]  ;;  %v4805_v30 = vld [vmem:[%s5667_s14 + $0xc4] sm:$0xf]  ;;  %v3790_v31 = vld [vmem:[%s5667_s14 + $0xc8] sm:$0xf0] }
  0xc3   : > { %3370 = vst [vmem:[%s5755_s24 + $0x10] sm:$0xff] %v5086_v32  ;;  %v4933_v32 = vld [vmem:[%s5667_s14 + $0x4c4] sm:$0xf]  ;;  %v4301_v37 = vor.u32 %v4934_v29, %v4300_v28  ;;  %v3793_v41 = vor.u32 %v4805_v30, %v3790_v31 }
  0xc4   : > { %5089 = vtanh.f32 %v2480_v33  ;;  %v4302_v33 = vld [vmem:[%s5667_s14 + $0x4c8] sm:$0xf0] }
  0xc6   : > { %v2150_v42 = vpop.f32.mrf.mxu2 }
  0xc7   : > { %v2799_v43 = vpop.f32.mrf.mxu3 }
  0xc8   : > { %v5088_v46 = vpop.eup %5087  ;;  %v2800_v47 = vadd.f32 %v2799_v43, %v2150_v42  ;;  %v1833_v48 = vpop.f32.mrf.mxu0  ;;  %v4305_v42 = vor.u32 %v4933_v32, %v4302_v33 }
  0xc9   : > { %3498 = vst [vmem:[%s5755_s24 + $0x410] sm:$0xff] %v5088_v46  ;;  %v2482_v51 = vpop.f32.mrf.mxu1 }
  0xca   : > { %v5090_v52 = vpop.eup %5089  ;;  %5091 = vtanh.f32 %v2800_v47  ;;  %v2483_v53 = vadd.f32 %v2482_v51, %v1833_v48 }
  0xcb   : > { %3371 = vst [vmem:[%s5755_s24 + $0x18] sm:$0xff] %v5090_v52  ;;  %1872 = vmatmul.bf16.gmra.mxu0 %v3773_v44  ;;  %2192 = vmatmul.bf16.gmra.mxu2 %v4285_v45 }
  0xcc   : > { %5093 = vtanh.f32 %v2483_v53  ;;  %2521 = vmatmul.bf16.gmra.mxu1 %v3777_v49  ;;  %2841 = vmatmul.bf16.gmra.mxu3 %v4289_v50 }
  0xce   : > { %v2153_v54 = vpop.f32.mrf.mxu2 }
  0xcf   : > { %v2802_v55 = vpop.f32.mrf.mxu3 }
  0xd0   : > { %v5092_v56 = vpop.eup %5091  ;;  %v2803_v57 = vadd.f32 %v2802_v55, %v2153_v54  ;;  %v1835_v58 = vpop.f32.mrf.mxu0  ;;  %v3796_v54 = vld [vmem:[%s5667_s14 + $0xd0] sm:$0xf]  ;;  %v4808_v55 = vld [vmem:[%s5667_s14 + $0xd4] sm:$0xf0] }
  0xd1   : > { %3499 = vst [vmem:[%s5755_s24 + $0x418] sm:$0xff] %v5092_v56  ;;  %v2484_v59 = vpop.f32.mrf.mxu1  ;;  %v4308_v56 = vld [vmem:[%s5667_s14 + $0x4d0] sm:$0xf]  ;;  %v3797_v0 = vor.u32 %v4808_v55, %v3796_v54 }
  0xd2   : > { %v5094_v60 = vpop.eup %5093  ;;  %5095 = vtanh.f32 %v2803_v57  ;;  %v2485_v61 = vadd.f32 %v2484_v59, %v1835_v58  ;;  %v4936_v57 = vld [vmem:[%s5667_s14 + $0x4d4] sm:$0xf0]  ;;  %v4807_v58 = vld [vmem:[%s5667_s14 + $0xd4] sm:$0xf]  ;;  %v3798_v59 = vld [vmem:[%s5667_s14 + $0xd8] sm:$0xf0] }
  0xd3   : > { %3372 = vst [vmem:[%s5755_s24 + $0x20] sm:$0xff] %v5094_v60  ;;  %v4935_v60 = vld [vmem:[%s5667_s14 + $0x4d4] sm:$0xf]  ;;  %v4309_v1 = vor.u32 %v4936_v57, %v4308_v56  ;;  %v3801_v5 = vor.u32 %v4807_v58, %v3798_v59 }
  0xd4   : > { %5097 = vtanh.f32 %v2485_v61  ;;  %v4310_v61 = vld [vmem:[%s5667_s14 + $0x4d8] sm:$0xf0] }
  0xd6   : > { %v2155_v6 = vpop.f32.mrf.mxu2 }
  0xd7   : > { %v2804_v7 = vpop.f32.mrf.mxu3 }
  0xd8   : > { %v5096_v10 = vpop.eup %5095  ;;  %v2805_v11 = vadd.f32 %v2804_v7, %v2155_v6  ;;  %v1838_v12 = vpop.f32.mrf.mxu0  ;;  %v4313_v6 = vor.u32 %v4935_v60, %v4310_v61 }
  0xd9   : > { %3500 = vst [vmem:[%s5755_s24 + $0x420] sm:$0xff] %v5096_v10  ;;  %v2487_v15 = vpop.f32.mrf.mxu1 }
  0xda   : > { %v5098_v16 = vpop.eup %5097  ;;  %5099 = vtanh.f32 %v2805_v11  ;;  %v2488_v17 = vadd.f32 %v2487_v15, %v1838_v12 }
  0xdb   : > { %3373 = vst [vmem:[%s5755_s24 + $0x28] sm:$0xff] %v5098_v16  ;;  %1877 = vmatmul.bf16.gmra.mxu0 %v3781_v8  ;;  %2197 = vmatmul.bf16.gmra.mxu2 %v4293_v9 }
  0xdc   : > { %5101 = vtanh.f32 %v2488_v17  ;;  %2526 = vmatmul.bf16.gmra.mxu1 %v3785_v13  ;;  %2846 = vmatmul.bf16.gmra.mxu3 %v4297_v14 }
  0xde   : > { %v2158_v18 = vpop.f32.mrf.mxu2 }
  0xdf   : > { %v2807_v19 = vpop.f32.mrf.mxu3 }
  0xe0   : > { %v5100_v20 = vpop.eup %5099  ;;  %v2808_v21 = vadd.f32 %v2807_v19, %v2158_v18  ;;  %v1840_v22 = vpop.f32.mrf.mxu0  ;;  %v3804_v18 = vld [vmem:[%s5667_s14 + $0xe0] sm:$0xf]  ;;  %v4810_v19 = vld [vmem:[%s5667_s14 + $0xe4] sm:$0xf0] }
  0xe1   : > { %3501 = vst [vmem:[%s5755_s24 + $0x428] sm:$0xff] %v5100_v20  ;;  %v2489_v23 = vpop.f32.mrf.mxu1  ;;  %v4316_v20 = vld [vmem:[%s5667_s14 + $0x4e0] sm:$0xf]  ;;  %v3805_v28 = vor.u32 %v4810_v19, %v3804_v18 }
  0xe2   : > { %v5102_v24 = vpop.eup %5101  ;;  %5103 = vtanh.f32 %v2808_v21  ;;  %v2490_v25 = vadd.f32 %v2489_v23, %v1840_v22  ;;  %v4938_v21 = vld [vmem:[%s5667_s14 + $0x4e4] sm:$0xf0]  ;;  %v4809_v22 = vld [vmem:[%s5667_s14 + $0xe4] sm:$0xf]  ;;  %v3806_v23 = vld [vmem:[%s5667_s14 + $0xe8] sm:$0xf0] }
  0xe3   : > { %3374 = vst [vmem:[%s5755_s24 + $0x30] sm:$0xff] %v5102_v24  ;;  %v4937_v24 = vld [vmem:[%s5667_s14 + $0x4e4] sm:$0xf]  ;;  %v4317_v29 = vor.u32 %v4938_v21, %v4316_v20  ;;  %v3809_v33 = vor.u32 %v4809_v22, %v3806_v23 }
  0xe4   : > { %5105 = vtanh.f32 %v2490_v25  ;;  %v4318_v25 = vld [vmem:[%s5667_s14 + $0x4e8] sm:$0xf0] }
  0xe6   : > { %v2160_v34 = vpop.f32.mrf.mxu2 }
  0xe7   : > { %v2809_v35 = vpop.f32.mrf.mxu3 }
  0xe8   : > { %v5104_v38 = vpop.eup %5103  ;;  %v2810_v39 = vadd.f32 %v2809_v35, %v2160_v34  ;;  %v1843_v40 = vpop.f32.mrf.mxu0  ;;  %v4321_v34 = vor.u32 %v4937_v24, %v4318_v25 }
  0xe9   : > { %3502 = vst [vmem:[%s5755_s24 + $0x430] sm:$0xff] %v5104_v38  ;;  %v2492_v43 = vpop.f32.mrf.mxu1 }
  0xea   : > { %v5106_v44 = vpop.eup %5105  ;;  %5107 = vtanh.f32 %v2810_v39  ;;  %v2493_v45 = vadd.f32 %v2492_v43, %v1843_v40 }
  0xeb   : > { %3375 = vst [vmem:[%s5755_s24 + $0x38] sm:$0xff] %v5106_v44  ;;  %1882 = vmatmul.bf16.gmra.mxu0 %v3789_v36  ;;  %2202 = vmatmul.bf16.gmra.mxu2 %v4301_v37 }
  0xec   : > { %5109 = vtanh.f32 %v2493_v45  ;;  %2531 = vmatmul.bf16.gmra.mxu1 %v3793_v41  ;;  %2851 = vmatmul.bf16.gmra.mxu3 %v4305_v42 }
  0xee   : > { %v2163_v46 = vpop.f32.mrf.mxu2 }
  0xef   : > { %v2812_v47 = vpop.f32.mrf.mxu3 }
  0xf0   : > { %v5108_v48 = vpop.eup %5107  ;;  %v2813_v49 = vadd.f32 %v2812_v47, %v2163_v46  ;;  %v1845_v50 = vpop.f32.mrf.mxu0  ;;  %v3812_v46 = vld [vmem:[%s5667_s14 + $0xf0] sm:$0xf]  ;;  %v4812_v47 = vld [vmem:[%s5667_s14 + $0xf4] sm:$0xf0] }
  0xf1   : > { %3503 = vst [vmem:[%s5755_s24 + $0x438] sm:$0xff] %v5108_v48  ;;  %v2494_v51 = vpop.f32.mrf.mxu1  ;;  %v4324_v48 = vld [vmem:[%s5667_s14 + $0x4f0] sm:$0xf]  ;;  %v3813_v56 = vor.u32 %v4812_v47, %v3812_v46 }
  0xf2   : > { %v5110_v52 = vpop.eup %5109  ;;  %5111 = vtanh.f32 %v2813_v49  ;;  %v2495_v53 = vadd.f32 %v2494_v51, %v1845_v50  ;;  %v4940_v49 = vld [vmem:[%s5667_s14 + $0x4f4] sm:$0xf0]  ;;  %v4811_v50 = vld [vmem:[%s5667_s14 + $0xf4] sm:$0xf]  ;;  %v3814_v51 = vld [vmem:[%s5667_s14 + $0xf8] sm:$0xf0] }
  0xf3   : > { %3376 = vst [vmem:[%s5755_s24 + $0x40] sm:$0xff] %v5110_v52  ;;  %v4939_v52 = vld [vmem:[%s5667_s14 + $0x4f4] sm:$0xf]  ;;  %v4325_v57 = vor.u32 %v4940_v49, %v4324_v48  ;;  %v3817_v61 = vor.u32 %v4811_v50, %v3814_v51 }
  0xf4   : > { %5113 = vtanh.f32 %v2495_v53  ;;  %v4326_v53 = vld [vmem:[%s5667_s14 + $0x4f8] sm:$0xf0] }
  0xf6   : > { %v2165_v62 = vpop.f32.mrf.mxu2 }
  0xf7   : > { %v2814_v63 = vpop.f32.mrf.mxu3 }
  0xf8   : > { %v5112_v2 = vpop.eup %5111  ;;  %v2815_v3 = vadd.f32 %v2814_v63, %v2165_v62  ;;  %v1848_v4 = vpop.f32.mrf.mxu0  ;;  %v4329_v62 = vor.u32 %v4939_v52, %v4326_v53 }
  0xf9   : > { %3504 = vst [vmem:[%s5755_s24 + $0x440] sm:$0xff] %v5112_v2  ;;  %v2497_v7 = vpop.f32.mrf.mxu1 }
  0xfa   : > { %v5114_v8 = vpop.eup %5113  ;;  %5115 = vtanh.f32 %v2815_v3  ;;  %v2498_v9 = vadd.f32 %v2497_v7, %v1848_v4 }
  0xfb   : > { %3377 = vst [vmem:[%s5755_s24 + $0x48] sm:$0xff] %v5114_v8  ;;  %1887 = vmatmul.bf16.gmra.mxu0 %v3797_v0  ;;  %2207 = vmatmul.bf16.gmra.mxu2 %v4309_v1 }
  0xfc   : > { %5117 = vtanh.f32 %v2498_v9  ;;  %2536 = vmatmul.bf16.gmra.mxu1 %v3801_v5  ;;  %2856 = vmatmul.bf16.gmra.mxu3 %v4313_v6 }
  0xfe   : > { %v2168_v10 = vpop.f32.mrf.mxu2 }
  0xff   : > { %v2817_v11 = vpop.f32.mrf.mxu3 }
 0x100   : > { %v5116_v12 = vpop.eup %5115  ;;  %v2818_v13 = vadd.f32 %v2817_v11, %v2168_v10  ;;  %v1850_v14 = vpop.f32.mrf.mxu0  ;;  %v3820_v10 = vld [vmem:[%s5667_s14 + $0x100] sm:$0xf]  ;;  %v4814_v11 = vld [vmem:[%s5667_s14 + $0x104] sm:$0xf0] }
 0x101   : > { %3505 = vst [vmem:[%s5755_s24 + $0x448] sm:$0xff] %v5116_v12  ;;  %v2499_v15 = vpop.f32.mrf.mxu1  ;;  %v4332_v12 = vld [vmem:[%s5667_s14 + $0x500] sm:$0xf]  ;;  %v3821_v20 = vor.u32 %v4814_v11, %v3820_v10 }
 0x102   : > { %v5118_v16 = vpop.eup %5117  ;;  %5119 = vtanh.f32 %v2818_v13  ;;  %v2500_v17 = vadd.f32 %v2499_v15, %v1850_v14  ;;  %v4942_v13 = vld [vmem:[%s5667_s14 + $0x504] sm:$0xf0]  ;;  %v4813_v14 = vld [vmem:[%s5667_s14 + $0x104] sm:$0xf]  ;;  %v3822_v15 = vld [vmem:[%s5667_s14 + $0x108] sm:$0xf0] }
 0x103   : > { %3378 = vst [vmem:[%s5755_s24 + $0x50] sm:$0xff] %v5118_v16  ;;  %v4941_v16 = vld [vmem:[%s5667_s14 + $0x504] sm:$0xf]  ;;  %v4333_v21 = vor.u32 %v4942_v13, %v4332_v12  ;;  %v3825_v25 = vor.u32 %v4813_v14, %v3822_v15 }
 0x104   : > { %5121 = vtanh.f32 %v2500_v17  ;;  %v4334_v17 = vld [vmem:[%s5667_s14 + $0x508] sm:$0xf0] }
 0x106   : > { %v2170_v26 = vpop.f32.mrf.mxu2 }
 0x107   : > { %v2819_v27 = vpop.f32.mrf.mxu3 }
 0x108   : > { %v5120_v30 = vpop.eup %5119  ;;  %v2820_v31 = vadd.f32 %v2819_v27, %v2170_v26  ;;  %v1853_v32 = vpop.f32.mrf.mxu0  ;;  %v4337_v26 = vor.u32 %v4941_v16, %v4334_v17 }
 0x109   : > { %3506 = vst [vmem:[%s5755_s24 + $0x450] sm:$0xff] %v5120_v30  ;;  %v2502_v35 = vpop.f32.mrf.mxu1 }
 0x10a   : > { %v5122_v36 = vpop.eup %5121  ;;  %5123 = vtanh.f32 %v2820_v31  ;;  %v2503_v37 = vadd.f32 %v2502_v35, %v1853_v32 }
 0x10b   : > { %3379 = vst [vmem:[%s5755_s24 + $0x58] sm:$0xff] %v5122_v36  ;;  %1892 = vmatmul.bf16.gmra.mxu0 %v3805_v28  ;;  %2212 = vmatmul.bf16.gmra.mxu2 %v4317_v29 }
 0x10c   : > { %5125 = vtanh.f32 %v2503_v37  ;;  %2541 = vmatmul.bf16.gmra.mxu1 %v3809_v33  ;;  %2861 = vmatmul.bf16.gmra.mxu3 %v4321_v34 }
 0x10e   : > { %v2173_v38 = vpop.f32.mrf.mxu2 }
 0x10f   : > { %v2822_v39 = vpop.f32.mrf.mxu3 }
 0x110   : > { %v5124_v40 = vpop.eup %5123  ;;  %v2823_v41 = vadd.f32 %v2822_v39, %v2173_v38  ;;  %v1855_v42 = vpop.f32.mrf.mxu0  ;;  %v3828_v38 = vld [vmem:[%s5667_s14 + $0x110] sm:$0xf]  ;;  %v4816_v39 = vld [vmem:[%s5667_s14 + $0x114] sm:$0xf0] }
 0x111   : > { %3507 = vst [vmem:[%s5755_s24 + $0x458] sm:$0xff] %v5124_v40  ;;  %v2504_v43 = vpop.f32.mrf.mxu1  ;;  %v4340_v40 = vld [vmem:[%s5667_s14 + $0x510] sm:$0xf]  ;;  %v3829_v48 = vor.u32 %v4816_v39, %v3828_v38 }
 0x112   : > { %v5126_v44 = vpop.eup %5125  ;;  %5127 = vtanh.f32 %v2823_v41  ;;  %v2505_v45 = vadd.f32 %v2504_v43, %v1855_v42  ;;  %v4944_v41 = vld [vmem:[%s5667_s14 + $0x514] sm:$0xf0]  ;;  %v4815_v42 = vld [vmem:[%s5667_s14 + $0x114] sm:$0xf]  ;;  %v3830_v43 = vld [vmem:[%s5667_s14 + $0x118] sm:$0xf0] }
 0x113   : > { %3380 = vst [vmem:[%s5755_s24 + $0x60] sm:$0xff] %v5126_v44  ;;  %v4943_v44 = vld [vmem:[%s5667_s14 + $0x514] sm:$0xf]  ;;  %v4341_v49 = vor.u32 %v4944_v41, %v4340_v40  ;;  %v3833_v53 = vor.u32 %v4815_v42, %v3830_v43 }
 0x114   : > { %5129 = vtanh.f32 %v2505_v45  ;;  %v4342_v45 = vld [vmem:[%s5667_s14 + $0x518] sm:$0xf0] }
 0x116   : > { %v2175_v54 = vpop.f32.mrf.mxu2 }
 0x117   : > { %v2824_v55 = vpop.f32.mrf.mxu3 }
 0x118   : > { %v5128_v58 = vpop.eup %5127  ;;  %v2825_v59 = vadd.f32 %v2824_v55, %v2175_v54  ;;  %v1858_v60 = vpop.f32.mrf.mxu0  ;;  %v4345_v54 = vor.u32 %v4943_v44, %v4342_v45 }
 0x119   : > { %3508 = vst [vmem:[%s5755_s24 + $0x460] sm:$0xff] %v5128_v58  ;;  %v2507_v63 = vpop.f32.mrf.mxu1 }
 0x11a   : > { %v5130_v0 = vpop.eup %5129  ;;  %5131 = vtanh.f32 %v2825_v59  ;;  %v2508_v1 = vadd.f32 %v2507_v63, %v1858_v60 }
 0x11b   : > { %3381 = vst [vmem:[%s5755_s24 + $0x68] sm:$0xff] %v5130_v0  ;;  %1897 = vmatmul.bf16.gmra.mxu0 %v3813_v56  ;;  %2217 = vmatmul.bf16.gmra.mxu2 %v4325_v57 }
 0x11c   : > { %5133 = vtanh.f32 %v2508_v1  ;;  %2546 = vmatmul.bf16.gmra.mxu1 %v3817_v61  ;;  %2866 = vmatmul.bf16.gmra.mxu3 %v4329_v62 }
 0x11e   : > { %v2178_v2 = vpop.f32.mrf.mxu2 }
 0x11f   : > { %v2827_v3 = vpop.f32.mrf.mxu3 }
 0x120   : > { %v5132_v4 = vpop.eup %5131  ;;  %v2828_v5 = vadd.f32 %v2827_v3, %v2178_v2  ;;  %v1860_v6 = vpop.f32.mrf.mxu0  ;;  %v3836_v2 = vld [vmem:[%s5667_s14 + $0x120] sm:$0xf]  ;;  %v4818_v3 = vld [vmem:[%s5667_s14 + $0x124] sm:$0xf0] }
 0x121   : > { %3509 = vst [vmem:[%s5755_s24 + $0x468] sm:$0xff] %v5132_v4  ;;  %v2509_v7 = vpop.f32.mrf.mxu1  ;;  %v4348_v4 = vld [vmem:[%s5667_s14 + $0x520] sm:$0xf]  ;;  %v3837_v12 = vor.u32 %v4818_v3, %v3836_v2 }
 0x122   : > { %v5134_v8 = vpop.eup %5133  ;;  %5135 = vtanh.f32 %v2828_v5  ;;  %v2510_v9 = vadd.f32 %v2509_v7, %v1860_v6  ;;  %v4946_v5 = vld [vmem:[%s5667_s14 + $0x524] sm:$0xf0]  ;;  %v4817_v6 = vld [vmem:[%s5667_s14 + $0x124] sm:$0xf]  ;;  %v3838_v7 = vld [vmem:[%s5667_s14 + $0x128] sm:$0xf0] }
 0x123   : > { %3382 = vst [vmem:[%s5755_s24 + $0x70] sm:$0xff] %v5134_v8  ;;  %v4945_v8 = vld [vmem:[%s5667_s14 + $0x524] sm:$0xf]  ;;  %v4349_v13 = vor.u32 %v4946_v5, %v4348_v4  ;;  %v3841_v17 = vor.u32 %v4817_v6, %v3838_v7 }
 0x124   : > { %5137 = vtanh.f32 %v2510_v9  ;;  %v4350_v9 = vld [vmem:[%s5667_s14 + $0x528] sm:$0xf0] }
 0x126   : > { %v2180_v18 = vpop.f32.mrf.mxu2 }
 0x127   : > { %v2829_v19 = vpop.f32.mrf.mxu3 }
 0x128   : > { %v5136_v22 = vpop.eup %5135  ;;  %v2830_v23 = vadd.f32 %v2829_v19, %v2180_v18  ;;  %v1863_v24 = vpop.f32.mrf.mxu0  ;;  %v4353_v18 = vor.u32 %v4945_v8, %v4350_v9 }
 0x129   : > { %3510 = vst [vmem:[%s5755_s24 + $0x470] sm:$0xff] %v5136_v22  ;;  %v2512_v27 = vpop.f32.mrf.mxu1 }
 0x12a   : > { %v5138_v28 = vpop.eup %5137  ;;  %5139 = vtanh.f32 %v2830_v23  ;;  %v2513_v29 = vadd.f32 %v2512_v27, %v1863_v24 }
 0x12b   : > { %3383 = vst [vmem:[%s5755_s24 + $0x78] sm:$0xff] %v5138_v28  ;;  %1902 = vmatmul.bf16.gmra.mxu0 %v3821_v20  ;;  %2222 = vmatmul.bf16.gmra.mxu2 %v4333_v21 }
 0x12c   : > { %5141 = vtanh.f32 %v2513_v29  ;;  %2551 = vmatmul.bf16.gmra.mxu1 %v3825_v25  ;;  %2871 = vmatmul.bf16.gmra.mxu3 %v4337_v26 }
 0x12e   : > { %v2183_v30 = vpop.f32.mrf.mxu2 }
 0x12f   : > { %v2832_v31 = vpop.f32.mrf.mxu3 }
 0x130   : > { %v5140_v32 = vpop.eup %5139  ;;  %v2833_v33 = vadd.f32 %v2832_v31, %v2183_v30  ;;  %v1865_v34 = vpop.f32.mrf.mxu0  ;;  %v3844_v30 = vld [vmem:[%s5667_s14 + $0x130] sm:$0xf]  ;;  %v4820_v31 = vld [vmem:[%s5667_s14 + $0x134] sm:$0xf0] }
 0x131   : > { %3511 = vst [vmem:[%s5755_s24 + $0x478] sm:$0xff] %v5140_v32  ;;  %v2514_v35 = vpop.f32.mrf.mxu1  ;;  %v4356_v32 = vld [vmem:[%s5667_s14 + $0x530] sm:$0xf]  ;;  %v3845_v40 = vor.u32 %v4820_v31, %v3844_v30 }
 0x132   : > { %v5142_v36 = vpop.eup %5141  ;;  %5143 = vtanh.f32 %v2833_v33  ;;  %v2515_v37 = vadd.f32 %v2514_v35, %v1865_v34  ;;  %v4948_v33 = vld [vmem:[%s5667_s14 + $0x534] sm:$0xf0]  ;;  %v4819_v34 = vld [vmem:[%s5667_s14 + $0x134] sm:$0xf]  ;;  %v3846_v35 = vld [vmem:[%s5667_s14 + $0x138] sm:$0xf0] }
 0x133   : > { %3384 = vst [vmem:[%s5755_s24 + $0x80] sm:$0xff] %v5142_v36  ;;  %v4947_v36 = vld [vmem:[%s5667_s14 + $0x534] sm:$0xf]  ;;  %v4357_v41 = vor.u32 %v4948_v33, %v4356_v32  ;;  %v3849_v45 = vor.u32 %v4819_v34, %v3846_v35 }
 0x134   : > { %5145 = vtanh.f32 %v2515_v37  ;;  %v4358_v37 = vld [vmem:[%s5667_s14 + $0x538] sm:$0xf0] }
 0x136   : > { %v2185_v46 = vpop.f32.mrf.mxu2 }
 0x137   : > { %v2834_v47 = vpop.f32.mrf.mxu3 }
 0x138   : > { %v5144_v50 = vpop.eup %5143  ;;  %v2835_v51 = vadd.f32 %v2834_v47, %v2185_v46  ;;  %v1868_v52 = vpop.f32.mrf.mxu0  ;;  %v4361_v46 = vor.u32 %v4947_v36, %v4358_v37 }
 0x139   : > { %3512 = vst [vmem:[%s5755_s24 + $0x480] sm:$0xff] %v5144_v50  ;;  %v2517_v55 = vpop.f32.mrf.mxu1 }
 0x13a   : > { %v5146_v56 = vpop.eup %5145  ;;  %5147 = vtanh.f32 %v2835_v51  ;;  %v2518_v57 = vadd.f32 %v2517_v55, %v1868_v52 }
 0x13b   : > { %3385 = vst [vmem:[%s5755_s24 + $0x88] sm:$0xff] %v5146_v56  ;;  %1907 = vmatmul.bf16.gmra.mxu0 %v3829_v48  ;;  %2227 = vmatmul.bf16.gmra.mxu2 %v4341_v49 }
 0x13c   : > { %5149 = vtanh.f32 %v2518_v57  ;;  %2556 = vmatmul.bf16.gmra.mxu1 %v3833_v53  ;;  %2876 = vmatmul.bf16.gmra.mxu3 %v4345_v54 }
 0x13e   : > { %v2188_v58 = vpop.f32.mrf.mxu2 }
 0x13f   : > { %v2837_v59 = vpop.f32.mrf.mxu3 }
 0x140   : > { %v5148_v60 = vpop.eup %5147  ;;  %v2838_v61 = vadd.f32 %v2837_v59, %v2188_v58  ;;  %v1870_v62 = vpop.f32.mrf.mxu0  ;;  %v3852_v58 = vld [vmem:[%s5667_s14 + $0x140] sm:$0xf]  ;;  %v4822_v59 = vld [vmem:[%s5667_s14 + $0x144] sm:$0xf0] }
 0x141   : > { %3513 = vst [vmem:[%s5755_s24 + $0x488] sm:$0xff] %v5148_v60  ;;  %v2519_v63 = vpop.f32.mrf.mxu1  ;;  %v4364_v60 = vld [vmem:[%s5667_s14 + $0x540] sm:$0xf]  ;;  %v3853_v4 = vor.u32 %v4822_v59, %v3852_v58 }
 0x142   : > { %v5150_v0 = vpop.eup %5149  ;;  %5151 = vtanh.f32 %v2838_v61  ;;  %v2520_v1 = vadd.f32 %v2519_v63, %v1870_v62  ;;  %v4950_v61 = vld [vmem:[%s5667_s14 + $0x544] sm:$0xf0]  ;;  %v4821_v62 = vld [vmem:[%s5667_s14 + $0x144] sm:$0xf]  ;;  %v3854_v63 = vld [vmem:[%s5667_s14 + $0x148] sm:$0xf0] }
 0x143   : > { %3386 = vst [vmem:[%s5755_s24 + $0x90] sm:$0xff] %v5150_v0  ;;  %v4949_v0 = vld [vmem:[%s5667_s14 + $0x544] sm:$0xf]  ;;  %v4365_v5 = vor.u32 %v4950_v61, %v4364_v60  ;;  %v3857_v9 = vor.u32 %v4821_v62, %v3854_v63 }
 0x144   : > { %5153 = vtanh.f32 %v2520_v1  ;;  %v4366_v1 = vld [vmem:[%s5667_s14 + $0x548] sm:$0xf0] }
 0x146   : > { %v2190_v10 = vpop.f32.mrf.mxu2 }
 0x147   : > { %v2839_v11 = vpop.f32.mrf.mxu3 }
 0x148   : > { %v5152_v14 = vpop.eup %5151  ;;  %v2840_v15 = vadd.f32 %v2839_v11, %v2190_v10  ;;  %v1873_v16 = vpop.f32.mrf.mxu0  ;;  %v4369_v10 = vor.u32 %v4949_v0, %v4366_v1 }
 0x149   : > { %3514 = vst [vmem:[%s5755_s24 + $0x490] sm:$0xff] %v5152_v14  ;;  %v2522_v19 = vpop.f32.mrf.mxu1 }
 0x14a   : > { %v5154_v20 = vpop.eup %5153  ;;  %5155 = vtanh.f32 %v2840_v15  ;;  %v2523_v21 = vadd.f32 %v2522_v19, %v1873_v16 }
 0x14b   : > { %3387 = vst [vmem:[%s5755_s24 + $0x98] sm:$0xff] %v5154_v20  ;;  %1912 = vmatmul.bf16.gmra.mxu0 %v3837_v12  ;;  %2232 = vmatmul.bf16.gmra.mxu2 %v4349_v13 }
 0x14c   : > { %5157 = vtanh.f32 %v2523_v21  ;;  %2561 = vmatmul.bf16.gmra.mxu1 %v3841_v17  ;;  %2881 = vmatmul.bf16.gmra.mxu3 %v4353_v18 }
 0x14e   : > { %v2193_v22 = vpop.f32.mrf.mxu2 }
 0x14f   : > { %v2842_v23 = vpop.f32.mrf.mxu3 }
 0x150   : > { %v5156_v24 = vpop.eup %5155  ;;  %v2843_v25 = vadd.f32 %v2842_v23, %v2193_v22  ;;  %v1875_v26 = vpop.f32.mrf.mxu0  ;;  %v3860_v22 = vld [vmem:[%s5667_s14 + $0x150] sm:$0xf]  ;;  %v4824_v23 = vld [vmem:[%s5667_s14 + $0x154] sm:$0xf0] }
 0x151   : > { %3515 = vst [vmem:[%s5755_s24 + $0x498] sm:$0xff] %v5156_v24  ;;  %v2524_v27 = vpop.f32.mrf.mxu1  ;;  %v4372_v24 = vld [vmem:[%s5667_s14 + $0x550] sm:$0xf]  ;;  %v3861_v32 = vor.u32 %v4824_v23, %v3860_v22 }
 0x152   : > { %v5158_v28 = vpop.eup %5157  ;;  %5159 = vtanh.f32 %v2843_v25  ;;  %v2525_v29 = vadd.f32 %v2524_v27, %v1875_v26  ;;  %v4952_v25 = vld [vmem:[%s5667_s14 + $0x554] sm:$0xf0]  ;;  %v4823_v26 = vld [vmem:[%s5667_s14 + $0x154] sm:$0xf]  ;;  %v3862_v27 = vld [vmem:[%s5667_s14 + $0x158] sm:$0xf0] }
 0x153   : > { %3388 = vst [vmem:[%s5755_s24 + $0xa0] sm:$0xff] %v5158_v28  ;;  %v4951_v28 = vld [vmem:[%s5667_s14 + $0x554] sm:$0xf]  ;;  %v4373_v33 = vor.u32 %v4952_v25, %v4372_v24  ;;  %v3865_v37 = vor.u32 %v4823_v26, %v3862_v27 }
 0x154   : > { %5161 = vtanh.f32 %v2525_v29  ;;  %v4374_v29 = vld [vmem:[%s5667_s14 + $0x558] sm:$0xf0] }
 0x156   : > { %v2195_v38 = vpop.f32.mrf.mxu2 }
 0x157   : > { %v2844_v39 = vpop.f32.mrf.mxu3 }
 0x158   : > { %v5160_v42 = vpop.eup %5159  ;;  %v2845_v43 = vadd.f32 %v2844_v39, %v2195_v38  ;;  %v1878_v44 = vpop.f32.mrf.mxu0  ;;  %v4377_v38 = vor.u32 %v4951_v28, %v4374_v29 }
 0x159   : > { %3516 = vst [vmem:[%s5755_s24 + $0x4a0] sm:$0xff] %v5160_v42  ;;  %v2527_v47 = vpop.f32.mrf.mxu1 }
 0x15a   : > { %v5162_v48 = vpop.eup %5161  ;;  %5163 = vtanh.f32 %v2845_v43  ;;  %v2528_v49 = vadd.f32 %v2527_v47, %v1878_v44 }
 0x15b   : > { %3389 = vst [vmem:[%s5755_s24 + $0xa8] sm:$0xff] %v5162_v48  ;;  %1917 = vmatmul.bf16.gmra.mxu0 %v3845_v40  ;;  %2237 = vmatmul.bf16.gmra.mxu2 %v4357_v41 }
 0x15c   : > { %5165 = vtanh.f32 %v2528_v49  ;;  %2566 = vmatmul.bf16.gmra.mxu1 %v3849_v45  ;;  %2886 = vmatmul.bf16.gmra.mxu3 %v4361_v46 }
 0x15e   : > { %v2198_v50 = vpop.f32.mrf.mxu2 }
 0x15f   : > { %v2847_v51 = vpop.f32.mrf.mxu3 }
 0x160   : > { %v5164_v52 = vpop.eup %5163  ;;  %v2848_v53 = vadd.f32 %v2847_v51, %v2198_v50  ;;  %v1880_v54 = vpop.f32.mrf.mxu0  ;;  %v3868_v50 = vld [vmem:[%s5667_s14 + $0x160] sm:$0xf]  ;;  %v4826_v51 = vld [vmem:[%s5667_s14 + $0x164] sm:$0xf0] }
 0x161   : > { %3517 = vst [vmem:[%s5755_s24 + $0x4a8] sm:$0xff] %v5164_v52  ;;  %v2529_v55 = vpop.f32.mrf.mxu1  ;;  %v4380_v52 = vld [vmem:[%s5667_s14 + $0x560] sm:$0xf]  ;;  %v3869_v60 = vor.u32 %v4826_v51, %v3868_v50 }
 0x162   : > { %v5166_v56 = vpop.eup %5165  ;;  %5167 = vtanh.f32 %v2848_v53  ;;  %v2530_v57 = vadd.f32 %v2529_v55, %v1880_v54  ;;  %v4954_v53 = vld [vmem:[%s5667_s14 + $0x564] sm:$0xf0]  ;;  %v4825_v54 = vld [vmem:[%s5667_s14 + $0x164] sm:$0xf]  ;;  %v3870_v55 = vld [vmem:[%s5667_s14 + $0x168] sm:$0xf0] }
 0x163   : > { %3390 = vst [vmem:[%s5755_s24 + $0xb0] sm:$0xff] %v5166_v56  ;;  %v4953_v56 = vld [vmem:[%s5667_s14 + $0x564] sm:$0xf]  ;;  %v4381_v61 = vor.u32 %v4954_v53, %v4380_v52  ;;  %v3873_v1 = vor.u32 %v4825_v54, %v3870_v55 }
 0x164   : > { %5169 = vtanh.f32 %v2530_v57  ;;  %v4382_v57 = vld [vmem:[%s5667_s14 + $0x568] sm:$0xf0] }
 0x166   : > { %v2200_v2 = vpop.f32.mrf.mxu2 }
 0x167   : > { %v2849_v3 = vpop.f32.mrf.mxu3 }
 0x168   : > { %v5168_v6 = vpop.eup %5167  ;;  %v2850_v7 = vadd.f32 %v2849_v3, %v2200_v2  ;;  %v1883_v8 = vpop.f32.mrf.mxu0  ;;  %v4385_v2 = vor.u32 %v4953_v56, %v4382_v57 }
 0x169   : > { %3518 = vst [vmem:[%s5755_s24 + $0x4b0] sm:$0xff] %v5168_v6  ;;  %v2532_v11 = vpop.f32.mrf.mxu1 }
 0x16a   : > { %v5170_v12 = vpop.eup %5169  ;;  %5171 = vtanh.f32 %v2850_v7  ;;  %v2533_v13 = vadd.f32 %v2532_v11, %v1883_v8 }
 0x16b   : > { %3391 = vst [vmem:[%s5755_s24 + $0xb8] sm:$0xff] %v5170_v12  ;;  %1922 = vmatmul.bf16.gmra.mxu0 %v3853_v4  ;;  %2242 = vmatmul.bf16.gmra.mxu2 %v4365_v5 }
 0x16c   : > { %5173 = vtanh.f32 %v2533_v13  ;;  %2571 = vmatmul.bf16.gmra.mxu1 %v3857_v9  ;;  %2891 = vmatmul.bf16.gmra.mxu3 %v4369_v10 }
 0x16e   : > { %v2203_v14 = vpop.f32.mrf.mxu2 }
 0x16f   : > { %v2852_v15 = vpop.f32.mrf.mxu3 }
 0x170   : > { %v5172_v16 = vpop.eup %5171  ;;  %v2853_v17 = vadd.f32 %v2852_v15, %v2203_v14  ;;  %v1885_v18 = vpop.f32.mrf.mxu0  ;;  %v3876_v14 = vld [vmem:[%s5667_s14 + $0x170] sm:$0xf]  ;;  %v4828_v15 = vld [vmem:[%s5667_s14 + $0x174] sm:$0xf0] }
 0x171   : > { %3519 = vst [vmem:[%s5755_s24 + $0x4b8] sm:$0xff] %v5172_v16  ;;  %v2534_v19 = vpop.f32.mrf.mxu1  ;;  %v4388_v16 = vld [vmem:[%s5667_s14 + $0x570] sm:$0xf]  ;;  %v3877_v24 = vor.u32 %v4828_v15, %v3876_v14 }
 0x172   : > { %v5174_v20 = vpop.eup %5173  ;;  %5175 = vtanh.f32 %v2853_v17  ;;  %v2535_v21 = vadd.f32 %v2534_v19, %v1885_v18  ;;  %v4956_v17 = vld [vmem:[%s5667_s14 + $0x574] sm:$0xf0]  ;;  %v4827_v18 = vld [vmem:[%s5667_s14 + $0x174] sm:$0xf]  ;;  %v3878_v19 = vld [vmem:[%s5667_s14 + $0x178] sm:$0xf0] }
 0x173   : > { %3392 = vst [vmem:[%s5755_s24 + $0xc0] sm:$0xff] %v5174_v20  ;;  %v4955_v20 = vld [vmem:[%s5667_s14 + $0x574] sm:$0xf]  ;;  %v4389_v25 = vor.u32 %v4956_v17, %v4388_v16  ;;  %v3881_v29 = vor.u32 %v4827_v18, %v3878_v19 }
 0x174   : > { %5177 = vtanh.f32 %v2535_v21  ;;  %v4390_v21 = vld [vmem:[%s5667_s14 + $0x578] sm:$0xf0] }
 0x176   : > { %v2205_v30 = vpop.f32.mrf.mxu2 }
 0x177   : > { %v2854_v31 = vpop.f32.mrf.mxu3 }
 0x178   : > { %v5176_v34 = vpop.eup %5175  ;;  %v2855_v35 = vadd.f32 %v2854_v31, %v2205_v30  ;;  %v1888_v36 = vpop.f32.mrf.mxu0  ;;  %v4393_v30 = vor.u32 %v4955_v20, %v4390_v21 }
 0x179   : > { %3520 = vst [vmem:[%s5755_s24 + $0x4c0] sm:$0xff] %v5176_v34  ;;  %v2537_v39 = vpop.f32.mrf.mxu1 }
 0x17a   : > { %v5178_v40 = vpop.eup %5177  ;;  %5179 = vtanh.f32 %v2855_v35  ;;  %v2538_v41 = vadd.f32 %v2537_v39, %v1888_v36 }
 0x17b   : > { %3393 = vst [vmem:[%s5755_s24 + $0xc8] sm:$0xff] %v5178_v40  ;;  %1927 = vmatmul.bf16.gmra.mxu0 %v3861_v32  ;;  %2247 = vmatmul.bf16.gmra.mxu2 %v4373_v33 }
 0x17c   : > { %5181 = vtanh.f32 %v2538_v41  ;;  %2576 = vmatmul.bf16.gmra.mxu1 %v3865_v37  ;;  %2896 = vmatmul.bf16.gmra.mxu3 %v4377_v38 }
 0x17e   : > { %v2208_v42 = vpop.f32.mrf.mxu2 }
 0x17f   : > { %v2857_v43 = vpop.f32.mrf.mxu3 }
 0x180   : > { %v5180_v44 = vpop.eup %5179  ;;  %v2858_v45 = vadd.f32 %v2857_v43, %v2208_v42  ;;  %v1890_v46 = vpop.f32.mrf.mxu0  ;;  %v3884_v42 = vld [vmem:[%s5667_s14 + $0x180] sm:$0xf]  ;;  %v4830_v43 = vld [vmem:[%s5667_s14 + $0x184] sm:$0xf0] }
 0x181   : > { %3521 = vst [vmem:[%s5755_s24 + $0x4c8] sm:$0xff] %v5180_v44  ;;  %v2539_v47 = vpop.f32.mrf.mxu1  ;;  %v4396_v44 = vld [vmem:[%s5667_s14 + $0x580] sm:$0xf]  ;;  %v3885_v52 = vor.u32 %v4830_v43, %v3884_v42 }
 0x182   : > { %v5182_v48 = vpop.eup %5181  ;;  %5183 = vtanh.f32 %v2858_v45  ;;  %v2540_v49 = vadd.f32 %v2539_v47, %v1890_v46  ;;  %v4958_v45 = vld [vmem:[%s5667_s14 + $0x584] sm:$0xf0]  ;;  %v4829_v46 = vld [vmem:[%s5667_s14 + $0x184] sm:$0xf]  ;;  %v3886_v47 = vld [vmem:[%s5667_s14 + $0x188] sm:$0xf0] }
 0x183   : > { %3394 = vst [vmem:[%s5755_s24 + $0xd0] sm:$0xff] %v5182_v48  ;;  %v4957_v48 = vld [vmem:[%s5667_s14 + $0x584] sm:$0xf]  ;;  %v4397_v53 = vor.u32 %v4958_v45, %v4396_v44  ;;  %v3889_v57 = vor.u32 %v4829_v46, %v3886_v47 }
 0x184   : > { %5185 = vtanh.f32 %v2540_v49  ;;  %v4398_v49 = vld [vmem:[%s5667_s14 + $0x588] sm:$0xf0] }
 0x186   : > { %v2210_v58 = vpop.f32.mrf.mxu2 }
 0x187   : > { %v2859_v59 = vpop.f32.mrf.mxu3 }
 0x188   : > { %v5184_v62 = vpop.eup %5183  ;;  %v2860_v63 = vadd.f32 %v2859_v59, %v2210_v58  ;;  %v1893_v0 = vpop.f32.mrf.mxu0  ;;  %v4401_v58 = vor.u32 %v4957_v48, %v4398_v49 }
 0x189   : > { %3522 = vst [vmem:[%s5755_s24 + $0x4d0] sm:$0xff] %v5184_v62  ;;  %v2542_v3 = vpop.f32.mrf.mxu1 }
 0x18a   : > { %v5186_v4 = vpop.eup %5185  ;;  %5187 = vtanh.f32 %v2860_v63  ;;  %v2543_v5 = vadd.f32 %v2542_v3, %v1893_v0 }
 0x18b   : > { %3395 = vst [vmem:[%s5755_s24 + $0xd8] sm:$0xff] %v5186_v4  ;;  %1932 = vmatmul.bf16.gmra.mxu0 %v3869_v60  ;;  %2252 = vmatmul.bf16.gmra.mxu2 %v4381_v61 }
 0x18c   : > { %5189 = vtanh.f32 %v2543_v5  ;;  %2581 = vmatmul.bf16.gmra.mxu1 %v3873_v1  ;;  %2901 = vmatmul.bf16.gmra.mxu3 %v4385_v2 }
 0x18e   : > { %v2213_v6 = vpop.f32.mrf.mxu2 }
 0x18f   : > { %v2862_v7 = vpop.f32.mrf.mxu3 }
 0x190   : > { %v5188_v8 = vpop.eup %5187  ;;  %v2863_v9 = vadd.f32 %v2862_v7, %v2213_v6  ;;  %v1895_v10 = vpop.f32.mrf.mxu0  ;;  %v3892_v6 = vld [vmem:[%s5667_s14 + $0x190] sm:$0xf]  ;;  %v4832_v7 = vld [vmem:[%s5667_s14 + $0x194] sm:$0xf0] }
 0x191   : > { %3523 = vst [vmem:[%s5755_s24 + $0x4d8] sm:$0xff] %v5188_v8  ;;  %v2544_v11 = vpop.f32.mrf.mxu1  ;;  %v4404_v8 = vld [vmem:[%s5667_s14 + $0x590] sm:$0xf]  ;;  %v3893_v16 = vor.u32 %v4832_v7, %v3892_v6 }
 0x192   : > { %v5190_v12 = vpop.eup %5189  ;;  %5191 = vtanh.f32 %v2863_v9  ;;  %v2545_v13 = vadd.f32 %v2544_v11, %v1895_v10  ;;  %v4960_v9 = vld [vmem:[%s5667_s14 + $0x594] sm:$0xf0]  ;;  %v4831_v10 = vld [vmem:[%s5667_s14 + $0x194] sm:$0xf]  ;;  %v3894_v11 = vld [vmem:[%s5667_s14 + $0x198] sm:$0xf0] }
 0x193   : > { %3396 = vst [vmem:[%s5755_s24 + $0xe0] sm:$0xff] %v5190_v12  ;;  %v4959_v12 = vld [vmem:[%s5667_s14 + $0x594] sm:$0xf]  ;;  %v4405_v17 = vor.u32 %v4960_v9, %v4404_v8  ;;  %v3897_v21 = vor.u32 %v4831_v10, %v3894_v11 }
 0x194   : > { %5193 = vtanh.f32 %v2545_v13  ;;  %v4406_v13 = vld [vmem:[%s5667_s14 + $0x598] sm:$0xf0] }
 0x196   : > { %v2215_v22 = vpop.f32.mrf.mxu2 }
 0x197   : > { %v2864_v23 = vpop.f32.mrf.mxu3 }
 0x198   : > { %v5192_v26 = vpop.eup %5191  ;;  %v2865_v27 = vadd.f32 %v2864_v23, %v2215_v22  ;;  %v1898_v28 = vpop.f32.mrf.mxu0  ;;  %v4409_v22 = vor.u32 %v4959_v12, %v4406_v13 }
 0x199   : > { %3524 = vst [vmem:[%s5755_s24 + $0x4e0] sm:$0xff] %v5192_v26  ;;  %v2547_v31 = vpop.f32.mrf.mxu1 }
 0x19a   : > { %v5194_v32 = vpop.eup %5193  ;;  %5195 = vtanh.f32 %v2865_v27  ;;  %v2548_v33 = vadd.f32 %v2547_v31, %v1898_v28 }
 0x19b   : > { %3397 = vst [vmem:[%s5755_s24 + $0xe8] sm:$0xff] %v5194_v32  ;;  %1937 = vmatmul.bf16.gmra.mxu0 %v3877_v24  ;;  %2257 = vmatmul.bf16.gmra.mxu2 %v4389_v25 }
 0x19c   : > { %5197 = vtanh.f32 %v2548_v33  ;;  %2586 = vmatmul.bf16.gmra.mxu1 %v3881_v29  ;;  %2906 = vmatmul.bf16.gmra.mxu3 %v4393_v30 }
 0x19e   : > { %v2218_v34 = vpop.f32.mrf.mxu2 }
 0x19f   : > { %v2867_v35 = vpop.f32.mrf.mxu3 }
 0x1a0   : > { %v5196_v36 = vpop.eup %5195  ;;  %v2868_v37 = vadd.f32 %v2867_v35, %v2218_v34  ;;  %v1900_v38 = vpop.f32.mrf.mxu0  ;;  %v3900_v34 = vld [vmem:[%s5667_s14 + $0x1a0] sm:$0xf]  ;;  %v4834_v35 = vld [vmem:[%s5667_s14 + $0x1a4] sm:$0xf0] }
 0x1a1   : > { %3525 = vst [vmem:[%s5755_s24 + $0x4e8] sm:$0xff] %v5196_v36  ;;  %v2549_v39 = vpop.f32.mrf.mxu1  ;;  %v4412_v36 = vld [vmem:[%s5667_s14 + $0x5a0] sm:$0xf]  ;;  %v3901_v44 = vor.u32 %v4834_v35, %v3900_v34 }
 0x1a2   : > { %v5198_v40 = vpop.eup %5197  ;;  %5199 = vtanh.f32 %v2868_v37  ;;  %v2550_v41 = vadd.f32 %v2549_v39, %v1900_v38  ;;  %v4962_v37 = vld [vmem:[%s5667_s14 + $0x5a4] sm:$0xf0]  ;;  %v4833_v38 = vld [vmem:[%s5667_s14 + $0x1a4] sm:$0xf]  ;;  %v3902_v39 = vld [vmem:[%s5667_s14 + $0x1a8] sm:$0xf0] }
 0x1a3   : > { %3398 = vst [vmem:[%s5755_s24 + $0xf0] sm:$0xff] %v5198_v40  ;;  %v4961_v40 = vld [vmem:[%s5667_s14 + $0x5a4] sm:$0xf]  ;;  %v4413_v45 = vor.u32 %v4962_v37, %v4412_v36  ;;  %v3905_v49 = vor.u32 %v4833_v38, %v3902_v39 }
 0x1a4   : > { %5201 = vtanh.f32 %v2550_v41  ;;  %v4414_v41 = vld [vmem:[%s5667_s14 + $0x5a8] sm:$0xf0] }
 0x1a6   : > { %v2220_v50 = vpop.f32.mrf.mxu2 }
 0x1a7   : > { %v2869_v51 = vpop.f32.mrf.mxu3 }
 0x1a8   : > { %v5200_v54 = vpop.eup %5199  ;;  %v2870_v55 = vadd.f32 %v2869_v51, %v2220_v50  ;;  %v1903_v56 = vpop.f32.mrf.mxu0  ;;  %v4417_v50 = vor.u32 %v4961_v40, %v4414_v41 }
 0x1a9   : > { %3526 = vst [vmem:[%s5755_s24 + $0x4f0] sm:$0xff] %v5200_v54  ;;  %v2552_v59 = vpop.f32.mrf.mxu1 }
 0x1aa   : > { %v5202_v60 = vpop.eup %5201  ;;  %5203 = vtanh.f32 %v2870_v55  ;;  %v2553_v61 = vadd.f32 %v2552_v59, %v1903_v56 }
 0x1ab   : > { %3399 = vst [vmem:[%s5755_s24 + $0xf8] sm:$0xff] %v5202_v60  ;;  %1942 = vmatmul.bf16.gmra.mxu0 %v3885_v52  ;;  %2262 = vmatmul.bf16.gmra.mxu2 %v4397_v53 }
 0x1ac   : > { %5205 = vtanh.f32 %v2553_v61  ;;  %2591 = vmatmul.bf16.gmra.mxu1 %v3889_v57  ;;  %2911 = vmatmul.bf16.gmra.mxu3 %v4401_v58 }
 0x1ae   : > { %v2223_v62 = vpop.f32.mrf.mxu2 }
 0x1af   : > { %v2872_v63 = vpop.f32.mrf.mxu3 }
 0x1b0   : > { %v5204_v0 = vpop.eup %5203  ;;  %v2873_v1 = vadd.f32 %v2872_v63, %v2223_v62  ;;  %v1905_v2 = vpop.f32.mrf.mxu0  ;;  %v3908_v62 = vld [vmem:[%s5667_s14 + $0x1b0] sm:$0xf]  ;;  %v4836_v63 = vld [vmem:[%s5667_s14 + $0x1b4] sm:$0xf0] }
 0x1b1   : > { %3527 = vst [vmem:[%s5755_s24 + $0x4f8] sm:$0xff] %v5204_v0  ;;  %v2554_v3 = vpop.f32.mrf.mxu1  ;;  %v4420_v0 = vld [vmem:[%s5667_s14 + $0x5b0] sm:$0xf]  ;;  %v3909_v8 = vor.u32 %v4836_v63, %v3908_v62 }
 0x1b2   : > { %v5206_v4 = vpop.eup %5205  ;;  %5207 = vtanh.f32 %v2873_v1  ;;  %v2555_v5 = vadd.f32 %v2554_v3, %v1905_v2  ;;  %v4964_v1 = vld [vmem:[%s5667_s14 + $0x5b4] sm:$0xf0]  ;;  %v4835_v2 = vld [vmem:[%s5667_s14 + $0x1b4] sm:$0xf]  ;;  %v3910_v3 = vld [vmem:[%s5667_s14 + $0x1b8] sm:$0xf0] }
 0x1b3   : > { %3400 = vst [vmem:[%s5755_s24 + $0x100] sm:$0xff] %v5206_v4  ;;  %v4963_v4 = vld [vmem:[%s5667_s14 + $0x5b4] sm:$0xf]  ;;  %v4421_v9 = vor.u32 %v4964_v1, %v4420_v0  ;;  %v3913_v13 = vor.u32 %v4835_v2, %v3910_v3 }
 0x1b4   : > { %5209 = vtanh.f32 %v2555_v5  ;;  %v4422_v5 = vld [vmem:[%s5667_s14 + $0x5b8] sm:$0xf0] }
 0x1b6   : > { %v2225_v14 = vpop.f32.mrf.mxu2 }
 0x1b7   : > { %v2874_v15 = vpop.f32.mrf.mxu3 }
 0x1b8   : > { %v5208_v18 = vpop.eup %5207  ;;  %v2875_v19 = vadd.f32 %v2874_v15, %v2225_v14  ;;  %v1908_v20 = vpop.f32.mrf.mxu0  ;;  %v4425_v14 = vor.u32 %v4963_v4, %v4422_v5 }
 0x1b9   : > { %3528 = vst [vmem:[%s5755_s24 + $0x500] sm:$0xff] %v5208_v18  ;;  %v2557_v23 = vpop.f32.mrf.mxu1 }
 0x1ba   : > { %v5210_v24 = vpop.eup %5209  ;;  %5211 = vtanh.f32 %v2875_v19  ;;  %v2558_v25 = vadd.f32 %v2557_v23, %v1908_v20 }
 0x1bb   : > { %3401 = vst [vmem:[%s5755_s24 + $0x108] sm:$0xff] %v5210_v24  ;;  %1947 = vmatmul.bf16.gmra.mxu0 %v3893_v16  ;;  %2267 = vmatmul.bf16.gmra.mxu2 %v4405_v17 }
 0x1bc   : > { %5213 = vtanh.f32 %v2558_v25  ;;  %2596 = vmatmul.bf16.gmra.mxu1 %v3897_v21  ;;  %2916 = vmatmul.bf16.gmra.mxu3 %v4409_v22 }
 0x1be   : > { %v2228_v26 = vpop.f32.mrf.mxu2 }
 0x1bf   : > { %v2877_v27 = vpop.f32.mrf.mxu3 }
 0x1c0   : > { %v5212_v28 = vpop.eup %5211  ;;  %v2878_v29 = vadd.f32 %v2877_v27, %v2228_v26  ;;  %v1910_v30 = vpop.f32.mrf.mxu0  ;;  %v3916_v26 = vld [vmem:[%s5667_s14 + $0x1c0] sm:$0xf]  ;;  %v4838_v27 = vld [vmem:[%s5667_s14 + $0x1c4] sm:$0xf0] }
 0x1c1   : > { %3529 = vst [vmem:[%s5755_s24 + $0x508] sm:$0xff] %v5212_v28  ;;  %v2559_v31 = vpop.f32.mrf.mxu1  ;;  %v4428_v28 = vld [vmem:[%s5667_s14 + $0x5c0] sm:$0xf]  ;;  %v3917_v36 = vor.u32 %v4838_v27, %v3916_v26 }
 0x1c2   : > { %v5214_v32 = vpop.eup %5213  ;;  %5215 = vtanh.f32 %v2878_v29  ;;  %v2560_v33 = vadd.f32 %v2559_v31, %v1910_v30  ;;  %v4966_v29 = vld [vmem:[%s5667_s14 + $0x5c4] sm:$0xf0]  ;;  %v4837_v30 = vld [vmem:[%s5667_s14 + $0x1c4] sm:$0xf]  ;;  %v3918_v31 = vld [vmem:[%s5667_s14 + $0x1c8] sm:$0xf0] }
 0x1c3   : > { %3402 = vst [vmem:[%s5755_s24 + $0x110] sm:$0xff] %v5214_v32  ;;  %v4965_v32 = vld [vmem:[%s5667_s14 + $0x5c4] sm:$0xf]  ;;  %v4429_v37 = vor.u32 %v4966_v29, %v4428_v28  ;;  %v3921_v41 = vor.u32 %v4837_v30, %v3918_v31 }
 0x1c4   : > { %5217 = vtanh.f32 %v2560_v33  ;;  %v4430_v33 = vld [vmem:[%s5667_s14 + $0x5c8] sm:$0xf0] }
 0x1c6   : > { %v2230_v42 = vpop.f32.mrf.mxu2 }
 0x1c7   : > { %v2879_v43 = vpop.f32.mrf.mxu3 }
 0x1c8   : > { %v5216_v46 = vpop.eup %5215  ;;  %v2880_v47 = vadd.f32 %v2879_v43, %v2230_v42  ;;  %v1913_v48 = vpop.f32.mrf.mxu0  ;;  %v4433_v42 = vor.u32 %v4965_v32, %v4430_v33 }
 0x1c9   : > { %3530 = vst [vmem:[%s5755_s24 + $0x510] sm:$0xff] %v5216_v46  ;;  %v2562_v51 = vpop.f32.mrf.mxu1 }
 0x1ca   : > { %v5218_v52 = vpop.eup %5217  ;;  %5219 = vtanh.f32 %v2880_v47  ;;  %v2563_v53 = vadd.f32 %v2562_v51, %v1913_v48 }
 0x1cb   : > { %3403 = vst [vmem:[%s5755_s24 + $0x118] sm:$0xff] %v5218_v52  ;;  %1952 = vmatmul.bf16.gmra.mxu0 %v3901_v44  ;;  %2272 = vmatmul.bf16.gmra.mxu2 %v4413_v45 }
 0x1cc   : > { %5221 = vtanh.f32 %v2563_v53  ;;  %2601 = vmatmul.bf16.gmra.mxu1 %v3905_v49  ;;  %2921 = vmatmul.bf16.gmra.mxu3 %v4417_v50 }
 0x1ce   : > { %v2233_v54 = vpop.f32.mrf.mxu2 }
 0x1cf   : > { %v2882_v55 = vpop.f32.mrf.mxu3 }
 0x1d0   : > { %v5220_v56 = vpop.eup %5219  ;;  %v2883_v57 = vadd.f32 %v2882_v55, %v2233_v54  ;;  %v1915_v58 = vpop.f32.mrf.mxu0  ;;  %v3924_v54 = vld [vmem:[%s5667_s14 + $0x1d0] sm:$0xf]  ;;  %v4840_v55 = vld [vmem:[%s5667_s14 + $0x1d4] sm:$0xf0] }
 0x1d1   : > { %3531 = vst [vmem:[%s5755_s24 + $0x518] sm:$0xff] %v5220_v56  ;;  %v2564_v59 = vpop.f32.mrf.mxu1  ;;  %v4436_v56 = vld [vmem:[%s5667_s14 + $0x5d0] sm:$0xf]  ;;  %v3925_v0 = vor.u32 %v4840_v55, %v3924_v54 }
 0x1d2   : > { %v5222_v60 = vpop.eup %5221  ;;  %5223 = vtanh.f32 %v2883_v57  ;;  %v2565_v61 = vadd.f32 %v2564_v59, %v1915_v58  ;;  %v4968_v57 = vld [vmem:[%s5667_s14 + $0x5d4] sm:$0xf0]  ;;  %v4839_v58 = vld [vmem:[%s5667_s14 + $0x1d4] sm:$0xf]  ;;  %v3926_v59 = vld [vmem:[%s5667_s14 + $0x1d8] sm:$0xf0] }
 0x1d3   : > { %3404 = vst [vmem:[%s5755_s24 + $0x120] sm:$0xff] %v5222_v60  ;;  %v4967_v60 = vld [vmem:[%s5667_s14 + $0x5d4] sm:$0xf]  ;;  %v4437_v1 = vor.u32 %v4968_v57, %v4436_v56  ;;  %v3929_v5 = vor.u32 %v4839_v58, %v3926_v59 }
 0x1d4   : > { %5225 = vtanh.f32 %v2565_v61  ;;  %v4438_v61 = vld [vmem:[%s5667_s14 + $0x5d8] sm:$0xf0] }
 0x1d6   : > { %v2235_v6 = vpop.f32.mrf.mxu2 }
 0x1d7   : > { %v2884_v7 = vpop.f32.mrf.mxu3 }
 0x1d8   : > { %v5224_v10 = vpop.eup %5223  ;;  %v2885_v11 = vadd.f32 %v2884_v7, %v2235_v6  ;;  %v1918_v12 = vpop.f32.mrf.mxu0  ;;  %v4441_v6 = vor.u32 %v4967_v60, %v4438_v61 }
 0x1d9   : > { %3532 = vst [vmem:[%s5755_s24 + $0x520] sm:$0xff] %v5224_v10  ;;  %v2567_v15 = vpop.f32.mrf.mxu1 }
 0x1da   : > { %v5226_v16 = vpop.eup %5225  ;;  %5227 = vtanh.f32 %v2885_v11  ;;  %v2568_v17 = vadd.f32 %v2567_v15, %v1918_v12 }
 0x1db   : > { %3405 = vst [vmem:[%s5755_s24 + $0x128] sm:$0xff] %v5226_v16  ;;  %1957 = vmatmul.bf16.gmra.mxu0 %v3909_v8  ;;  %2277 = vmatmul.bf16.gmra.mxu2 %v4421_v9 }
 0x1dc   : > { %5229 = vtanh.f32 %v2568_v17  ;;  %2606 = vmatmul.bf16.gmra.mxu1 %v3913_v13  ;;  %2926 = vmatmul.bf16.gmra.mxu3 %v4425_v14 }
 0x1de   : > { %v2238_v18 = vpop.f32.mrf.mxu2 }
 0x1df   : > { %v2887_v19 = vpop.f32.mrf.mxu3 }
 0x1e0   : > { %v5228_v20 = vpop.eup %5227  ;;  %v2888_v21 = vadd.f32 %v2887_v19, %v2238_v18  ;;  %v1920_v22 = vpop.f32.mrf.mxu0  ;;  %v3932_v18 = vld [vmem:[%s5667_s14 + $0x1e0] sm:$0xf]  ;;  %v4842_v19 = vld [vmem:[%s5667_s14 + $0x1e4] sm:$0xf0] }
 0x1e1   : > { %3533 = vst [vmem:[%s5755_s24 + $0x528] sm:$0xff] %v5228_v20  ;;  %v2569_v23 = vpop.f32.mrf.mxu1  ;;  %v4444_v20 = vld [vmem:[%s5667_s14 + $0x5e0] sm:$0xf]  ;;  %v3933_v28 = vor.u32 %v4842_v19, %v3932_v18 }
 0x1e2   : > { %v5230_v24 = vpop.eup %5229  ;;  %5231 = vtanh.f32 %v2888_v21  ;;  %v2570_v25 = vadd.f32 %v2569_v23, %v1920_v22  ;;  %v4970_v21 = vld [vmem:[%s5667_s14 + $0x5e4] sm:$0xf0]  ;;  %v4841_v22 = vld [vmem:[%s5667_s14 + $0x1e4] sm:$0xf]  ;;  %v3934_v23 = vld [vmem:[%s5667_s14 + $0x1e8] sm:$0xf0] }
 0x1e3   : > { %3406 = vst [vmem:[%s5755_s24 + $0x130] sm:$0xff] %v5230_v24  ;;  %v4969_v24 = vld [vmem:[%s5667_s14 + $0x5e4] sm:$0xf]  ;;  %v4445_v29 = vor.u32 %v4970_v21, %v4444_v20  ;;  %v3937_v33 = vor.u32 %v4841_v22, %v3934_v23 }
 0x1e4   : > { %5233 = vtanh.f32 %v2570_v25  ;;  %v4446_v25 = vld [vmem:[%s5667_s14 + $0x5e8] sm:$0xf0] }
 0x1e6   : > { %v2240_v34 = vpop.f32.mrf.mxu2 }
 0x1e7   : > { %v2889_v35 = vpop.f32.mrf.mxu3 }
 0x1e8   : > { %v5232_v38 = vpop.eup %5231  ;;  %v2890_v39 = vadd.f32 %v2889_v35, %v2240_v34  ;;  %v1923_v40 = vpop.f32.mrf.mxu0  ;;  %v4449_v34 = vor.u32 %v4969_v24, %v4446_v25 }
 0x1e9   : > { %3534 = vst [vmem:[%s5755_s24 + $0x530] sm:$0xff] %v5232_v38  ;;  %v2572_v43 = vpop.f32.mrf.mxu1 }
 0x1ea   : > { %v5234_v44 = vpop.eup %5233  ;;  %5235 = vtanh.f32 %v2890_v39  ;;  %v2573_v45 = vadd.f32 %v2572_v43, %v1923_v40 }
 0x1eb   : > { %3407 = vst [vmem:[%s5755_s24 + $0x138] sm:$0xff] %v5234_v44  ;;  %1962 = vmatmul.bf16.gmra.mxu0 %v3917_v36  ;;  %2282 = vmatmul.bf16.gmra.mxu2 %v4429_v37 }
 0x1ec   : > { %5237 = vtanh.f32 %v2573_v45  ;;  %2611 = vmatmul.bf16.gmra.mxu1 %v3921_v41  ;;  %2931 = vmatmul.bf16.gmra.mxu3 %v4433_v42 }
 0x1ee   : > { %v2243_v46 = vpop.f32.mrf.mxu2 }
 0x1ef   : > { %v2892_v47 = vpop.f32.mrf.mxu3 }
 0x1f0   : > { %v5236_v48 = vpop.eup %5235  ;;  %v2893_v49 = vadd.f32 %v2892_v47, %v2243_v46  ;;  %v1925_v50 = vpop.f32.mrf.mxu0  ;;  %v3940_v46 = vld [vmem:[%s5667_s14 + $0x1f0] sm:$0xf]  ;;  %v4844_v47 = vld [vmem:[%s5667_s14 + $0x1f4] sm:$0xf0] }
 0x1f1   : > { %3535 = vst [vmem:[%s5755_s24 + $0x538] sm:$0xff] %v5236_v48  ;;  %v2574_v51 = vpop.f32.mrf.mxu1  ;;  %v4452_v48 = vld [vmem:[%s5667_s14 + $0x5f0] sm:$0xf]  ;;  %v3941_v56 = vor.u32 %v4844_v47, %v3940_v46 }
 0x1f2   : > { %v5238_v52 = vpop.eup %5237  ;;  %5239 = vtanh.f32 %v2893_v49  ;;  %v2575_v53 = vadd.f32 %v2574_v51, %v1925_v50  ;;  %v4972_v49 = vld [vmem:[%s5667_s14 + $0x5f4] sm:$0xf0]  ;;  %v4843_v50 = vld [vmem:[%s5667_s14 + $0x1f4] sm:$0xf]  ;;  %v3942_v51 = vld [vmem:[%s5667_s14 + $0x1f8] sm:$0xf0] }
 0x1f3   : > { %3408 = vst [vmem:[%s5755_s24 + $0x140] sm:$0xff] %v5238_v52  ;;  %v4971_v52 = vld [vmem:[%s5667_s14 + $0x5f4] sm:$0xf]  ;;  %v4453_v57 = vor.u32 %v4972_v49, %v4452_v48  ;;  %v3945_v61 = vor.u32 %v4843_v50, %v3942_v51 }
 0x1f4   : > { %5241 = vtanh.f32 %v2575_v53  ;;  %v4454_v53 = vld [vmem:[%s5667_s14 + $0x5f8] sm:$0xf0] }
 0x1f6   : > { %v2245_v62 = vpop.f32.mrf.mxu2 }
 0x1f7   : > { %v2894_v63 = vpop.f32.mrf.mxu3 }
 0x1f8   : > { %v5240_v2 = vpop.eup %5239  ;;  %v2895_v3 = vadd.f32 %v2894_v63, %v2245_v62  ;;  %v1928_v4 = vpop.f32.mrf.mxu0  ;;  %v4457_v62 = vor.u32 %v4971_v52, %v4454_v53 }
 0x1f9   : > { %3536 = vst [vmem:[%s5755_s24 + $0x540] sm:$0xff] %v5240_v2  ;;  %v2577_v7 = vpop.f32.mrf.mxu1 }
 0x1fa   : > { %v5242_v8 = vpop.eup %5241  ;;  %5243 = vtanh.f32 %v2895_v3  ;;  %v2578_v9 = vadd.f32 %v2577_v7, %v1928_v4 }
 0x1fb   : > { %3409 = vst [vmem:[%s5755_s24 + $0x148] sm:$0xff] %v5242_v8  ;;  %1967 = vmatmul.bf16.gmra.mxu0 %v3925_v0  ;;  %2287 = vmatmul.bf16.gmra.mxu2 %v4437_v1 }
 0x1fc   : > { %5245 = vtanh.f32 %v2578_v9  ;;  %2616 = vmatmul.bf16.gmra.mxu1 %v3929_v5  ;;  %2936 = vmatmul.bf16.gmra.mxu3 %v4441_v6 }
 0x1fe   : > { %v2248_v10 = vpop.f32.mrf.mxu2 }
 0x1ff   : > { %v2897_v11 = vpop.f32.mrf.mxu3 }
 0x200   : > { %v5244_v12 = vpop.eup %5243  ;;  %v2898_v13 = vadd.f32 %v2897_v11, %v2248_v10  ;;  %v1930_v14 = vpop.f32.mrf.mxu0  ;;  %v3948_v10 = vld [vmem:[%s5667_s14 + $0x200] sm:$0xf]  ;;  %v4846_v11 = vld [vmem:[%s5667_s14 + $0x204] sm:$0xf0] }
 0x201   : > { %3537 = vst [vmem:[%s5755_s24 + $0x548] sm:$0xff] %v5244_v12  ;;  %v2579_v15 = vpop.f32.mrf.mxu1  ;;  %v4460_v12 = vld [vmem:[%s5667_s14 + $0x600] sm:$0xf]  ;;  %v3949_v20 = vor.u32 %v4846_v11, %v3948_v10 }
 0x202   : > { %v5246_v16 = vpop.eup %5245  ;;  %5247 = vtanh.f32 %v2898_v13  ;;  %v2580_v17 = vadd.f32 %v2579_v15, %v1930_v14  ;;  %v4974_v13 = vld [vmem:[%s5667_s14 + $0x604] sm:$0xf0]  ;;  %v4845_v14 = vld [vmem:[%s5667_s14 + $0x204] sm:$0xf]  ;;  %v3950_v15 = vld [vmem:[%s5667_s14 + $0x208] sm:$0xf0] }
 0x203   : > { %3410 = vst [vmem:[%s5755_s24 + $0x150] sm:$0xff] %v5246_v16  ;;  %v4973_v16 = vld [vmem:[%s5667_s14 + $0x604] sm:$0xf]  ;;  %v4461_v21 = vor.u32 %v4974_v13, %v4460_v12  ;;  %v3953_v25 = vor.u32 %v4845_v14, %v3950_v15 }
 0x204   : > { %5249 = vtanh.f32 %v2580_v17  ;;  %v4462_v17 = vld [vmem:[%s5667_s14 + $0x608] sm:$0xf0] }
 0x206   : > { %v2250_v26 = vpop.f32.mrf.mxu2 }
 0x207   : > { %v2899_v27 = vpop.f32.mrf.mxu3 }
 0x208   : > { %v5248_v30 = vpop.eup %5247  ;;  %v2900_v31 = vadd.f32 %v2899_v27, %v2250_v26  ;;  %v1933_v32 = vpop.f32.mrf.mxu0  ;;  %v4465_v26 = vor.u32 %v4973_v16, %v4462_v17 }
 0x209   : > { %3538 = vst [vmem:[%s5755_s24 + $0x550] sm:$0xff] %v5248_v30  ;;  %v2582_v35 = vpop.f32.mrf.mxu1 }
 0x20a   : > { %v5250_v36 = vpop.eup %5249  ;;  %5251 = vtanh.f32 %v2900_v31  ;;  %v2583_v37 = vadd.f32 %v2582_v35, %v1933_v32 }
 0x20b   : > { %3411 = vst [vmem:[%s5755_s24 + $0x158] sm:$0xff] %v5250_v36  ;;  %1972 = vmatmul.bf16.gmra.mxu0 %v3933_v28  ;;  %2292 = vmatmul.bf16.gmra.mxu2 %v4445_v29 }
 0x20c   : > { %5253 = vtanh.f32 %v2583_v37  ;;  %2621 = vmatmul.bf16.gmra.mxu1 %v3937_v33  ;;  %2941 = vmatmul.bf16.gmra.mxu3 %v4449_v34 }
 0x20e   : > { %v2253_v38 = vpop.f32.mrf.mxu2 }
 0x20f   : > { %v2902_v39 = vpop.f32.mrf.mxu3 }
 0x210   : > { %v5252_v40 = vpop.eup %5251  ;;  %v2903_v41 = vadd.f32 %v2902_v39, %v2253_v38  ;;  %v1935_v42 = vpop.f32.mrf.mxu0  ;;  %v3956_v38 = vld [vmem:[%s5667_s14 + $0x210] sm:$0xf]  ;;  %v4848_v39 = vld [vmem:[%s5667_s14 + $0x214] sm:$0xf0] }
 0x211   : > { %3539 = vst [vmem:[%s5755_s24 + $0x558] sm:$0xff] %v5252_v40  ;;  %v2584_v43 = vpop.f32.mrf.mxu1  ;;  %v4468_v40 = vld [vmem:[%s5667_s14 + $0x610] sm:$0xf]  ;;  %v3957_v48 = vor.u32 %v4848_v39, %v3956_v38 }
 0x212   : > { %v5254_v44 = vpop.eup %5253  ;;  %5255 = vtanh.f32 %v2903_v41  ;;  %v2585_v45 = vadd.f32 %v2584_v43, %v1935_v42  ;;  %v4976_v41 = vld [vmem:[%s5667_s14 + $0x614] sm:$0xf0]  ;;  %v4847_v42 = vld [vmem:[%s5667_s14 + $0x214] sm:$0xf]  ;;  %v3958_v43 = vld [vmem:[%s5667_s14 + $0x218] sm:$0xf0] }
 0x213   : > { %3412 = vst [vmem:[%s5755_s24 + $0x160] sm:$0xff] %v5254_v44  ;;  %v4975_v44 = vld [vmem:[%s5667_s14 + $0x614] sm:$0xf]  ;;  %v4469_v49 = vor.u32 %v4976_v41, %v4468_v40  ;;  %v3961_v53 = vor.u32 %v4847_v42, %v3958_v43 }
 0x214   : > { %5257 = vtanh.f32 %v2585_v45  ;;  %v4470_v45 = vld [vmem:[%s5667_s14 + $0x618] sm:$0xf0] }
 0x216   : > { %v2255_v54 = vpop.f32.mrf.mxu2 }
 0x217   : > { %v2904_v55 = vpop.f32.mrf.mxu3 }
 0x218   : > { %v5256_v58 = vpop.eup %5255  ;;  %v2905_v59 = vadd.f32 %v2904_v55, %v2255_v54  ;;  %v1938_v60 = vpop.f32.mrf.mxu0  ;;  %v4473_v54 = vor.u32 %v4975_v44, %v4470_v45 }
 0x219   : > { %3540 = vst [vmem:[%s5755_s24 + $0x560] sm:$0xff] %v5256_v58  ;;  %v2587_v63 = vpop.f32.mrf.mxu1 }
 0x21a   : > { %v5258_v0 = vpop.eup %5257  ;;  %5259 = vtanh.f32 %v2905_v59  ;;  %v2588_v1 = vadd.f32 %v2587_v63, %v1938_v60 }
 0x21b   : > { %3413 = vst [vmem:[%s5755_s24 + $0x168] sm:$0xff] %v5258_v0  ;;  %1977 = vmatmul.bf16.gmra.mxu0 %v3941_v56  ;;  %2297 = vmatmul.bf16.gmra.mxu2 %v4453_v57 }
 0x21c   : > { %5261 = vtanh.f32 %v2588_v1  ;;  %2626 = vmatmul.bf16.gmra.mxu1 %v3945_v61  ;;  %2946 = vmatmul.bf16.gmra.mxu3 %v4457_v62 }
 0x21e   : > { %v2258_v2 = vpop.f32.mrf.mxu2 }
 0x21f   : > { %v2907_v3 = vpop.f32.mrf.mxu3 }
 0x220   : > { %v5260_v4 = vpop.eup %5259  ;;  %v2908_v5 = vadd.f32 %v2907_v3, %v2258_v2  ;;  %v1940_v6 = vpop.f32.mrf.mxu0  ;;  %v3964_v2 = vld [vmem:[%s5667_s14 + $0x220] sm:$0xf]  ;;  %v4850_v3 = vld [vmem:[%s5667_s14 + $0x224] sm:$0xf0] }
 0x221   : > { %3541 = vst [vmem:[%s5755_s24 + $0x568] sm:$0xff] %v5260_v4  ;;  %v2589_v7 = vpop.f32.mrf.mxu1  ;;  %v4476_v4 = vld [vmem:[%s5667_s14 + $0x620] sm:$0xf]  ;;  %v3965_v12 = vor.u32 %v4850_v3, %v3964_v2 }
 0x222   : > { %v5262_v8 = vpop.eup %5261  ;;  %5263 = vtanh.f32 %v2908_v5  ;;  %v2590_v9 = vadd.f32 %v2589_v7, %v1940_v6  ;;  %v4978_v5 = vld [vmem:[%s5667_s14 + $0x624] sm:$0xf0]  ;;  %v4849_v6 = vld [vmem:[%s5667_s14 + $0x224] sm:$0xf]  ;;  %v3966_v7 = vld [vmem:[%s5667_s14 + $0x228] sm:$0xf0] }
 0x223   : > { %3414 = vst [vmem:[%s5755_s24 + $0x170] sm:$0xff] %v5262_v8  ;;  %v4977_v8 = vld [vmem:[%s5667_s14 + $0x624] sm:$0xf]  ;;  %v4477_v13 = vor.u32 %v4978_v5, %v4476_v4  ;;  %v3969_v17 = vor.u32 %v4849_v6, %v3966_v7 }
 0x224   : > { %5265 = vtanh.f32 %v2590_v9  ;;  %v4478_v9 = vld [vmem:[%s5667_s14 + $0x628] sm:$0xf0] }
 0x226   : > { %v2260_v18 = vpop.f32.mrf.mxu2 }
 0x227   : > { %v2909_v19 = vpop.f32.mrf.mxu3 }
 0x228   : > { %v5264_v22 = vpop.eup %5263  ;;  %v2910_v23 = vadd.f32 %v2909_v19, %v2260_v18  ;;  %v1943_v24 = vpop.f32.mrf.mxu0  ;;  %v4481_v18 = vor.u32 %v4977_v8, %v4478_v9 }
 0x229   : > { %3542 = vst [vmem:[%s5755_s24 + $0x570] sm:$0xff] %v5264_v22  ;;  %v2592_v27 = vpop.f32.mrf.mxu1 }
 0x22a   : > { %v5266_v28 = vpop.eup %5265  ;;  %5267 = vtanh.f32 %v2910_v23  ;;  %v2593_v29 = vadd.f32 %v2592_v27, %v1943_v24 }
 0x22b   : > { %3415 = vst [vmem:[%s5755_s24 + $0x178] sm:$0xff] %v5266_v28  ;;  %1982 = vmatmul.bf16.gmra.mxu0 %v3949_v20  ;;  %2302 = vmatmul.bf16.gmra.mxu2 %v4461_v21 }
 0x22c   : > { %5269 = vtanh.f32 %v2593_v29  ;;  %2631 = vmatmul.bf16.gmra.mxu1 %v3953_v25  ;;  %2951 = vmatmul.bf16.gmra.mxu3 %v4465_v26 }
 0x22e   : > { %v2263_v30 = vpop.f32.mrf.mxu2 }
 0x22f   : > { %v2912_v31 = vpop.f32.mrf.mxu3 }
 0x230   : > { %v5268_v32 = vpop.eup %5267  ;;  %v2913_v33 = vadd.f32 %v2912_v31, %v2263_v30  ;;  %v1945_v34 = vpop.f32.mrf.mxu0  ;;  %v3972_v30 = vld [vmem:[%s5667_s14 + $0x230] sm:$0xf]  ;;  %v4852_v31 = vld [vmem:[%s5667_s14 + $0x234] sm:$0xf0] }
 0x231   : > { %3543 = vst [vmem:[%s5755_s24 + $0x578] sm:$0xff] %v5268_v32  ;;  %v2594_v35 = vpop.f32.mrf.mxu1  ;;  %v4484_v32 = vld [vmem:[%s5667_s14 + $0x630] sm:$0xf]  ;;  %v3973_v40 = vor.u32 %v4852_v31, %v3972_v30 }
 0x232   : > { %v5270_v36 = vpop.eup %5269  ;;  %5271 = vtanh.f32 %v2913_v33  ;;  %v2595_v37 = vadd.f32 %v2594_v35, %v1945_v34  ;;  %v4980_v33 = vld [vmem:[%s5667_s14 + $0x634] sm:$0xf0]  ;;  %v4851_v34 = vld [vmem:[%s5667_s14 + $0x234] sm:$0xf]  ;;  %v3974_v35 = vld [vmem:[%s5667_s14 + $0x238] sm:$0xf0] }
 0x233   : > { %3416 = vst [vmem:[%s5755_s24 + $0x180] sm:$0xff] %v5270_v36  ;;  %v4979_v36 = vld [vmem:[%s5667_s14 + $0x634] sm:$0xf]  ;;  %v4485_v41 = vor.u32 %v4980_v33, %v4484_v32  ;;  %v3977_v45 = vor.u32 %v4851_v34, %v3974_v35 }
 0x234   : > { %5273 = vtanh.f32 %v2595_v37  ;;  %v4486_v37 = vld [vmem:[%s5667_s14 + $0x638] sm:$0xf0] }
 0x236   : > { %v2265_v46 = vpop.f32.mrf.mxu2 }
 0x237   : > { %v2914_v47 = vpop.f32.mrf.mxu3 }
 0x238   : > { %v5272_v50 = vpop.eup %5271  ;;  %v2915_v51 = vadd.f32 %v2914_v47, %v2265_v46  ;;  %v1948_v52 = vpop.f32.mrf.mxu0  ;;  %v4489_v46 = vor.u32 %v4979_v36, %v4486_v37 }
 0x239   : > { %3544 = vst [vmem:[%s5755_s24 + $0x580] sm:$0xff] %v5272_v50  ;;  %v2597_v55 = vpop.f32.mrf.mxu1 }
 0x23a   : > { %v5274_v56 = vpop.eup %5273  ;;  %5275 = vtanh.f32 %v2915_v51  ;;  %v2598_v57 = vadd.f32 %v2597_v55, %v1948_v52 }
 0x23b   : > { %3417 = vst [vmem:[%s5755_s24 + $0x188] sm:$0xff] %v5274_v56  ;;  %1987 = vmatmul.bf16.gmra.mxu0 %v3957_v48  ;;  %2307 = vmatmul.bf16.gmra.mxu2 %v4469_v49 }
 0x23c   : > { %5277 = vtanh.f32 %v2598_v57  ;;  %2636 = vmatmul.bf16.gmra.mxu1 %v3961_v53  ;;  %2956 = vmatmul.bf16.gmra.mxu3 %v4473_v54 }
 0x23e   : > { %v2268_v58 = vpop.f32.mrf.mxu2 }
 0x23f   : > { %v2917_v59 = vpop.f32.mrf.mxu3 }
 0x240   : > { %v5276_v60 = vpop.eup %5275  ;;  %v2918_v61 = vadd.f32 %v2917_v59, %v2268_v58  ;;  %v1950_v62 = vpop.f32.mrf.mxu0  ;;  %v3980_v58 = vld [vmem:[%s5667_s14 + $0x240] sm:$0xf]  ;;  %v4854_v59 = vld [vmem:[%s5667_s14 + $0x244] sm:$0xf0] }
 0x241   : > { %3545 = vst [vmem:[%s5755_s24 + $0x588] sm:$0xff] %v5276_v60  ;;  %v2599_v63 = vpop.f32.mrf.mxu1  ;;  %v4492_v60 = vld [vmem:[%s5667_s14 + $0x640] sm:$0xf]  ;;  %v3981_v4 = vor.u32 %v4854_v59, %v3980_v58 }
 0x242   : > { %v5278_v0 = vpop.eup %5277  ;;  %5279 = vtanh.f32 %v2918_v61  ;;  %v2600_v1 = vadd.f32 %v2599_v63, %v1950_v62  ;;  %v4982_v61 = vld [vmem:[%s5667_s14 + $0x644] sm:$0xf0]  ;;  %v4853_v62 = vld [vmem:[%s5667_s14 + $0x244] sm:$0xf]  ;;  %v3982_v63 = vld [vmem:[%s5667_s14 + $0x248] sm:$0xf0] }
 0x243   : > { %3418 = vst [vmem:[%s5755_s24 + $0x190] sm:$0xff] %v5278_v0  ;;  %v4981_v0 = vld [vmem:[%s5667_s14 + $0x644] sm:$0xf]  ;;  %v4493_v5 = vor.u32 %v4982_v61, %v4492_v60  ;;  %v3985_v9 = vor.u32 %v4853_v62, %v3982_v63 }
 0x244   : > { %5281 = vtanh.f32 %v2600_v1  ;;  %v4494_v1 = vld [vmem:[%s5667_s14 + $0x648] sm:$0xf0] }
 0x246   : > { %v2270_v10 = vpop.f32.mrf.mxu2 }
 0x247   : > { %v2919_v11 = vpop.f32.mrf.mxu3 }
 0x248   : > { %v5280_v14 = vpop.eup %5279  ;;  %v2920_v15 = vadd.f32 %v2919_v11, %v2270_v10  ;;  %v1953_v16 = vpop.f32.mrf.mxu0  ;;  %v4497_v10 = vor.u32 %v4981_v0, %v4494_v1 }
 0x249   : > { %3546 = vst [vmem:[%s5755_s24 + $0x590] sm:$0xff] %v5280_v14  ;;  %v2602_v19 = vpop.f32.mrf.mxu1 }
 0x24a   : > { %v5282_v20 = vpop.eup %5281  ;;  %5283 = vtanh.f32 %v2920_v15  ;;  %v2603_v21 = vadd.f32 %v2602_v19, %v1953_v16 }
 0x24b   : > { %3419 = vst [vmem:[%s5755_s24 + $0x198] sm:$0xff] %v5282_v20  ;;  %1992 = vmatmul.bf16.gmra.mxu0 %v3965_v12  ;;  %2312 = vmatmul.bf16.gmra.mxu2 %v4477_v13 }
 0x24c   : > { %5285 = vtanh.f32 %v2603_v21  ;;  %2641 = vmatmul.bf16.gmra.mxu1 %v3969_v17  ;;  %2961 = vmatmul.bf16.gmra.mxu3 %v4481_v18 }
 0x24e   : > { %v2273_v22 = vpop.f32.mrf.mxu2 }
 0x24f   : > { %v2922_v23 = vpop.f32.mrf.mxu3 }
 0x250   : > { %v5284_v24 = vpop.eup %5283  ;;  %v2923_v25 = vadd.f32 %v2922_v23, %v2273_v22  ;;  %v1955_v26 = vpop.f32.mrf.mxu0  ;;  %v3988_v22 = vld [vmem:[%s5667_s14 + $0x250] sm:$0xf]  ;;  %v4856_v23 = vld [vmem:[%s5667_s14 + $0x254] sm:$0xf0] }
 0x251   : > { %3547 = vst [vmem:[%s5755_s24 + $0x598] sm:$0xff] %v5284_v24  ;;  %v2604_v27 = vpop.f32.mrf.mxu1  ;;  %v4500_v24 = vld [vmem:[%s5667_s14 + $0x650] sm:$0xf]  ;;  %v3989_v32 = vor.u32 %v4856_v23, %v3988_v22 }
 0x252   : > { %v5286_v28 = vpop.eup %5285  ;;  %5287 = vtanh.f32 %v2923_v25  ;;  %v2605_v29 = vadd.f32 %v2604_v27, %v1955_v26  ;;  %v4984_v25 = vld [vmem:[%s5667_s14 + $0x654] sm:$0xf0]  ;;  %v4855_v26 = vld [vmem:[%s5667_s14 + $0x254] sm:$0xf]  ;;  %v3990_v27 = vld [vmem:[%s5667_s14 + $0x258] sm:$0xf0] }
 0x253   : > { %3420 = vst [vmem:[%s5755_s24 + $0x1a0] sm:$0xff] %v5286_v28  ;;  %v4983_v28 = vld [vmem:[%s5667_s14 + $0x654] sm:$0xf]  ;;  %v4501_v33 = vor.u32 %v4984_v25, %v4500_v24  ;;  %v3993_v37 = vor.u32 %v4855_v26, %v3990_v27 }
 0x254   : > { %5289 = vtanh.f32 %v2605_v29  ;;  %v4502_v29 = vld [vmem:[%s5667_s14 + $0x658] sm:$0xf0] }
 0x256   : > { %v2275_v38 = vpop.f32.mrf.mxu2 }
 0x257   : > { %v2924_v39 = vpop.f32.mrf.mxu3 }
 0x258   : > { %v5288_v42 = vpop.eup %5287  ;;  %v2925_v43 = vadd.f32 %v2924_v39, %v2275_v38  ;;  %v1958_v44 = vpop.f32.mrf.mxu0  ;;  %v4505_v38 = vor.u32 %v4983_v28, %v4502_v29 }
 0x259   : > { %3548 = vst [vmem:[%s5755_s24 + $0x5a0] sm:$0xff] %v5288_v42  ;;  %v2607_v47 = vpop.f32.mrf.mxu1 }
 0x25a   : > { %v5290_v48 = vpop.eup %5289  ;;  %5291 = vtanh.f32 %v2925_v43  ;;  %v2608_v49 = vadd.f32 %v2607_v47, %v1958_v44 }
 0x25b   : > { %3421 = vst [vmem:[%s5755_s24 + $0x1a8] sm:$0xff] %v5290_v48  ;;  %1997 = vmatmul.bf16.gmra.mxu0 %v3973_v40  ;;  %2317 = vmatmul.bf16.gmra.mxu2 %v4485_v41 }
 0x25c   : > { %5293 = vtanh.f32 %v2608_v49  ;;  %2646 = vmatmul.bf16.gmra.mxu1 %v3977_v45  ;;  %2966 = vmatmul.bf16.gmra.mxu3 %v4489_v46 }
 0x25e   : > { %v2278_v50 = vpop.f32.mrf.mxu2 }
 0x25f   : > { %v2927_v51 = vpop.f32.mrf.mxu3 }
 0x260   : > { %v5292_v52 = vpop.eup %5291  ;;  %v2928_v53 = vadd.f32 %v2927_v51, %v2278_v50  ;;  %v1960_v54 = vpop.f32.mrf.mxu0  ;;  %v3996_v50 = vld [vmem:[%s5667_s14 + $0x260] sm:$0xf]  ;;  %v4858_v51 = vld [vmem:[%s5667_s14 + $0x264] sm:$0xf0] }
 0x261   : > { %3549 = vst [vmem:[%s5755_s24 + $0x5a8] sm:$0xff] %v5292_v52  ;;  %v2609_v55 = vpop.f32.mrf.mxu1  ;;  %v4508_v52 = vld [vmem:[%s5667_s14 + $0x660] sm:$0xf]  ;;  %v3997_v60 = vor.u32 %v4858_v51, %v3996_v50 }
 0x262   : > { %v5294_v56 = vpop.eup %5293  ;;  %5295 = vtanh.f32 %v2928_v53  ;;  %v2610_v57 = vadd.f32 %v2609_v55, %v1960_v54  ;;  %v4986_v53 = vld [vmem:[%s5667_s14 + $0x664] sm:$0xf0]  ;;  %v4857_v54 = vld [vmem:[%s5667_s14 + $0x264] sm:$0xf]  ;;  %v3998_v55 = vld [vmem:[%s5667_s14 + $0x268] sm:$0xf0] }
 0x263   : > { %3422 = vst [vmem:[%s5755_s24 + $0x1b0] sm:$0xff] %v5294_v56  ;;  %v4985_v56 = vld [vmem:[%s5667_s14 + $0x664] sm:$0xf]  ;;  %v4509_v61 = vor.u32 %v4986_v53, %v4508_v52  ;;  %v4001_v1 = vor.u32 %v4857_v54, %v3998_v55 }
 0x264   : > { %5297 = vtanh.f32 %v2610_v57  ;;  %v4510_v57 = vld [vmem:[%s5667_s14 + $0x668] sm:$0xf0] }
 0x266   : > { %v2280_v2 = vpop.f32.mrf.mxu2 }
 0x267   : > { %v2929_v3 = vpop.f32.mrf.mxu3 }
 0x268   : > { %v5296_v6 = vpop.eup %5295  ;;  %v2930_v7 = vadd.f32 %v2929_v3, %v2280_v2  ;;  %v1963_v8 = vpop.f32.mrf.mxu0  ;;  %v4513_v2 = vor.u32 %v4985_v56, %v4510_v57 }
 0x269   : > { %3550 = vst [vmem:[%s5755_s24 + $0x5b0] sm:$0xff] %v5296_v6  ;;  %v2612_v11 = vpop.f32.mrf.mxu1 }
 0x26a   : > { %v5298_v12 = vpop.eup %5297  ;;  %5299 = vtanh.f32 %v2930_v7  ;;  %v2613_v13 = vadd.f32 %v2612_v11, %v1963_v8 }
 0x26b   : > { %3423 = vst [vmem:[%s5755_s24 + $0x1b8] sm:$0xff] %v5298_v12  ;;  %2002 = vmatmul.bf16.gmra.mxu0 %v3981_v4  ;;  %2322 = vmatmul.bf16.gmra.mxu2 %v4493_v5 }
 0x26c   : > { %5301 = vtanh.f32 %v2613_v13  ;;  %2651 = vmatmul.bf16.gmra.mxu1 %v3985_v9  ;;  %2971 = vmatmul.bf16.gmra.mxu3 %v4497_v10 }
 0x26e   : > { %v2283_v14 = vpop.f32.mrf.mxu2 }
 0x26f   : > { %v2932_v15 = vpop.f32.mrf.mxu3 }
 0x270   : > { %v5300_v16 = vpop.eup %5299  ;;  %v2933_v17 = vadd.f32 %v2932_v15, %v2283_v14  ;;  %v1965_v18 = vpop.f32.mrf.mxu0  ;;  %v4004_v14 = vld [vmem:[%s5667_s14 + $0x270] sm:$0xf]  ;;  %v4860_v15 = vld [vmem:[%s5667_s14 + $0x274] sm:$0xf0] }
 0x271   : > { %3551 = vst [vmem:[%s5755_s24 + $0x5b8] sm:$0xff] %v5300_v16  ;;  %v2614_v19 = vpop.f32.mrf.mxu1  ;;  %v4516_v16 = vld [vmem:[%s5667_s14 + $0x670] sm:$0xf]  ;;  %v4005_v24 = vor.u32 %v4860_v15, %v4004_v14 }
 0x272   : > { %v5302_v20 = vpop.eup %5301  ;;  %5303 = vtanh.f32 %v2933_v17  ;;  %v2615_v21 = vadd.f32 %v2614_v19, %v1965_v18  ;;  %v4988_v17 = vld [vmem:[%s5667_s14 + $0x674] sm:$0xf0]  ;;  %v4859_v18 = vld [vmem:[%s5667_s14 + $0x274] sm:$0xf]  ;;  %v4006_v19 = vld [vmem:[%s5667_s14 + $0x278] sm:$0xf0] }
 0x273   : > { %3424 = vst [vmem:[%s5755_s24 + $0x1c0] sm:$0xff] %v5302_v20  ;;  %v4987_v20 = vld [vmem:[%s5667_s14 + $0x674] sm:$0xf]  ;;  %v4517_v25 = vor.u32 %v4988_v17, %v4516_v16  ;;  %v4009_v29 = vor.u32 %v4859_v18, %v4006_v19 }
 0x274   : > { %5305 = vtanh.f32 %v2615_v21  ;;  %v4518_v21 = vld [vmem:[%s5667_s14 + $0x678] sm:$0xf0] }
 0x276   : > { %v2285_v30 = vpop.f32.mrf.mxu2 }
 0x277   : > { %v2934_v31 = vpop.f32.mrf.mxu3 }
 0x278   : > { %v5304_v34 = vpop.eup %5303  ;;  %v2935_v35 = vadd.f32 %v2934_v31, %v2285_v30  ;;  %v1968_v36 = vpop.f32.mrf.mxu0  ;;  %v4521_v30 = vor.u32 %v4987_v20, %v4518_v21 }
 0x279   : > { %3552 = vst [vmem:[%s5755_s24 + $0x5c0] sm:$0xff] %v5304_v34  ;;  %v2617_v39 = vpop.f32.mrf.mxu1 }
 0x27a   : > { %v5306_v40 = vpop.eup %5305  ;;  %5307 = vtanh.f32 %v2935_v35  ;;  %v2618_v41 = vadd.f32 %v2617_v39, %v1968_v36 }
 0x27b   : > { %3425 = vst [vmem:[%s5755_s24 + $0x1c8] sm:$0xff] %v5306_v40  ;;  %2007 = vmatmul.bf16.gmra.mxu0 %v3989_v32  ;;  %2327 = vmatmul.bf16.gmra.mxu2 %v4501_v33 }
 0x27c   : > { %5309 = vtanh.f32 %v2618_v41  ;;  %2656 = vmatmul.bf16.gmra.mxu1 %v3993_v37  ;;  %2976 = vmatmul.bf16.gmra.mxu3 %v4505_v38 }
 0x27e   : > { %v2288_v42 = vpop.f32.mrf.mxu2 }
 0x27f   : > { %v2937_v43 = vpop.f32.mrf.mxu3 }
 0x280   : > { %v5308_v44 = vpop.eup %5307  ;;  %v2938_v45 = vadd.f32 %v2937_v43, %v2288_v42  ;;  %v1970_v46 = vpop.f32.mrf.mxu0  ;;  %v4012_v42 = vld [vmem:[%s5667_s14 + $0x280] sm:$0xf]  ;;  %v4862_v43 = vld [vmem:[%s5667_s14 + $0x284] sm:$0xf0] }
 0x281   : > { %3553 = vst [vmem:[%s5755_s24 + $0x5c8] sm:$0xff] %v5308_v44  ;;  %v2619_v47 = vpop.f32.mrf.mxu1  ;;  %v4524_v44 = vld [vmem:[%s5667_s14 + $0x680] sm:$0xf]  ;;  %v4013_v52 = vor.u32 %v4862_v43, %v4012_v42 }
 0x282   : > { %v5310_v48 = vpop.eup %5309  ;;  %5311 = vtanh.f32 %v2938_v45  ;;  %v2620_v49 = vadd.f32 %v2619_v47, %v1970_v46  ;;  %v4990_v45 = vld [vmem:[%s5667_s14 + $0x684] sm:$0xf0]  ;;  %v4861_v46 = vld [vmem:[%s5667_s14 + $0x284] sm:$0xf]  ;;  %v4014_v47 = vld [vmem:[%s5667_s14 + $0x288] sm:$0xf0] }
 0x283   : > { %3426 = vst [vmem:[%s5755_s24 + $0x1d0] sm:$0xff] %v5310_v48  ;;  %v4989_v48 = vld [vmem:[%s5667_s14 + $0x684] sm:$0xf]  ;;  %v4525_v53 = vor.u32 %v4990_v45, %v4524_v44  ;;  %v4017_v57 = vor.u32 %v4861_v46, %v4014_v47 }
 0x284   : > { %5313 = vtanh.f32 %v2620_v49  ;;  %v4526_v49 = vld [vmem:[%s5667_s14 + $0x688] sm:$0xf0] }
 0x286   : > { %v2290_v58 = vpop.f32.mrf.mxu2 }
 0x287   : > { %v2939_v59 = vpop.f32.mrf.mxu3 }
 0x288   : > { %v5312_v62 = vpop.eup %5311  ;;  %v2940_v63 = vadd.f32 %v2939_v59, %v2290_v58  ;;  %v1973_v0 = vpop.f32.mrf.mxu0  ;;  %v4529_v58 = vor.u32 %v4989_v48, %v4526_v49 }
 0x289   : > { %3554 = vst [vmem:[%s5755_s24 + $0x5d0] sm:$0xff] %v5312_v62  ;;  %v2622_v3 = vpop.f32.mrf.mxu1 }
 0x28a   : > { %v5314_v4 = vpop.eup %5313  ;;  %5315 = vtanh.f32 %v2940_v63  ;;  %v2623_v5 = vadd.f32 %v2622_v3, %v1973_v0 }
 0x28b   : > { %3427 = vst [vmem:[%s5755_s24 + $0x1d8] sm:$0xff] %v5314_v4  ;;  %2012 = vmatmul.bf16.gmra.mxu0 %v3997_v60  ;;  %2332 = vmatmul.bf16.gmra.mxu2 %v4509_v61 }
 0x28c   : > { %5317 = vtanh.f32 %v2623_v5  ;;  %2661 = vmatmul.bf16.gmra.mxu1 %v4001_v1  ;;  %2981 = vmatmul.bf16.gmra.mxu3 %v4513_v2 }
 0x28e   : > { %v2293_v6 = vpop.f32.mrf.mxu2 }
 0x28f   : > { %v2942_v7 = vpop.f32.mrf.mxu3 }
 0x290   : > { %v5316_v8 = vpop.eup %5315  ;;  %v2943_v9 = vadd.f32 %v2942_v7, %v2293_v6  ;;  %v1975_v10 = vpop.f32.mrf.mxu0  ;;  %v4020_v6 = vld [vmem:[%s5667_s14 + $0x290] sm:$0xf]  ;;  %v4864_v7 = vld [vmem:[%s5667_s14 + $0x294] sm:$0xf0] }
 0x291   : > { %3555 = vst [vmem:[%s5755_s24 + $0x5d8] sm:$0xff] %v5316_v8  ;;  %v2624_v11 = vpop.f32.mrf.mxu1  ;;  %v4532_v8 = vld [vmem:[%s5667_s14 + $0x690] sm:$0xf]  ;;  %v4021_v16 = vor.u32 %v4864_v7, %v4020_v6 }
 0x292   : > { %v5318_v12 = vpop.eup %5317  ;;  %5319 = vtanh.f32 %v2943_v9  ;;  %v2625_v13 = vadd.f32 %v2624_v11, %v1975_v10  ;;  %v4992_v9 = vld [vmem:[%s5667_s14 + $0x694] sm:$0xf0]  ;;  %v4863_v10 = vld [vmem:[%s5667_s14 + $0x294] sm:$0xf]  ;;  %v4022_v11 = vld [vmem:[%s5667_s14 + $0x298] sm:$0xf0] }
 0x293   : > { %3428 = vst [vmem:[%s5755_s24 + $0x1e0] sm:$0xff] %v5318_v12  ;;  %v4991_v12 = vld [vmem:[%s5667_s14 + $0x694] sm:$0xf]  ;;  %v4533_v17 = vor.u32 %v4992_v9, %v4532_v8  ;;  %v4025_v21 = vor.u32 %v4863_v10, %v4022_v11 }
 0x294   : > { %5321 = vtanh.f32 %v2625_v13  ;;  %v4534_v13 = vld [vmem:[%s5667_s14 + $0x698] sm:$0xf0] }
 0x296   : > { %v2295_v22 = vpop.f32.mrf.mxu2 }
 0x297   : > { %v2944_v23 = vpop.f32.mrf.mxu3 }
 0x298   : > { %v5320_v26 = vpop.eup %5319  ;;  %v2945_v27 = vadd.f32 %v2944_v23, %v2295_v22  ;;  %v1978_v28 = vpop.f32.mrf.mxu0  ;;  %v4537_v22 = vor.u32 %v4991_v12, %v4534_v13 }
 0x299   : > { %3556 = vst [vmem:[%s5755_s24 + $0x5e0] sm:$0xff] %v5320_v26  ;;  %v2627_v31 = vpop.f32.mrf.mxu1 }
 0x29a   : > { %v5322_v32 = vpop.eup %5321  ;;  %5323 = vtanh.f32 %v2945_v27  ;;  %v2628_v33 = vadd.f32 %v2627_v31, %v1978_v28 }
 0x29b   : > { %3429 = vst [vmem:[%s5755_s24 + $0x1e8] sm:$0xff] %v5322_v32  ;;  %2017 = vmatmul.bf16.gmra.mxu0 %v4005_v24  ;;  %2337 = vmatmul.bf16.gmra.mxu2 %v4517_v25 }
 0x29c   : > { %5325 = vtanh.f32 %v2628_v33  ;;  %2666 = vmatmul.bf16.gmra.mxu1 %v4009_v29  ;;  %2986 = vmatmul.bf16.gmra.mxu3 %v4521_v30 }
 0x29e   : > { %v2298_v34 = vpop.f32.mrf.mxu2 }
 0x29f   : > { %v2947_v35 = vpop.f32.mrf.mxu3 }
 0x2a0   : > { %v5324_v36 = vpop.eup %5323  ;;  %v2948_v37 = vadd.f32 %v2947_v35, %v2298_v34  ;;  %v1980_v38 = vpop.f32.mrf.mxu0  ;;  %v4028_v34 = vld [vmem:[%s5667_s14 + $0x2a0] sm:$0xf]  ;;  %v4866_v35 = vld [vmem:[%s5667_s14 + $0x2a4] sm:$0xf0] }
 0x2a1   : > { %3557 = vst [vmem:[%s5755_s24 + $0x5e8] sm:$0xff] %v5324_v36  ;;  %v2629_v39 = vpop.f32.mrf.mxu1  ;;  %v4540_v36 = vld [vmem:[%s5667_s14 + $0x6a0] sm:$0xf]  ;;  %v4029_v44 = vor.u32 %v4866_v35, %v4028_v34 }
 0x2a2   : > { %v5326_v40 = vpop.eup %5325  ;;  %5327 = vtanh.f32 %v2948_v37  ;;  %v2630_v41 = vadd.f32 %v2629_v39, %v1980_v38  ;;  %v4994_v37 = vld [vmem:[%s5667_s14 + $0x6a4] sm:$0xf0]  ;;  %v4865_v38 = vld [vmem:[%s5667_s14 + $0x2a4] sm:$0xf]  ;;  %v4030_v39 = vld [vmem:[%s5667_s14 + $0x2a8] sm:$0xf0] }
 0x2a3   : > { %3430 = vst [vmem:[%s5755_s24 + $0x1f0] sm:$0xff] %v5326_v40  ;;  %v4993_v40 = vld [vmem:[%s5667_s14 + $0x6a4] sm:$0xf]  ;;  %v4541_v45 = vor.u32 %v4994_v37, %v4540_v36  ;;  %v4033_v49 = vor.u32 %v4865_v38, %v4030_v39 }
 0x2a4   : > { %5329 = vtanh.f32 %v2630_v41  ;;  %v4542_v41 = vld [vmem:[%s5667_s14 + $0x6a8] sm:$0xf0] }
 0x2a6   : > { %v2300_v50 = vpop.f32.mrf.mxu2 }
 0x2a7   : > { %v2949_v51 = vpop.f32.mrf.mxu3 }
 0x2a8   : > { %v5328_v54 = vpop.eup %5327  ;;  %v2950_v55 = vadd.f32 %v2949_v51, %v2300_v50  ;;  %v1983_v56 = vpop.f32.mrf.mxu0  ;;  %v4545_v50 = vor.u32 %v4993_v40, %v4542_v41 }
 0x2a9   : > { %3558 = vst [vmem:[%s5755_s24 + $0x5f0] sm:$0xff] %v5328_v54  ;;  %v2632_v59 = vpop.f32.mrf.mxu1 }
 0x2aa   : > { %v5330_v60 = vpop.eup %5329  ;;  %5331 = vtanh.f32 %v2950_v55  ;;  %v2633_v61 = vadd.f32 %v2632_v59, %v1983_v56 }
 0x2ab   : > { %3431 = vst [vmem:[%s5755_s24 + $0x1f8] sm:$0xff] %v5330_v60  ;;  %2022 = vmatmul.bf16.gmra.mxu0 %v4013_v52  ;;  %2342 = vmatmul.bf16.gmra.mxu2 %v4525_v53 }
 0x2ac   : > { %5333 = vtanh.f32 %v2633_v61  ;;  %2671 = vmatmul.bf16.gmra.mxu1 %v4017_v57  ;;  %2991 = vmatmul.bf16.gmra.mxu3 %v4529_v58 }
 0x2ae   : > { %v2303_v62 = vpop.f32.mrf.mxu2 }
 0x2af   : > { %v2952_v63 = vpop.f32.mrf.mxu3 }
 0x2b0   : > { %v5332_v0 = vpop.eup %5331  ;;  %v2953_v1 = vadd.f32 %v2952_v63, %v2303_v62  ;;  %v1985_v2 = vpop.f32.mrf.mxu0  ;;  %v4036_v62 = vld [vmem:[%s5667_s14 + $0x2b0] sm:$0xf]  ;;  %v4868_v63 = vld [vmem:[%s5667_s14 + $0x2b4] sm:$0xf0] }
 0x2b1   : > { %3559 = vst [vmem:[%s5755_s24 + $0x5f8] sm:$0xff] %v5332_v0  ;;  %v2634_v3 = vpop.f32.mrf.mxu1  ;;  %v4548_v0 = vld [vmem:[%s5667_s14 + $0x6b0] sm:$0xf]  ;;  %v4037_v8 = vor.u32 %v4868_v63, %v4036_v62 }
 0x2b2   : > { %v5334_v4 = vpop.eup %5333  ;;  %5335 = vtanh.f32 %v2953_v1  ;;  %v2635_v5 = vadd.f32 %v2634_v3, %v1985_v2  ;;  %v4996_v1 = vld [vmem:[%s5667_s14 + $0x6b4] sm:$0xf0]  ;;  %v4867_v2 = vld [vmem:[%s5667_s14 + $0x2b4] sm:$0xf]  ;;  %v4038_v3 = vld [vmem:[%s5667_s14 + $0x2b8] sm:$0xf0] }
 0x2b3   : > { %3432 = vst [vmem:[%s5755_s24 + $0x200] sm:$0xff] %v5334_v4  ;;  %v4995_v4 = vld [vmem:[%s5667_s14 + $0x6b4] sm:$0xf]  ;;  %v4549_v9 = vor.u32 %v4996_v1, %v4548_v0  ;;  %v4041_v13 = vor.u32 %v4867_v2, %v4038_v3 }
 0x2b4   : > { %5337 = vtanh.f32 %v2635_v5  ;;  %v4550_v5 = vld [vmem:[%s5667_s14 + $0x6b8] sm:$0xf0] }
 0x2b6   : > { %v2305_v14 = vpop.f32.mrf.mxu2 }
 0x2b7   : > { %v2954_v15 = vpop.f32.mrf.mxu3 }
 0x2b8   : > { %v5336_v18 = vpop.eup %5335  ;;  %v2955_v19 = vadd.f32 %v2954_v15, %v2305_v14  ;;  %v1988_v20 = vpop.f32.mrf.mxu0  ;;  %v4553_v14 = vor.u32 %v4995_v4, %v4550_v5 }
 0x2b9   : > { %3560 = vst [vmem:[%s5755_s24 + $0x600] sm:$0xff] %v5336_v18  ;;  %v2637_v23 = vpop.f32.mrf.mxu1 }
 0x2ba   : > { %v5338_v24 = vpop.eup %5337  ;;  %5339 = vtanh.f32 %v2955_v19  ;;  %v2638_v25 = vadd.f32 %v2637_v23, %v1988_v20 }
 0x2bb   : > { %3433 = vst [vmem:[%s5755_s24 + $0x208] sm:$0xff] %v5338_v24  ;;  %2027 = vmatmul.bf16.gmra.mxu0 %v4021_v16  ;;  %2347 = vmatmul.bf16.gmra.mxu2 %v4533_v17 }
 0x2bc   : > { %5341 = vtanh.f32 %v2638_v25  ;;  %2676 = vmatmul.bf16.gmra.mxu1 %v4025_v21  ;;  %2996 = vmatmul.bf16.gmra.mxu3 %v4537_v22 }
 0x2be   : > { %v2308_v26 = vpop.f32.mrf.mxu2 }
 0x2bf   : > { %v2957_v27 = vpop.f32.mrf.mxu3 }
 0x2c0   : > { %v5340_v28 = vpop.eup %5339  ;;  %v2958_v29 = vadd.f32 %v2957_v27, %v2308_v26  ;;  %v1990_v30 = vpop.f32.mrf.mxu0  ;;  %v4044_v26 = vld [vmem:[%s5667_s14 + $0x2c0] sm:$0xf]  ;;  %v4870_v27 = vld [vmem:[%s5667_s14 + $0x2c4] sm:$0xf0] }
 0x2c1   : > { %3561 = vst [vmem:[%s5755_s24 + $0x608] sm:$0xff] %v5340_v28  ;;  %v2639_v31 = vpop.f32.mrf.mxu1  ;;  %v4556_v28 = vld [vmem:[%s5667_s14 + $0x6c0] sm:$0xf]  ;;  %v4045_v36 = vor.u32 %v4870_v27, %v4044_v26 }
 0x2c2   : > { %v5342_v32 = vpop.eup %5341  ;;  %5343 = vtanh.f32 %v2958_v29  ;;  %v2640_v33 = vadd.f32 %v2639_v31, %v1990_v30  ;;  %v4998_v29 = vld [vmem:[%s5667_s14 + $0x6c4] sm:$0xf0]  ;;  %v4869_v30 = vld [vmem:[%s5667_s14 + $0x2c4] sm:$0xf]  ;;  %v4046_v31 = vld [vmem:[%s5667_s14 + $0x2c8] sm:$0xf0] }
 0x2c3   : > { %3434 = vst [vmem:[%s5755_s24 + $0x210] sm:$0xff] %v5342_v32  ;;  %v4997_v32 = vld [vmem:[%s5667_s14 + $0x6c4] sm:$0xf]  ;;  %v4557_v37 = vor.u32 %v4998_v29, %v4556_v28  ;;  %v4049_v41 = vor.u32 %v4869_v30, %v4046_v31 }
 0x2c4   : > { %5345 = vtanh.f32 %v2640_v33  ;;  %v4558_v33 = vld [vmem:[%s5667_s14 + $0x6c8] sm:$0xf0] }
 0x2c6   : > { %v2310_v42 = vpop.f32.mrf.mxu2 }
 0x2c7   : > { %v2959_v43 = vpop.f32.mrf.mxu3 }
 0x2c8   : > { %v5344_v46 = vpop.eup %5343  ;;  %v2960_v47 = vadd.f32 %v2959_v43, %v2310_v42  ;;  %v1993_v48 = vpop.f32.mrf.mxu0  ;;  %v4561_v42 = vor.u32 %v4997_v32, %v4558_v33 }
 0x2c9   : > { %3562 = vst [vmem:[%s5755_s24 + $0x610] sm:$0xff] %v5344_v46  ;;  %v2642_v51 = vpop.f32.mrf.mxu1 }
 0x2ca   : > { %v5346_v52 = vpop.eup %5345  ;;  %5347 = vtanh.f32 %v2960_v47  ;;  %v2643_v53 = vadd.f32 %v2642_v51, %v1993_v48 }
 0x2cb   : > { %3435 = vst [vmem:[%s5755_s24 + $0x218] sm:$0xff] %v5346_v52  ;;  %2032 = vmatmul.bf16.gmra.mxu0 %v4029_v44  ;;  %2352 = vmatmul.bf16.gmra.mxu2 %v4541_v45 }
 0x2cc   : > { %5349 = vtanh.f32 %v2643_v53  ;;  %2681 = vmatmul.bf16.gmra.mxu1 %v4033_v49  ;;  %3001 = vmatmul.bf16.gmra.mxu3 %v4545_v50 }
 0x2ce   : > { %v2313_v54 = vpop.f32.mrf.mxu2 }
 0x2cf   : > { %v2962_v55 = vpop.f32.mrf.mxu3 }
 0x2d0   : > { %v5348_v56 = vpop.eup %5347  ;;  %v2963_v57 = vadd.f32 %v2962_v55, %v2313_v54  ;;  %v1995_v58 = vpop.f32.mrf.mxu0  ;;  %v4052_v54 = vld [vmem:[%s5667_s14 + $0x2d0] sm:$0xf]  ;;  %v4872_v55 = vld [vmem:[%s5667_s14 + $0x2d4] sm:$0xf0] }
 0x2d1   : > { %3563 = vst [vmem:[%s5755_s24 + $0x618] sm:$0xff] %v5348_v56  ;;  %v2644_v59 = vpop.f32.mrf.mxu1  ;;  %v4564_v56 = vld [vmem:[%s5667_s14 + $0x6d0] sm:$0xf]  ;;  %v4053_v0 = vor.u32 %v4872_v55, %v4052_v54 }
 0x2d2   : > { %v5350_v60 = vpop.eup %5349  ;;  %5351 = vtanh.f32 %v2963_v57  ;;  %v2645_v61 = vadd.f32 %v2644_v59, %v1995_v58  ;;  %v5000_v57 = vld [vmem:[%s5667_s14 + $0x6d4] sm:$0xf0]  ;;  %v4871_v58 = vld [vmem:[%s5667_s14 + $0x2d4] sm:$0xf]  ;;  %v4054_v59 = vld [vmem:[%s5667_s14 + $0x2d8] sm:$0xf0] }
 0x2d3   : > { %3436 = vst [vmem:[%s5755_s24 + $0x220] sm:$0xff] %v5350_v60  ;;  %v4999_v60 = vld [vmem:[%s5667_s14 + $0x6d4] sm:$0xf]  ;;  %v4565_v1 = vor.u32 %v5000_v57, %v4564_v56  ;;  %v4057_v5 = vor.u32 %v4871_v58, %v4054_v59 }
 0x2d4   : > { %5353 = vtanh.f32 %v2645_v61  ;;  %v4566_v61 = vld [vmem:[%s5667_s14 + $0x6d8] sm:$0xf0] }
 0x2d6   : > { %v2315_v6 = vpop.f32.mrf.mxu2 }
 0x2d7   : > { %v2964_v7 = vpop.f32.mrf.mxu3 }
 0x2d8   : > { %v5352_v10 = vpop.eup %5351  ;;  %v2965_v11 = vadd.f32 %v2964_v7, %v2315_v6  ;;  %v1998_v12 = vpop.f32.mrf.mxu0  ;;  %v4569_v6 = vor.u32 %v4999_v60, %v4566_v61 }
 0x2d9   : > { %3564 = vst [vmem:[%s5755_s24 + $0x620] sm:$0xff] %v5352_v10  ;;  %v2647_v15 = vpop.f32.mrf.mxu1 }
 0x2da   : > { %v5354_v16 = vpop.eup %5353  ;;  %5355 = vtanh.f32 %v2965_v11  ;;  %v2648_v17 = vadd.f32 %v2647_v15, %v1998_v12 }
 0x2db   : > { %3437 = vst [vmem:[%s5755_s24 + $0x228] sm:$0xff] %v5354_v16  ;;  %2037 = vmatmul.bf16.gmra.mxu0 %v4037_v8  ;;  %2357 = vmatmul.bf16.gmra.mxu2 %v4549_v9 }
 0x2dc   : > { %5357 = vtanh.f32 %v2648_v17  ;;  %2686 = vmatmul.bf16.gmra.mxu1 %v4041_v13  ;;  %3006 = vmatmul.bf16.gmra.mxu3 %v4553_v14 }
 0x2de   : > { %v2318_v18 = vpop.f32.mrf.mxu2 }
 0x2df   : > { %v2967_v19 = vpop.f32.mrf.mxu3 }
 0x2e0   : > { %v5356_v20 = vpop.eup %5355  ;;  %v2968_v21 = vadd.f32 %v2967_v19, %v2318_v18  ;;  %v2000_v22 = vpop.f32.mrf.mxu0  ;;  %v4060_v18 = vld [vmem:[%s5667_s14 + $0x2e0] sm:$0xf]  ;;  %v4874_v19 = vld [vmem:[%s5667_s14 + $0x2e4] sm:$0xf0] }
 0x2e1   : > { %3565 = vst [vmem:[%s5755_s24 + $0x628] sm:$0xff] %v5356_v20  ;;  %v2649_v23 = vpop.f32.mrf.mxu1  ;;  %v4572_v20 = vld [vmem:[%s5667_s14 + $0x6e0] sm:$0xf]  ;;  %v4061_v28 = vor.u32 %v4874_v19, %v4060_v18 }
 0x2e2   : > { %v5358_v24 = vpop.eup %5357  ;;  %5359 = vtanh.f32 %v2968_v21  ;;  %v2650_v25 = vadd.f32 %v2649_v23, %v2000_v22  ;;  %v5002_v21 = vld [vmem:[%s5667_s14 + $0x6e4] sm:$0xf0]  ;;  %v4873_v22 = vld [vmem:[%s5667_s14 + $0x2e4] sm:$0xf]  ;;  %v4062_v23 = vld [vmem:[%s5667_s14 + $0x2e8] sm:$0xf0] }
 0x2e3   : > { %3438 = vst [vmem:[%s5755_s24 + $0x230] sm:$0xff] %v5358_v24  ;;  %v5001_v24 = vld [vmem:[%s5667_s14 + $0x6e4] sm:$0xf]  ;;  %v4573_v29 = vor.u32 %v5002_v21, %v4572_v20  ;;  %v4065_v33 = vor.u32 %v4873_v22, %v4062_v23 }
 0x2e4   : > { %5361 = vtanh.f32 %v2650_v25  ;;  %v4574_v25 = vld [vmem:[%s5667_s14 + $0x6e8] sm:$0xf0] }
 0x2e6   : > { %v2320_v34 = vpop.f32.mrf.mxu2 }
 0x2e7   : > { %v2969_v35 = vpop.f32.mrf.mxu3 }
 0x2e8   : > { %v5360_v38 = vpop.eup %5359  ;;  %v2970_v39 = vadd.f32 %v2969_v35, %v2320_v34  ;;  %v2003_v40 = vpop.f32.mrf.mxu0  ;;  %v4577_v34 = vor.u32 %v5001_v24, %v4574_v25 }
 0x2e9   : > { %3566 = vst [vmem:[%s5755_s24 + $0x630] sm:$0xff] %v5360_v38  ;;  %v2652_v43 = vpop.f32.mrf.mxu1 }
 0x2ea   : > { %v5362_v44 = vpop.eup %5361  ;;  %5363 = vtanh.f32 %v2970_v39  ;;  %v2653_v45 = vadd.f32 %v2652_v43, %v2003_v40 }
 0x2eb   : > { %3439 = vst [vmem:[%s5755_s24 + $0x238] sm:$0xff] %v5362_v44  ;;  %2042 = vmatmul.bf16.gmra.mxu0 %v4045_v36  ;;  %2362 = vmatmul.bf16.gmra.mxu2 %v4557_v37 }
 0x2ec   : > { %5365 = vtanh.f32 %v2653_v45  ;;  %2691 = vmatmul.bf16.gmra.mxu1 %v4049_v41  ;;  %3011 = vmatmul.bf16.gmra.mxu3 %v4561_v42 }
 0x2ee   : > { %v2323_v46 = vpop.f32.mrf.mxu2 }
 0x2ef   : > { %v2972_v47 = vpop.f32.mrf.mxu3 }
 0x2f0   : > { %v5364_v48 = vpop.eup %5363  ;;  %v2973_v49 = vadd.f32 %v2972_v47, %v2323_v46  ;;  %v2005_v50 = vpop.f32.mrf.mxu0  ;;  %v4068_v46 = vld [vmem:[%s5667_s14 + $0x2f0] sm:$0xf]  ;;  %v4876_v47 = vld [vmem:[%s5667_s14 + $0x2f4] sm:$0xf0] }
 0x2f1   : > { %3567 = vst [vmem:[%s5755_s24 + $0x638] sm:$0xff] %v5364_v48  ;;  %v2654_v51 = vpop.f32.mrf.mxu1  ;;  %v4580_v48 = vld [vmem:[%s5667_s14 + $0x6f0] sm:$0xf]  ;;  %v4069_v56 = vor.u32 %v4876_v47, %v4068_v46 }
 0x2f2   : > { %v5366_v52 = vpop.eup %5365  ;;  %5367 = vtanh.f32 %v2973_v49  ;;  %v2655_v53 = vadd.f32 %v2654_v51, %v2005_v50  ;;  %v5004_v49 = vld [vmem:[%s5667_s14 + $0x6f4] sm:$0xf0]  ;;  %v4875_v50 = vld [vmem:[%s5667_s14 + $0x2f4] sm:$0xf]  ;;  %v4070_v51 = vld [vmem:[%s5667_s14 + $0x2f8] sm:$0xf0] }
 0x2f3   : > { %3440 = vst [vmem:[%s5755_s24 + $0x240] sm:$0xff] %v5366_v52  ;;  %v5003_v52 = vld [vmem:[%s5667_s14 + $0x6f4] sm:$0xf]  ;;  %v4581_v57 = vor.u32 %v5004_v49, %v4580_v48  ;;  %v4073_v61 = vor.u32 %v4875_v50, %v4070_v51 }
 0x2f4   : > { %5369 = vtanh.f32 %v2655_v53  ;;  %v4582_v53 = vld [vmem:[%s5667_s14 + $0x6f8] sm:$0xf0] }
 0x2f6   : > { %v2325_v62 = vpop.f32.mrf.mxu2 }
 0x2f7   : > { %v2974_v63 = vpop.f32.mrf.mxu3 }
 0x2f8   : > { %v5368_v2 = vpop.eup %5367  ;;  %v2975_v3 = vadd.f32 %v2974_v63, %v2325_v62  ;;  %v2008_v4 = vpop.f32.mrf.mxu0  ;;  %v4585_v62 = vor.u32 %v5003_v52, %v4582_v53 }
 0x2f9   : > { %3568 = vst [vmem:[%s5755_s24 + $0x640] sm:$0xff] %v5368_v2  ;;  %v2657_v7 = vpop.f32.mrf.mxu1 }
 0x2fa   : > { %v5370_v8 = vpop.eup %5369  ;;  %5371 = vtanh.f32 %v2975_v3  ;;  %v2658_v9 = vadd.f32 %v2657_v7, %v2008_v4 }
 0x2fb   : > { %3441 = vst [vmem:[%s5755_s24 + $0x248] sm:$0xff] %v5370_v8  ;;  %2047 = vmatmul.bf16.gmra.mxu0 %v4053_v0  ;;  %2367 = vmatmul.bf16.gmra.mxu2 %v4565_v1 }
 0x2fc   : > { %5373 = vtanh.f32 %v2658_v9  ;;  %2696 = vmatmul.bf16.gmra.mxu1 %v4057_v5  ;;  %3016 = vmatmul.bf16.gmra.mxu3 %v4569_v6 }
 0x2fe   : > { %v2328_v10 = vpop.f32.mrf.mxu2 }
 0x2ff   : > { %v2977_v11 = vpop.f32.mrf.mxu3 }
 0x300   : > { %v5372_v12 = vpop.eup %5371  ;;  %v2978_v13 = vadd.f32 %v2977_v11, %v2328_v10  ;;  %v2010_v14 = vpop.f32.mrf.mxu0  ;;  %v4076_v10 = vld [vmem:[%s5667_s14 + $0x300] sm:$0xf]  ;;  %v4878_v11 = vld [vmem:[%s5667_s14 + $0x304] sm:$0xf0] }
 0x301   : > { %3569 = vst [vmem:[%s5755_s24 + $0x648] sm:$0xff] %v5372_v12  ;;  %v2659_v15 = vpop.f32.mrf.mxu1  ;;  %v4588_v12 = vld [vmem:[%s5667_s14 + $0x700] sm:$0xf]  ;;  %v4077_v20 = vor.u32 %v4878_v11, %v4076_v10 }
 0x302   : > { %v5374_v16 = vpop.eup %5373  ;;  %5375 = vtanh.f32 %v2978_v13  ;;  %v2660_v17 = vadd.f32 %v2659_v15, %v2010_v14  ;;  %v5006_v13 = vld [vmem:[%s5667_s14 + $0x704] sm:$0xf0]  ;;  %v4877_v14 = vld [vmem:[%s5667_s14 + $0x304] sm:$0xf]  ;;  %v4078_v15 = vld [vmem:[%s5667_s14 + $0x308] sm:$0xf0] }
 0x303   : > { %3442 = vst [vmem:[%s5755_s24 + $0x250] sm:$0xff] %v5374_v16  ;;  %v5005_v16 = vld [vmem:[%s5667_s14 + $0x704] sm:$0xf]  ;;  %v4589_v21 = vor.u32 %v5006_v13, %v4588_v12  ;;  %v4081_v25 = vor.u32 %v4877_v14, %v4078_v15 }
 0x304   : > { %5377 = vtanh.f32 %v2660_v17  ;;  %v4590_v17 = vld [vmem:[%s5667_s14 + $0x708] sm:$0xf0] }
 0x306   : > { %v2330_v26 = vpop.f32.mrf.mxu2 }
 0x307   : > { %v2979_v27 = vpop.f32.mrf.mxu3 }
 0x308   : > { %v5376_v30 = vpop.eup %5375  ;;  %v2980_v31 = vadd.f32 %v2979_v27, %v2330_v26  ;;  %v2013_v32 = vpop.f32.mrf.mxu0  ;;  %v4593_v26 = vor.u32 %v5005_v16, %v4590_v17 }
 0x309   : > { %3570 = vst [vmem:[%s5755_s24 + $0x650] sm:$0xff] %v5376_v30  ;;  %v2662_v35 = vpop.f32.mrf.mxu1 }
 0x30a   : > { %v5378_v36 = vpop.eup %5377  ;;  %5379 = vtanh.f32 %v2980_v31  ;;  %v2663_v37 = vadd.f32 %v2662_v35, %v2013_v32 }
 0x30b   : > { %3443 = vst [vmem:[%s5755_s24 + $0x258] sm:$0xff] %v5378_v36  ;;  %2052 = vmatmul.bf16.gmra.mxu0 %v4061_v28  ;;  %2372 = vmatmul.bf16.gmra.mxu2 %v4573_v29 }
 0x30c   : > { %5381 = vtanh.f32 %v2663_v37  ;;  %2701 = vmatmul.bf16.gmra.mxu1 %v4065_v33  ;;  %3021 = vmatmul.bf16.gmra.mxu3 %v4577_v34 }
 0x30e   : > { %v2333_v38 = vpop.f32.mrf.mxu2 }
 0x30f   : > { %v2982_v39 = vpop.f32.mrf.mxu3 }
 0x310   : > { %v5380_v40 = vpop.eup %5379  ;;  %v2983_v41 = vadd.f32 %v2982_v39, %v2333_v38  ;;  %v2015_v42 = vpop.f32.mrf.mxu0  ;;  %v4084_v38 = vld [vmem:[%s5667_s14 + $0x310] sm:$0xf]  ;;  %v4880_v39 = vld [vmem:[%s5667_s14 + $0x314] sm:$0xf0] }
 0x311   : > { %3571 = vst [vmem:[%s5755_s24 + $0x658] sm:$0xff] %v5380_v40  ;;  %v2664_v43 = vpop.f32.mrf.mxu1  ;;  %v4596_v40 = vld [vmem:[%s5667_s14 + $0x710] sm:$0xf]  ;;  %v4085_v48 = vor.u32 %v4880_v39, %v4084_v38 }
 0x312   : > { %v5382_v44 = vpop.eup %5381  ;;  %5383 = vtanh.f32 %v2983_v41  ;;  %v2665_v45 = vadd.f32 %v2664_v43, %v2015_v42  ;;  %v5008_v41 = vld [vmem:[%s5667_s14 + $0x714] sm:$0xf0]  ;;  %v4879_v42 = vld [vmem:[%s5667_s14 + $0x314] sm:$0xf]  ;;  %v4086_v43 = vld [vmem:[%s5667_s14 + $0x318] sm:$0xf0] }
 0x313   : > { %3444 = vst [vmem:[%s5755_s24 + $0x260] sm:$0xff] %v5382_v44  ;;  %v5007_v44 = vld [vmem:[%s5667_s14 + $0x714] sm:$0xf]  ;;  %v4597_v49 = vor.u32 %v5008_v41, %v4596_v40  ;;  %v4089_v53 = vor.u32 %v4879_v42, %v4086_v43 }
 0x314   : > { %5385 = vtanh.f32 %v2665_v45  ;;  %v4598_v45 = vld [vmem:[%s5667_s14 + $0x718] sm:$0xf0] }
 0x316   : > { %v2335_v54 = vpop.f32.mrf.mxu2 }
 0x317   : > { %v2984_v55 = vpop.f32.mrf.mxu3 }
 0x318   : > { %v5384_v58 = vpop.eup %5383  ;;  %v2985_v59 = vadd.f32 %v2984_v55, %v2335_v54  ;;  %v2018_v60 = vpop.f32.mrf.mxu0  ;;  %v4601_v54 = vor.u32 %v5007_v44, %v4598_v45 }
 0x319   : > { %3572 = vst [vmem:[%s5755_s24 + $0x660] sm:$0xff] %v5384_v58  ;;  %v2667_v63 = vpop.f32.mrf.mxu1 }
 0x31a   : > { %v5386_v0 = vpop.eup %5385  ;;  %5387 = vtanh.f32 %v2985_v59  ;;  %v2668_v1 = vadd.f32 %v2667_v63, %v2018_v60 }
 0x31b   : > { %3445 = vst [vmem:[%s5755_s24 + $0x268] sm:$0xff] %v5386_v0  ;;  %2057 = vmatmul.bf16.gmra.mxu0 %v4069_v56  ;;  %2377 = vmatmul.bf16.gmra.mxu2 %v4581_v57 }
 0x31c   : > { %5389 = vtanh.f32 %v2668_v1  ;;  %2706 = vmatmul.bf16.gmra.mxu1 %v4073_v61  ;;  %3026 = vmatmul.bf16.gmra.mxu3 %v4585_v62 }
 0x31e   : > { %v2338_v2 = vpop.f32.mrf.mxu2 }
 0x31f   : > { %v2987_v3 = vpop.f32.mrf.mxu3 }
 0x320   : > { %v5388_v4 = vpop.eup %5387  ;;  %v2988_v5 = vadd.f32 %v2987_v3, %v2338_v2  ;;  %v2020_v6 = vpop.f32.mrf.mxu0  ;;  %v4092_v2 = vld [vmem:[%s5667_s14 + $0x320] sm:$0xf]  ;;  %v4882_v3 = vld [vmem:[%s5667_s14 + $0x324] sm:$0xf0] }
 0x321   : > { %3573 = vst [vmem:[%s5755_s24 + $0x668] sm:$0xff] %v5388_v4  ;;  %v2669_v7 = vpop.f32.mrf.mxu1  ;;  %v4604_v4 = vld [vmem:[%s5667_s14 + $0x720] sm:$0xf]  ;;  %v4093_v12 = vor.u32 %v4882_v3, %v4092_v2 }
 0x322   : > { %v5390_v8 = vpop.eup %5389  ;;  %5391 = vtanh.f32 %v2988_v5  ;;  %v2670_v9 = vadd.f32 %v2669_v7, %v2020_v6  ;;  %v5010_v5 = vld [vmem:[%s5667_s14 + $0x724] sm:$0xf0]  ;;  %v4881_v6 = vld [vmem:[%s5667_s14 + $0x324] sm:$0xf]  ;;  %v4094_v7 = vld [vmem:[%s5667_s14 + $0x328] sm:$0xf0] }
 0x323   : > { %3446 = vst [vmem:[%s5755_s24 + $0x270] sm:$0xff] %v5390_v8  ;;  %v5009_v8 = vld [vmem:[%s5667_s14 + $0x724] sm:$0xf]  ;;  %v4605_v13 = vor.u32 %v5010_v5, %v4604_v4  ;;  %v4097_v17 = vor.u32 %v4881_v6, %v4094_v7 }
 0x324   : > { %5393 = vtanh.f32 %v2670_v9  ;;  %v4606_v9 = vld [vmem:[%s5667_s14 + $0x728] sm:$0xf0] }
 0x326   : > { %v2340_v18 = vpop.f32.mrf.mxu2 }
 0x327   : > { %v2989_v19 = vpop.f32.mrf.mxu3 }
 0x328   : > { %v5392_v22 = vpop.eup %5391  ;;  %v2990_v23 = vadd.f32 %v2989_v19, %v2340_v18  ;;  %v2023_v24 = vpop.f32.mrf.mxu0  ;;  %v4609_v18 = vor.u32 %v5009_v8, %v4606_v9 }
 0x329   : > { %3574 = vst [vmem:[%s5755_s24 + $0x670] sm:$0xff] %v5392_v22  ;;  %v2672_v27 = vpop.f32.mrf.mxu1 }
 0x32a   : > { %v5394_v28 = vpop.eup %5393  ;;  %5395 = vtanh.f32 %v2990_v23  ;;  %v2673_v29 = vadd.f32 %v2672_v27, %v2023_v24 }
 0x32b   : > { %3447 = vst [vmem:[%s5755_s24 + $0x278] sm:$0xff] %v5394_v28  ;;  %2062 = vmatmul.bf16.gmra.mxu0 %v4077_v20  ;;  %2382 = vmatmul.bf16.gmra.mxu2 %v4589_v21 }
 0x32c   : > { %5397 = vtanh.f32 %v2673_v29  ;;  %2711 = vmatmul.bf16.gmra.mxu1 %v4081_v25  ;;  %3031 = vmatmul.bf16.gmra.mxu3 %v4593_v26 }
 0x32e   : > { %v2343_v30 = vpop.f32.mrf.mxu2 }
 0x32f   : > { %v2992_v31 = vpop.f32.mrf.mxu3 }
 0x330   : > { %v5396_v32 = vpop.eup %5395  ;;  %v2993_v33 = vadd.f32 %v2992_v31, %v2343_v30  ;;  %v2025_v34 = vpop.f32.mrf.mxu0  ;;  %v4100_v30 = vld [vmem:[%s5667_s14 + $0x330] sm:$0xf]  ;;  %v4884_v31 = vld [vmem:[%s5667_s14 + $0x334] sm:$0xf0] }
 0x331   : > { %3575 = vst [vmem:[%s5755_s24 + $0x678] sm:$0xff] %v5396_v32  ;;  %v2674_v35 = vpop.f32.mrf.mxu1  ;;  %v4612_v32 = vld [vmem:[%s5667_s14 + $0x730] sm:$0xf]  ;;  %v4101_v40 = vor.u32 %v4884_v31, %v4100_v30 }
 0x332   : > { %v5398_v36 = vpop.eup %5397  ;;  %5399 = vtanh.f32 %v2993_v33  ;;  %v2675_v37 = vadd.f32 %v2674_v35, %v2025_v34  ;;  %v5012_v33 = vld [vmem:[%s5667_s14 + $0x734] sm:$0xf0]  ;;  %v4883_v34 = vld [vmem:[%s5667_s14 + $0x334] sm:$0xf]  ;;  %v4102_v35 = vld [vmem:[%s5667_s14 + $0x338] sm:$0xf0] }
 0x333   : > { %3448 = vst [vmem:[%s5755_s24 + $0x280] sm:$0xff] %v5398_v36  ;;  %v5011_v36 = vld [vmem:[%s5667_s14 + $0x734] sm:$0xf]  ;;  %v4613_v41 = vor.u32 %v5012_v33, %v4612_v32  ;;  %v4105_v45 = vor.u32 %v4883_v34, %v4102_v35 }
 0x334   : > { %5401 = vtanh.f32 %v2675_v37  ;;  %v4614_v37 = vld [vmem:[%s5667_s14 + $0x738] sm:$0xf0] }
 0x336   : > { %v2345_v46 = vpop.f32.mrf.mxu2 }
 0x337   : > { %v2994_v47 = vpop.f32.mrf.mxu3 }
 0x338   : > { %v5400_v50 = vpop.eup %5399  ;;  %v2995_v51 = vadd.f32 %v2994_v47, %v2345_v46  ;;  %v2028_v52 = vpop.f32.mrf.mxu0  ;;  %v4617_v46 = vor.u32 %v5011_v36, %v4614_v37 }
 0x339   : > { %3576 = vst [vmem:[%s5755_s24 + $0x680] sm:$0xff] %v5400_v50  ;;  %v2677_v55 = vpop.f32.mrf.mxu1 }
 0x33a   : > { %v5402_v56 = vpop.eup %5401  ;;  %5403 = vtanh.f32 %v2995_v51  ;;  %v2678_v57 = vadd.f32 %v2677_v55, %v2028_v52 }
 0x33b   : > { %3449 = vst [vmem:[%s5755_s24 + $0x288] sm:$0xff] %v5402_v56  ;;  %2067 = vmatmul.bf16.gmra.mxu0 %v4085_v48  ;;  %2387 = vmatmul.bf16.gmra.mxu2 %v4597_v49 }
 0x33c   : > { %5405 = vtanh.f32 %v2678_v57  ;;  %2716 = vmatmul.bf16.gmra.mxu1 %v4089_v53  ;;  %3036 = vmatmul.bf16.gmra.mxu3 %v4601_v54 }
 0x33e   : > { %v2348_v58 = vpop.f32.mrf.mxu2 }
 0x33f   : > { %v2997_v59 = vpop.f32.mrf.mxu3 }
 0x340   : > { %v5404_v60 = vpop.eup %5403  ;;  %v2998_v61 = vadd.f32 %v2997_v59, %v2348_v58  ;;  %v2030_v62 = vpop.f32.mrf.mxu0  ;;  %v4108_v58 = vld [vmem:[%s5667_s14 + $0x340] sm:$0xf]  ;;  %v4886_v59 = vld [vmem:[%s5667_s14 + $0x344] sm:$0xf0] }
 0x341   : > { %3577 = vst [vmem:[%s5755_s24 + $0x688] sm:$0xff] %v5404_v60  ;;  %v2679_v63 = vpop.f32.mrf.mxu1  ;;  %v4620_v60 = vld [vmem:[%s5667_s14 + $0x740] sm:$0xf]  ;;  %v4109_v4 = vor.u32 %v4886_v59, %v4108_v58 }
 0x342   : > { %v5406_v0 = vpop.eup %5405  ;;  %5407 = vtanh.f32 %v2998_v61  ;;  %v2680_v1 = vadd.f32 %v2679_v63, %v2030_v62  ;;  %v5014_v61 = vld [vmem:[%s5667_s14 + $0x744] sm:$0xf0]  ;;  %v4885_v62 = vld [vmem:[%s5667_s14 + $0x344] sm:$0xf]  ;;  %v4110_v63 = vld [vmem:[%s5667_s14 + $0x348] sm:$0xf0] }
 0x343   : > { %3450 = vst [vmem:[%s5755_s24 + $0x290] sm:$0xff] %v5406_v0  ;;  %v5013_v0 = vld [vmem:[%s5667_s14 + $0x744] sm:$0xf]  ;;  %v4621_v5 = vor.u32 %v5014_v61, %v4620_v60  ;;  %v4113_v9 = vor.u32 %v4885_v62, %v4110_v63 }
 0x344   : > { %5409 = vtanh.f32 %v2680_v1  ;;  %v4622_v1 = vld [vmem:[%s5667_s14 + $0x748] sm:$0xf0] }
 0x346   : > { %v2350_v10 = vpop.f32.mrf.mxu2 }
 0x347   : > { %v2999_v11 = vpop.f32.mrf.mxu3 }
 0x348   : > { %v5408_v14 = vpop.eup %5407  ;;  %v3000_v15 = vadd.f32 %v2999_v11, %v2350_v10  ;;  %v2033_v16 = vpop.f32.mrf.mxu0  ;;  %v4625_v10 = vor.u32 %v5013_v0, %v4622_v1 }
 0x349   : > { %3578 = vst [vmem:[%s5755_s24 + $0x690] sm:$0xff] %v5408_v14  ;;  %v2682_v19 = vpop.f32.mrf.mxu1 }
 0x34a   : > { %v5410_v20 = vpop.eup %5409  ;;  %5411 = vtanh.f32 %v3000_v15  ;;  %v2683_v21 = vadd.f32 %v2682_v19, %v2033_v16 }
 0x34b   : > { %3451 = vst [vmem:[%s5755_s24 + $0x298] sm:$0xff] %v5410_v20  ;;  %2072 = vmatmul.bf16.gmra.mxu0 %v4093_v12  ;;  %2392 = vmatmul.bf16.gmra.mxu2 %v4605_v13 }
 0x34c   : > { %5413 = vtanh.f32 %v2683_v21  ;;  %2721 = vmatmul.bf16.gmra.mxu1 %v4097_v17  ;;  %3041 = vmatmul.bf16.gmra.mxu3 %v4609_v18 }
 0x34e   : > { %v2353_v22 = vpop.f32.mrf.mxu2 }
 0x34f   : > { %v3002_v23 = vpop.f32.mrf.mxu3 }
 0x350   : > { %v5412_v24 = vpop.eup %5411  ;;  %v3003_v25 = vadd.f32 %v3002_v23, %v2353_v22  ;;  %v2035_v26 = vpop.f32.mrf.mxu0  ;;  %v4116_v22 = vld [vmem:[%s5667_s14 + $0x350] sm:$0xf]  ;;  %v4888_v23 = vld [vmem:[%s5667_s14 + $0x354] sm:$0xf0] }
 0x351   : > { %3579 = vst [vmem:[%s5755_s24 + $0x698] sm:$0xff] %v5412_v24  ;;  %v2684_v27 = vpop.f32.mrf.mxu1  ;;  %v4628_v24 = vld [vmem:[%s5667_s14 + $0x750] sm:$0xf]  ;;  %v4117_v32 = vor.u32 %v4888_v23, %v4116_v22 }
 0x352   : > { %v5414_v28 = vpop.eup %5413  ;;  %5415 = vtanh.f32 %v3003_v25  ;;  %v2685_v29 = vadd.f32 %v2684_v27, %v2035_v26  ;;  %v5016_v25 = vld [vmem:[%s5667_s14 + $0x754] sm:$0xf0]  ;;  %v4887_v26 = vld [vmem:[%s5667_s14 + $0x354] sm:$0xf]  ;;  %v4118_v27 = vld [vmem:[%s5667_s14 + $0x358] sm:$0xf0] }
 0x353   : > { %3452 = vst [vmem:[%s5755_s24 + $0x2a0] sm:$0xff] %v5414_v28  ;;  %v5015_v28 = vld [vmem:[%s5667_s14 + $0x754] sm:$0xf]  ;;  %v4629_v33 = vor.u32 %v5016_v25, %v4628_v24  ;;  %v4121_v37 = vor.u32 %v4887_v26, %v4118_v27 }
 0x354   : > { %5417 = vtanh.f32 %v2685_v29  ;;  %v4630_v29 = vld [vmem:[%s5667_s14 + $0x758] sm:$0xf0] }
 0x356   : > { %v2355_v38 = vpop.f32.mrf.mxu2 }
 0x357   : > { %v3004_v39 = vpop.f32.mrf.mxu3 }
 0x358   : > { %v5416_v42 = vpop.eup %5415  ;;  %v3005_v43 = vadd.f32 %v3004_v39, %v2355_v38  ;;  %v2038_v44 = vpop.f32.mrf.mxu0  ;;  %v4633_v38 = vor.u32 %v5015_v28, %v4630_v29 }
 0x359   : > { %3580 = vst [vmem:[%s5755_s24 + $0x6a0] sm:$0xff] %v5416_v42  ;;  %v2687_v47 = vpop.f32.mrf.mxu1 }
 0x35a   : > { %v5418_v48 = vpop.eup %5417  ;;  %5419 = vtanh.f32 %v3005_v43  ;;  %v2688_v49 = vadd.f32 %v2687_v47, %v2038_v44 }
 0x35b   : > { %3453 = vst [vmem:[%s5755_s24 + $0x2a8] sm:$0xff] %v5418_v48  ;;  %2077 = vmatmul.bf16.gmra.mxu0 %v4101_v40  ;;  %2397 = vmatmul.bf16.gmra.mxu2 %v4613_v41 }
 0x35c   : > { %5421 = vtanh.f32 %v2688_v49  ;;  %2726 = vmatmul.bf16.gmra.mxu1 %v4105_v45  ;;  %3046 = vmatmul.bf16.gmra.mxu3 %v4617_v46 }
 0x35e   : > { %v2358_v50 = vpop.f32.mrf.mxu2 }
 0x35f   : > { %v3007_v51 = vpop.f32.mrf.mxu3 }
 0x360   : > { %v5420_v52 = vpop.eup %5419  ;;  %v3008_v53 = vadd.f32 %v3007_v51, %v2358_v50  ;;  %v2040_v54 = vpop.f32.mrf.mxu0  ;;  %v4124_v50 = vld [vmem:[%s5667_s14 + $0x360] sm:$0xf]  ;;  %v4890_v51 = vld [vmem:[%s5667_s14 + $0x364] sm:$0xf0] }
 0x361   : > { %3581 = vst [vmem:[%s5755_s24 + $0x6a8] sm:$0xff] %v5420_v52  ;;  %v2689_v55 = vpop.f32.mrf.mxu1  ;;  %v4636_v52 = vld [vmem:[%s5667_s14 + $0x760] sm:$0xf]  ;;  %v4125_v60 = vor.u32 %v4890_v51, %v4124_v50 }
 0x362   : > { %v5422_v56 = vpop.eup %5421  ;;  %5423 = vtanh.f32 %v3008_v53  ;;  %v2690_v57 = vadd.f32 %v2689_v55, %v2040_v54  ;;  %v5018_v53 = vld [vmem:[%s5667_s14 + $0x764] sm:$0xf0]  ;;  %v4889_v54 = vld [vmem:[%s5667_s14 + $0x364] sm:$0xf]  ;;  %v4126_v55 = vld [vmem:[%s5667_s14 + $0x368] sm:$0xf0] }
 0x363   : > { %3454 = vst [vmem:[%s5755_s24 + $0x2b0] sm:$0xff] %v5422_v56  ;;  %v5017_v56 = vld [vmem:[%s5667_s14 + $0x764] sm:$0xf]  ;;  %v4637_v61 = vor.u32 %v5018_v53, %v4636_v52  ;;  %v4129_v1 = vor.u32 %v4889_v54, %v4126_v55 }
 0x364   : > { %5425 = vtanh.f32 %v2690_v57  ;;  %v4638_v57 = vld [vmem:[%s5667_s14 + $0x768] sm:$0xf0] }
 0x366   : > { %v2360_v2 = vpop.f32.mrf.mxu2 }
 0x367   : > { %v3009_v3 = vpop.f32.mrf.mxu3 }
 0x368   : > { %v5424_v6 = vpop.eup %5423  ;;  %v3010_v7 = vadd.f32 %v3009_v3, %v2360_v2  ;;  %v2043_v8 = vpop.f32.mrf.mxu0  ;;  %v4641_v2 = vor.u32 %v5017_v56, %v4638_v57 }
 0x369   : > { %3582 = vst [vmem:[%s5755_s24 + $0x6b0] sm:$0xff] %v5424_v6  ;;  %v2692_v11 = vpop.f32.mrf.mxu1 }
 0x36a   : > { %v5426_v12 = vpop.eup %5425  ;;  %5427 = vtanh.f32 %v3010_v7  ;;  %v2693_v13 = vadd.f32 %v2692_v11, %v2043_v8 }
 0x36b   : > { %3455 = vst [vmem:[%s5755_s24 + $0x2b8] sm:$0xff] %v5426_v12  ;;  %2082 = vmatmul.bf16.gmra.mxu0 %v4109_v4  ;;  %2402 = vmatmul.bf16.gmra.mxu2 %v4621_v5 }
 0x36c   : > { %5429 = vtanh.f32 %v2693_v13  ;;  %2731 = vmatmul.bf16.gmra.mxu1 %v4113_v9  ;;  %3051 = vmatmul.bf16.gmra.mxu3 %v4625_v10 }
 0x36e   : > { %v2363_v14 = vpop.f32.mrf.mxu2 }
 0x36f   : > { %v3012_v15 = vpop.f32.mrf.mxu3 }
 0x370   : > { %v5428_v16 = vpop.eup %5427  ;;  %v3013_v17 = vadd.f32 %v3012_v15, %v2363_v14  ;;  %v2045_v18 = vpop.f32.mrf.mxu0  ;;  %v4132_v14 = vld [vmem:[%s5667_s14 + $0x370] sm:$0xf]  ;;  %v4892_v15 = vld [vmem:[%s5667_s14 + $0x374] sm:$0xf0] }
 0x371   : > { %3583 = vst [vmem:[%s5755_s24 + $0x6b8] sm:$0xff] %v5428_v16  ;;  %v2694_v19 = vpop.f32.mrf.mxu1  ;;  %v4644_v16 = vld [vmem:[%s5667_s14 + $0x770] sm:$0xf]  ;;  %v4133_v24 = vor.u32 %v4892_v15, %v4132_v14 }
 0x372   : > { %v5430_v20 = vpop.eup %5429  ;;  %5431 = vtanh.f32 %v3013_v17  ;;  %v2695_v21 = vadd.f32 %v2694_v19, %v2045_v18  ;;  %v5020_v17 = vld [vmem:[%s5667_s14 + $0x774] sm:$0xf0]  ;;  %v4891_v18 = vld [vmem:[%s5667_s14 + $0x374] sm:$0xf]  ;;  %v4134_v19 = vld [vmem:[%s5667_s14 + $0x378] sm:$0xf0] }
 0x373   : > { %3456 = vst [vmem:[%s5755_s24 + $0x2c0] sm:$0xff] %v5430_v20  ;;  %v5019_v20 = vld [vmem:[%s5667_s14 + $0x774] sm:$0xf]  ;;  %v4645_v25 = vor.u32 %v5020_v17, %v4644_v16  ;;  %v4137_v29 = vor.u32 %v4891_v18, %v4134_v19 }
 0x374   : > { %5433 = vtanh.f32 %v2695_v21  ;;  %v4646_v21 = vld [vmem:[%s5667_s14 + $0x778] sm:$0xf0] }
 0x376   : > { %v2365_v30 = vpop.f32.mrf.mxu2 }
 0x377   : > { %v3014_v31 = vpop.f32.mrf.mxu3 }
 0x378   : > { %v5432_v34 = vpop.eup %5431  ;;  %v3015_v35 = vadd.f32 %v3014_v31, %v2365_v30  ;;  %v2048_v36 = vpop.f32.mrf.mxu0  ;;  %v4649_v30 = vor.u32 %v5019_v20, %v4646_v21 }
 0x379   : > { %3584 = vst [vmem:[%s5755_s24 + $0x6c0] sm:$0xff] %v5432_v34  ;;  %v2697_v39 = vpop.f32.mrf.mxu1 }
 0x37a   : > { %v5434_v40 = vpop.eup %5433  ;;  %5435 = vtanh.f32 %v3015_v35  ;;  %v2698_v41 = vadd.f32 %v2697_v39, %v2048_v36 }
 0x37b   : > { %3457 = vst [vmem:[%s5755_s24 + $0x2c8] sm:$0xff] %v5434_v40  ;;  %2087 = vmatmul.bf16.gmra.mxu0 %v4117_v32  ;;  %2407 = vmatmul.bf16.gmra.mxu2 %v4629_v33 }
 0x37c   : > { %5437 = vtanh.f32 %v2698_v41  ;;  %2736 = vmatmul.bf16.gmra.mxu1 %v4121_v37  ;;  %3056 = vmatmul.bf16.gmra.mxu3 %v4633_v38 }
 0x37e   : > { %v2368_v42 = vpop.f32.mrf.mxu2 }
 0x37f   : > { %v3017_v43 = vpop.f32.mrf.mxu3 }
 0x380   : > { %v5436_v44 = vpop.eup %5435  ;;  %v3018_v45 = vadd.f32 %v3017_v43, %v2368_v42  ;;  %v2050_v46 = vpop.f32.mrf.mxu0  ;;  %v4140_v42 = vld [vmem:[%s5667_s14 + $0x380] sm:$0xf]  ;;  %v4894_v43 = vld [vmem:[%s5667_s14 + $0x384] sm:$0xf0] }
 0x381   : > { %3585 = vst [vmem:[%s5755_s24 + $0x6c8] sm:$0xff] %v5436_v44  ;;  %v2699_v47 = vpop.f32.mrf.mxu1  ;;  %v4652_v44 = vld [vmem:[%s5667_s14 + $0x780] sm:$0xf]  ;;  %v4141_v52 = vor.u32 %v4894_v43, %v4140_v42 }
 0x382   : > { %v5438_v48 = vpop.eup %5437  ;;  %5439 = vtanh.f32 %v3018_v45  ;;  %v2700_v49 = vadd.f32 %v2699_v47, %v2050_v46  ;;  %v5022_v45 = vld [vmem:[%s5667_s14 + $0x784] sm:$0xf0]  ;;  %v4893_v46 = vld [vmem:[%s5667_s14 + $0x384] sm:$0xf]  ;;  %v4142_v47 = vld [vmem:[%s5667_s14 + $0x388] sm:$0xf0] }
 0x383   : > { %3458 = vst [vmem:[%s5755_s24 + $0x2d0] sm:$0xff] %v5438_v48  ;;  %v5021_v48 = vld [vmem:[%s5667_s14 + $0x784] sm:$0xf]  ;;  %v4653_v53 = vor.u32 %v5022_v45, %v4652_v44  ;;  %v4145_v57 = vor.u32 %v4893_v46, %v4142_v47 }
 0x384   : > { %5441 = vtanh.f32 %v2700_v49  ;;  %v4654_v49 = vld [vmem:[%s5667_s14 + $0x788] sm:$0xf0] }
 0x386   : > { %v2370_v58 = vpop.f32.mrf.mxu2 }
 0x387   : > { %v3019_v59 = vpop.f32.mrf.mxu3 }
 0x388   : > { %v5440_v62 = vpop.eup %5439  ;;  %v3020_v63 = vadd.f32 %v3019_v59, %v2370_v58  ;;  %v2053_v0 = vpop.f32.mrf.mxu0  ;;  %v4657_v58 = vor.u32 %v5021_v48, %v4654_v49 }
 0x389   : > { %3586 = vst [vmem:[%s5755_s24 + $0x6d0] sm:$0xff] %v5440_v62  ;;  %v2702_v3 = vpop.f32.mrf.mxu1 }
 0x38a   : > { %v5442_v4 = vpop.eup %5441  ;;  %5443 = vtanh.f32 %v3020_v63  ;;  %v2703_v5 = vadd.f32 %v2702_v3, %v2053_v0 }
 0x38b   : > { %3459 = vst [vmem:[%s5755_s24 + $0x2d8] sm:$0xff] %v5442_v4  ;;  %2092 = vmatmul.bf16.gmra.mxu0 %v4125_v60  ;;  %2412 = vmatmul.bf16.gmra.mxu2 %v4637_v61 }
 0x38c   : > { %5445 = vtanh.f32 %v2703_v5  ;;  %2741 = vmatmul.bf16.gmra.mxu1 %v4129_v1  ;;  %3061 = vmatmul.bf16.gmra.mxu3 %v4641_v2 }
 0x38e   : > { %v2373_v6 = vpop.f32.mrf.mxu2 }
 0x38f   : > { %v3022_v7 = vpop.f32.mrf.mxu3 }
 0x390   : > { %v5444_v8 = vpop.eup %5443  ;;  %v3023_v9 = vadd.f32 %v3022_v7, %v2373_v6  ;;  %v2055_v10 = vpop.f32.mrf.mxu0  ;;  %v4148_v6 = vld [vmem:[%s5667_s14 + $0x390] sm:$0xf]  ;;  %v4896_v7 = vld [vmem:[%s5667_s14 + $0x394] sm:$0xf0] }
 0x391   : > { %3587 = vst [vmem:[%s5755_s24 + $0x6d8] sm:$0xff] %v5444_v8  ;;  %v2704_v11 = vpop.f32.mrf.mxu1  ;;  %v4660_v8 = vld [vmem:[%s5667_s14 + $0x790] sm:$0xf]  ;;  %v4149_v16 = vor.u32 %v4896_v7, %v4148_v6 }
 0x392   : > { %v5446_v12 = vpop.eup %5445  ;;  %5447 = vtanh.f32 %v3023_v9  ;;  %v2705_v13 = vadd.f32 %v2704_v11, %v2055_v10  ;;  %v5024_v9 = vld [vmem:[%s5667_s14 + $0x794] sm:$0xf0]  ;;  %v4895_v10 = vld [vmem:[%s5667_s14 + $0x394] sm:$0xf]  ;;  %v4150_v11 = vld [vmem:[%s5667_s14 + $0x398] sm:$0xf0] }
 0x393   : > { %3460 = vst [vmem:[%s5755_s24 + $0x2e0] sm:$0xff] %v5446_v12  ;;  %v5023_v12 = vld [vmem:[%s5667_s14 + $0x794] sm:$0xf]  ;;  %v4661_v17 = vor.u32 %v5024_v9, %v4660_v8  ;;  %v4153_v21 = vor.u32 %v4895_v10, %v4150_v11 }
 0x394   : > { %5449 = vtanh.f32 %v2705_v13  ;;  %v4662_v13 = vld [vmem:[%s5667_s14 + $0x798] sm:$0xf0] }
 0x396   : > { %v2375_v22 = vpop.f32.mrf.mxu2 }
 0x397   : > { %v3024_v23 = vpop.f32.mrf.mxu3 }
 0x398   : > { %v5448_v26 = vpop.eup %5447  ;;  %v3025_v27 = vadd.f32 %v3024_v23, %v2375_v22  ;;  %v2058_v28 = vpop.f32.mrf.mxu0  ;;  %v4665_v22 = vor.u32 %v5023_v12, %v4662_v13 }
 0x399   : > { %3588 = vst [vmem:[%s5755_s24 + $0x6e0] sm:$0xff] %v5448_v26  ;;  %v2707_v31 = vpop.f32.mrf.mxu1 }
 0x39a   : > { %v5450_v32 = vpop.eup %5449  ;;  %5451 = vtanh.f32 %v3025_v27  ;;  %v2708_v33 = vadd.f32 %v2707_v31, %v2058_v28 }
 0x39b   : > { %3461 = vst [vmem:[%s5755_s24 + $0x2e8] sm:$0xff] %v5450_v32  ;;  %2097 = vmatmul.bf16.gmra.mxu0 %v4133_v24  ;;  %2417 = vmatmul.bf16.gmra.mxu2 %v4645_v25 }
 0x39c   : > { %5453 = vtanh.f32 %v2708_v33  ;;  %2746 = vmatmul.bf16.gmra.mxu1 %v4137_v29  ;;  %3066 = vmatmul.bf16.gmra.mxu3 %v4649_v30 }
 0x39e   : > { %v2378_v34 = vpop.f32.mrf.mxu2 }
 0x39f   : > { %v3027_v35 = vpop.f32.mrf.mxu3 }
 0x3a0   : > { %v5452_v36 = vpop.eup %5451  ;;  %v3028_v37 = vadd.f32 %v3027_v35, %v2378_v34  ;;  %v2060_v38 = vpop.f32.mrf.mxu0  ;;  %v4156_v34 = vld [vmem:[%s5667_s14 + $0x3a0] sm:$0xf]  ;;  %v4898_v35 = vld [vmem:[%s5667_s14 + $0x3a4] sm:$0xf0] }
 0x3a1   : > { %3589 = vst [vmem:[%s5755_s24 + $0x6e8] sm:$0xff] %v5452_v36  ;;  %v2709_v39 = vpop.f32.mrf.mxu1  ;;  %v4668_v36 = vld [vmem:[%s5667_s14 + $0x7a0] sm:$0xf]  ;;  %v4157_v44 = vor.u32 %v4898_v35, %v4156_v34 }
 0x3a2   : > { %v5454_v40 = vpop.eup %5453  ;;  %5455 = vtanh.f32 %v3028_v37  ;;  %v2710_v41 = vadd.f32 %v2709_v39, %v2060_v38  ;;  %v5026_v37 = vld [vmem:[%s5667_s14 + $0x7a4] sm:$0xf0]  ;;  %v4897_v38 = vld [vmem:[%s5667_s14 + $0x3a4] sm:$0xf]  ;;  %v4158_v39 = vld [vmem:[%s5667_s14 + $0x3a8] sm:$0xf0] }
 0x3a3   : > { %3462 = vst [vmem:[%s5755_s24 + $0x2f0] sm:$0xff] %v5454_v40  ;;  %v5025_v40 = vld [vmem:[%s5667_s14 + $0x7a4] sm:$0xf]  ;;  %v4669_v45 = vor.u32 %v5026_v37, %v4668_v36  ;;  %v4161_v49 = vor.u32 %v4897_v38, %v4158_v39 }
 0x3a4   : > { %5457 = vtanh.f32 %v2710_v41  ;;  %v4670_v41 = vld [vmem:[%s5667_s14 + $0x7a8] sm:$0xf0] }
 0x3a6   : > { %v2380_v50 = vpop.f32.mrf.mxu2 }
 0x3a7   : > { %v3029_v51 = vpop.f32.mrf.mxu3 }
 0x3a8   : > { %v5456_v54 = vpop.eup %5455  ;;  %v3030_v55 = vadd.f32 %v3029_v51, %v2380_v50  ;;  %v2063_v56 = vpop.f32.mrf.mxu0  ;;  %v4673_v50 = vor.u32 %v5025_v40, %v4670_v41 }
 0x3a9   : > { %3590 = vst [vmem:[%s5755_s24 + $0x6f0] sm:$0xff] %v5456_v54  ;;  %v2712_v59 = vpop.f32.mrf.mxu1 }
 0x3aa   : > { %v5458_v60 = vpop.eup %5457  ;;  %5459 = vtanh.f32 %v3030_v55  ;;  %v2713_v61 = vadd.f32 %v2712_v59, %v2063_v56 }
 0x3ab   : > { %3463 = vst [vmem:[%s5755_s24 + $0x2f8] sm:$0xff] %v5458_v60  ;;  %2102 = vmatmul.bf16.gmra.mxu0 %v4141_v52  ;;  %2422 = vmatmul.bf16.gmra.mxu2 %v4653_v53 }
 0x3ac   : > { %5461 = vtanh.f32 %v2713_v61  ;;  %2751 = vmatmul.bf16.gmra.mxu1 %v4145_v57  ;;  %3071 = vmatmul.bf16.gmra.mxu3 %v4657_v58 }
 0x3ae   : > { %v2383_v62 = vpop.f32.mrf.mxu2 }
 0x3af   : > { %v3032_v63 = vpop.f32.mrf.mxu3 }
 0x3b0   : > { %v5460_v0 = vpop.eup %5459  ;;  %v3033_v1 = vadd.f32 %v3032_v63, %v2383_v62  ;;  %v2065_v2 = vpop.f32.mrf.mxu0  ;;  %v4164_v62 = vld [vmem:[%s5667_s14 + $0x3b0] sm:$0xf]  ;;  %v4900_v63 = vld [vmem:[%s5667_s14 + $0x3b4] sm:$0xf0] }
 0x3b1   : > { %3591 = vst [vmem:[%s5755_s24 + $0x6f8] sm:$0xff] %v5460_v0  ;;  %v2714_v3 = vpop.f32.mrf.mxu1  ;;  %v4676_v0 = vld [vmem:[%s5667_s14 + $0x7b0] sm:$0xf]  ;;  %v4165_v8 = vor.u32 %v4900_v63, %v4164_v62 }
 0x3b2   : > { %v5462_v4 = vpop.eup %5461  ;;  %5463 = vtanh.f32 %v3033_v1  ;;  %v2715_v5 = vadd.f32 %v2714_v3, %v2065_v2  ;;  %v5028_v1 = vld [vmem:[%s5667_s14 + $0x7b4] sm:$0xf0]  ;;  %v4899_v2 = vld [vmem:[%s5667_s14 + $0x3b4] sm:$0xf]  ;;  %v4166_v3 = vld [vmem:[%s5667_s14 + $0x3b8] sm:$0xf0] }
 0x3b3   : > { %3464 = vst [vmem:[%s5755_s24 + $0x300] sm:$0xff] %v5462_v4  ;;  %v5027_v4 = vld [vmem:[%s5667_s14 + $0x7b4] sm:$0xf]  ;;  %v4677_v9 = vor.u32 %v5028_v1, %v4676_v0  ;;  %v4169_v13 = vor.u32 %v4899_v2, %v4166_v3 }
 0x3b4   : > { %5465 = vtanh.f32 %v2715_v5  ;;  %v4678_v5 = vld [vmem:[%s5667_s14 + $0x7b8] sm:$0xf0] }
 0x3b6   : > { %v2385_v14 = vpop.f32.mrf.mxu2 }
 0x3b7   : > { %v3034_v15 = vpop.f32.mrf.mxu3 }
 0x3b8   : > { %v5464_v18 = vpop.eup %5463  ;;  %v3035_v19 = vadd.f32 %v3034_v15, %v2385_v14  ;;  %v2068_v20 = vpop.f32.mrf.mxu0  ;;  %v4681_v14 = vor.u32 %v5027_v4, %v4678_v5 }
 0x3b9   : > { %3592 = vst [vmem:[%s5755_s24 + $0x700] sm:$0xff] %v5464_v18  ;;  %v2717_v23 = vpop.f32.mrf.mxu1 }
 0x3ba   : > { %v5466_v24 = vpop.eup %5465  ;;  %5467 = vtanh.f32 %v3035_v19  ;;  %v2718_v25 = vadd.f32 %v2717_v23, %v2068_v20 }
 0x3bb   : > { %3465 = vst [vmem:[%s5755_s24 + $0x308] sm:$0xff] %v5466_v24  ;;  %2107 = vmatmul.bf16.gmra.mxu0 %v4149_v16  ;;  %2427 = vmatmul.bf16.gmra.mxu2 %v4661_v17 }
 0x3bc   : > { %5469 = vtanh.f32 %v2718_v25  ;;  %2756 = vmatmul.bf16.gmra.mxu1 %v4153_v21  ;;  %3076 = vmatmul.bf16.gmra.mxu3 %v4665_v22 }
 0x3be   : > { %v2388_v26 = vpop.f32.mrf.mxu2 }
 0x3bf   : > { %v3037_v27 = vpop.f32.mrf.mxu3 }
 0x3c0   : > { %v5468_v28 = vpop.eup %5467  ;;  %v3038_v29 = vadd.f32 %v3037_v27, %v2388_v26  ;;  %v2070_v30 = vpop.f32.mrf.mxu0  ;;  %v4172_v26 = vld [vmem:[%s5667_s14 + $0x3c0] sm:$0xf]  ;;  %v4902_v27 = vld [vmem:[%s5667_s14 + $0x3c4] sm:$0xf0] }
 0x3c1   : > { %3593 = vst [vmem:[%s5755_s24 + $0x708] sm:$0xff] %v5468_v28  ;;  %v2719_v31 = vpop.f32.mrf.mxu1  ;;  %v4684_v28 = vld [vmem:[%s5667_s14 + $0x7c0] sm:$0xf]  ;;  %v4173_v36 = vor.u32 %v4902_v27, %v4172_v26 }
 0x3c2   : > { %v5470_v32 = vpop.eup %5469  ;;  %5471 = vtanh.f32 %v3038_v29  ;;  %v2720_v33 = vadd.f32 %v2719_v31, %v2070_v30  ;;  %v5030_v29 = vld [vmem:[%s5667_s14 + $0x7c4] sm:$0xf0]  ;;  %v4901_v30 = vld [vmem:[%s5667_s14 + $0x3c4] sm:$0xf]  ;;  %v4174_v31 = vld [vmem:[%s5667_s14 + $0x3c8] sm:$0xf0] }
 0x3c3   : > { %3466 = vst [vmem:[%s5755_s24 + $0x310] sm:$0xff] %v5470_v32  ;;  %v5029_v32 = vld [vmem:[%s5667_s14 + $0x7c4] sm:$0xf]  ;;  %v4685_v37 = vor.u32 %v5030_v29, %v4684_v28  ;;  %v4177_v41 = vor.u32 %v4901_v30, %v4174_v31 }
 0x3c4   : > { %5473 = vtanh.f32 %v2720_v33  ;;  %v4686_v33 = vld [vmem:[%s5667_s14 + $0x7c8] sm:$0xf0] }
 0x3c6   : > { %v2390_v42 = vpop.f32.mrf.mxu2 }
 0x3c7   : > { %v3039_v43 = vpop.f32.mrf.mxu3 }
 0x3c8   : > { %v5472_v46 = vpop.eup %5471  ;;  %v3040_v47 = vadd.f32 %v3039_v43, %v2390_v42  ;;  %v2073_v48 = vpop.f32.mrf.mxu0  ;;  %v4689_v42 = vor.u32 %v5029_v32, %v4686_v33 }
 0x3c9   : > { %3594 = vst [vmem:[%s5755_s24 + $0x710] sm:$0xff] %v5472_v46  ;;  %v2722_v51 = vpop.f32.mrf.mxu1 }
 0x3ca   : > { %v5474_v52 = vpop.eup %5473  ;;  %5475 = vtanh.f32 %v3040_v47  ;;  %v2723_v53 = vadd.f32 %v2722_v51, %v2073_v48 }
 0x3cb   : > { %3467 = vst [vmem:[%s5755_s24 + $0x318] sm:$0xff] %v5474_v52  ;;  %2112 = vmatmul.bf16.gmra.mxu0 %v4157_v44  ;;  %2432 = vmatmul.bf16.gmra.mxu2 %v4669_v45 }
 0x3cc   : > { %5477 = vtanh.f32 %v2723_v53  ;;  %2761 = vmatmul.bf16.gmra.mxu1 %v4161_v49  ;;  %3081 = vmatmul.bf16.gmra.mxu3 %v4673_v50 }
 0x3ce   : > { %v2393_v54 = vpop.f32.mrf.mxu2 }
 0x3cf   : > { %v3042_v55 = vpop.f32.mrf.mxu3 }
 0x3d0   : > { %v5476_v56 = vpop.eup %5475  ;;  %v3043_v57 = vadd.f32 %v3042_v55, %v2393_v54  ;;  %v2075_v58 = vpop.f32.mrf.mxu0  ;;  %v4180_v54 = vld [vmem:[%s5667_s14 + $0x3d0] sm:$0xf]  ;;  %v4904_v55 = vld [vmem:[%s5667_s14 + $0x3d4] sm:$0xf0] }
 0x3d1   : > { %3595 = vst [vmem:[%s5755_s24 + $0x718] sm:$0xff] %v5476_v56  ;;  %v2724_v59 = vpop.f32.mrf.mxu1  ;;  %v4692_v56 = vld [vmem:[%s5667_s14 + $0x7d0] sm:$0xf]  ;;  %v4181_v0 = vor.u32 %v4904_v55, %v4180_v54 }
 0x3d2   : > { %v5478_v60 = vpop.eup %5477  ;;  %5479 = vtanh.f32 %v3043_v57  ;;  %v2725_v61 = vadd.f32 %v2724_v59, %v2075_v58  ;;  %v5032_v57 = vld [vmem:[%s5667_s14 + $0x7d4] sm:$0xf0]  ;;  %v4903_v58 = vld [vmem:[%s5667_s14 + $0x3d4] sm:$0xf]  ;;  %v4182_v59 = vld [vmem:[%s5667_s14 + $0x3d8] sm:$0xf0] }
 0x3d3   : > { %3468 = vst [vmem:[%s5755_s24 + $0x320] sm:$0xff] %v5478_v60  ;;  %v5031_v60 = vld [vmem:[%s5667_s14 + $0x7d4] sm:$0xf]  ;;  %v4693_v1 = vor.u32 %v5032_v57, %v4692_v56  ;;  %v4185_v5 = vor.u32 %v4903_v58, %v4182_v59 }
 0x3d4   : > { %5481 = vtanh.f32 %v2725_v61  ;;  %v4694_v61 = vld [vmem:[%s5667_s14 + $0x7d8] sm:$0xf0] }
 0x3d6   : > { %v2395_v6 = vpop.f32.mrf.mxu2 }
 0x3d7   : > { %v3044_v7 = vpop.f32.mrf.mxu3 }
 0x3d8   : > { %v5480_v10 = vpop.eup %5479  ;;  %v3045_v11 = vadd.f32 %v3044_v7, %v2395_v6  ;;  %v2078_v12 = vpop.f32.mrf.mxu0  ;;  %v4697_v6 = vor.u32 %v5031_v60, %v4694_v61 }
 0x3d9   : > { %3596 = vst [vmem:[%s5755_s24 + $0x720] sm:$0xff] %v5480_v10  ;;  %v2727_v15 = vpop.f32.mrf.mxu1 }
 0x3da   : > { %v5482_v16 = vpop.eup %5481  ;;  %5483 = vtanh.f32 %v3045_v11  ;;  %v2728_v17 = vadd.f32 %v2727_v15, %v2078_v12 }
 0x3db   : > { %3469 = vst [vmem:[%s5755_s24 + $0x328] sm:$0xff] %v5482_v16  ;;  %2117 = vmatmul.bf16.gmra.mxu0 %v4165_v8  ;;  %2437 = vmatmul.bf16.gmra.mxu2 %v4677_v9 }
 0x3dc   : > { %5485 = vtanh.f32 %v2728_v17  ;;  %2766 = vmatmul.bf16.gmra.mxu1 %v4169_v13  ;;  %3086 = vmatmul.bf16.gmra.mxu3 %v4681_v14 }
 0x3de   : > { %v2398_v18 = vpop.f32.mrf.mxu2 }
 0x3df   : > { %v3047_v19 = vpop.f32.mrf.mxu3 }
 0x3e0   : > { %v5484_v20 = vpop.eup %5483  ;;  %v3048_v21 = vadd.f32 %v3047_v19, %v2398_v18  ;;  %v2080_v22 = vpop.f32.mrf.mxu0  ;;  %v4188_v18 = vld [vmem:[%s5667_s14 + $0x3e0] sm:$0xf]  ;;  %v4906_v19 = vld [vmem:[%s5667_s14 + $0x3e4] sm:$0xf0] }
 0x3e1   : > { %3597 = vst [vmem:[%s5755_s24 + $0x728] sm:$0xff] %v5484_v20  ;;  %v2729_v23 = vpop.f32.mrf.mxu1  ;;  %v4700_v20 = vld [vmem:[%s5667_s14 + $0x7e0] sm:$0xf]  ;;  %v4189_v28 = vor.u32 %v4906_v19, %v4188_v18 }
 0x3e2   : > { %v5486_v24 = vpop.eup %5485  ;;  %5487 = vtanh.f32 %v3048_v21  ;;  %v2730_v25 = vadd.f32 %v2729_v23, %v2080_v22  ;;  %v5034_v21 = vld [vmem:[%s5667_s14 + $0x7e4] sm:$0xf0]  ;;  %v4905_v22 = vld [vmem:[%s5667_s14 + $0x3e4] sm:$0xf]  ;;  %v4190_v23 = vld [vmem:[%s5667_s14 + $0x3e8] sm:$0xf0] }
 0x3e3   : > { %3470 = vst [vmem:[%s5755_s24 + $0x330] sm:$0xff] %v5486_v24  ;;  %v5033_v24 = vld [vmem:[%s5667_s14 + $0x7e4] sm:$0xf]  ;;  %v4701_v29 = vor.u32 %v5034_v21, %v4700_v20  ;;  %v4193_v33 = vor.u32 %v4905_v22, %v4190_v23 }
 0x3e4   : > { %5489 = vtanh.f32 %v2730_v25  ;;  %v4702_v25 = vld [vmem:[%s5667_s14 + $0x7e8] sm:$0xf0] }
 0x3e6   : > { %v2400_v34 = vpop.f32.mrf.mxu2 }
 0x3e7   : > { %v3049_v35 = vpop.f32.mrf.mxu3 }
 0x3e8   : > { %v5488_v38 = vpop.eup %5487  ;;  %v3050_v39 = vadd.f32 %v3049_v35, %v2400_v34  ;;  %v2083_v40 = vpop.f32.mrf.mxu0  ;;  %v4705_v34 = vor.u32 %v5033_v24, %v4702_v25 }
 0x3e9   : > { %3598 = vst [vmem:[%s5755_s24 + $0x730] sm:$0xff] %v5488_v38  ;;  %v2732_v43 = vpop.f32.mrf.mxu1 }
 0x3ea   : > { %v5490_v44 = vpop.eup %5489  ;;  %5491 = vtanh.f32 %v3050_v39  ;;  %v2733_v45 = vadd.f32 %v2732_v43, %v2083_v40 }
 0x3eb   : > { %3471 = vst [vmem:[%s5755_s24 + $0x338] sm:$0xff] %v5490_v44  ;;  %2122 = vmatmul.bf16.gmra.mxu0 %v4173_v36  ;;  %2442 = vmatmul.bf16.gmra.mxu2 %v4685_v37 }
 0x3ec   : > { %5493 = vtanh.f32 %v2733_v45  ;;  %2771 = vmatmul.bf16.gmra.mxu1 %v4177_v41  ;;  %3091 = vmatmul.bf16.gmra.mxu3 %v4689_v42 }
 0x3ee   : > { %v2403_v46 = vpop.f32.mrf.mxu2 }
 0x3ef   : > { %v3052_v47 = vpop.f32.mrf.mxu3 }
 0x3f0   : > { %v5492_v48 = vpop.eup %5491  ;;  %v3053_v49 = vadd.f32 %v3052_v47, %v2403_v46  ;;  %v2085_v50 = vpop.f32.mrf.mxu0  ;;  %v4196_v46 = vld [vmem:[%s5667_s14 + $0x3f0] sm:$0xf]  ;;  %v4908_v47 = vld [vmem:[%s5667_s14 + $0x3f4] sm:$0xf0] }
 0x3f1   : > { %3599 = vst [vmem:[%s5755_s24 + $0x738] sm:$0xff] %v5492_v48  ;;  %v2734_v51 = vpop.f32.mrf.mxu1  ;;  %v4708_v48 = vld [vmem:[%s5667_s14 + $0x7f0] sm:$0xf]  ;;  %v4197_v56 = vor.u32 %v4908_v47, %v4196_v46 }
 0x3f2   : > { %v5494_v52 = vpop.eup %5493  ;;  %5495 = vtanh.f32 %v3053_v49  ;;  %v2735_v53 = vadd.f32 %v2734_v51, %v2085_v50  ;;  %v5036_v49 = vld [vmem:[%s5667_s14 + $0x7f4] sm:$0xf0]  ;;  %v4907_v50 = vld [vmem:[%s5667_s14 + $0x3f4] sm:$0xf]  ;;  %v4198_v51 = vld [vmem:[%s5667_s14 + $0x3f8] sm:$0xf0] }
 0x3f3   : > { %3472 = vst [vmem:[%s5755_s24 + $0x340] sm:$0xff] %v5494_v52  ;;  %v5035_v52 = vld [vmem:[%s5667_s14 + $0x7f4] sm:$0xf]  ;;  %v4709_v57 = vor.u32 %v5036_v49, %v4708_v48  ;;  %v4201_v61 = vor.u32 %v4907_v50, %v4198_v51 }
 0x3f4   : > { %5497 = vtanh.f32 %v2735_v53  ;;  %v4710_v53 = vld [vmem:[%s5667_s14 + $0x7f8] sm:$0xf0] }
 0x3f6   : > { %v2405_v62 = vpop.f32.mrf.mxu2 }
 0x3f7   : > { %v3054_v63 = vpop.f32.mrf.mxu3 }
 0x3f8   : > { %v5496_v2 = vpop.eup %5495  ;;  %v3055_v3 = vadd.f32 %v3054_v63, %v2405_v62  ;;  %v2088_v4 = vpop.f32.mrf.mxu0  ;;  %v4713_v62 = vor.u32 %v5035_v52, %v4710_v53 }
 0x3f9   : > { %3600 = vst [vmem:[%s5755_s24 + $0x740] sm:$0xff] %v5496_v2  ;;  %v2737_v7 = vpop.f32.mrf.mxu1 }
 0x3fa   : > { %v5498_v8 = vpop.eup %5497  ;;  %5499 = vtanh.f32 %v3055_v3  ;;  %v2738_v9 = vadd.f32 %v2737_v7, %v2088_v4 }
 0x3fb   : > { %3473 = vst [vmem:[%s5755_s24 + $0x348] sm:$0xff] %v5498_v8  ;;  %2127 = vmatmul.bf16.gmra.mxu0 %v4181_v0  ;;  %2447 = vmatmul.bf16.gmra.mxu2 %v4693_v1 }
 0x3fc   : > { %5501 = vtanh.f32 %v2738_v9  ;;  %2776 = vmatmul.bf16.gmra.mxu1 %v4185_v5  ;;  %3096 = vmatmul.bf16.gmra.mxu3 %v4697_v6 }
 0x3fe   : > { %v2408_v10 = vpop.f32.mrf.mxu2 }
 0x3ff   : > { %v3057_v11 = vpop.f32.mrf.mxu3 }
 0x400   : > { %v5500_v12 = vpop.eup %5499  ;;  %v3058_v13 = vadd.f32 %v3057_v11, %v2408_v10  ;;  %v2090_v14 = vpop.f32.mrf.mxu0 }
 0x401   : > { %3601 = vst [vmem:[%s5755_s24 + $0x748] sm:$0xff] %v5500_v12  ;;  %v2739_v15 = vpop.f32.mrf.mxu1 }
 0x402   : > { %v5502_v16 = vpop.eup %5501  ;;  %5503 = vtanh.f32 %v3058_v13  ;;  %v2740_v17 = vadd.f32 %v2739_v15, %v2090_v14 }
 0x403   : > { %3474 = vst [vmem:[%s5755_s24 + $0x350] sm:$0xff] %v5502_v16 }
 0x404   : > { %5505 = vtanh.f32 %v2740_v17 }
 0x406   : > { %v2410_v26 = vpop.f32.mrf.mxu2 }
 0x407   : > { %v3059_v27 = vpop.f32.mrf.mxu3 }
 0x408   : > { %v5504_v30 = vpop.eup %5503  ;;  %v3060_v31 = vadd.f32 %v3059_v27, %v2410_v26  ;;  %v2093_v32 = vpop.f32.mrf.mxu0 }
 0x409   : > { %3602 = vst [vmem:[%s5755_s24 + $0x750] sm:$0xff] %v5504_v30  ;;  %v2742_v35 = vpop.f32.mrf.mxu1 }
 0x40a   : > { %v5506_v36 = vpop.eup %5505  ;;  %5507 = vtanh.f32 %v3060_v31  ;;  %v2743_v37 = vadd.f32 %v2742_v35, %v2093_v32 }
 0x40b   : > { %3475 = vst [vmem:[%s5755_s24 + $0x358] sm:$0xff] %v5506_v36  ;;  %2132 = vmatmul.bf16.gmra.mxu0 %v4189_v28  ;;  %2452 = vmatmul.bf16.gmra.mxu2 %v4701_v29 }
 0x40c   : > { %5509 = vtanh.f32 %v2743_v37  ;;  %2781 = vmatmul.bf16.gmra.mxu1 %v4193_v33  ;;  %3101 = vmatmul.bf16.gmra.mxu3 %v4705_v34 }
 0x40e   : > { %v2413_v38 = vpop.f32.mrf.mxu2 }
 0x40f   : > { %v3062_v39 = vpop.f32.mrf.mxu3 }
 0x410   : > { %v5508_v40 = vpop.eup %5507  ;;  %v3063_v41 = vadd.f32 %v3062_v39, %v2413_v38  ;;  %v2095_v42 = vpop.f32.mrf.mxu0 }
 0x411   : > { %3603 = vst [vmem:[%s5755_s24 + $0x758] sm:$0xff] %v5508_v40  ;;  %v2744_v43 = vpop.f32.mrf.mxu1 }
 0x412   : > { %v5510_v44 = vpop.eup %5509  ;;  %5511 = vtanh.f32 %v3063_v41  ;;  %v2745_v45 = vadd.f32 %v2744_v43, %v2095_v42 }
 0x413   : > { %3476 = vst [vmem:[%s5755_s24 + $0x360] sm:$0xff] %v5510_v44 }
 0x414   : > { %5513 = vtanh.f32 %v2745_v45 }
 0x416   : > { %v2415_v54 = vpop.f32.mrf.mxu2 }
 0x417   : > { %v3064_v55 = vpop.f32.mrf.mxu3 }
 0x418   : > { %v5512_v58 = vpop.eup %5511  ;;  %v3065_v59 = vadd.f32 %v3064_v55, %v2415_v54  ;;  %v2098_v60 = vpop.f32.mrf.mxu0 }
 0x419   : > { %3604 = vst [vmem:[%s5755_s24 + $0x760] sm:$0xff] %v5512_v58  ;;  %v2747_v63 = vpop.f32.mrf.mxu1 }
 0x41a   : > { %v5514_v0 = vpop.eup %5513  ;;  %5515 = vtanh.f32 %v3065_v59  ;;  %v2748_v1 = vadd.f32 %v2747_v63, %v2098_v60 }
 0x41b   : > { %3477 = vst [vmem:[%s5755_s24 + $0x368] sm:$0xff] %v5514_v0  ;;  %2137 = vmatmul.bf16.gmra.mxu0 %v4197_v56  ;;  %2457 = vmatmul.bf16.gmra.mxu2 %v4709_v57 }
 0x41c   : > { %5517 = vtanh.f32 %v2748_v1  ;;  %2786 = vmatmul.bf16.gmra.mxu1 %v4201_v61  ;;  %3106 = vmatmul.bf16.gmra.mxu3 %v4713_v62 }
 0x41e   : > { %v2418_v2 = vpop.f32.mrf.mxu2 }
 0x41f   : > { %v3067_v3 = vpop.f32.mrf.mxu3 }
 0x420   : > { %v5516_v4 = vpop.eup %5515  ;;  %v3068_v5 = vadd.f32 %v3067_v3, %v2418_v2  ;;  %v2100_v6 = vpop.f32.mrf.mxu0 }
 0x421   : > { %3605 = vst [vmem:[%s5755_s24 + $0x768] sm:$0xff] %v5516_v4  ;;  %v2749_v7 = vpop.f32.mrf.mxu1 }
 0x422   : > { %v5518_v8 = vpop.eup %5517  ;;  %5519 = vtanh.f32 %v3068_v5  ;;  %v2750_v9 = vadd.f32 %v2749_v7, %v2100_v6 }
 0x423   : > { %3478 = vst [vmem:[%s5755_s24 + $0x370] sm:$0xff] %v5518_v8 }
 0x424   : > { %5521 = vtanh.f32 %v2750_v9 }
 0x426   : > { %v2420_v10 = vpop.f32.mrf.mxu2 }
 0x427   : > { %v3069_v11 = vpop.f32.mrf.mxu3 }
 0x428   : > { %v5520_v12 = vpop.eup %5519  ;;  %v3070_v13 = vadd.f32 %v3069_v11, %v2420_v10  ;;  %v2103_v14 = vpop.f32.mrf.mxu0 }
 0x429   : > { %3606 = vst [vmem:[%s5755_s24 + $0x770] sm:$0xff] %v5520_v12  ;;  %v2752_v15 = vpop.f32.mrf.mxu1 }
 0x42a   : > { %v5522_v16 = vpop.eup %5521  ;;  %5523 = vtanh.f32 %v3070_v13  ;;  %v2753_v17 = vadd.f32 %v2752_v15, %v2103_v14 }
 0x42b   : > { %3479 = vst [vmem:[%s5755_s24 + $0x378] sm:$0xff] %v5522_v16 }
 0x42c   : > { %5525 = vtanh.f32 %v2753_v17 }
 0x42e   : > { %v2423_v18 = vpop.f32.mrf.mxu2 }
 0x42f   : > { %v3072_v19 = vpop.f32.mrf.mxu3 }
 0x430   : > { %v5524_v20 = vpop.eup %5523  ;;  %v3073_v21 = vadd.f32 %v3072_v19, %v2423_v18  ;;  %v2105_v22 = vpop.f32.mrf.mxu0 }
 0x431   : > { %3607 = vst [vmem:[%s5755_s24 + $0x778] sm:$0xff] %v5524_v20  ;;  %v2754_v23 = vpop.f32.mrf.mxu1 }
 0x432   : > { %v5526_v24 = vpop.eup %5525  ;;  %5527 = vtanh.f32 %v3073_v21  ;;  %v2755_v25 = vadd.f32 %v2754_v23, %v2105_v22 }
 0x433   : > { %3480 = vst [vmem:[%s5755_s24 + $0x380] sm:$0xff] %v5526_v24 }
 0x434   : > { %5529 = vtanh.f32 %v2755_v25 }
 0x436   : > { %v2425_v26 = vpop.f32.mrf.mxu2 }
 0x437   : > { %v3074_v27 = vpop.f32.mrf.mxu3 }
 0x438   : > { %v5528_v28 = vpop.eup %5527  ;;  %v3075_v29 = vadd.f32 %v3074_v27, %v2425_v26  ;;  %v2108_v30 = vpop.f32.mrf.mxu0 }
 0x439   : > { %3608 = vst [vmem:[%s5755_s24 + $0x780] sm:$0xff] %v5528_v28  ;;  %v2757_v31 = vpop.f32.mrf.mxu1 }
 0x43a   : > { %v5530_v32 = vpop.eup %5529  ;;  %5531 = vtanh.f32 %v3075_v29  ;;  %v2758_v33 = vadd.f32 %v2757_v31, %v2108_v30 }
 0x43b   : > { %3481 = vst [vmem:[%s5755_s24 + $0x388] sm:$0xff] %v5530_v32 }
 0x43c   : > { %5533 = vtanh.f32 %v2758_v33 }
 0x43e   : > { %v2428_v34 = vpop.f32.mrf.mxu2 }
 0x43f   : > { %v3077_v35 = vpop.f32.mrf.mxu3 }
 0x440   : > { %v5532_v36 = vpop.eup %5531  ;;  %v3078_v37 = vadd.f32 %v3077_v35, %v2428_v34  ;;  %v2110_v38 = vpop.f32.mrf.mxu0 }
 0x441   : > { %3609 = vst [vmem:[%s5755_s24 + $0x788] sm:$0xff] %v5532_v36  ;;  %v2759_v39 = vpop.f32.mrf.mxu1 }
 0x442   : > { %v5534_v40 = vpop.eup %5533  ;;  %5535 = vtanh.f32 %v3078_v37  ;;  %v2760_v41 = vadd.f32 %v2759_v39, %v2110_v38 }
 0x443   : > { %3482 = vst [vmem:[%s5755_s24 + $0x390] sm:$0xff] %v5534_v40 }
 0x444   : > { %5537 = vtanh.f32 %v2760_v41 }
 0x446   : > { %v2430_v42 = vpop.f32.mrf.mxu2 }
 0x447   : > { %v3079_v43 = vpop.f32.mrf.mxu3 }
 0x448   : > { %v5536_v44 = vpop.eup %5535  ;;  %v3080_v45 = vadd.f32 %v3079_v43, %v2430_v42  ;;  %v2113_v46 = vpop.f32.mrf.mxu0 }
 0x449   : > { %3610 = vst [vmem:[%s5755_s24 + $0x790] sm:$0xff] %v5536_v44  ;;  %v2762_v47 = vpop.f32.mrf.mxu1 }
 0x44a   : > { %v5538_v48 = vpop.eup %5537  ;;  %5539 = vtanh.f32 %v3080_v45  ;;  %v2763_v49 = vadd.f32 %v2762_v47, %v2113_v46 }
 0x44b   : > { %3483 = vst [vmem:[%s5755_s24 + $0x398] sm:$0xff] %v5538_v48 }
 0x44c   : > { %5541 = vtanh.f32 %v2763_v49 }
 0x44e   : > { %v2433_v50 = vpop.f32.mrf.mxu2 }
 0x44f   : > { %v3082_v51 = vpop.f32.mrf.mxu3 }
 0x450   : > { %v5540_v52 = vpop.eup %5539  ;;  %v3083_v53 = vadd.f32 %v3082_v51, %v2433_v50  ;;  %v2115_v54 = vpop.f32.mrf.mxu0 }
 0x451   : > { %3611 = vst [vmem:[%s5755_s24 + $0x798] sm:$0xff] %v5540_v52  ;;  %v2764_v55 = vpop.f32.mrf.mxu1 }
 0x452   : > { %v5542_v56 = vpop.eup %5541  ;;  %5543 = vtanh.f32 %v3083_v53  ;;  %v2765_v57 = vadd.f32 %v2764_v55, %v2115_v54 }
 0x453   : > { %3484 = vst [vmem:[%s5755_s24 + $0x3a0] sm:$0xff] %v5542_v56 }
 0x454   : > { %5545 = vtanh.f32 %v2765_v57 }
 0x456   : > { %v2435_v58 = vpop.f32.mrf.mxu2 }
 0x457   : > { %v3084_v59 = vpop.f32.mrf.mxu3 }
 0x458   : > { %v5544_v60 = vpop.eup %5543  ;;  %v3085_v61 = vadd.f32 %v3084_v59, %v2435_v58  ;;  %v2118_v62 = vpop.f32.mrf.mxu0 }
 0x459   : > { %3612 = vst [vmem:[%s5755_s24 + $0x7a0] sm:$0xff] %v5544_v60  ;;  %v2767_v63 = vpop.f32.mrf.mxu1 }
 0x45a   : > { %v5546_v0 = vpop.eup %5545  ;;  %5547 = vtanh.f32 %v3085_v61  ;;  %v2768_v1 = vadd.f32 %v2767_v63, %v2118_v62 }
 0x45b   : > { %3485 = vst [vmem:[%s5755_s24 + $0x3a8] sm:$0xff] %v5546_v0 }
 0x45c   : > { %5549 = vtanh.f32 %v2768_v1 }
 0x45e   : > { %v2438_v2 = vpop.f32.mrf.mxu2 }
 0x45f   : > { %v3087_v3 = vpop.f32.mrf.mxu3 }
 0x460   : > { %v5548_v4 = vpop.eup %5547  ;;  %v3088_v5 = vadd.f32 %v3087_v3, %v2438_v2  ;;  %v2120_v6 = vpop.f32.mrf.mxu0 }
 0x461   : > { %3613 = vst [vmem:[%s5755_s24 + $0x7a8] sm:$0xff] %v5548_v4  ;;  %v2769_v7 = vpop.f32.mrf.mxu1 }
 0x462   : > { %v5550_v8 = vpop.eup %5549  ;;  %5551 = vtanh.f32 %v3088_v5  ;;  %v2770_v9 = vadd.f32 %v2769_v7, %v2120_v6 }
 0x463   : > { %3486 = vst [vmem:[%s5755_s24 + $0x3b0] sm:$0xff] %v5550_v8 }
 0x464   : > { %5553 = vtanh.f32 %v2770_v9 }
 0x466   : > { %v2440_v10 = vpop.f32.mrf.mxu2 }
 0x467   : > { %v3089_v11 = vpop.f32.mrf.mxu3 }
 0x468   : > { %v5552_v12 = vpop.eup %5551  ;;  %v3090_v13 = vadd.f32 %v3089_v11, %v2440_v10  ;;  %v2123_v14 = vpop.f32.mrf.mxu0 }
 0x469   : > { %3614 = vst [vmem:[%s5755_s24 + $0x7b0] sm:$0xff] %v5552_v12  ;;  %v2772_v15 = vpop.f32.mrf.mxu1 }
 0x46a   : > { %v5554_v16 = vpop.eup %5553  ;;  %5555 = vtanh.f32 %v3090_v13  ;;  %v2773_v17 = vadd.f32 %v2772_v15, %v2123_v14 }
 0x46b   : > { %3487 = vst [vmem:[%s5755_s24 + $0x3b8] sm:$0xff] %v5554_v16 }
 0x46c   : > { %5557 = vtanh.f32 %v2773_v17 }
 0x46e   : > { %v2443_v18 = vpop.f32.mrf.mxu2 }
 0x46f   : > { %v3092_v19 = vpop.f32.mrf.mxu3 }
 0x470   : > { %v5556_v20 = vpop.eup %5555  ;;  %v3093_v21 = vadd.f32 %v3092_v19, %v2443_v18  ;;  %v2125_v22 = vpop.f32.mrf.mxu0 }
 0x471   : > { %3615 = vst [vmem:[%s5755_s24 + $0x7b8] sm:$0xff] %v5556_v20  ;;  %v2774_v23 = vpop.f32.mrf.mxu1 }
 0x472   : > { %v5558_v24 = vpop.eup %5557  ;;  %5559 = vtanh.f32 %v3093_v21  ;;  %v2775_v25 = vadd.f32 %v2774_v23, %v2125_v22 }
 0x473   : > { %3488 = vst [vmem:[%s5755_s24 + $0x3c0] sm:$0xff] %v5558_v24 }
 0x474   : > { %5561 = vtanh.f32 %v2775_v25 }
 0x476   : > { %v2445_v26 = vpop.f32.mrf.mxu2 }
 0x477   : > { %v3094_v27 = vpop.f32.mrf.mxu3 }
 0x478   : > { %v5560_v28 = vpop.eup %5559  ;;  %v3095_v29 = vadd.f32 %v3094_v27, %v2445_v26  ;;  %v2128_v30 = vpop.f32.mrf.mxu0 }
 0x479   : > { %3616 = vst [vmem:[%s5755_s24 + $0x7c0] sm:$0xff] %v5560_v28  ;;  %v2777_v31 = vpop.f32.mrf.mxu1 }
 0x47a   : > { %v5562_v32 = vpop.eup %5561  ;;  %5563 = vtanh.f32 %v3095_v29  ;;  %v2778_v33 = vadd.f32 %v2777_v31, %v2128_v30 }
 0x47b   : > { %3489 = vst [vmem:[%s5755_s24 + $0x3c8] sm:$0xff] %v5562_v32 }
 0x47c   : > { %5565 = vtanh.f32 %v2778_v33 }
 0x47e   : > { %v2448_v34 = vpop.f32.mrf.mxu2 }
 0x47f   : > { %v3097_v35 = vpop.f32.mrf.mxu3 }
 0x480   : > { %v5564_v36 = vpop.eup %5563  ;;  %v3098_v37 = vadd.f32 %v3097_v35, %v2448_v34  ;;  %v2130_v38 = vpop.f32.mrf.mxu0 }
 0x481   : > { %3617 = vst [vmem:[%s5755_s24 + $0x7c8] sm:$0xff] %v5564_v36  ;;  %v2779_v39 = vpop.f32.mrf.mxu1 }
 0x482   : > { %v5566_v40 = vpop.eup %5565  ;;  %5567 = vtanh.f32 %v3098_v37  ;;  %v2780_v41 = vadd.f32 %v2779_v39, %v2130_v38 }
 0x483   : > { %3490 = vst [vmem:[%s5755_s24 + $0x3d0] sm:$0xff] %v5566_v40 }
 0x484   : > { %5569 = vtanh.f32 %v2780_v41 }
 0x486   : > { %v2450_v42 = vpop.f32.mrf.mxu2 }
 0x487   : > { %v3099_v43 = vpop.f32.mrf.mxu3 }
 0x488   : > { %v5568_v44 = vpop.eup %5567  ;;  %v3100_v45 = vadd.f32 %v3099_v43, %v2450_v42  ;;  %v2133_v46 = vpop.f32.mrf.mxu0 }
 0x489   : > { %3618 = vst [vmem:[%s5755_s24 + $0x7d0] sm:$0xff] %v5568_v44  ;;  %v2782_v47 = vpop.f32.mrf.mxu1 }
 0x48a   : > { %v5570_v48 = vpop.eup %5569  ;;  %5571 = vtanh.f32 %v3100_v45  ;;  %v2783_v49 = vadd.f32 %v2782_v47, %v2133_v46 }
 0x48b   : > { %3491 = vst [vmem:[%s5755_s24 + $0x3d8] sm:$0xff] %v5570_v48 }
 0x48c   : > { %5573 = vtanh.f32 %v2783_v49 }
 0x48e   : > { %v2453_v50 = vpop.f32.mrf.mxu2 }
 0x48f   : > { %v3102_v51 = vpop.f32.mrf.mxu3 }
 0x490   : > { %v5572_v52 = vpop.eup %5571  ;;  %v3103_v53 = vadd.f32 %v3102_v51, %v2453_v50  ;;  %v2135_v54 = vpop.f32.mrf.mxu0 }
 0x491   : > { %3619 = vst [vmem:[%s5755_s24 + $0x7d8] sm:$0xff] %v5572_v52  ;;  %v2784_v55 = vpop.f32.mrf.mxu1 }
 0x492   : > { %v5574_v56 = vpop.eup %5573  ;;  %5575 = vtanh.f32 %v3103_v53  ;;  %v2785_v57 = vadd.f32 %v2784_v55, %v2135_v54 }
 0x493   : > { %3492 = vst [vmem:[%s5755_s24 + $0x3e0] sm:$0xff] %v5574_v56 }
 0x494   : > { %5577 = vtanh.f32 %v2785_v57 }
 0x496   : > { %v2455_v58 = vpop.f32.mrf.mxu2 }
 0x497   : > { %v3104_v59 = vpop.f32.mrf.mxu3 }
 0x498   : > { %v5576_v60 = vpop.eup %5575  ;;  %v3105_v61 = vadd.f32 %v3104_v59, %v2455_v58  ;;  %v2138_v62 = vpop.f32.mrf.mxu0 }
 0x499   : > { %3620 = vst [vmem:[%s5755_s24 + $0x7e0] sm:$0xff] %v5576_v60  ;;  %v2787_v63 = vpop.f32.mrf.mxu1 }
 0x49a   : > { %v5578_v0 = vpop.eup %5577  ;;  %5579 = vtanh.f32 %v3105_v61  ;;  %v2788_v1 = vadd.f32 %v2787_v63, %v2138_v62 }
 0x49b   : > { %3493 = vst [vmem:[%s5755_s24 + $0x3e8] sm:$0xff] %v5578_v0 }
 0x49c   : > { %5581 = vtanh.f32 %v2788_v1 }
 0x49e   : > { %v2458_v2 = vpop.f32.mrf.mxu2 }
 0x49f   : > { %v3107_v3 = vpop.f32.mrf.mxu3 }
 0x4a0   : > { %v5580_v4 = vpop.eup %5579  ;;  %v3108_v5 = vadd.f32 %v3107_v3, %v2458_v2  ;;  %v2140_v6 = vpop.f32.mrf.mxu0 }
 0x4a1   : > { %3621 = vst [vmem:[%s5755_s24 + $0x7e8] sm:$0xff] %v5580_v4  ;;  %v2789_v7 = vpop.f32.mrf.mxu1 }
 0x4a2   : > { %v5582_v8 = vpop.eup %5581  ;;  %5583 = vtanh.f32 %v3108_v5  ;;  %v2790_v9 = vadd.f32 %v2789_v7, %v2140_v6 }
 0x4a3   : > { %3494 = vst [vmem:[%s5755_s24 + $0x3f0] sm:$0xff] %v5582_v8 }
 0x4a4   : > { %5585 = vtanh.f32 %v2790_v9 }
 0x4a6   : > { %v2460_v10 = vpop.f32.mrf.mxu2 }
 0x4a7   : > { %v3109_v11 = vpop.f32.mrf.mxu3 }
 0x4a8   : > { %v5584_v12 = vpop.eup %5583  ;;  %v3110_v13 = vadd.f32 %v3109_v11, %v2460_v10 }
 0x4a9   : > { %3622 = vst [vmem:[%s5755_s24 + $0x7f0] sm:$0xff] %v5584_v12 }
 0x4aa   : > { %v5586_v14 = vpop.eup %5585  ;;  %5587 = vtanh.f32 %v3110_v13 }
 0x4ab   : > { %3495 = vst [vmem:[%s5755_s24 + $0x3f8] sm:$0xff] %v5586_v14 }
 0x4b0   : > { %v5588_v15 = vpop.eup %5587 }
 0x4b1   : > { %3623 = vst [vmem:[%s5755_s24 + $0x7f8] sm:$0xff] %v5588_v15 }
 0x4b2 PF: > { %s12_s9 = sadd.s32 1, %s5595_s9  }
 0x4b3   : > { %p9_p4 = scmp.ge.s32.totalorder %s12_s9, 11  }
 0x4b5   :  { %11 = sbr.rel (!%p9_p4) target bundleno = 1 (0x1), region = 58 }

</bundles_post_ra>
